<compile_context>
chip_gen: v7x
topology: tpu7x:2x2x1
jax: 0.10.0
libtpu: 0.0.40
codegen_flags: <defaults>
</compile_context>

<pallas_src>
import math
import functools

import numpy as np
import jax
import jax.numpy as jnp
from jax.experimental import pallas as pl
from jax.experimental.pallas import tpu as pltpu


# ----------------------------------------------------------------------------
# small helpers
# ----------------------------------------------------------------------------
def _row_tile(m, k, n, max_tile=512):
    """Largest row tile (multiple of 8, <= max_tile, divides m) whose per-step
    activation footprint stays well inside v7x's smaller VMEM even with the
    pipeline's double buffering.  Falls back to the full array for odd sizes."""
    budget = 4 * 1024 * 1024  # bytes for one (x tile + out tile)
    best = None
    for t in (8, 16, 32, 64, 128, 256, 512):
        if t > max_tile or m % t:
            continue
        if t * (k + n) * 4 <= budget:
            best = t
    return best if best is not None else m


# ----------------------------------------------------------------------------
# Pallas kernels
# ----------------------------------------------------------------------------
def linear_kernel(x_ref, w_ref, b_ref, o_ref):
    acc = jnp.dot(x_ref[...].astype(jnp.bfloat16), w_ref[...],
                  preferred_element_type=jnp.float32)
    o_ref[...] = (acc + b_ref[...]).astype(o_ref.dtype)


def linear_gelu_kernel(x_ref, w_ref, b_ref, o_ref):
    acc = jnp.dot(x_ref[...].astype(jnp.bfloat16), w_ref[...],
                  preferred_element_type=jnp.float32)
    h = acc + b_ref[...]
    # exact GELU (PyTorch nn.GELU default), f32 elementwise
    g = 0.5 * h * (1.0 + jax.lax.erf(h * (1.0 / math.sqrt(2.0))))
    o_ref[...] = g.astype(o_ref.dtype)


def linear_add_ln_kernel(x_ref, w_ref, b_ref, res_ref, g_ref, beta_ref, o_ref):
    # out = res + LayerNorm(x @ W + b)   (LN over the last/emb axis, eps=1e-5)
    acc = jnp.dot(x_ref[...].astype(jnp.bfloat16), w_ref[...],
                  preferred_element_type=jnp.float32)
    y = acc + b_ref[...]
    mu = jnp.mean(y, axis=-1, keepdims=True)
    var = jnp.mean((y - mu) * (y - mu), axis=-1, keepdims=True)
    yn = (y - mu) * jax.lax.rsqrt(var + 1e-5)
    o_ref[...] = (res_ref[...] + yn * g_ref[...] + beta_ref[...]).astype(o_ref.dtype)


def _window_attention_compute(slab, scale, bias, mask, o_ref, *, num_heads, head_dim):
    # slab: (W, T, 3E) f32   scale: (1, E)   bias: (H, T, T)   mask: (W, T, T) or None
    emb = num_heads * head_dim
    outs = []
    for h in range(num_heads):  # static unrolled loop over heads
        lo, hi = h * head_dim, (h + 1) * head_dim
        qh = slab[:, :, lo:hi]
        kh = slab[:, :, emb + lo:emb + hi]
        vh = slab[:, :, 2 * emb + lo:2 * emb + hi]
        # cosine attention: L2-normalize along head_dim (f32), then fold the per-head
        # SWIN-V2 logit scale into q (cheaper than scaling the (T,T) score matrix).
        qn = qh * jax.lax.rsqrt(jnp.sum(qh * qh, axis=-1, keepdims=True) + 1e-6)
        qn = qn * scale[:, lo:hi]
        kn = kh * jax.lax.rsqrt(jnp.sum(kh * kh, axis=-1, keepdims=True) + 1e-6)
        s = jnp.einsum("wtd,wsd->wts",
                       qn.astype(jnp.bfloat16), kn.astype(jnp.bfloat16),
                       preferred_element_type=jnp.float32)
        s = s + bias[h][None, :, :]
        if mask is not None:
            s = s + mask
        s = s - jnp.max(s, axis=-1, keepdims=True)
        p = jnp.exp(s)
        p = p * pl.reciprocal(jnp.sum(p, axis=-1, keepdims=True), approx=True)
        outs.append(jnp.einsum("wts,wsd->wtd",
                               p.astype(jnp.bfloat16), vh.astype(jnp.bfloat16),
                               preferred_element_type=jnp.float32))
    # merge heads in-kernel -> single lane-dense (W, T, E) store
    o_ref[...] = jnp.concatenate(outs, axis=-1).astype(o_ref.dtype)


def window_attn_kernel(qkv_ref, scale_ref, bias_ref, o_ref, *, num_heads, head_dim):
    _window_attention_compute(qkv_ref[...], scale_ref[...], bias_ref[...], None, o_ref,
                              num_heads=num_heads, head_dim=head_dim)


def shifted_window_attn_kernel(qkv_ref, scale_ref, bias_ref, mask_ref, o_ref, *,
                               num_heads, head_dim):
    _window_attention_compute(qkv_ref[...], scale_ref[...], bias_ref[...], mask_ref[...],
                              o_ref, num_heads=num_heads, head_dim=head_dim)


# ----------------------------------------------------------------------------
# pallas_call wrappers
# ----------------------------------------------------------------------------
def pallas_linear(x2d, w, b, *, gelu=False):
    M, K = x2d.shape
    N = w.shape[1]
    tm = _row_tile(M, K, N)
    kern = linear_gelu_kernel if gelu else linear_kernel
    # TODO(synk): K stays untiled here (K <= 4*emb); add a K grid axis + VMEM accumulator
    #             scratch if the embedding grows large.
    return pl.pallas_call(
        kern,
        out_shape=jax.ShapeDtypeStruct((M, N), jnp.float32),
        grid=(M // tm,),
        in_specs=[
            pl.BlockSpec((tm, K), lambda i: (i, 0)),
            pl.BlockSpec((K, N), lambda i: (0, 0)),
            pl.BlockSpec((1, N), lambda i: (0, 0)),
        ],
        out_specs=pl.BlockSpec((tm, N), lambda i: (i, 0)),
        compiler_params=pltpu.CompilerParams(dimension_semantics=("parallel",)),
    )(x2d, w, b)


def pallas_linear_add_ln(x2d, w, b, res2d, gamma, beta):
    M, K = x2d.shape
    N = w.shape[1]
    tm = _row_tile(M, K, 2 * N)
    return pl.pallas_call(
        linear_add_ln_kernel,
        out_shape=jax.ShapeDtypeStruct((M, N), jnp.float32),
        grid=(M // tm,),
        in_specs=[
            pl.BlockSpec((tm, K), lambda i: (i, 0)),
            pl.BlockSpec((K, N), lambda i: (0, 0)),
            pl.BlockSpec((1, N), lambda i: (0, 0)),
            pl.BlockSpec((tm, N), lambda i: (i, 0)),
            pl.BlockSpec((1, N), lambda i: (0, 0)),
            pl.BlockSpec((1, N), lambda i: (0, 0)),
        ],
        out_specs=pl.BlockSpec((tm, N), lambda i: (i, 0)),
        compiler_params=pltpu.CompilerParams(dimension_semantics=("parallel",)),
    )(x2d, w, b, res2d, gamma, beta)


def pallas_window_attention(qkv_wins, scale_lanes, bias, mask, *, num_heads, wins_per_step):
    NW, T, threeE = qkv_wins.shape
    E = threeE // 3
    D = E // num_heads
    W = wins_per_step
    args = [qkv_wins, scale_lanes, bias]
    in_specs = [
        pl.BlockSpec((W, T, 3 * E), lambda i: (i, 0, 0)),
        pl.BlockSpec((1, E), lambda i: (0, 0)),
        pl.BlockSpec((num_heads, T, T), lambda i: (0, 0, 0)),
    ]
    if mask is not None:
        kern = functools.partial(shifted_window_attn_kernel, num_heads=num_heads, head_dim=D)
        in_specs.append(pl.BlockSpec((W, T, T), lambda i: (0, 0, 0)))
        args.append(mask)
    else:
        kern = functools.partial(window_attn_kernel, num_heads=num_heads, head_dim=D)
    return pl.pallas_call(
        kern,
        out_shape=jax.ShapeDtypeStruct((NW, T, E), jnp.float32),
        grid=(NW // W,),
        in_specs=in_specs,
        out_specs=pl.BlockSpec((W, T, E), lambda i: (i, 0, 0)),
        compiler_params=pltpu.CompilerParams(dimension_semantics=("parallel",)),
    )(*args)


# ----------------------------------------------------------------------------
# static (host-side) helpers for window attention glue
# ----------------------------------------------------------------------------
def relative_position_index(wh, ww):
    coords = np.stack(np.meshgrid(np.arange(wh), np.arange(ww), indexing="ij"))  # (2,wh,ww)
    flat = coords.reshape(2, -1)                                                 # (2,T)
    rel = flat[:, :, None] - flat[:, None, :]                                    # (2,T,T)
    rel = rel.transpose(1, 2, 0).astype(np.int32)
    rel[:, :, 0] += wh - 1
    rel[:, :, 1] += ww - 1
    rel[:, :, 0] *= 2 * ww - 1
    return jnp.asarray(rel.sum(-1))                                              # (T,T)


def shifted_window_mask(Hg, Wg, wh, ww):
    sh, sw = wh // 2, ww // 2
    img = np.zeros((Hg, Wg), dtype=np.int32)
    cnt = 0
    for hs in (slice(0, -wh), slice(-wh, -sh), slice(-sh, None)):
        for ws in (slice(0, -ww), slice(-ww, -sw), slice(-sw, None)):
            img[hs, ws] = cnt
            cnt += 1
    win = img.reshape(Hg // wh, wh, Wg // ww, ww).transpose(0, 2, 1, 3).reshape(-1, wh * ww)
    diff = win[:, None, :] - win[:, :, None]
    mask = np.where(diff != 0, -1e9, 0.0).astype(np.float32)                     # (nW, T, T)
    return jnp.asarray(mask)


# ----------------------------------------------------------------------------
# model: SwinConnectDecoder forward
# ----------------------------------------------------------------------------
def window_cos_msa(x, p, ln_g, ln_b, *, patch_grid, window, num_heads, shifted):
    B, L, E = x.shape
    Hg, Wg = patch_grid
    wh, ww = window
    nwh, nww = Hg // wh, Wg // ww
    nW = nwh * nww
    T = wh * ww

    x2d = x.reshape(B * L, E)
    qkv = pallas_linear(x2d, p["qkv_w"], p["qkv_b"])                 # (B*L, 3E)

    g = qkv.reshape(B, Hg, Wg, 3 * E)
    if shifted:
        g = jnp.roll(g, shift=(-(wh // 2), -(ww // 2)), axis=(1, 2))
    # window partition -> (B*nW, T, 3E), lane-dense slabs for the attention kernel
    wins = g.reshape(B, nwh, wh, nww, ww, 3 * E).transpose(0, 1, 3, 2, 4, 5)
    wins = wins.reshape(B * nW, T, 3 * E)

    mask = p["attn_mask"] if shifted else None                       # (nW, T, T) or dropped
    o = pallas_window_attention(wins, p["scale_lanes"], p["rel_bias"], mask,
                                num_heads=num_heads, wins_per_step=nW)  # (B*nW, T, E)

    # reverse window partition (heads already merged in-kernel)
    o = o.reshape(B, nwh, nww, wh, ww, E).transpose(0, 1, 3, 2, 4, 5).reshape(B, Hg, Wg, E)
    if shifted:
        o = jnp.roll(o, shift=(wh // 2, ww // 2), axis=(1, 2))
    o2d = o.reshape(B * L, E)

    # fused projection + residual + LayerNorm:  out = x + LN(o @ proj_w + proj_b)
    out = pallas_linear_add_ln(o2d, p["proj_w"], p["proj_b"], x2d, ln_g, ln_b)
    return out.reshape(B, L, E)


def mlp_add_ln(x, params):
    B, L, E = x.shape
    x2d = x.reshape(B * L, E)
    h = pallas_linear(x2d, params["mlp_w1"], params["mlp_b1"], gelu=True)
    # fused second linear + residual + LayerNorm
    out = pallas_linear_add_ln(h, params["mlp_w2"], params["mlp_b2"], x2d,
                               params["ln_g"], params["ln_b"])
    return out.reshape(B, L, E)


def swin_connect_decoder_forward(params, x, y, *, patch_grid, window, num_heads):
    B, L, E = x.shape
    # concat along emb + linear remap (2E -> E)
    xy = jnp.concatenate([x, y], axis=-1).reshape(B * L, 2 * E)
    h = pallas_linear(xy, params["remap_w"], params["remap_b"]).reshape(B, L, E)

    # SwinEncoder2: x = x + LN(WMSA(x)); x = x + LN(MLP(x)); x = x + LN(SWMSA(x)); x = x + LN(MLP(x))
    h = window_cos_msa(h, params["wmsa"], params["ln_g"], params["ln_b"],
                       patch_grid=patch_grid, window=window, num_heads=num_heads, shifted=False)
    h = mlp_add_ln(h, params)
    h = window_cos_msa(h, params["swmsa"], params["ln_g"], params["ln_b"],
                       patch_grid=patch_grid, window=window, num_heads=num_heads, shifted=True)
    h = mlp_add_ln(h, params)
    return h


# ----------------------------------------------------------------------------
# parameter init (f32, PyTorch-like) + prep (bf16 weights, hoisted bias/scale/mask)
# ----------------------------------------------------------------------------
def init_params(key, emb, num_heads, window):
    wh, ww = window
    ks = jax.random.split(key, 9)

    def lin(k, fan_in, fan_out):
        w = 0.02 * jax.random.normal(k, (fan_in, fan_out), jnp.float32)
        b = jnp.zeros((1, fan_out), jnp.float32)
        return w, b

    params = {}
    params["remap_w"], params["remap_b"] = lin(ks[0], 2 * emb, emb)

    def msa(kq, kp, kt):
        qkv_w, qkv_b = lin(kq, emb, 3 * emb)
        proj_w, proj_b = lin(kp, emb, emb)
        table = 0.02 * jax.random.normal(kt, ((2 * wh - 1) * (2 * ww - 1), num_heads), jnp.float32)
        logit_scale = math.log(10.0) * jnp.ones((num_heads,), jnp.float32)
        return dict(qkv_w=qkv_w, qkv_b=qkv_b, proj_w=proj_w, proj_b=proj_b,
                    rel_bias_table=table, logit_scale=logit_scale)

    params["wmsa"] = msa(ks[1], ks[2], ks[3])
    params["swmsa"] = msa(ks[4], ks[5], ks[6])

    # shared LayerNorm and shared MLP (module reuses self.ln and self.MLP)
    params["ln_g"] = jnp.ones((1, emb), jnp.float32)
    params["ln_b"] = jnp.zeros((1, emb), jnp.float32)
    params["mlp_w1"], params["mlp_b1"] = lin(ks[7], emb, 4 * emb)
    params["mlp_w2"], params["mlp_b2"] = lin(ks[8], 4 * emb, emb)
    return params


def prepare_params(params, *, emb, num_heads, patch_grid, window):
    """Hoist per-call work out of the jitted forward: bf16 weight casts, rel-pos bias
    gather+transpose, per-head logit-scale exp(clamp) broadcast, shifted-window mask."""
    wh, ww = window
    Hg, Wg = patch_grid
    D = emb // num_heads
    idx = relative_position_index(wh, ww)                          # (T, T)
    smask = shifted_window_mask(Hg, Wg, wh, ww)                    # (nW, T, T)

    def prep_msa(p, shifted):
        bias = p["rel_bias_table"][idx].transpose(2, 0, 1)                     # (H, T, T)
        scale = jnp.exp(jnp.minimum(p["logit_scale"], math.log(100.0)))        # (H,)
        scale_lanes = jnp.repeat(scale, D).reshape(1, emb)                     # per-head, lane layout
        out = dict(qkv_w=p["qkv_w"].astype(jnp.bfloat16), qkv_b=p["qkv_b"],
                   proj_w=p["proj_w"].astype(jnp.bfloat16), proj_b=p["proj_b"],
                   rel_bias=bias, scale_lanes=scale_lanes)
        if shifted:
            out["attn_mask"] = smask
        return out

    return dict(
        remap_w=params["remap_w"].astype(jnp.bfloat16), remap_b=params["remap_b"],
        mlp_w1=params["mlp_w1"].astype(jnp.bfloat16), mlp_b1=params["mlp_b1"],
        mlp_w2=params["mlp_w2"].astype(jnp.bfloat16), mlp_b2=params["mlp_b2"],
        ln_g=params["ln_g"], ln_b=params["ln_b"],
        wmsa=prep_msa(params["wmsa"], shifted=False),
        swmsa=prep_msa(params["swmsa"], shifted=True),
    )


# ----------------------------------------------------------------------------
if __name__ == "__main__":
    # small, consistent shapes: emb=32, heads=4, patch grid (8,8), window (4,4)
    EMB, HEADS = 32, 4
    PATCH_GRID = (8, 8)
    WINDOW = (4, 4)
    B = 2
    L = PATCH_GRID[0] * PATCH_GRID[1]   # 64 tokens

    key = jax.random.PRNGKey(0)
    kx, ky, kp = jax.random.split(key, 3)
    x = jax.random.normal(kx, (B, L, EMB), jnp.float32)
    y = jax.random.normal(ky, (B, L, EMB), jnp.float32)

    raw_params = init_params(kp, EMB, HEADS, WINDOW)
    params = prepare_params(raw_params, emb=EMB, num_heads=HEADS,
                            patch_grid=PATCH_GRID, window=WINDOW)

    fwd = functools.partial(swin_connect_decoder_forward,
                            patch_grid=PATCH_GRID, window=WINDOW, num_heads=HEADS)
    out = jax.jit(fwd)(params, x, y)
    out = jax.block_until_ready(out)
    assert out.shape == (B, L, EMB) and bool(jnp.all(jnp.isfinite(out)))
    print("KERNEL_OK")
</pallas_src>

<mosaic_0001>
module attributes {stable_mosaic.version = 11 : i64} {
  func.func @linear_kernel(%arg0: i32, %arg1: memref<128x64xf32, #tpu.memory_space<vmem>>, %arg2: memref<64x32xbf16, #tpu.memory_space<vmem>>, %arg3: memref<1x32xf32, #tpu.memory_space<vmem>>, %arg4: memref<128x32xf32, #tpu.memory_space<vmem>>) attributes {dimension_semantics = [#tpu.dimension_semantics<parallel>], iteration_bounds = array<i64: 1>, scalar_prefetch = 0 : i64, scratch_operands = 0 : i64, tpu.core_type = #tpu.core_type<tc>, window_params = [{transform_indices = @transform_0, window_bounds = array<i64: 128, 64>}, {pipeline_mode = #tpu.pipeline_mode<synchronous>, transform_indices = @transform_1, window_bounds = array<i64: 64, 32>}, {pipeline_mode = #tpu.pipeline_mode<synchronous>, transform_indices = @transform_2, window_bounds = array<i64: 1, 32>}, {transform_indices = @transform_3, window_bounds = array<i64: 128, 32>}]} {
    %c0 = arith.constant 0 : index
    %c0_0 = arith.constant 0 : index
    %0 = vector.load %arg1[%c0, %c0_0] : memref<128x64xf32, #tpu.memory_space<vmem>>, vector<128x64xf32>
    %1 = arith.truncf %0 : vector<128x64xf32> to vector<128x64xbf16>
    %c0_1 = arith.constant 0 : index
    %c0_2 = arith.constant 0 : index
    %2 = vector.load %arg2[%c0_1, %c0_2] : memref<64x32xbf16, #tpu.memory_space<vmem>>, vector<64x32xbf16>
    %cst = arith.constant dense<0.000000e+00> : vector<128x32xf32>
    %3 = tpu.matmul %1, %2, %cst {dimension_numbers = #tpu.dot_dimension_numbers<[1], [0], [0], [1], [0, 0, 1, 1], [], []>} : vector<128x64xbf16>, vector<64x32xbf16>, vector<128x32xf32> -> vector<128x32xf32>
    %c0_3 = arith.constant 0 : index
    %c0_4 = arith.constant 0 : index
    %4 = vector.load %arg3[%c0_3, %c0_4] : memref<1x32xf32, #tpu.memory_space<vmem>>, vector<1x32xf32>
    %5 = vector.broadcast %4 : vector<1x32xf32> to vector<128x32xf32>
    %6 = arith.addf %3, %5 : vector<128x32xf32>
    %c0_5 = arith.constant 0 : index
    %c0_6 = arith.constant 0 : index
    %7 = vector.load %arg4[%c0_5, %c0_6] : memref<128x32xf32, #tpu.memory_space<vmem>>, vector<128x32xf32>
    tpu.vector_store %arg4[%c0_5, %c0_6], %6 {strides = array<i32>} : memref<128x32xf32, #tpu.memory_space<vmem>>, vector<128x32xf32>,
    return
  }
  func.func @transform_0(%arg0: i32) -> (i32, i32) {
    %c0_i32 = arith.constant 0 : i32
    %c0_i32_0 = arith.constant 0 : i32
    return %arg0, %c0_i32 : i32, i32
  }
  func.func @transform_1(%arg0: i32) -> (i32, i32) {
    %c0_i32 = arith.constant 0 : i32
    %c0_i32_0 = arith.constant 0 : i32
    %c0_i32_1 = arith.constant 0 : i32
    return %c0_i32, %c0_i32_0 : i32, i32
  }
  func.func @transform_2(%arg0: i32) -> (i32, i32) {
    %c0_i32 = arith.constant 0 : i32
    %c0_i32_0 = arith.constant 0 : i32
    %c0_i32_1 = arith.constant 0 : i32
    return %c0_i32, %c0_i32_0 : i32, i32
  }
  func.func @transform_3(%arg0: i32) -> (i32, i32) {
    %c0_i32 = arith.constant 0 : i32
    %c0_i32_0 = arith.constant 0 : i32
    return %arg0, %c0_i32 : i32, i32
  }
}

module attributes {stable_mosaic.version = 11 : i64} {
  func.func @linear_kernel(%arg0: i32, %arg1: memref<128x32xf32, #tpu.memory_space<vmem>>, %arg2: memref<32x96xbf16, #tpu.memory_space<vmem>>, %arg3: memref<1x96xf32, #tpu.memory_space<vmem>>, %arg4: memref<128x96xf32, #tpu.memory_space<vmem>>) attributes {dimension_semantics = [#tpu.dimension_semantics<parallel>], iteration_bounds = array<i64: 1>, scalar_prefetch = 0 : i64, scratch_operands = 0 : i64, tpu.core_type = #tpu.core_type<tc>, window_params = [{transform_indices = @transform_0, window_bounds = array<i64: 128, 32>}, {pipeline_mode = #tpu.pipeline_mode<synchronous>, transform_indices = @transform_1, window_bounds = array<i64: 32, 96>}, {pipeline_mode = #tpu.pipeline_mode<synchronous>, transform_indices = @transform_2, window_bounds = array<i64: 1, 96>}, {transform_indices = @transform_3, window_bounds = array<i64: 128, 96>}]} {
    %c0 = arith.constant 0 : index
    %c0_0 = arith.constant 0 : index
    %0 = vector.load %arg1[%c0, %c0_0] : memref<128x32xf32, #tpu.memory_space<vmem>>, vector<128x32xf32>
    %1 = arith.truncf %0 : vector<128x32xf32> to vector<128x32xbf16>
    %c0_1 = arith.constant 0 : index
    %c0_2 = arith.constant 0 : index
    %2 = vector.load %arg2[%c0_1, %c0_2] : memref<32x96xbf16, #tpu.memory_space<vmem>>, vector<32x96xbf16>
    %cst = arith.constant dense<0.000000e+00> : vector<128x96xf32>
    %3 = tpu.matmul %1, %2, %cst {dimension_numbers = #tpu.dot_dimension_numbers<[1], [0], [0], [1], [0, 0, 1, 1], [], []>} : vector<128x32xbf16>, vector<32x96xbf16>, vector<128x96xf32> -> vector<128x96xf32>
    %c0_3 = arith.constant 0 : index
    %c0_4 = arith.constant 0 : index
    %4 = vector.load %arg3[%c0_3, %c0_4] : memref<1x96xf32, #tpu.memory_space<vmem>>, vector<1x96xf32>
    %5 = vector.broadcast %4 : vector<1x96xf32> to vector<128x96xf32>
    %6 = arith.addf %3, %5 : vector<128x96xf32>
    %c0_5 = arith.constant 0 : index
    %c0_6 = arith.constant 0 : index
    %7 = vector.load %arg4[%c0_5, %c0_6] : memref<128x96xf32, #tpu.memory_space<vmem>>, vector<128x96xf32>
    tpu.vector_store %arg4[%c0_5, %c0_6], %6 {strides = array<i32>} : memref<128x96xf32, #tpu.memory_space<vmem>>, vector<128x96xf32>,
    return
  }
  func.func @transform_0(%arg0: i32) -> (i32, i32) {
    %c0_i32 = arith.constant 0 : i32
    %c0_i32_0 = arith.constant 0 : i32
    return %arg0, %c0_i32 : i32, i32
  }
  func.func @transform_1(%arg0: i32) -> (i32, i32) {
    %c0_i32 = arith.constant 0 : i32
    %c0_i32_0 = arith.constant 0 : i32
    %c0_i32_1 = arith.constant 0 : i32
    return %c0_i32, %c0_i32_0 : i32, i32
  }
  func.func @transform_2(%arg0: i32) -> (i32, i32) {
    %c0_i32 = arith.constant 0 : i32
    %c0_i32_0 = arith.constant 0 : i32
    %c0_i32_1 = arith.constant 0 : i32
    return %c0_i32, %c0_i32_0 : i32, i32
  }
  func.func @transform_3(%arg0: i32) -> (i32, i32) {
    %c0_i32 = arith.constant 0 : i32
    %c0_i32_0 = arith.constant 0 : i32
    return %arg0, %c0_i32 : i32, i32
  }
}

module attributes {stable_mosaic.version = 11 : i64} {
  func.func @window_attn_kernel(%arg0: i32, %arg1: memref<4x16x96xf32, #tpu.memory_space<vmem>>, %arg2: memref<1x32xf32, #tpu.memory_space<vmem>>, %arg3: memref<4x16x16xf32, #tpu.memory_space<vmem>>, %arg4: memref<4x16x32xf32, #tpu.memory_space<vmem>>) attributes {dimension_semantics = [#tpu.dimension_semantics<parallel>], iteration_bounds = array<i64: 2>, scalar_prefetch = 0 : i64, scratch_operands = 0 : i64, tpu.core_type = #tpu.core_type<tc>, window_params = [{transform_indices = @transform_0, window_bounds = array<i64: 4, 16, 96>}, {pipeline_mode = #tpu.pipeline_mode<synchronous>, transform_indices = @transform_1, window_bounds = array<i64: 1, 32>}, {pipeline_mode = #tpu.pipeline_mode<synchronous>, transform_indices = @transform_2, window_bounds = array<i64: 4, 16, 16>}, {transform_indices = @transform_3, window_bounds = array<i64: 4, 16, 32>}]} {
    %c0 = arith.constant 0 : index
    %c0_0 = arith.constant 0 : index
    %c0_1 = arith.constant 0 : index
    %0 = vector.load %arg1[%c0, %c0_0, %c0_1] : memref<4x16x96xf32, #tpu.memory_space<vmem>>, vector<4x16x96xf32>
    %c0_2 = arith.constant 0 : index
    %c0_3 = arith.constant 0 : index
    %1 = vector.load %arg2[%c0_2, %c0_3] : memref<1x32xf32, #tpu.memory_space<vmem>>, vector<1x32xf32>
    %c0_4 = arith.constant 0 : index
    %c0_5 = arith.constant 0 : index
    %c0_6 = arith.constant 0 : index
    %2 = vector.load %arg3[%c0_4, %c0_5, %c0_6] : memref<4x16x16xf32, #tpu.memory_space<vmem>>, vector<4x16x16xf32>
    %3 = vector.extract_strided_slice %0 {offsets = [0, 0, 0], sizes = [4, 16, 8], strides = [1, 1, 1]} : vector<4x16x96xf32> to vector<4x16x8xf32>
    %4 = vector.extract_strided_slice %0 {offsets = [0, 0, 32], sizes = [4, 16, 8], strides = [1, 1, 1]} : vector<4x16x96xf32> to vector<4x16x8xf32>
    %5 = vector.extract_strided_slice %0 {offsets = [0, 0, 64], sizes = [4, 16, 8], strides = [1, 1, 1]} : vector<4x16x96xf32> to vector<4x16x8xf32>
    %6 = arith.mulf %3, %3 : vector<4x16x8xf32>
    %cst = arith.constant dense<0.000000e+00> : vector<4x16xf32>
    %7 = vector.multi_reduction <add>, %6, %cst [2] : vector<4x16x8xf32> to vector<4x16xf32>
    %8 = vector.shape_cast %7 : vector<4x16xf32> to vector<4x16x1xf32>
    %cst_7 = arith.constant 9.99999997E-7 : f32
    %9 = vector.broadcast %cst_7 : f32 to vector<4x16x1xf32>
    %10 = arith.addf %8, %9 : vector<4x16x1xf32>
    %11 = math.rsqrt %10 : vector<4x16x1xf32>
    %12 = vector.broadcast %11 : vector<4x16x1xf32> to vector<4x16x8xf32>
    %13 = arith.mulf %3, %12 : vector<4x16x8xf32>
    %14 = vector.extract_strided_slice %1 {offsets = [0, 0], sizes = [1, 8], strides = [1, 1]} : vector<1x32xf32> to vector<1x8xf32>
    %15 = vector.shape_cast %14 : vector<1x8xf32> to vector<1x1x8xf32>
    %16 = vector.broadcast %15 : vector<1x1x8xf32> to vector<4x16x8xf32>
    %17 = arith.mulf %13, %16 : vector<4x16x8xf32>
    %18 = arith.mulf %4, %4 : vector<4x16x8xf32>
    %cst_8 = arith.constant dense<0.000000e+00> : vector<4x16xf32>
    %19 = vector.multi_reduction <add>, %18, %cst_8 [2] : vector<4x16x8xf32> to vector<4x16xf32>
    %20 = vector.shape_cast %19 : vector<4x16xf32> to vector<4x16x1xf32>
    %cst_9 = arith.constant 9.99999997E-7 : f32
    %21 = vector.broadcast %cst_9 : f32 to vector<4x16x1xf32>
    %22 = arith.addf %20, %21 : vector<4x16x1xf32>
    %23 = math.rsqrt %22 : vector<4x16x1xf32>
    %24 = vector.broadcast %23 : vector<4x16x1xf32> to vector<4x16x8xf32>
    %25 = arith.mulf %4, %24 : vector<4x16x8xf32>
    %26 = arith.truncf %17 : vector<4x16x8xf32> to vector<4x16x8xbf16>
    %27 = arith.truncf %25 : vector<4x16x8xf32> to vector<4x16x8xbf16>
    "tpu.trace_start"() <{level = 10 : i32, message = "wtd,wsd->wts"}> : () -> ()
    %cst_10 = arith.constant dense<0.000000e+00> : vector<4x16x16xf32>
    %28 = tpu.matmul %26, %27, %cst_10 {dimension_numbers = #tpu.dot_dimension_numbers<[2], [2], [1], [1], [0, 0, 0, 1, 1, 1], [0], [0]>} : vector<4x16x8xbf16>, vector<4x16x8xbf16>, vector<4x16x16xf32> -> vector<4x16x16xf32>
    "tpu.trace_stop"() : () -> ()
    %29 = vector.extract_strided_slice %2 {offsets = [0, 0, 0], sizes = [1, 16, 16], strides = [1, 1, 1]} : vector<4x16x16xf32> to vector<1x16x16xf32>
    %30 = vector.shape_cast %29 : vector<1x16x16xf32> to vector<16x16xf32>
    %31 = vector.shape_cast %30 : vector<16x16xf32> to vector<1x16x16xf32>
    %32 = vector.broadcast %31 : vector<1x16x16xf32> to vector<4x16x16xf32>
    %33 = arith.addf %28, %32 : vector<4x16x16xf32>
    %cst_11 = arith.constant dense<0xFF800000> : vector<4x16xf32>
    %34 = vector.multi_reduction <maximumf>, %33, %cst_11 [2] : vector<4x16x16xf32> to vector<4x16xf32>
    %35 = vector.shape_cast %34 : vector<4x16xf32> to vector<4x16x1xf32>
    %36 = vector.broadcast %35 : vector<4x16x1xf32> to vector<4x16x16xf32>
    %37 = arith.subf %33, %36 : vector<4x16x16xf32>
    %38 = math.exp %37 : vector<4x16x16xf32>
    %cst_12 = arith.constant dense<0.000000e+00> : vector<4x16xf32>
    %39 = vector.multi_reduction <add>, %38, %cst_12 [2] : vector<4x16x16xf32> to vector<4x16xf32>
    %40 = vector.shape_cast %39 : vector<4x16xf32> to vector<4x16x1xf32>
    %41 = tpu.reciprocal %40 {approx = true} : vector<4x16x1xf32> -> vector<4x16x1xf32>
    %42 = vector.broadcast %41 : vector<4x16x1xf32> to vector<4x16x16xf32>
    %43 = arith.mulf %38, %42 : vector<4x16x16xf32>
    %44 = arith.truncf %43 : vector<4x16x16xf32> to vector<4x16x16xbf16>
    %45 = arith.truncf %5 : vector<4x16x8xf32> to vector<4x16x8xbf16>
    "tpu.trace_start"() <{level = 10 : i32, message = "wts,wsd->wtd"}> : () -> ()
    %cst_13 = arith.constant dense<0.000000e+00> : vector<4x16x8xf32>
    %46 = tpu.matmul %44, %45, %cst_13 {dimension_numbers = #tpu.dot_dimension_numbers<[2], [1], [1], [2], [0, 0, 0, 1, 1, 2], [0], [0]>} : vector<4x16x16xbf16>, vector<4x16x8xbf16>, vector<4x16x8xf32> -> vector<4x16x8xf32>
    "tpu.trace_stop"() : () -> ()
    %47 = vector.extract_strided_slice %0 {offsets = [0, 0, 8], sizes = [4, 16, 8], strides = [1, 1, 1]} : vector<4x16x96xf32> to vector<4x16x8xf32>
    %48 = vector.extract_strided_slice %0 {offsets = [0, 0, 40], sizes = [4, 16, 8], strides = [1, 1, 1]} : vector<4x16x96xf32> to vector<4x16x8xf32>
    %49 = vector.extract_strided_slice %0 {offsets = [0, 0, 72], sizes = [4, 16, 8], strides = [1, 1, 1]} : vector<4x16x96xf32> to vector<4x16x8xf32>
    %50 = arith.mulf %47, %47 : vector<4x16x8xf32>
    %cst_14 = arith.constant dense<0.000000e+00> : vector<4x16xf32>
    %51 = vector.multi_reduction <add>, %50, %cst_14 [2] : vector<4x16x8xf32> to vector<4x16xf32>
    %52 = vector.shape_cast %51 : vector<4x16xf32> to vector<4x16x1xf32>
    %cst_15 = arith.constant 9.99999997E-7 : f32
    %53 = vector.broadcast %cst_15 : f32 to vector<4x16x1xf32>
    %54 = arith.addf %52, %53 : vector<4x16x1xf32>
    %55 = math.rsqrt %54 : vector<4x16x1xf32>
    %56 = vector.broadcast %55 : vector<4x16x1xf32> to vector<4x16x8xf32>
    %57 = arith.mulf %47, %56 : vector<4x16x8xf32>
    %58 = vector.extract_strided_slice %1 {offsets = [0, 8], sizes = [1, 8], strides = [1, 1]} : vector<1x32xf32> to vector<1x8xf32>
    %59 = vector.shape_cast %58 : vector<1x8xf32> to vector<1x1x8xf32>
    %60 = vector.broadcast %59 : vector<1x1x8xf32> to vector<4x16x8xf32>
    %61 = arith.mulf %57, %60 : vector<4x16x8xf32>
    %62 = arith.mulf %48, %48 : vector<4x16x8xf32>
    %cst_16 = arith.constant dense<0.000000e+00> : vector<4x16xf32>
    %63 = vector.multi_reduction <add>, %62, %cst_16 [2] : vector<4x16x8xf32> to vector<4x16xf32>
    %64 = vector.shape_cast %63 : vector<4x16xf32> to vector<4x16x1xf32>
    %cst_17 = arith.constant 9.99999997E-7 : f32
    %65 = vector.broadcast %cst_17 : f32 to vector<4x16x1xf32>
    %66 = arith.addf %64, %65 : vector<4x16x1xf32>
    %67 = math.rsqrt %66 : vector<4x16x1xf32>
    %68 = vector.broadcast %67 : vector<4x16x1xf32> to vector<4x16x8xf32>
    %69 = arith.mulf %48, %68 : vector<4x16x8xf32>
    %70 = arith.truncf %61 : vector<4x16x8xf32> to vector<4x16x8xbf16>
    %71 = arith.truncf %69 : vector<4x16x8xf32> to vector<4x16x8xbf16>
    "tpu.trace_start"() <{level = 10 : i32, message = "wtd,wsd->wts"}> : () -> ()
    %cst_18 = arith.constant dense<0.000000e+00> : vector<4x16x16xf32>
    %72 = tpu.matmul %70, %71, %cst_18 {dimension_numbers = #tpu.dot_dimension_numbers<[2], [2], [1], [1], [0, 0, 0, 1, 1, 1], [0], [0]>} : vector<4x16x8xbf16>, vector<4x16x8xbf16>, vector<4x16x16xf32> -> vector<4x16x16xf32>
    "tpu.trace_stop"() : () -> ()
    %73 = vector.extract_strided_slice %2 {offsets = [1, 0, 0], sizes = [1, 16, 16], strides = [1, 1, 1]} : vector<4x16x16xf32> to vector<1x16x16xf32>
    %74 = vector.shape_cast %73 : vector<1x16x16xf32> to vector<16x16xf32>
    %75 = vector.shape_cast %74 : vector<16x16xf32> to vector<1x16x16xf32>
    %76 = vector.broadcast %75 : vector<1x16x16xf32> to vector<4x16x16xf32>
    %77 = arith.addf %72, %76 : vector<4x16x16xf32>
    %cst_19 = arith.constant dense<0xFF800000> : vector<4x16xf32>
    %78 = vector.multi_reduction <maximumf>, %77, %cst_19 [2] : vector<4x16x16xf32> to vector<4x16xf32>
    %79 = vector.shape_cast %78 : vector<4x16xf32> to vector<4x16x1xf32>
    %80 = vector.broadcast %79 : vector<4x16x1xf32> to vector<4x16x16xf32>
    %81 = arith.subf %77, %80 : vector<4x16x16xf32>
    %82 = math.exp %81 : vector<4x16x16xf32>
    %cst_20 = arith.constant dense<0.000000e+00> : vector<4x16xf32>
    %83 = vector.multi_reduction <add>, %82, %cst_20 [2] : vector<4x16x16xf32> to vector<4x16xf32>
    %84 = vector.shape_cast %83 : vector<4x16xf32> to vector<4x16x1xf32>
    %85 = tpu.reciprocal %84 {approx = true} : vector<4x16x1xf32> -> vector<4x16x1xf32>
    %86 = vector.broadcast %85 : vector<4x16x1xf32> to vector<4x16x16xf32>
    %87 = arith.mulf %82, %86 : vector<4x16x16xf32>
    %88 = arith.truncf %87 : vector<4x16x16xf32> to vector<4x16x16xbf16>
    %89 = arith.truncf %49 : vector<4x16x8xf32> to vector<4x16x8xbf16>
    "tpu.trace_start"() <{level = 10 : i32, message = "wts,wsd->wtd"}> : () -> ()
    %cst_21 = arith.constant dense<0.000000e+00> : vector<4x16x8xf32>
    %90 = tpu.matmul %88, %89, %cst_21 {dimension_numbers = #tpu.dot_dimension_numbers<[2], [1], [1], [2], [0, 0, 0, 1, 1, 2], [0], [0]>} : vector<4x16x16xbf16>, vector<4x16x8xbf16>, vector<4x16x8xf32> -> vector<4x16x8xf32>
    "tpu.trace_stop"() : () -> ()
    %91 = vector.extract_strided_slice %0 {offsets = [0, 0, 16], sizes = [4, 16, 8], strides = [1, 1, 1]} : vector<4x16x96xf32> to vector<4x16x8xf32>
    %92 = vector.extract_strided_slice %0 {offsets = [0, 0, 48], sizes = [4, 16, 8], strides = [1, 1, 1]} : vector<4x16x96xf32> to vector<4x16x8xf32>
    %93 = vector.extract_strided_slice %0 {offsets = [0, 0, 80], sizes = [4, 16, 8], strides = [1, 1, 1]} : vector<4x16x96xf32> to vector<4x16x8xf32>
    %94 = arith.mulf %91, %91 : vector<4x16x8xf32>
    %cst_22 = arith.constant dense<0.000000e+00> : vector<4x16xf32>
    %95 = vector.multi_reduction <add>, %94, %cst_22 [2] : vector<4x16x8xf32> to vector<4x16xf32>
    %96 = vector.shape_cast %95 : vector<4x16xf32> to vector<4x16x1xf32>
    %cst_23 = arith.constant 9.99999997E-7 : f32
    %97 = vector.broadcast %cst_23 : f32 to vector<4x16x1xf32>
    %98 = arith.addf %96, %97 : vector<4x16x1xf32>
    %99 = math.rsqrt %98 : vector<4x16x1xf32>
    %100 = vector.broadcast %99 : vector<4x16x1xf32> to vector<4x16x8xf32>
    %101 = arith.mulf %91, %100 : vector<4x16x8xf32>
    %102 = vector.extract_strided_slice %1 {offsets = [0, 16], sizes = [1, 8], strides = [1, 1]} : vector<1x32xf32> to vector<1x8xf32>
    %103 = vector.shape_cast %102 : vector<1x8xf32> to vector<1x1x8xf32>
    %104 = vector.broadcast %103 : vector<1x1x8xf32> to vector<4x16x8xf32>
    %105 = arith.mulf %101, %104 : vector<4x16x8xf32>
    %106 = arith.mulf %92, %92 : vector<4x16x8xf32>
    %cst_24 = arith.constant dense<0.000000e+00> : vector<4x16xf32>
    %107 = vector.multi_reduction <add>, %106, %cst_24 [2] : vector<4x16x8xf32> to vector<4x16xf32>
    %108 = vector.shape_cast %107 : vector<4x16xf32> to vector<4x16x1xf32>
    %cst_25 = arith.constant 9.99999997E-7 : f32
    %109 = vector.broadcast %cst_25 : f32 to vector<4x16x1xf32>
    %110 = arith.addf %108, %109 : vector<4x16x1xf32>
    %111 = math.rsqrt %110 : vector<4x16x1xf32>
    %112 = vector.broadcast %111 : vector<4x16x1xf32> to vector<4x16x8xf32>
    %113 = arith.mulf %92, %112 : vector<4x16x8xf32>
    %114 = arith.truncf %105 : vector<4x16x8xf32> to vector<4x16x8xbf16>
    %115 = arith.truncf %113 : vector<4x16x8xf32> to vector<4x16x8xbf16>
    "tpu.trace_start"() <{level = 10 : i32, message = "wtd,wsd->wts"}> : () -> ()
    %cst_26 = arith.constant dense<0.000000e+00> : vector<4x16x16xf32>
    %116 = tpu.matmul %114, %115, %cst_26 {dimension_numbers = #tpu.dot_dimension_numbers<[2], [2], [1], [1], [0, 0, 0, 1, 1, 1], [0], [0]>} : vector<4x16x8xbf16>, vector<4x16x8xbf16>, vector<4x16x16xf32> -> vector<4x16x16xf32>
    "tpu.trace_stop"() : () -> ()
    %117 = vector.extract_strided_slice %2 {offsets = [2, 0, 0], sizes = [1, 16, 16], strides = [1, 1, 1]} : vector<4x16x16xf32> to vector<1x16x16xf32>
    %118 = vector.shape_cast %117 : vector<1x16x16xf32> to vector<16x16xf32>
    %119 = vector.shape_cast %118 : vector<16x16xf32> to vector<1x16x16xf32>
    %120 = vector.broadcast %119 : vector<1x16x16xf32> to vector<4x16x16xf32>
    %121 = arith.addf %116, %120 : vector<4x16x16xf32>
    %cst_27 = arith.constant dense<0xFF800000> : vector<4x16xf32>
    %122 = vector.multi_reduction <maximumf>, %121, %cst_27 [2] : vector<4x16x16xf32> to vector<4x16xf32>
    %123 = vector.shape_cast %122 : vector<4x16xf32> to vector<4x16x1xf32>
    %124 = vector.broadcast %123 : vector<4x16x1xf32> to vector<4x16x16xf32>
    %125 = arith.subf %121, %124 : vector<4x16x16xf32>
    %126 = math.exp %125 : vector<4x16x16xf32>
    %cst_28 = arith.constant dense<0.000000e+00> : vector<4x16xf32>
    %127 = vector.multi_reduction <add>, %126, %cst_28 [2] : vector<4x16x16xf32> to vector<4x16xf32>
    %128 = vector.shape_cast %127 : vector<4x16xf32> to vector<4x16x1xf32>
    %129 = tpu.reciprocal %128 {approx = true} : vector<4x16x1xf32> -> vector<4x16x1xf32>
    %130 = vector.broadcast %129 : vector<4x16x1xf32> to vector<4x16x16xf32>
    %131 = arith.mulf %126, %130 : vector<4x16x16xf32>
    %132 = arith.truncf %131 : vector<4x16x16xf32> to vector<4x16x16xbf16>
    %133 = arith.truncf %93 : vector<4x16x8xf32> to vector<4x16x8xbf16>
    "tpu.trace_start"() <{level = 10 : i32, message = "wts,wsd->wtd"}> : () -> ()
    %cst_29 = arith.constant dense<0.000000e+00> : vector<4x16x8xf32>
    %134 = tpu.matmul %132, %133, %cst_29 {dimension_numbers = #tpu.dot_dimension_numbers<[2], [1], [1], [2], [0, 0, 0, 1, 1, 2], [0], [0]>} : vector<4x16x16xbf16>, vector<4x16x8xbf16>, vector<4x16x8xf32> -> vector<4x16x8xf32>
    "tpu.trace_stop"() : () -> ()
    %135 = vector.extract_strided_slice %0 {offsets = [0, 0, 24], sizes = [4, 16, 8], strides = [1, 1, 1]} : vector<4x16x96xf32> to vector<4x16x8xf32>
    %136 = vector.extract_strided_slice %0 {offsets = [0, 0, 56], sizes = [4, 16, 8], strides = [1, 1, 1]} : vector<4x16x96xf32> to vector<4x16x8xf32>
    %137 = vector.extract_strided_slice %0 {offsets = [0, 0, 88], sizes = [4, 16, 8], strides = [1, 1, 1]} : vector<4x16x96xf32> to vector<4x16x8xf32>
    %138 = arith.mulf %135, %135 : vector<4x16x8xf32>
    %cst_30 = arith.constant dense<0.000000e+00> : vector<4x16xf32>
    %139 = vector.multi_reduction <add>, %138, %cst_30 [2] : vector<4x16x8xf32> to vector<4x16xf32>
    %140 = vector.shape_cast %139 : vector<4x16xf32> to vector<4x16x1xf32>
    %cst_31 = arith.constant 9.99999997E-7 : f32
    %141 = vector.broadcast %cst_31 : f32 to vector<4x16x1xf32>
    %142 = arith.addf %140, %141 : vector<4x16x1xf32>
    %143 = math.rsqrt %142 : vector<4x16x1xf32>
    %144 = vector.broadcast %143 : vector<4x16x1xf32> to vector<4x16x8xf32>
    %145 = arith.mulf %135, %144 : vector<4x16x8xf32>
    %146 = vector.extract_strided_slice %1 {offsets = [0, 24], sizes = [1, 8], strides = [1, 1]} : vector<1x32xf32> to vector<1x8xf32>
    %147 = vector.shape_cast %146 : vector<1x8xf32> to vector<1x1x8xf32>
    %148 = vector.broadcast %147 : vector<1x1x8xf32> to vector<4x16x8xf32>
    %149 = arith.mulf %145, %148 : vector<4x16x8xf32>
    %150 = arith.mulf %136, %136 : vector<4x16x8xf32>
    %cst_32 = arith.constant dense<0.000000e+00> : vector<4x16xf32>
    %151 = vector.multi_reduction <add>, %150, %cst_32 [2] : vector<4x16x8xf32> to vector<4x16xf32>
    %152 = vector.shape_cast %151 : vector<4x16xf32> to vector<4x16x1xf32>
    %cst_33 = arith.constant 9.99999997E-7 : f32
    %153 = vector.broadcast %cst_33 : f32 to vector<4x16x1xf32>
    %154 = arith.addf %152, %153 : vector<4x16x1xf32>
    %155 = math.rsqrt %154 : vector<4x16x1xf32>
    %156 = vector.broadcast %155 : vector<4x16x1xf32> to vector<4x16x8xf32>
    %157 = arith.mulf %136, %156 : vector<4x16x8xf32>
    %158 = arith.truncf %149 : vector<4x16x8xf32> to vector<4x16x8xbf16>
    %159 = arith.truncf %157 : vector<4x16x8xf32> to vector<4x16x8xbf16>
    "tpu.trace_start"() <{level = 10 : i32, message = "wtd,wsd->wts"}> : () -> ()
    %cst_34 = arith.constant dense<0.000000e+00> : vector<4x16x16xf32>
    %160 = tpu.matmul %158, %159, %cst_34 {dimension_numbers = #tpu.dot_dimension_numbers<[2], [2], [1], [1], [0, 0, 0, 1, 1, 1], [0], [0]>} : vector<4x16x8xbf16>, vector<4x16x8xbf16>, vector<4x16x16xf32> -> vector<4x16x16xf32>
    "tpu.trace_stop"() : () -> ()
    %161 = vector.extract_strided_slice %2 {offsets = [3, 0, 0], sizes = [1, 16, 16], strides = [1, 1, 1]} : vector<4x16x16xf32> to vector<1x16x16xf32>
    %162 = vector.shape_cast %161 : vector<1x16x16xf32> to vector<16x16xf32>
    %163 = vector.shape_cast %162 : vector<16x16xf32> to vector<1x16x16xf32>
    %164 = vector.broadcast %163 : vector<1x16x16xf32> to vector<4x16x16xf32>
    %165 = arith.addf %160, %164 : vector<4x16x16xf32>
    %cst_35 = arith.constant dense<0xFF800000> : vector<4x16xf32>
    %166 = vector.multi_reduction <maximumf>, %165, %cst_35 [2] : vector<4x16x16xf32> to vector<4x16xf32>
    %167 = vector.shape_cast %166 : vector<4x16xf32> to vector<4x16x1xf32>
    %168 = vector.broadcast %167 : vector<4x16x1xf32> to vector<4x16x16xf32>
    %169 = arith.subf %165, %168 : vector<4x16x16xf32>
    %170 = math.exp %169 : vector<4x16x16xf32>
    %cst_36 = arith.constant dense<0.000000e+00> : vector<4x16xf32>
    %171 = vector.multi_reduction <add>, %170, %cst_36 [2] : vector<4x16x16xf32> to vector<4x16xf32>
    %172 = vector.shape_cast %171 : vector<4x16xf32> to vector<4x16x1xf32>
    %173 = tpu.reciprocal %172 {approx = true} : vector<4x16x1xf32> -> vector<4x16x1xf32>
    %174 = vector.broadcast %173 : vector<4x16x1xf32> to vector<4x16x16xf32>
    %175 = arith.mulf %170, %174 : vector<4x16x16xf32>
    %176 = arith.truncf %175 : vector<4x16x16xf32> to vector<4x16x16xbf16>
    %177 = arith.truncf %137 : vector<4x16x8xf32> to vector<4x16x8xbf16>
    "tpu.trace_start"() <{level = 10 : i32, message = "wts,wsd->wtd"}> : () -> ()
    %cst_37 = arith.constant dense<0.000000e+00> : vector<4x16x8xf32>
    %178 = tpu.matmul %176, %177, %cst_37 {dimension_numbers = #tpu.dot_dimension_numbers<[2], [1], [1], [2], [0, 0, 0, 1, 1, 2], [0], [0]>} : vector<4x16x16xbf16>, vector<4x16x8xbf16>, vector<4x16x8xf32> -> vector<4x16x8xf32>
    "tpu.trace_stop"() : () -> ()
    %179 = tpu.concatenate %46, %90, %134, %178 in 2 : vector<4x16x8xf32>, vector<4x16x8xf32>, vector<4x16x8xf32>, vector<4x16x8xf32> -> vector<4x16x32xf32>
    %c0_38 = arith.constant 0 : index
    %c0_39 = arith.constant 0 : index
    %c0_40 = arith.constant 0 : index
    %180 = vector.load %arg4[%c0_38, %c0_39, %c0_40] : memref<4x16x32xf32, #tpu.memory_space<vmem>>, vector<4x16x32xf32>
    tpu.vector_store %arg4[%c0_38, %c0_39, %c0_40], %179 {strides = array<i32>} : memref<4x16x32xf32, #tpu.memory_space<vmem>>, vector<4x16x32xf32>,
    return
  }
  func.func @transform_0(%arg0: i32) -> (i32, i32, i32) {
    %c0_i32 = arith.constant 0 : i32
    %c0_i32_0 = arith.constant 0 : i32
    %c0_i32_1 = arith.constant 0 : i32
    return %arg0, %c0_i32, %c0_i32_0 : i32, i32, i32
  }
  func.func @transform_1(%arg0: i32) -> (i32, i32) {
    %c0_i32 = arith.constant 0 : i32
    %c0_i32_0 = arith.constant 0 : i32
    %c0_i32_1 = arith.constant 0 : i32
    return %c0_i32, %c0_i32_0 : i32, i32
  }
  func.func @transform_2(%arg0: i32) -> (i32, i32, i32) {
    %c0_i32 = arith.constant 0 : i32
    %c0_i32_0 = arith.constant 0 : i32
    %c0_i32_1 = arith.constant 0 : i32
    %c0_i32_2 = arith.constant 0 : i32
    return %c0_i32, %c0_i32_0, %c0_i32_1 : i32, i32, i32
  }
  func.func @transform_3(%arg0: i32) -> (i32, i32, i32) {
    %c0_i32 = arith.constant 0 : i32
    %c0_i32_0 = arith.constant 0 : i32
    %c0_i32_1 = arith.constant 0 : i32
    return %arg0, %c0_i32, %c0_i32_0 : i32, i32, i32
  }
}

module attributes {stable_mosaic.version = 11 : i64} {
  func.func @linear_add_ln_kernel(%arg0: i32, %arg1: memref<128x32xf32, #tpu.memory_space<vmem>>, %arg2: memref<32x32xbf16, #tpu.memory_space<vmem>>, %arg3: memref<1x32xf32, #tpu.memory_space<vmem>>, %arg4: memref<128x32xf32, #tpu.memory_space<vmem>>, %arg5: memref<1x32xf32, #tpu.memory_space<vmem>>, %arg6: memref<1x32xf32, #tpu.memory_space<vmem>>, %arg7: memref<128x32xf32, #tpu.memory_space<vmem>>) attributes {dimension_semantics = [#tpu.dimension_semantics<parallel>], iteration_bounds = array<i64: 1>, scalar_prefetch = 0 : i64, scratch_operands = 0 : i64, tpu.core_type = #tpu.core_type<tc>, window_params = [{transform_indices = @transform_0, window_bounds = array<i64: 128, 32>}, {pipeline_mode = #tpu.pipeline_mode<synchronous>, transform_indices = @transform_1, window_bounds = array<i64: 32, 32>}, {pipeline_mode = #tpu.pipeline_mode<synchronous>, transform_indices = @transform_2, window_bounds = array<i64: 1, 32>}, {transform_indices = @transform_3, window_bounds = array<i64: 128, 32>}, {pipeline_mode = #tpu.pipeline_mode<synchronous>, transform_indices = @transform_4, window_bounds = array<i64: 1, 32>}, {pipeline_mode = #tpu.pipeline_mode<synchronous>, transform_indices = @transform_5, window_bounds = array<i64: 1, 32>}, {transform_indices = @transform_6, window_bounds = array<i64: 128, 32>}]} {
    %c0 = arith.constant 0 : index
    %c0_0 = arith.constant 0 : index
    %0 = vector.load %arg1[%c0, %c0_0] : memref<128x32xf32, #tpu.memory_space<vmem>>, vector<128x32xf32>
    %1 = arith.truncf %0 : vector<128x32xf32> to vector<128x32xbf16>
    %c0_1 = arith.constant 0 : index
    %c0_2 = arith.constant 0 : index
    %2 = vector.load %arg2[%c0_1, %c0_2] : memref<32x32xbf16, #tpu.memory_space<vmem>>, vector<32x32xbf16>
    %cst = arith.constant dense<0.000000e+00> : vector<128x32xf32>
    %3 = tpu.matmul %1, %2, %cst {dimension_numbers = #tpu.dot_dimension_numbers<[1], [0], [0], [1], [0, 0, 1, 1], [], []>} : vector<128x32xbf16>, vector<32x32xbf16>, vector<128x32xf32> -> vector<128x32xf32>
    %c0_3 = arith.constant 0 : index
    %c0_4 = arith.constant 0 : index
    %4 = vector.load %arg3[%c0_3, %c0_4] : memref<1x32xf32, #tpu.memory_space<vmem>>, vector<1x32xf32>
    %5 = vector.broadcast %4 : vector<1x32xf32> to vector<128x32xf32>
    %6 = arith.addf %3, %5 : vector<128x32xf32>
    %cst_5 = arith.constant dense<0.000000e+00> : vector<128xf32>
    %7 = vector.multi_reduction <add>, %6, %cst_5 [1] : vector<128x32xf32> to vector<128xf32>
    %8 = vector.shape_cast %7 : vector<128xf32> to vector<128x1xf32>
    %cst_6 = arith.constant 3.200000e+01 : f32
    %9 = vector.broadcast %cst_6 : f32 to vector<128x1xf32>
    %10 = arith.divf %8, %9 : vector<128x1xf32>
    %11 = vector.broadcast %10 : vector<128x1xf32> to vector<128x32xf32>
    %12 = arith.subf %6, %11 : vector<128x32xf32>
    %13 = vector.broadcast %10 : vector<128x1xf32> to vector<128x32xf32>
    %14 = arith.subf %6, %13 : vector<128x32xf32>
    %15 = arith.mulf %12, %14 : vector<128x32xf32>
    %cst_7 = arith.constant dense<0.000000e+00> : vector<128xf32>
    %16 = vector.multi_reduction <add>, %15, %cst_7 [1] : vector<128x32xf32> to vector<128xf32>
    %17 = vector.shape_cast %16 : vector<128xf32> to vector<128x1xf32>
    %cst_8 = arith.constant 3.200000e+01 : f32
    %18 = vector.broadcast %cst_8 : f32 to vector<128x1xf32>
    %19 = arith.divf %17, %18 : vector<128x1xf32>
    %20 = vector.broadcast %10 : vector<128x1xf32> to vector<128x32xf32>
    %21 = arith.subf %6, %20 : vector<128x32xf32>
    %cst_9 = arith.constant 9.99999974E-6 : f32
    %22 = vector.broadcast %cst_9 : f32 to vector<128x1xf32>
    %23 = arith.addf %19, %22 : vector<128x1xf32>
    %24 = math.rsqrt %23 : vector<128x1xf32>
    %25 = vector.broadcast %24 : vector<128x1xf32> to vector<128x32xf32>
    %26 = arith.mulf %21, %25 : vector<128x32xf32>
    %c0_10 = arith.constant 0 : index
    %c0_11 = arith.constant 0 : index
    %27 = vector.load %arg4[%c0_10, %c0_11] : memref<128x32xf32, #tpu.memory_space<vmem>>, vector<128x32xf32>
    %c0_12 = arith.constant 0 : index
    %c0_13 = arith.constant 0 : index
    %28 = vector.load %arg5[%c0_12, %c0_13] : memref<1x32xf32, #tpu.memory_space<vmem>>, vector<1x32xf32>
    %29 = vector.broadcast %28 : vector<1x32xf32> to vector<128x32xf32>
    %30 = arith.mulf %26, %29 : vector<128x32xf32>
    %31 = arith.addf %27, %30 : vector<128x32xf32>
    %c0_14 = arith.constant 0 : index
    %c0_15 = arith.constant 0 : index
    %32 = vector.load %arg6[%c0_14, %c0_15] : memref<1x32xf32, #tpu.memory_space<vmem>>, vector<1x32xf32>
    %33 = vector.broadcast %32 : vector<1x32xf32> to vector<128x32xf32>
    %34 = arith.addf %31, %33 : vector<128x32xf32>
    %c0_16 = arith.constant 0 : index
    %c0_17 = arith.constant 0 : index
    %35 = vector.load %arg7[%c0_16, %c0_17] : memref<128x32xf32, #tpu.memory_space<vmem>>, vector<128x32xf32>
    tpu.vector_store %arg7[%c0_16, %c0_17], %34 {strides = array<i32>} : memref<128x32xf32, #tpu.memory_space<vmem>>, vector<128x32xf32>,
    return
  }
  func.func @transform_0(%arg0: i32) -> (i32, i32) {
    %c0_i32 = arith.constant 0 : i32
    %c0_i32_0 = arith.constant 0 : i32
    return %arg0, %c0_i32 : i32, i32
  }
  func.func @transform_1(%arg0: i32) -> (i32, i32) {
    %c0_i32 = arith.constant 0 : i32
    %c0_i32_0 = arith.constant 0 : i32
    %c0_i32_1 = arith.constant 0 : i32
    return %c0_i32, %c0_i32_0 : i32, i32
  }
  func.func @transform_2(%arg0: i32) -> (i32, i32) {
    %c0_i32 = arith.constant 0 : i32
    %c0_i32_0 = arith.constant 0 : i32
    %c0_i32_1 = arith.constant 0 : i32
    return %c0_i32, %c0_i32_0 : i32, i32
  }
  func.func @transform_3(%arg0: i32) -> (i32, i32) {
    %c0_i32 = arith.constant 0 : i32
    %c0_i32_0 = arith.constant 0 : i32
    return %arg0, %c0_i32 : i32, i32
  }
  func.func @transform_4(%arg0: i32) -> (i32, i32) {
    %c0_i32 = arith.constant 0 : i32
    %c0_i32_0 = arith.constant 0 : i32
    %c0_i32_1 = arith.constant 0 : i32
    return %c0_i32, %c0_i32_0 : i32, i32
  }
  func.func @transform_5(%arg0: i32) -> (i32, i32) {
    %c0_i32 = arith.constant 0 : i32
    %c0_i32_0 = arith.constant 0 : i32
    %c0_i32_1 = arith.constant 0 : i32
    return %c0_i32, %c0_i32_0 : i32, i32
  }
  func.func @transform_6(%arg0: i32) -> (i32, i32) {
    %c0_i32 = arith.constant 0 : i32
    %c0_i32_0 = arith.constant 0 : i32
    return %arg0, %c0_i32 : i32, i32
  }
}

module attributes {stable_mosaic.version = 11 : i64} {
  func.func @linear_gelu_kernel(%arg0: i32, %arg1: memref<128x32xf32, #tpu.memory_space<vmem>>, %arg2: memref<32x128xbf16, #tpu.memory_space<vmem>>, %arg3: memref<1x128xf32, #tpu.memory_space<vmem>>, %arg4: memref<128x128xf32, #tpu.memory_space<vmem>>) attributes {dimension_semantics = [#tpu.dimension_semantics<parallel>], iteration_bounds = array<i64: 1>, scalar_prefetch = 0 : i64, scratch_operands = 0 : i64, tpu.core_type = #tpu.core_type<tc>, window_params = [{transform_indices = @transform_0, window_bounds = array<i64: 128, 32>}, {pipeline_mode = #tpu.pipeline_mode<synchronous>, transform_indices = @transform_1, window_bounds = array<i64: 32, 128>}, {pipeline_mode = #tpu.pipeline_mode<synchronous>, transform_indices = @transform_2, window_bounds = array<i64: 1, 128>}, {transform_indices = @transform_3, window_bounds = array<i64: 128, 128>}]} {
    %c0 = arith.constant 0 : index
    %c0_0 = arith.constant 0 : index
    %0 = vector.load %arg1[%c0, %c0_0] : memref<128x32xf32, #tpu.memory_space<vmem>>, vector<128x32xf32>
    %1 = arith.truncf %0 : vector<128x32xf32> to vector<128x32xbf16>
    %c0_1 = arith.constant 0 : index
    %c0_2 = arith.constant 0 : index
    %2 = vector.load %arg2[%c0_1, %c0_2] : memref<32x128xbf16, #tpu.memory_space<vmem>>, vector<32x128xbf16>
    %cst = arith.constant dense<0.000000e+00> : vector<128x128xf32>
    %3 = tpu.matmul %1, %2, %cst {dimension_numbers = #tpu.dot_dimension_numbers<[1], [0], [0], [1], [0, 0, 1, 1], [], []>} : vector<128x32xbf16>, vector<32x128xbf16>, vector<128x128xf32> -> vector<128x128xf32>
    %c0_3 = arith.constant 0 : index
    %c0_4 = arith.constant 0 : index
    %4 = vector.load %arg3[%c0_3, %c0_4] : memref<1x128xf32, #tpu.memory_space<vmem>>, vector<1x128xf32>
    %5 = vector.broadcast %4 : vector<1x128xf32> to vector<128x128xf32>
    %6 = arith.addf %3, %5 : vector<128x128xf32>
    %cst_5 = arith.constant 5.000000e-01 : f32
    %7 = vector.broadcast %cst_5 : f32 to vector<128x128xf32>
    %8 = arith.mulf %7, %6 : vector<128x128xf32>
    %cst_6 = arith.constant 0.707106769 : f32
    %9 = vector.broadcast %cst_6 : f32 to vector<128x128xf32>
    %10 = arith.mulf %6, %9 : vector<128x128xf32>
    %11 = math.erf %10 : vector<128x128xf32>
    %cst_7 = arith.constant 1.000000e+00 : f32
    %12 = vector.broadcast %cst_7 : f32 to vector<128x128xf32>
    %13 = arith.addf %12, %11 : vector<128x128xf32>
    %14 = arith.mulf %8, %13 : vector<128x128xf32>
    %c0_8 = arith.constant 0 : index
    %c0_9 = arith.constant 0 : index
    %15 = vector.load %arg4[%c0_8, %c0_9] : memref<128x128xf32, #tpu.memory_space<vmem>>, vector<128x128xf32>
    tpu.vector_store %arg4[%c0_8, %c0_9], %14 {strides = array<i32>} : memref<128x128xf32, #tpu.memory_space<vmem>>, vector<128x128xf32>,
    return
  }
  func.func @transform_0(%arg0: i32) -> (i32, i32) {
    %c0_i32 = arith.constant 0 : i32
    %c0_i32_0 = arith.constant 0 : i32
    return %arg0, %c0_i32 : i32, i32
  }
  func.func @transform_1(%arg0: i32) -> (i32, i32) {
    %c0_i32 = arith.constant 0 : i32
    %c0_i32_0 = arith.constant 0 : i32
    %c0_i32_1 = arith.constant 0 : i32
    return %c0_i32, %c0_i32_0 : i32, i32
  }
  func.func @transform_2(%arg0: i32) -> (i32, i32) {
    %c0_i32 = arith.constant 0 : i32
    %c0_i32_0 = arith.constant 0 : i32
    %c0_i32_1 = arith.constant 0 : i32
    return %c0_i32, %c0_i32_0 : i32, i32
  }
  func.func @transform_3(%arg0: i32) -> (i32, i32) {
    %c0_i32 = arith.constant 0 : i32
    %c0_i32_0 = arith.constant 0 : i32
    return %arg0, %c0_i32 : i32, i32
  }
}

module attributes {stable_mosaic.version = 11 : i64} {
  func.func @linear_add_ln_kernel(%arg0: i32, %arg1: memref<128x128xf32, #tpu.memory_space<vmem>>, %arg2: memref<128x32xbf16, #tpu.memory_space<vmem>>, %arg3: memref<1x32xf32, #tpu.memory_space<vmem>>, %arg4: memref<128x32xf32, #tpu.memory_space<vmem>>, %arg5: memref<1x32xf32, #tpu.memory_space<vmem>>, %arg6: memref<1x32xf32, #tpu.memory_space<vmem>>, %arg7: memref<128x32xf32, #tpu.memory_space<vmem>>) attributes {dimension_semantics = [#tpu.dimension_semantics<parallel>], iteration_bounds = array<i64: 1>, scalar_prefetch = 0 : i64, scratch_operands = 0 : i64, tpu.core_type = #tpu.core_type<tc>, window_params = [{transform_indices = @transform_0, window_bounds = array<i64: 128, 128>}, {pipeline_mode = #tpu.pipeline_mode<synchronous>, transform_indices = @transform_1, window_bounds = array<i64: 128, 32>}, {pipeline_mode = #tpu.pipeline_mode<synchronous>, transform_indices = @transform_2, window_bounds = array<i64: 1, 32>}, {transform_indices = @transform_3, window_bounds = array<i64: 128, 32>}, {pipeline_mode = #tpu.pipeline_mode<synchronous>, transform_indices = @transform_4, window_bounds = array<i64: 1, 32>}, {pipeline_mode = #tpu.pipeline_mode<synchronous>, transform_indices = @transform_5, window_bounds = array<i64: 1, 32>}, {transform_indices = @transform_6, window_bounds = array<i64: 128, 32>}]} {
    %c0 = arith.constant 0 : index
    %c0_0 = arith.constant 0 : index
    %0 = vector.load %arg1[%c0, %c0_0] : memref<128x128xf32, #tpu.memory_space<vmem>>, vector<128x128xf32>
    %1 = arith.truncf %0 : vector<128x128xf32> to vector<128x128xbf16>
    %c0_1 = arith.constant 0 : index
    %c0_2 = arith.constant 0 : index
    %2 = vector.load %arg2[%c0_1, %c0_2] : memref<128x32xbf16, #tpu.memory_space<vmem>>, vector<128x32xbf16>
    %cst = arith.constant dense<0.000000e+00> : vector<128x32xf32>
    %3 = tpu.matmul %1, %2, %cst {dimension_numbers = #tpu.dot_dimension_numbers<[1], [0], [0], [1], [0, 0, 1, 1], [], []>} : vector<128x128xbf16>, vector<128x32xbf16>, vector<128x32xf32> -> vector<128x32xf32>
    %c0_3 = arith.constant 0 : index
    %c0_4 = arith.constant 0 : index
    %4 = vector.load %arg3[%c0_3, %c0_4] : memref<1x32xf32, #tpu.memory_space<vmem>>, vector<1x32xf32>
    %5 = vector.broadcast %4 : vector<1x32xf32> to vector<128x32xf32>
    %6 = arith.addf %3, %5 : vector<128x32xf32>
    %cst_5 = arith.constant dense<0.000000e+00> : vector<128xf32>
    %7 = vector.multi_reduction <add>, %6, %cst_5 [1] : vector<128x32xf32> to vector<128xf32>
    %8 = vector.shape_cast %7 : vector<128xf32> to vector<128x1xf32>
    %cst_6 = arith.constant 3.200000e+01 : f32
    %9 = vector.broadcast %cst_6 : f32 to vector<128x1xf32>
    %10 = arith.divf %8, %9 : vector<128x1xf32>
    %11 = vector.broadcast %10 : vector<128x1xf32> to vector<128x32xf32>
    %12 = arith.subf %6, %11 : vector<128x32xf32>
    %13 = vector.broadcast %10 : vector<128x1xf32> to vector<128x32xf32>
    %14 = arith.subf %6, %13 : vector<128x32xf32>
    %15 = arith.mulf %12, %14 : vector<128x32xf32>
    %cst_7 = arith.constant dense<0.000000e+00> : vector<128xf32>
    %16 = vector.multi_reduction <add>, %15, %cst_7 [1] : vector<128x32xf32> to vector<128xf32>
    %17 = vector.shape_cast %16 : vector<128xf32> to vector<128x1xf32>
    %cst_8 = arith.constant 3.200000e+01 : f32
    %18 = vector.broadcast %cst_8 : f32 to vector<128x1xf32>
    %19 = arith.divf %17, %18 : vector<128x1xf32>
    %20 = vector.broadcast %10 : vector<128x1xf32> to vector<128x32xf32>
    %21 = arith.subf %6, %20 : vector<128x32xf32>
    %cst_9 = arith.constant 9.99999974E-6 : f32
    %22 = vector.broadcast %cst_9 : f32 to vector<128x1xf32>
    %23 = arith.addf %19, %22 : vector<128x1xf32>
    %24 = math.rsqrt %23 : vector<128x1xf32>
    %25 = vector.broadcast %24 : vector<128x1xf32> to vector<128x32xf32>
    %26 = arith.mulf %21, %25 : vector<128x32xf32>
    %c0_10 = arith.constant 0 : index
    %c0_11 = arith.constant 0 : index
    %27 = vector.load %arg4[%c0_10, %c0_11] : memref<128x32xf32, #tpu.memory_space<vmem>>, vector<128x32xf32>
    %c0_12 = arith.constant 0 : index
    %c0_13 = arith.constant 0 : index
    %28 = vector.load %arg5[%c0_12, %c0_13] : memref<1x32xf32, #tpu.memory_space<vmem>>, vector<1x32xf32>
    %29 = vector.broadcast %28 : vector<1x32xf32> to vector<128x32xf32>
    %30 = arith.mulf %26, %29 : vector<128x32xf32>
    %31 = arith.addf %27, %30 : vector<128x32xf32>
    %c0_14 = arith.constant 0 : index
    %c0_15 = arith.constant 0 : index
    %32 = vector.load %arg6[%c0_14, %c0_15] : memref<1x32xf32, #tpu.memory_space<vmem>>, vector<1x32xf32>
    %33 = vector.broadcast %32 : vector<1x32xf32> to vector<128x32xf32>
    %34 = arith.addf %31, %33 : vector<128x32xf32>
    %c0_16 = arith.constant 0 : index
    %c0_17 = arith.constant 0 : index
    %35 = vector.load %arg7[%c0_16, %c0_17] : memref<128x32xf32, #tpu.memory_space<vmem>>, vector<128x32xf32>
    tpu.vector_store %arg7[%c0_16, %c0_17], %34 {strides = array<i32>} : memref<128x32xf32, #tpu.memory_space<vmem>>, vector<128x32xf32>,
    return
  }
  func.func @transform_0(%arg0: i32) -> (i32, i32) {
    %c0_i32 = arith.constant 0 : i32
    %c0_i32_0 = arith.constant 0 : i32
    return %arg0, %c0_i32 : i32, i32
  }
  func.func @transform_1(%arg0: i32) -> (i32, i32) {
    %c0_i32 = arith.constant 0 : i32
    %c0_i32_0 = arith.constant 0 : i32
    %c0_i32_1 = arith.constant 0 : i32
    return %c0_i32, %c0_i32_0 : i32, i32
  }
  func.func @transform_2(%arg0: i32) -> (i32, i32) {
    %c0_i32 = arith.constant 0 : i32
    %c0_i32_0 = arith.constant 0 : i32
    %c0_i32_1 = arith.constant 0 : i32
    return %c0_i32, %c0_i32_0 : i32, i32
  }
  func.func @transform_3(%arg0: i32) -> (i32, i32) {
    %c0_i32 = arith.constant 0 : i32
    %c0_i32_0 = arith.constant 0 : i32
    return %arg0, %c0_i32 : i32, i32
  }
  func.func @transform_4(%arg0: i32) -> (i32, i32) {
    %c0_i32 = arith.constant 0 : i32
    %c0_i32_0 = arith.constant 0 : i32
    %c0_i32_1 = arith.constant 0 : i32
    return %c0_i32, %c0_i32_0 : i32, i32
  }
  func.func @transform_5(%arg0: i32) -> (i32, i32) {
    %c0_i32 = arith.constant 0 : i32
    %c0_i32_0 = arith.constant 0 : i32
    %c0_i32_1 = arith.constant 0 : i32
    return %c0_i32, %c0_i32_0 : i32, i32
  }
  func.func @transform_6(%arg0: i32) -> (i32, i32) {
    %c0_i32 = arith.constant 0 : i32
    %c0_i32_0 = arith.constant 0 : i32
    return %arg0, %c0_i32 : i32, i32
  }
}

module attributes {stable_mosaic.version = 11 : i64} {
  func.func @shifted_window_attn_kernel(%arg0: i32, %arg1: memref<4x16x96xf32, #tpu.memory_space<vmem>>, %arg2: memref<1x32xf32, #tpu.memory_space<vmem>>, %arg3: memref<4x16x16xf32, #tpu.memory_space<vmem>>, %arg4: memref<4x16x16xf32, #tpu.memory_space<vmem>>, %arg5: memref<4x16x32xf32, #tpu.memory_space<vmem>>) attributes {dimension_semantics = [#tpu.dimension_semantics<parallel>], iteration_bounds = array<i64: 2>, scalar_prefetch = 0 : i64, scratch_operands = 0 : i64, tpu.core_type = #tpu.core_type<tc>, window_params = [{transform_indices = @transform_0, window_bounds = array<i64: 4, 16, 96>}, {pipeline_mode = #tpu.pipeline_mode<synchronous>, transform_indices = @transform_1, window_bounds = array<i64: 1, 32>}, {pipeline_mode = #tpu.pipeline_mode<synchronous>, transform_indices = @transform_2, window_bounds = array<i64: 4, 16, 16>}, {pipeline_mode = #tpu.pipeline_mode<synchronous>, transform_indices = @transform_3, window_bounds = array<i64: 4, 16, 16>}, {transform_indices = @transform_4, window_bounds = array<i64: 4, 16, 32>}]} {
    %c0 = arith.constant 0 : index
    %c0_0 = arith.constant 0 : index
    %c0_1 = arith.constant 0 : index
    %0 = vector.load %arg1[%c0, %c0_0, %c0_1] : memref<4x16x96xf32, #tpu.memory_space<vmem>>, vector<4x16x96xf32>
    %c0_2 = arith.constant 0 : index
    %c0_3 = arith.constant 0 : index
    %1 = vector.load %arg2[%c0_2, %c0_3] : memref<1x32xf32, #tpu.memory_space<vmem>>, vector<1x32xf32>
    %c0_4 = arith.constant 0 : index
    %c0_5 = arith.constant 0 : index
    %c0_6 = arith.constant 0 : index
    %2 = vector.load %arg3[%c0_4, %c0_5, %c0_6] : memref<4x16x16xf32, #tpu.memory_space<vmem>>, vector<4x16x16xf32>
    %c0_7 = arith.constant 0 : index
    %c0_8 = arith.constant 0 : index
    %c0_9 = arith.constant 0 : index
    %3 = vector.load %arg4[%c0_7, %c0_8, %c0_9] : memref<4x16x16xf32, #tpu.memory_space<vmem>>, vector<4x16x16xf32>
    %4 = vector.extract_strided_slice %0 {offsets = [0, 0, 0], sizes = [4, 16, 8], strides = [1, 1, 1]} : vector<4x16x96xf32> to vector<4x16x8xf32>
    %5 = vector.extract_strided_slice %0 {offsets = [0, 0, 32], sizes = [4, 16, 8], strides = [1, 1, 1]} : vector<4x16x96xf32> to vector<4x16x8xf32>
    %6 = vector.extract_strided_slice %0 {offsets = [0, 0, 64], sizes = [4, 16, 8], strides = [1, 1, 1]} : vector<4x16x96xf32> to vector<4x16x8xf32>
    %7 = arith.mulf %4, %4 : vector<4x16x8xf32>
    %cst = arith.constant dense<0.000000e+00> : vector<4x16xf32>
    %8 = vector.multi_reduction <add>, %7, %cst [2] : vector<4x16x8xf32> to vector<4x16xf32>
    %9 = vector.shape_cast %8 : vector<4x16xf32> to vector<4x16x1xf32>
    %cst_10 = arith.constant 9.99999997E-7 : f32
    %10 = vector.broadcast %cst_10 : f32 to vector<4x16x1xf32>
    %11 = arith.addf %9, %10 : vector<4x16x1xf32>
    %12 = math.rsqrt %11 : vector<4x16x1xf32>
    %13 = vector.broadcast %12 : vector<4x16x1xf32> to vector<4x16x8xf32>
    %14 = arith.mulf %4, %13 : vector<4x16x8xf32>
    %15 = vector.extract_strided_slice %1 {offsets = [0, 0], sizes = [1, 8], strides = [1, 1]} : vector<1x32xf32> to vector<1x8xf32>
    %16 = vector.shape_cast %15 : vector<1x8xf32> to vector<1x1x8xf32>
    %17 = vector.broadcast %16 : vector<1x1x8xf32> to vector<4x16x8xf32>
    %18 = arith.mulf %14, %17 : vector<4x16x8xf32>
    %19 = arith.mulf %5, %5 : vector<4x16x8xf32>
    %cst_11 = arith.constant dense<0.000000e+00> : vector<4x16xf32>
    %20 = vector.multi_reduction <add>, %19, %cst_11 [2] : vector<4x16x8xf32> to vector<4x16xf32>
    %21 = vector.shape_cast %20 : vector<4x16xf32> to vector<4x16x1xf32>
    %cst_12 = arith.constant 9.99999997E-7 : f32
    %22 = vector.broadcast %cst_12 : f32 to vector<4x16x1xf32>
    %23 = arith.addf %21, %22 : vector<4x16x1xf32>
    %24 = math.rsqrt %23 : vector<4x16x1xf32>
    %25 = vector.broadcast %24 : vector<4x16x1xf32> to vector<4x16x8xf32>
    %26 = arith.mulf %5, %25 : vector<4x16x8xf32>
    %27 = arith.truncf %18 : vector<4x16x8xf32> to vector<4x16x8xbf16>
    %28 = arith.truncf %26 : vector<4x16x8xf32> to vector<4x16x8xbf16>
    "tpu.trace_start"() <{level = 10 : i32, message = "wtd,wsd->wts"}> : () -> ()
    %cst_13 = arith.constant dense<0.000000e+00> : vector<4x16x16xf32>
    %29 = tpu.matmul %27, %28, %cst_13 {dimension_numbers = #tpu.dot_dimension_numbers<[2], [2], [1], [1], [0, 0, 0, 1, 1, 1], [0], [0]>} : vector<4x16x8xbf16>, vector<4x16x8xbf16>, vector<4x16x16xf32> -> vector<4x16x16xf32>
    "tpu.trace_stop"() : () -> ()
    %30 = vector.extract_strided_slice %2 {offsets = [0, 0, 0], sizes = [1, 16, 16], strides = [1, 1, 1]} : vector<4x16x16xf32> to vector<1x16x16xf32>
    %31 = vector.shape_cast %30 : vector<1x16x16xf32> to vector<16x16xf32>
    %32 = vector.shape_cast %31 : vector<16x16xf32> to vector<1x16x16xf32>
    %33 = vector.broadcast %32 : vector<1x16x16xf32> to vector<4x16x16xf32>
    %34 = arith.addf %29, %33 : vector<4x16x16xf32>
    %35 = arith.addf %34, %3 : vector<4x16x16xf32>
    %cst_14 = arith.constant dense<0xFF800000> : vector<4x16xf32>
    %36 = vector.multi_reduction <maximumf>, %35, %cst_14 [2] : vector<4x16x16xf32> to vector<4x16xf32>
    %37 = vector.shape_cast %36 : vector<4x16xf32> to vector<4x16x1xf32>
    %38 = vector.broadcast %37 : vector<4x16x1xf32> to vector<4x16x16xf32>
    %39 = arith.subf %35, %38 : vector<4x16x16xf32>
    %40 = math.exp %39 : vector<4x16x16xf32>
    %cst_15 = arith.constant dense<0.000000e+00> : vector<4x16xf32>
    %41 = vector.multi_reduction <add>, %40, %cst_15 [2] : vector<4x16x16xf32> to vector<4x16xf32>
    %42 = vector.shape_cast %41 : vector<4x16xf32> to vector<4x16x1xf32>
    %43 = tpu.reciprocal %42 {approx = true} : vector<4x16x1xf32> -> vector<4x16x1xf32>
    %44 = vector.broadcast %43 : vector<4x16x1xf32> to vector<4x16x16xf32>
    %45 = arith.mulf %40, %44 : vector<4x16x16xf32>
    %46 = arith.truncf %45 : vector<4x16x16xf32> to vector<4x16x16xbf16>
    %47 = arith.truncf %6 : vector<4x16x8xf32> to vector<4x16x8xbf16>
    "tpu.trace_start"() <{level = 10 : i32, message = "wts,wsd->wtd"}> : () -> ()
    %cst_16 = arith.constant dense<0.000000e+00> : vector<4x16x8xf32>
    %48 = tpu.matmul %46, %47, %cst_16 {dimension_numbers = #tpu.dot_dimension_numbers<[2], [1], [1], [2], [0, 0, 0, 1, 1, 2], [0], [0]>} : vector<4x16x16xbf16>, vector<4x16x8xbf16>, vector<4x16x8xf32> -> vector<4x16x8xf32>
    "tpu.trace_stop"() : () -> ()
    %49 = vector.extract_strided_slice %0 {offsets = [0, 0, 8], sizes = [4, 16, 8], strides = [1, 1, 1]} : vector<4x16x96xf32> to vector<4x16x8xf32>
    %50 = vector.extract_strided_slice %0 {offsets = [0, 0, 40], sizes = [4, 16, 8], strides = [1, 1, 1]} : vector<4x16x96xf32> to vector<4x16x8xf32>
    %51 = vector.extract_strided_slice %0 {offsets = [0, 0, 72], sizes = [4, 16, 8], strides = [1, 1, 1]} : vector<4x16x96xf32> to vector<4x16x8xf32>
    %52 = arith.mulf %49, %49 : vector<4x16x8xf32>
    %cst_17 = arith.constant dense<0.000000e+00> : vector<4x16xf32>
    %53 = vector.multi_reduction <add>, %52, %cst_17 [2] : vector<4x16x8xf32> to vector<4x16xf32>
    %54 = vector.shape_cast %53 : vector<4x16xf32> to vector<4x16x1xf32>
    %cst_18 = arith.constant 9.99999997E-7 : f32
    %55 = vector.broadcast %cst_18 : f32 to vector<4x16x1xf32>
    %56 = arith.addf %54, %55 : vector<4x16x1xf32>
    %57 = math.rsqrt %56 : vector<4x16x1xf32>
    %58 = vector.broadcast %57 : vector<4x16x1xf32> to vector<4x16x8xf32>
    %59 = arith.mulf %49, %58 : vector<4x16x8xf32>
    %60 = vector.extract_strided_slice %1 {offsets = [0, 8], sizes = [1, 8], strides = [1, 1]} : vector<1x32xf32> to vector<1x8xf32>
    %61 = vector.shape_cast %60 : vector<1x8xf32> to vector<1x1x8xf32>
    %62 = vector.broadcast %61 : vector<1x1x8xf32> to vector<4x16x8xf32>
    %63 = arith.mulf %59, %62 : vector<4x16x8xf32>
    %64 = arith.mulf %50, %50 : vector<4x16x8xf32>
    %cst_19 = arith.constant dense<0.000000e+00> : vector<4x16xf32>
    %65 = vector.multi_reduction <add>, %64, %cst_19 [2] : vector<4x16x8xf32> to vector<4x16xf32>
    %66 = vector.shape_cast %65 : vector<4x16xf32> to vector<4x16x1xf32>
    %cst_20 = arith.constant 9.99999997E-7 : f32
    %67 = vector.broadcast %cst_20 : f32 to vector<4x16x1xf32>
    %68 = arith.addf %66, %67 : vector<4x16x1xf32>
    %69 = math.rsqrt %68 : vector<4x16x1xf32>
    %70 = vector.broadcast %69 : vector<4x16x1xf32> to vector<4x16x8xf32>
    %71 = arith.mulf %50, %70 : vector<4x16x8xf32>
    %72 = arith.truncf %63 : vector<4x16x8xf32> to vector<4x16x8xbf16>
    %73 = arith.truncf %71 : vector<4x16x8xf32> to vector<4x16x8xbf16>
    "tpu.trace_start"() <{level = 10 : i32, message = "wtd,wsd->wts"}> : () -> ()
    %cst_21 = arith.constant dense<0.000000e+00> : vector<4x16x16xf32>
    %74 = tpu.matmul %72, %73, %cst_21 {dimension_numbers = #tpu.dot_dimension_numbers<[2], [2], [1], [1], [0, 0, 0, 1, 1, 1], [0], [0]>} : vector<4x16x8xbf16>, vector<4x16x8xbf16>, vector<4x16x16xf32> -> vector<4x16x16xf32>
    "tpu.trace_stop"() : () -> ()
    %75 = vector.extract_strided_slice %2 {offsets = [1, 0, 0], sizes = [1, 16, 16], strides = [1, 1, 1]} : vector<4x16x16xf32> to vector<1x16x16xf32>
    %76 = vector.shape_cast %75 : vector<1x16x16xf32> to vector<16x16xf32>
    %77 = vector.shape_cast %76 : vector<16x16xf32> to vector<1x16x16xf32>
    %78 = vector.broadcast %77 : vector<1x16x16xf32> to vector<4x16x16xf32>
    %79 = arith.addf %74, %78 : vector<4x16x16xf32>
    %80 = arith.addf %79, %3 : vector<4x16x16xf32>
    %cst_22 = arith.constant dense<0xFF800000> : vector<4x16xf32>
    %81 = vector.multi_reduction <maximumf>, %80, %cst_22 [2] : vector<4x16x16xf32> to vector<4x16xf32>
    %82 = vector.shape_cast %81 : vector<4x16xf32> to vector<4x16x1xf32>
    %83 = vector.broadcast %82 : vector<4x16x1xf32> to vector<4x16x16xf32>
    %84 = arith.subf %80, %83 : vector<4x16x16xf32>
    %85 = math.exp %84 : vector<4x16x16xf32>
    %cst_23 = arith.constant dense<0.000000e+00> : vector<4x16xf32>
    %86 = vector.multi_reduction <add>, %85, %cst_23 [2] : vector<4x16x16xf32> to vector<4x16xf32>
    %87 = vector.shape_cast %86 : vector<4x16xf32> to vector<4x16x1xf32>
    %88 = tpu.reciprocal %87 {approx = true} : vector<4x16x1xf32> -> vector<4x16x1xf32>
    %89 = vector.broadcast %88 : vector<4x16x1xf32> to vector<4x16x16xf32>
    %90 = arith.mulf %85, %89 : vector<4x16x16xf32>
    %91 = arith.truncf %90 : vector<4x16x16xf32> to vector<4x16x16xbf16>
    %92 = arith.truncf %51 : vector<4x16x8xf32> to vector<4x16x8xbf16>
    "tpu.trace_start"() <{level = 10 : i32, message = "wts,wsd->wtd"}> : () -> ()
    %cst_24 = arith.constant dense<0.000000e+00> : vector<4x16x8xf32>
    %93 = tpu.matmul %91, %92, %cst_24 {dimension_numbers = #tpu.dot_dimension_numbers<[2], [1], [1], [2], [0, 0, 0, 1, 1, 2], [0], [0]>} : vector<4x16x16xbf16>, vector<4x16x8xbf16>, vector<4x16x8xf32> -> vector<4x16x8xf32>
    "tpu.trace_stop"() : () -> ()
    %94 = vector.extract_strided_slice %0 {offsets = [0, 0, 16], sizes = [4, 16, 8], strides = [1, 1, 1]} : vector<4x16x96xf32> to vector<4x16x8xf32>
    %95 = vector.extract_strided_slice %0 {offsets = [0, 0, 48], sizes = [4, 16, 8], strides = [1, 1, 1]} : vector<4x16x96xf32> to vector<4x16x8xf32>
    %96 = vector.extract_strided_slice %0 {offsets = [0, 0, 80], sizes = [4, 16, 8], strides = [1, 1, 1]} : vector<4x16x96xf32> to vector<4x16x8xf32>
    %97 = arith.mulf %94, %94 : vector<4x16x8xf32>
    %cst_25 = arith.constant dense<0.000000e+00> : vector<4x16xf32>
    %98 = vector.multi_reduction <add>, %97, %cst_25 [2] : vector<4x16x8xf32> to vector<4x16xf32>
    %99 = vector.shape_cast %98 : vector<4x16xf32> to vector<4x16x1xf32>
    %cst_26 = arith.constant 9.99999997E-7 : f32
    %100 = vector.broadcast %cst_26 : f32 to vector<4x16x1xf32>
    %101 = arith.addf %99, %100 : vector<4x16x1xf32>
    %102 = math.rsqrt %101 : vector<4x16x1xf32>
    %103 = vector.broadcast %102 : vector<4x16x1xf32> to vector<4x16x8xf32>
    %104 = arith.mulf %94, %103 : vector<4x16x8xf32>
    %105 = vector.extract_strided_slice %1 {offsets = [0, 16], sizes = [1, 8], strides = [1, 1]} : vector<1x32xf32> to vector<1x8xf32>
    %106 = vector.shape_cast %105 : vector<1x8xf32> to vector<1x1x8xf32>
    %107 = vector.broadcast %106 : vector<1x1x8xf32> to vector<4x16x8xf32>
    %108 = arith.mulf %104, %107 : vector<4x16x8xf32>
    %109 = arith.mulf %95, %95 : vector<4x16x8xf32>
    %cst_27 = arith.constant dense<0.000000e+00> : vector<4x16xf32>
    %110 = vector.multi_reduction <add>, %109, %cst_27 [2] : vector<4x16x8xf32> to vector<4x16xf32>
    %111 = vector.shape_cast %110 : vector<4x16xf32> to vector<4x16x1xf32>
    %cst_28 = arith.constant 9.99999997E-7 : f32
    %112 = vector.broadcast %cst_28 : f32 to vector<4x16x1xf32>
    %113 = arith.addf %111, %112 : vector<4x16x1xf32>
    %114 = math.rsqrt %113 : vector<4x16x1xf32>
    %115 = vector.broadcast %114 : vector<4x16x1xf32> to vector<4x16x8xf32>
    %116 = arith.mulf %95, %115 : vector<4x16x8xf32>
    %117 = arith.truncf %108 : vector<4x16x8xf32> to vector<4x16x8xbf16>
    %118 = arith.truncf %116 : vector<4x16x8xf32> to vector<4x16x8xbf16>
    "tpu.trace_start"() <{level = 10 : i32, message = "wtd,wsd->wts"}> : () -> ()
    %cst_29 = arith.constant dense<0.000000e+00> : vector<4x16x16xf32>
    %119 = tpu.matmul %117, %118, %cst_29 {dimension_numbers = #tpu.dot_dimension_numbers<[2], [2], [1], [1], [0, 0, 0, 1, 1, 1], [0], [0]>} : vector<4x16x8xbf16>, vector<4x16x8xbf16>, vector<4x16x16xf32> -> vector<4x16x16xf32>
    "tpu.trace_stop"() : () -> ()
    %120 = vector.extract_strided_slice %2 {offsets = [2, 0, 0], sizes = [1, 16, 16], strides = [1, 1, 1]} : vector<4x16x16xf32> to vector<1x16x16xf32>
    %121 = vector.shape_cast %120 : vector<1x16x16xf32> to vector<16x16xf32>
    %122 = vector.shape_cast %121 : vector<16x16xf32> to vector<1x16x16xf32>
    %123 = vector.broadcast %122 : vector<1x16x16xf32> to vector<4x16x16xf32>
    %124 = arith.addf %119, %123 : vector<4x16x16xf32>
    %125 = arith.addf %124, %3 : vector<4x16x16xf32>
    %cst_30 = arith.constant dense<0xFF800000> : vector<4x16xf32>
    %126 = vector.multi_reduction <maximumf>, %125, %cst_30 [2] : vector<4x16x16xf32> to vector<4x16xf32>
    %127 = vector.shape_cast %126 : vector<4x16xf32> to vector<4x16x1xf32>
    %128 = vector.broadcast %127 : vector<4x16x1xf32> to vector<4x16x16xf32>
    %129 = arith.subf %125, %128 : vector<4x16x16xf32>
    %130 = math.exp %129 : vector<4x16x16xf32>
    %cst_31 = arith.constant dense<0.000000e+00> : vector<4x16xf32>
    %131 = vector.multi_reduction <add>, %130, %cst_31 [2] : vector<4x16x16xf32> to vector<4x16xf32>
    %132 = vector.shape_cast %131 : vector<4x16xf32> to vector<4x16x1xf32>
    %133 = tpu.reciprocal %132 {approx = true} : vector<4x16x1xf32> -> vector<4x16x1xf32>
    %134 = vector.broadcast %133 : vector<4x16x1xf32> to vector<4x16x16xf32>
    %135 = arith.mulf %130, %134 : vector<4x16x16xf32>
    %136 = arith.truncf %135 : vector<4x16x16xf32> to vector<4x16x16xbf16>
    %137 = arith.truncf %96 : vector<4x16x8xf32> to vector<4x16x8xbf16>
    "tpu.trace_start"() <{level = 10 : i32, message = "wts,wsd->wtd"}> : () -> ()
    %cst_32 = arith.constant dense<0.000000e+00> : vector<4x16x8xf32>
    %138 = tpu.matmul %136, %137, %cst_32 {dimension_numbers = #tpu.dot_dimension_numbers<[2], [1], [1], [2], [0, 0, 0, 1, 1, 2], [0], [0]>} : vector<4x16x16xbf16>, vector<4x16x8xbf16>, vector<4x16x8xf32> -> vector<4x16x8xf32>
    "tpu.trace_stop"() : () -> ()
    %139 = vector.extract_strided_slice %0 {offsets = [0, 0, 24], sizes = [4, 16, 8], strides = [1, 1, 1]} : vector<4x16x96xf32> to vector<4x16x8xf32>
    %140 = vector.extract_strided_slice %0 {offsets = [0, 0, 56], sizes = [4, 16, 8], strides = [1, 1, 1]} : vector<4x16x96xf32> to vector<4x16x8xf32>
    %141 = vector.extract_strided_slice %0 {offsets = [0, 0, 88], sizes = [4, 16, 8], strides = [1, 1, 1]} : vector<4x16x96xf32> to vector<4x16x8xf32>
    %142 = arith.mulf %139, %139 : vector<4x16x8xf32>
    %cst_33 = arith.constant dense<0.000000e+00> : vector<4x16xf32>
    %143 = vector.multi_reduction <add>, %142, %cst_33 [2] : vector<4x16x8xf32> to vector<4x16xf32>
    %144 = vector.shape_cast %143 : vector<4x16xf32> to vector<4x16x1xf32>
    %cst_34 = arith.constant 9.99999997E-7 : f32
    %145 = vector.broadcast %cst_34 : f32 to vector<4x16x1xf32>
    %146 = arith.addf %144, %145 : vector<4x16x1xf32>
    %147 = math.rsqrt %146 : vector<4x16x1xf32>
    %148 = vector.broadcast %147 : vector<4x16x1xf32> to vector<4x16x8xf32>
    %149 = arith.mulf %139, %148 : vector<4x16x8xf32>
    %150 = vector.extract_strided_slice %1 {offsets = [0, 24], sizes = [1, 8], strides = [1, 1]} : vector<1x32xf32> to vector<1x8xf32>
    %151 = vector.shape_cast %150 : vector<1x8xf32> to vector<1x1x8xf32>
    %152 = vector.broadcast %151 : vector<1x1x8xf32> to vector<4x16x8xf32>
    %153 = arith.mulf %149, %152 : vector<4x16x8xf32>
    %154 = arith.mulf %140, %140 : vector<4x16x8xf32>
    %cst_35 = arith.constant dense<0.000000e+00> : vector<4x16xf32>
    %155 = vector.multi_reduction <add>, %154, %cst_35 [2] : vector<4x16x8xf32> to vector<4x16xf32>
    %156 = vector.shape_cast %155 : vector<4x16xf32> to vector<4x16x1xf32>
    %cst_36 = arith.constant 9.99999997E-7 : f32
    %157 = vector.broadcast %cst_36 : f32 to vector<4x16x1xf32>
    %158 = arith.addf %156, %157 : vector<4x16x1xf32>
    %159 = math.rsqrt %158 : vector<4x16x1xf32>
    %160 = vector.broadcast %159 : vector<4x16x1xf32> to vector<4x16x8xf32>
    %161 = arith.mulf %140, %160 : vector<4x16x8xf32>
    %162 = arith.truncf %153 : vector<4x16x8xf32> to vector<4x16x8xbf16>
    %163 = arith.truncf %161 : vector<4x16x8xf32> to vector<4x16x8xbf16>
    "tpu.trace_start"() <{level = 10 : i32, message = "wtd,wsd->wts"}> : () -> ()
    %cst_37 = arith.constant dense<0.000000e+00> : vector<4x16x16xf32>
    %164 = tpu.matmul %162, %163, %cst_37 {dimension_numbers = #tpu.dot_dimension_numbers<[2], [2], [1], [1], [0, 0, 0, 1, 1, 1], [0], [0]>} : vector<4x16x8xbf16>, vector<4x16x8xbf16>, vector<4x16x16xf32> -> vector<4x16x16xf32>
    "tpu.trace_stop"() : () -> ()
    %165 = vector.extract_strided_slice %2 {offsets = [3, 0, 0], sizes = [1, 16, 16], strides = [1, 1, 1]} : vector<4x16x16xf32> to vector<1x16x16xf32>
    %166 = vector.shape_cast %165 : vector<1x16x16xf32> to vector<16x16xf32>
    %167 = vector.shape_cast %166 : vector<16x16xf32> to vector<1x16x16xf32>
    %168 = vector.broadcast %167 : vector<1x16x16xf32> to vector<4x16x16xf32>
    %169 = arith.addf %164, %168 : vector<4x16x16xf32>
    %170 = arith.addf %169, %3 : vector<4x16x16xf32>
    %cst_38 = arith.constant dense<0xFF800000> : vector<4x16xf32>
    %171 = vector.multi_reduction <maximumf>, %170, %cst_38 [2] : vector<4x16x16xf32> to vector<4x16xf32>
    %172 = vector.shape_cast %171 : vector<4x16xf32> to vector<4x16x1xf32>
    %173 = vector.broadcast %172 : vector<4x16x1xf32> to vector<4x16x16xf32>
    %174 = arith.subf %170, %173 : vector<4x16x16xf32>
    %175 = math.exp %174 : vector<4x16x16xf32>
    %cst_39 = arith.constant dense<0.000000e+00> : vector<4x16xf32>
    %176 = vector.multi_reduction <add>, %175, %cst_39 [2] : vector<4x16x16xf32> to vector<4x16xf32>
    %177 = vector.shape_cast %176 : vector<4x16xf32> to vector<4x16x1xf32>
    %178 = tpu.reciprocal %177 {approx = true} : vector<4x16x1xf32> -> vector<4x16x1xf32>
    %179 = vector.broadcast %178 : vector<4x16x1xf32> to vector<4x16x16xf32>
    %180 = arith.mulf %175, %179 : vector<4x16x16xf32>
    %181 = arith.truncf %180 : vector<4x16x16xf32> to vector<4x16x16xbf16>
    %182 = arith.truncf %141 : vector<4x16x8xf32> to vector<4x16x8xbf16>
    "tpu.trace_start"() <{level = 10 : i32, message = "wts,wsd->wtd"}> : () -> ()
    %cst_40 = arith.constant dense<0.000000e+00> : vector<4x16x8xf32>
    %183 = tpu.matmul %181, %182, %cst_40 {dimension_numbers = #tpu.dot_dimension_numbers<[2], [1], [1], [2], [0, 0, 0, 1, 1, 2], [0], [0]>} : vector<4x16x16xbf16>, vector<4x16x8xbf16>, vector<4x16x8xf32> -> vector<4x16x8xf32>
    "tpu.trace_stop"() : () -> ()
    %184 = tpu.concatenate %48, %93, %138, %183 in 2 : vector<4x16x8xf32>, vector<4x16x8xf32>, vector<4x16x8xf32>, vector<4x16x8xf32> -> vector<4x16x32xf32>
    %c0_41 = arith.constant 0 : index
    %c0_42 = arith.constant 0 : index
    %c0_43 = arith.constant 0 : index
    %185 = vector.load %arg5[%c0_41, %c0_42, %c0_43] : memref<4x16x32xf32, #tpu.memory_space<vmem>>, vector<4x16x32xf32>
    tpu.vector_store %arg5[%c0_41, %c0_42, %c0_43], %184 {strides = array<i32>} : memref<4x16x32xf32, #tpu.memory_space<vmem>>, vector<4x16x32xf32>,
    return
  }
  func.func @transform_0(%arg0: i32) -> (i32, i32, i32) {
    %c0_i32 = arith.constant 0 : i32
    %c0_i32_0 = arith.constant 0 : i32
    %c0_i32_1 = arith.constant 0 : i32
    return %arg0, %c0_i32, %c0_i32_0 : i32, i32, i32
  }
  func.func @transform_1(%arg0: i32) -> (i32, i32) {
    %c0_i32 = arith.constant 0 : i32
    %c0_i32_0 = arith.constant 0 : i32
    %c0_i32_1 = arith.constant 0 : i32
    return %c0_i32, %c0_i32_0 : i32, i32
  }
  func.func @transform_2(%arg0: i32) -> (i32, i32, i32) {
    %c0_i32 = arith.constant 0 : i32
    %c0_i32_0 = arith.constant 0 : i32
    %c0_i32_1 = arith.constant 0 : i32
    %c0_i32_2 = arith.constant 0 : i32
    return %c0_i32, %c0_i32_0, %c0_i32_1 : i32, i32, i32
  }
  func.func @transform_3(%arg0: i32) -> (i32, i32, i32) {
    %c0_i32 = arith.constant 0 : i32
    %c0_i32_0 = arith.constant 0 : i32
    %c0_i32_1 = arith.constant 0 : i32
    %c0_i32_2 = arith.constant 0 : i32
    return %c0_i32, %c0_i32_0, %c0_i32_1 : i32, i32, i32
  }
  func.func @transform_4(%arg0: i32) -> (i32, i32, i32) {
    %c0_i32 = arith.constant 0 : i32
    %c0_i32_0 = arith.constant 0 : i32
    %c0_i32_1 = arith.constant 0 : i32
    return %arg0, %c0_i32, %c0_i32_0 : i32, i32, i32
  }
}

</mosaic_0001>

<bundles_post_ra>
// kernel: swin_connect_decoder_forward.11
= control target key start
LH: loop header
LB: loop body
LE: loop exit
PB: predicated region body
PF: predicated region fallthrough
CT: control target
= control target key end

     0   :  { %vm78_vm0 = vcmask 523264   ;;  %vm200_vm1 = vcmask 261120   ;;  %s437_s1 = inlined_call_operand.vmem [shape: bf16[64,32], index: 1, kind: input, shape index: {}]   ;;  %s438_s0 = inlined_call_operand.vmem [shape: f32[128,64], index: 0, kind: input, shape index: {}]   ;;  %s439_s2 = inlined_call_operand.vmem [shape: f32[1,32], index: 2, kind: input, shape index: {}]   ;;  %s440_s3 = inlined_call_operand.vmem [shape: f32[128,32], index: 3, kind: output, shape index: {}]  }
   0x1   :  { %v278_v0 = vld [vmem:[%s437_s1] sm:$0xff]   ;;  %v279_v1 = vld [vmem:[%s437_s1 + $0x8] sm:$0xff]   ;;  %v280_v2 = vld [vmem:[%s437_s1 + $0x10] sm:$0xff]  }
   0x2   :  { %246 = vmatprep.subr.bf16.mxu0 %v278_v0  ;;  %270 = vmatprep.subr.bf16.mxu1 %v278_v0  ;;  %v15_v3 = vld [vmem:[%s438_s0] sm:$0xff]  ;;  %v16_v4 = vld [vmem:[%s438_s0 + $0x8] sm:$0xff]  ;;  %v281_v9 = vld [vmem:[%s437_s1 + $0x18] sm:$0xff]  }
   0x3   :  { %247 = vmatpush3.bf16.msra.mxu0 %v278_v0  ;;  %274 = vmatpush3.bf16.msra.mxu1 %v278_v0  ;;  %v23_v5 = vld [vmem:[%s438_s0 + $0x40] sm:$0xff]  ;;  %v31_v6 = vpack.c.bf16 %v16_v4, %v15_v3  ;;  %v24_v7 = vld [vmem:[%s438_s0 + $0x48] sm:$0xff]  ;;  %v17_v10 = vld [vmem:[%s438_s0 + $0x10] sm:$0xff] }
   0x4   :  { %248 = vmatprep.subr.bf16.mxu0 %v279_v1  ;;  %271 = vmatprep.subr.bf16.mxu1 %v279_v1  ;;  %v35_v8 = vpack.c.bf16 %v24_v7, %v23_v5  ;;  %v18_v11 = vld [vmem:[%s438_s0 + $0x18] sm:$0xff]  ;;  %v25_v12 = vld [vmem:[%s438_s0 + $0x50] sm:$0xff]  ;;  %v19_v14 = vld [vmem:[%s438_s0 + $0x20] sm:$0xff] }
   0x5   :  { %254 = vmatprep.mubr.msk.bf16.mxu0 %vm78_vm0, %v31_v6  ;;  %v26_v13 = vld [vmem:[%s438_s0 + $0x58] sm:$0xff]  ;;  %v20_v15 = vld [vmem:[%s438_s0 + $0x28] sm:$0xff]  ;;  %v27_v16 = vld [vmem:[%s438_s0 + $0x60] sm:$0xff]  ;;  %v32_v18 = vpack.c.bf16 %v18_v11, %v17_v10 }
   0x6   :  { %262 = vmatprep.mubr.msk.bf16.mxu1 %vm78_vm0, %v35_v8  ;;  %v28_v17 = vld [vmem:[%s438_s0 + $0x68] sm:$0xff]  ;;  %v36_v19 = vpack.c.bf16 %v26_v13, %v25_v12  ;;  %v33_v20 = vpack.c.bf16 %v20_v15, %v19_v14  ;;  %v21_v22 = vld [vmem:[%s438_s0 + $0x30] sm:$0xff]  ;;  %v22_v23 = vld [vmem:[%s438_s0 + $0x38] sm:$0xff] }
   0x7   :  { %249 = vmatpush3.bf16.msra.mxu0 %v279_v1  ;;  %275 = vmatpush3.bf16.msra.mxu1 %v279_v1  ;;  %v37_v21 = vpack.c.bf16 %v28_v17, %v27_v16  ;;  %v29_v24 = vld [vmem:[%s438_s0 + $0x70] sm:$0xff]  ;;  %v30_v25 = vld [vmem:[%s438_s0 + $0x78] sm:$0xff]  ;;  %v34_v26 = vpack.c.bf16 %v22_v23, %v21_v22  ;;  %v221_v28 = vld [vmem:[%s439_s2] ss:$0 sm:$0xff] }
   0x8   :  { %250 = vmatprep.subr.bf16.mxu0 %v280_v2  ;;  %272 = vmatprep.subr.bf16.mxu1 %v280_v2  ;;  %v38_v27 = vpack.c.bf16 %v30_v25, %v29_v24 }
   0xb   :  { %251 = vmatpush3.bf16.msra.mxu0 %v280_v2  ;;  %276 = vmatpush3.bf16.msra.mxu1 %v280_v2 }
   0xc   :  { %252 = vmatprep.subr.bf16.mxu0 %v281_v9  ;;  %273 = vmatprep.subr.bf16.mxu1 %v281_v9 }
   0xf   :  { %253 = vmatpush3.bf16.msra.mxu0 %v281_v9  ;;  %277 = vmatpush3.bf16.msra.mxu1 %v281_v9 }
  0x12   :  { %255 = vmatmul.mubr.msk.bf16.vlgmr.msra.gmra.mrb[0].mxu0 %vm78_vm0, %v32_v18  ;;  %263 = vmatmul.mubr.msk.bf16.vlgmr.msra.gmra.mrb[0].mxu1 %vm78_vm0, %v36_v19 }
  0x13   :  { %258 = vmatprep.mubr.msk.bf16.mxu0 %vm78_vm0, %v33_v20  ;;  %266 = vmatprep.mubr.msk.bf16.mxu1 %vm78_vm0, %v37_v21 }
  0x1a   :  { %259 = vmatmul.mubr.msk.bf16.gmra.mrb[4].mxu0 %vm78_vm0, %v34_v26  ;;  %267 = vmatmul.mubr.msk.bf16.gmra.mrb[4].mxu1 %vm78_vm0, %v38_v27 }
  0xe5   :  { %v256_v29 = vpop.f32.mrb[0].mxu0  ;;  %v264_v30 = vpop.f32.mrb[0].mxu1 }
  0xe6   :  { %v146_v31 = vadd.f32 %v256_v29, %v221_v28  ;;  %v178_v32 = vadd.f32 %v264_v30, %v221_v28  ;;  %v137_v33 = vpop.f32.mrb[1].mxu0  ;;  %v169_v34 = vpop.f32.mrb[1].mxu1 }
  0xe7   :  { %v138_v35 = vadd.f32 %v221_v28, %v137_v33  ;;  %v170_v36 = vadd.f32 %v221_v28, %v169_v34  ;;  %v257_v37 = vpop.f32.mrb[2].mxu0  ;;  %v265_v38 = vpop.f32.mrb[2].mxu1 }
  0xe8   :  { %203 = vst.msk [vmem:[%s440_s3 + $0x10] sm:$0xff] %vm200_vm1, %v146_v31  ;;  %211 = vst.msk [vmem:[%s440_s3 + $0x50] sm:$0xff] %vm200_vm1, %v178_v32  ;;  %v149_v39 = vadd.f32 %v257_v37, %v221_v28  ;;  %v181_v40 = vadd.f32 %v265_v38, %v221_v28  ;;  %v140_v41 = vpop.f32.mrb[3].mxu0  ;;  %v172_v42 = vpop.f32.mrb[3].mxu1 }
  0xe9   :  { %201 = vst.msk [vmem:[%s440_s3] sm:$0xff] %vm200_vm1, %v138_v35  ;;  %209 = vst.msk [vmem:[%s440_s3 + $0x40] sm:$0xff] %vm200_vm1, %v170_v36  ;;  %v141_v43 = vadd.f32 %v221_v28, %v140_v41  ;;  %v173_v44 = vadd.f32 %v221_v28, %v172_v42 }
  0xea   :  { %204 = vst.msk [vmem:[%s440_s3 + $0x18] sm:$0xff] %vm200_vm1, %v149_v39  ;;  %212 = vst.msk [vmem:[%s440_s3 + $0x58] sm:$0xff] %vm200_vm1, %v181_v40 }
  0xeb   :  { %202 = vst.msk [vmem:[%s440_s3 + $0x8] sm:$0xff] %vm200_vm1, %v141_v43  ;;  %210 = vst.msk [vmem:[%s440_s3 + $0x48] sm:$0xff] %vm200_vm1, %v173_v44 }
  0xed   :  { %v260_v45 = vpop.f32.mrb[4].mxu0  ;;  %v268_v46 = vpop.f32.mrb[4].mxu1 }
  0xee   :  { %v162_v47 = vadd.f32 %v260_v45, %v221_v28  ;;  %v194_v48 = vadd.f32 %v268_v46, %v221_v28  ;;  %v153_v49 = vpop.f32.mrb[5].mxu0  ;;  %v185_v50 = vpop.f32.mrb[5].mxu1 }
  0xef   :  { %v154_v51 = vadd.f32 %v221_v28, %v153_v49  ;;  %v186_v52 = vadd.f32 %v221_v28, %v185_v50  ;;  %v261_v53 = vpop.f32.mrb[6].mxu0  ;;  %v269_v54 = vpop.f32.mrb[6].mxu1 }
  0xf0   :  { %207 = vst.msk [vmem:[%s440_s3 + $0x30] sm:$0xff] %vm200_vm1, %v162_v47  ;;  %215 = vst.msk [vmem:[%s440_s3 + $0x70] sm:$0xff] %vm200_vm1, %v194_v48  ;;  %v165_v55 = vadd.f32 %v261_v53, %v221_v28  ;;  %v197_v56 = vadd.f32 %v269_v54, %v221_v28  ;;  %v156_v57 = vpop.f32.mrb[7].mxu0  ;;  %v188_v58 = vpop.f32.mrb[7].mxu1 }
  0xf1   :  { %205 = vst.msk [vmem:[%s440_s3 + $0x20] sm:$0xff] %vm200_vm1, %v154_v51  ;;  %213 = vst.msk [vmem:[%s440_s3 + $0x60] sm:$0xff] %vm200_vm1, %v186_v52  ;;  %v157_v59 = vadd.f32 %v221_v28, %v156_v57  ;;  %v189_v60 = vadd.f32 %v221_v28, %v188_v58 }
  0xf2   :  { %208 = vst.msk [vmem:[%s440_s3 + $0x38] sm:$0xff] %vm200_vm1, %v165_v55  ;;  %216 = vst.msk [vmem:[%s440_s3 + $0x78] sm:$0xff] %vm200_vm1, %v197_v56 }
  0xf3   :  { %206 = vst.msk [vmem:[%s440_s3 + $0x28] sm:$0xff] %vm200_vm1, %v157_v59  ;;  %214 = vst.msk [vmem:[%s440_s3 + $0x68] sm:$0xff] %vm200_vm1, %v189_v60 }

// kernel: swin_connect_decoder_forward.14
= control target key start
LH: loop header
LB: loop body
LE: loop exit
PB: predicated region body
PF: predicated region fallthrough
CT: control target
= control target key end

     0   :  { %vm71_vm0 = vcmask 261120   ;;  %s1011_s1 = inlined_call_operand.vmem [shape: bf16[32,32], index: 1, kind: input, shape index: {}]   ;;  %s1012_s0 = inlined_call_operand.vmem [shape: f32[128,32], index: 0, kind: input, shape index: {}]   ;;  %s1013_s2 = inlined_call_operand.vmem [shape: f32[1,32], index: 2, kind: input, shape index: {}]   ;;  %s1014_s4 = inlined_call_operand.vmem [shape: f32[1,32], index: 4, kind: input, shape index: {}]   ;;  %s1015_s3 = inlined_call_operand.vmem [shape: f32[128,32], index: 3, kind: input, shape index: {}]   ;;  %s1016_s5 = inlined_call_operand.vmem [shape: f32[1,32], index: 5, kind: input, shape index: {}]   ;;  %s1017_s6 = inlined_call_operand.vmem [shape: f32[128,32], index: 6, kind: output, shape index: {}]  }
   0x1   :  { %v547_v0 = vld [vmem:[%s1011_s1] sm:$0xff]   ;;  %v548_v1 = vld [vmem:[%s1011_s1 + $0x8] sm:$0xff]   ;;  %v26_v7 = vld [vmem:[%s1012_s0 + $0x10] sm:$0xff] }
   0x2   :  { %523 = vmatprep.subr.bf16.mxu0 %v547_v0  ;;  %543 = vmatprep.subr.bf16.mxu1 %v547_v0  ;;  %v24_v2 = vld [vmem:[%s1012_s0] sm:$0xff]  ;;  %v25_v3 = vld [vmem:[%s1012_s0 + $0x8] sm:$0xff]  ;;  %v27_v8 = vld [vmem:[%s1012_s0 + $0x18] sm:$0xff] }
   0x3   :  { %v32_v4 = vld [vmem:[%s1012_s0 + $0x40] sm:$0xff]  ;;  %524 = vmatpush3.bf16.msra.mxu0 %v547_v0  ;;  %545 = vmatpush3.bf16.msra.mxu1 %v547_v0  ;;  %v40_v5 = vpack.c.bf16 %v25_v3, %v24_v2  ;;  %v33_v6 = vld [vmem:[%s1012_s0 + $0x48] sm:$0xff]  ;;  %v34_v10 = vld [vmem:[%s1012_s0 + $0x50] sm:$0xff]  ;;  %v41_v14 = vpack.c.bf16 %v27_v8, %v26_v7 }
   0x4   :  { %525 = vmatprep.subr.bf16.mxu0 %v548_v1  ;;  %544 = vmatprep.subr.bf16.mxu1 %v548_v1  ;;  %v44_v9 = vpack.c.bf16 %v33_v6, %v32_v4  ;;  %v35_v11 = vld [vmem:[%s1012_s0 + $0x58] sm:$0xff]  ;;  %v28_v12 = vld [vmem:[%s1012_s0 + $0x20] sm:$0xff]  ;;  %v29_v13 = vld [vmem:[%s1012_s0 + $0x28] sm:$0xff] }
   0x5   :  { %527 = vmatprep.mubr.msk.bf16.mxu0 %vm71_vm0, %v40_v5  ;;  %v45_v15 = vpack.c.bf16 %v35_v11, %v34_v10  ;;  %v36_v16 = vld [vmem:[%s1012_s0 + $0x60] sm:$0xff]  ;;  %v37_v17 = vld [vmem:[%s1012_s0 + $0x68] sm:$0xff]  ;;  %v42_v18 = vpack.c.bf16 %v29_v13, %v28_v12  ;;  %v30_v20 = vld [vmem:[%s1012_s0 + $0x30] sm:$0xff] }
   0x6   :  { %535 = vmatprep.mubr.msk.bf16.mxu1 %vm71_vm0, %v44_v9  ;;  %v46_v19 = vpack.c.bf16 %v37_v17, %v36_v16  ;;  %v31_v21 = vld [vmem:[%s1012_s0 + $0x38] sm:$0xff]  ;;  %v38_v22 = vld [vmem:[%s1012_s0 + $0x70] sm:$0xff]  ;;  %v500_v26 = vld [vmem:[%s1013_s2] ss:$0 sm:$0xff] }
   0x7   :  { %526 = vmatpush3.bf16.msra.mxu0 %v548_v1  ;;  %546 = vmatpush3.bf16.msra.mxu1 %v548_v1  ;;  %v39_v23 = vld [vmem:[%s1012_s0 + $0x78] sm:$0xff]  ;;  %v43_v24 = vpack.c.bf16 %v31_v21, %v30_v20 }
   0x8   :  { %v47_v25 = vpack.c.bf16 %v39_v23, %v38_v22 }
   0xa   :  { %528 = vmatmul.mubr.msk.bf16.vlgmr.msra.gmra.mrb[0].mxu0 %vm71_vm0, %v41_v14  ;;  %536 = vmatmul.mubr.msk.bf16.vlgmr.msra.gmra.mrb[0].mxu1 %vm71_vm0, %v45_v15 }
   0xb   :  { %531 = vmatprep.mubr.msk.bf16.mxu0 %vm71_vm0, %v42_v18  ;;  %539 = vmatprep.mubr.msk.bf16.mxu1 %vm71_vm0, %v46_v19 }
  0x12   :  { %532 = vmatmul.mubr.msk.bf16.gmra.mrb[4].mxu0 %vm71_vm0, %v43_v24  ;;  %540 = vmatmul.mubr.msk.bf16.gmra.mrb[4].mxu1 %vm71_vm0, %v47_v25 }
  0xdd   :  { %v529_v27 = vpop.f32.mrb[0].mxu0  ;;  %v537_v28 = vpop.f32.mrb[0].mxu1 }
  0xde   :  { %v681_v29 = vadd.f32 %v529_v27, %v500_v26  ;;  %v683_v30 = vadd.f32 %v537_v28, %v500_v26  ;;  %v130_v31 = vpop.f32.mrb[1].mxu0  ;;  %v162_v32 = vpop.f32.mrb[1].mxu1 }
  0xdf   :  { %v530_v33 = vpop.f32.mrb[2].mxu0  ;;  %v538_v34 = vpop.f32.mrb[2].mxu1  ;;  %v685_v35 = vadd.f32 %v500_v26, %v130_v31  ;;  %v693_v41 = vadd.f32 %v500_v26, %v162_v32 }
  0xe0   :  { %v687_v36 = vadd.f32 %v530_v33, %v500_v26  ;;  %v133_v37 = vpop.f32.mrb[3].mxu0  ;;  %v165_v38 = vpop.f32.mrb[3].mxu1  ;;  %v223_v39 = vsel %vm71_vm0, %v683_v30, 0.0  ;;  %v199_v40 = vsel %vm71_vm0, %v681_v29, 0.0  ;;  %v695_v42 = vadd.f32 %v538_v34, %v500_v26 }
  0xe1   :  { %224 = vadd.xlane.f32.xlu0 %v223_v39  ;;  %200 = vadd.xlane.f32.xlu1 %v199_v40  ;;  %v193_v44 = vsel %vm71_vm0, %v685_v35, 0.0  ;;  %v701_v51 = vadd.f32 %v500_v26, %v133_v37  ;;  %v703_v52 = vadd.f32 %v500_v26, %v165_v38  ;;  %v217_v54 = vsel %vm71_vm0, %v693_v41, 0.0 }
  0xe2   :  { %v202_v43 = vsel %vm71_vm0, %v687_v36, 0.0  ;;  %v226_v53 = vsel %vm71_vm0, %v695_v42, 0.0 }
  0xe3   :  { %v220_v59 = vsel %vm71_vm0, %v703_v52, 0.0  ;;  %v196_v60 = vsel %vm71_vm0, %v701_v51, 0.0 }
  0xe5   :  { %203 = vadd.xlane.f32.xlu1 %v202_v43  ;;  %194 = vadd.xlane.f32.xlu0 %v193_v44  ;;  %v533_v45 = vpop.f32.mrb[4].mxu0  ;;  %v541_v46 = vpop.f32.mrb[4].mxu1 }
  0xe6   :  { %v146_v47 = vpop.f32.mrb[5].mxu0  ;;  %v178_v48 = vpop.f32.mrb[5].mxu1  ;;  %v709_v57 = vadd.f32 %v533_v45, %v500_v26  ;;  %v737_v7 = vadd.f32 %v541_v46, %v500_v26 }
  0xe7   :  { %v534_v49 = vpop.f32.mrb[6].mxu0  ;;  %v542_v50 = vpop.f32.mrb[6].mxu1  ;;  %v721_v63 = vadd.f32 %v500_v26, %v146_v47  ;;  %v725_v1 = vadd.f32 %v500_v26, %v178_v48 }
  0xe8   :  { %v149_v55 = vpop.f32.mrb[7].mxu0  ;;  %v181_v56 = vpop.f32.mrb[7].mxu1  ;;  %v711_v58 = vadd.f32 %v534_v49, %v500_v26  ;;  %v211_v62 = vsel %vm71_vm0, %v709_v57, 0.0  ;;  %v739_v8 = vadd.f32 %v542_v50, %v500_v26  ;;  %v235_v10 = vsel %vm71_vm0, %v737_v7, 0.0 }
  0xe9   :  { %227 = vadd.xlane.f32.xlu1 %v226_v53  ;;  %218 = vadd.xlane.f32.xlu0 %v217_v54  ;;  %v723_v0 = vadd.f32 %v500_v26, %v149_v55  ;;  %v727_v2 = vadd.f32 %v500_v26, %v181_v56  ;;  %v205_v4 = vsel %vm71_vm0, %v721_v63, 0.0  ;;  %v229_v6 = vsel %vm71_vm0, %v725_v1, 0.0 }
  0xea   :  { %v214_v61 = vsel %vm71_vm0, %v711_v58, 0.0  ;;  %v238_v9 = vsel %vm71_vm0, %v739_v8, 0.0 }
  0xeb   :  { %v208_v3 = vsel %vm71_vm0, %v723_v0, 0.0  ;;  %v232_v5 = vsel %vm71_vm0, %v727_v2, 0.0 }
  0xed   :  { %221 = vadd.xlane.f32.xlu1 %v220_v59  ;;  %197 = vadd.xlane.f32.xlu0 %v196_v60 }
  0xf1   :  { %215 = vadd.xlane.f32.xlu1 %v214_v61  ;;  %212 = vadd.xlane.f32.xlu0 %v211_v62 }
  0xf5   :  { %209 = vadd.xlane.f32.xlu1 %v208_v3  ;;  %206 = vadd.xlane.f32.xlu0 %v205_v4 }
  0xf9   :  { %233 = vadd.xlane.f32.xlu1 %v232_v5  ;;  %230 = vadd.xlane.f32.xlu0 %v229_v6 }
  0xfd   :  { %239 = vadd.xlane.f32.xlu1 %v238_v9  ;;  %236 = vadd.xlane.f32.xlu0 %v235_v10 }
 0x16e   :  { %v225_v11 = vpop.xlane.xlu0 %224  ;;  %v201_v12 = vpop.xlane.xlu1 %200 }
 0x16f   :  { %v252_v13 = vmul.f32 0.03125, %v225_v11  ;;  %v244_v14 = vmul.f32 0.03125, %v201_v12 }
 0x171   :  { %v746_v15 = vsub.f32 %v683_v30, %v252_v13  ;;  %v749_v16 = vsub.f32 %v681_v29, %v244_v14 }
 0x172   :  { %v204_v17 = vpop.xlane.xlu1 %203  ;;  %v195_v18 = vpop.xlane.xlu0 %194 }
 0x173   :  { %v245_v19 = vmul.f32 0.03125, %v204_v17  ;;  %v242_v20 = vmul.f32 0.03125, %v195_v18  ;;  %v276_v21 = vmul.f32 %v749_v16, %v749_v16  ;;  %v284_v25 = vmul.f32 %v746_v15, %v746_v15 }
 0x175   :  { %v754_v22 = vsub.f32 %v687_v36, %v245_v19  ;;  %v757_v23 = vsub.f32 %v685_v35, %v242_v20  ;;  %v296_v24 = vsel %vm71_vm0, %v276_v21, 0.0  ;;  %v320_v35 = vsel %vm71_vm0, %v284_v25, 0.0 }
 0x176   :  { %v228_v26 = vpop.xlane.xlu1 %227  ;;  %297 = vadd.xlane.f32.xlu0 %v296_v24  ;;  %v219_v27 = vpop.xlane.xlu0 %218 }
 0x177   :  { %v253_v28 = vmul.f32 0.03125, %v228_v26  ;;  %v250_v29 = vmul.f32 0.03125, %v219_v27  ;;  %v277_v30 = vmul.f32 %v754_v22, %v754_v22  ;;  %v274_v31 = vmul.f32 %v757_v23, %v757_v23 }
 0x179   :  { %v767_v32 = vsub.f32 %v695_v42, %v253_v28  ;;  %v770_v33 = vsub.f32 %v693_v41, %v250_v29  ;;  %v299_v34 = vsel %vm71_vm0, %v277_v30, 0.0  ;;  %v290_v43 = vsel %vm71_vm0, %v274_v31, 0.0 }
 0x17a   :  { %v222_v36 = vpop.xlane.xlu1 %221  ;;  %300 = vadd.xlane.f32.xlu1 %v299_v34  ;;  %321 = vadd.xlane.f32.xlu0 %v320_v35  ;;  %v198_v37 = vpop.xlane.xlu0 %197 }
 0x17b   :  { %v251_v38 = vmul.f32 0.03125, %v222_v36  ;;  %v243_v39 = vmul.f32 0.03125, %v198_v37  ;;  %v285_v40 = vmul.f32 %v767_v32, %v767_v32  ;;  %v282_v45 = vmul.f32 %v770_v33, %v770_v33 }
 0x17d   :  { %v778_v42 = vsub.f32 %v703_v52, %v251_v38  ;;  %v781_v41 = vsub.f32 %v701_v51, %v243_v39  ;;  %v323_v44 = vsel %vm71_vm0, %v285_v40, 0.0  ;;  %v314_v54 = vsel %vm71_vm0, %v282_v45, 0.0 }
 0x17e   :  { %v216_v46 = vpop.xlane.xlu1 %215  ;;  %324 = vadd.xlane.f32.xlu1 %v323_v44  ;;  %291 = vadd.xlane.f32.xlu0 %v290_v43  ;;  %v213_v47 = vpop.xlane.xlu0 %212 }
 0x17f   :  { %v249_v48 = vmul.f32 0.03125, %v216_v46  ;;  %v248_v49 = vmul.f32 0.03125, %v213_v47  ;;  %v275_v50 = vmul.f32 %v781_v41, %v781_v41  ;;  %v283_v52 = vmul.f32 %v778_v42, %v778_v42 }
 0x181   :  { %v791_v51 = vsub.f32 %v711_v58, %v249_v48  ;;  %v794_v53 = vsub.f32 %v709_v57, %v248_v49  ;;  %v293_v55 = vsel %vm71_vm0, %v275_v50, 0.0  ;;  %v317_v3 = vsel %vm71_vm0, %v283_v52, 0.0 }
 0x182   :  { %v210_v56 = vpop.xlane.xlu1 %209  ;;  %315 = vadd.xlane.f32.xlu0 %v314_v54  ;;  %294 = vadd.xlane.f32.xlu1 %v293_v55  ;;  %v207_v59 = vpop.xlane.xlu0 %206 }
 0x183   :  { %v247_v60 = vmul.f32 0.03125, %v210_v56  ;;  %v246_v61 = vmul.f32 0.03125, %v207_v59  ;;  %v280_v62 = vmul.f32 %v794_v53, %v794_v53  ;;  %v281_v5 = vmul.f32 %v791_v51, %v791_v51  ;;  %v844_v59 = vld [vmem:[%s1014_s4] ss:$0 sm:$0xff] }
 0x185   :  { %v802_v58 = vsub.f32 %v723_v0, %v247_v60  ;;  %v805_v57 = vsub.f32 %v721_v63, %v246_v61  ;;  %v308_v4 = vsel %vm71_vm0, %v280_v62, 0.0  ;;  %v311_v14 = vsel %vm71_vm0, %v281_v5, 0.0  ;;  %v404_v5 = vld [vmem:[%s1015_s3 + $0x10] sm:$0xff] }
 0x186   :  { %v234_v6 = vpop.xlane.xlu1 %233  ;;  %318 = vadd.xlane.f32.xlu1 %v317_v3  ;;  %309 = vadd.xlane.f32.xlu0 %v308_v4  ;;  %v231_v9 = vpop.xlane.xlu0 %230 }
 0x187   :  { %v255_v10 = vmul.f32 0.03125, %v234_v6  ;;  %v254_v11 = vmul.f32 0.03125, %v231_v9  ;;  %v278_v12 = vmul.f32 %v805_v57, %v805_v57  ;;  %v279_v0 = vmul.f32 %v802_v58, %v802_v58 }
 0x189   :  { %v815_v63 = vsub.f32 %v727_v2, %v255_v10  ;;  %v818_v13 = vsub.f32 %v725_v1, %v254_v11  ;;  %v302_v17 = vsel %vm71_vm0, %v278_v12, 0.0  ;;  %v305_v25 = vsel %vm71_vm0, %v279_v0, 0.0  ;;  %v854_v12 = vld [vmem:[%s1016_s5] ss:$0 sm:$0xff] }
 0x18a   :  { %v240_v18 = vpop.xlane.xlu1 %239  ;;  %312 = vadd.xlane.f32.xlu1 %v311_v14  ;;  %303 = vadd.xlane.f32.xlu0 %v302_v17  ;;  %v237_v19 = vpop.xlane.xlu0 %236 }
 0x18b   :  { %v257_v20 = vmul.f32 0.03125, %v240_v18  ;;  %v256_v21 = vmul.f32 0.03125, %v237_v19  ;;  %v286_v24 = vmul.f32 %v818_v13, %v818_v13  ;;  %v287_v27 = vmul.f32 %v815_v63, %v815_v63 }
 0x18d   :  { %v826_v2 = vsub.f32 %v739_v8, %v257_v20  ;;  %v829_v1 = vsub.f32 %v737_v7, %v256_v21  ;;  %v326_v26 = vsel %vm71_vm0, %v286_v24, 0.0  ;;  %v329_v29 = vsel %vm71_vm0, %v287_v27, 0.0  ;;  %v405_v21 = vld [vmem:[%s1015_s3 + $0x18] sm:$0xff] }
 0x18e   :  { %306 = vadd.xlane.f32.xlu1 %v305_v25  ;;  %327 = vadd.xlane.f32.xlu0 %v326_v26 }
 0x18f   :  { %v288_v28 = vmul.f32 %v829_v1, %v829_v1  ;;  %v289_v8 = vmul.f32 %v826_v2, %v826_v2 }
 0x191   :  { %v332_v30 = vsel %vm71_vm0, %v288_v28, 0.0  ;;  %v335_v7 = vsel %vm71_vm0, %v289_v8, 0.0 }
 0x192   :  { %330 = vadd.xlane.f32.xlu1 %v329_v29  ;;  %333 = vadd.xlane.f32.xlu0 %v332_v30  ;;  %v412_v29 = vld [vmem:[%s1015_s3 + $0x50] sm:$0xff] }
 0x196   :  { %336 = vadd.xlane.f32.xlu1 %v335_v7 }
 0x203   :  { %v298_v31 = vpop.xlane.xlu0 %297 }
 0x204   :  { %v340_v34 = vmul.f32 0.03125, %v298_v31 }
 0x206   :  { %v356_v35 = vadd.f32 1e-05, %v340_v34 }
 0x207   :  { %v301_v36 = vpop.xlane.xlu1 %300  ;;  %v322_v37 = vpop.xlane.xlu0 %321 }
 0x208   :  { %549 = vrsqrt.f32 %v356_v35  ;;  %v341_v38 = vmul.f32 0.03125, %v301_v36  ;;  %v348_v39 = vmul.f32 0.03125, %v322_v37 }
 0x20a   :  { %v357_v40 = vadd.f32 1e-05, %v341_v38  ;;  %v364_v43 = vadd.f32 1e-05, %v348_v39  ;;  %v413_v38 = vld [vmem:[%s1015_s3 + $0x58] sm:$0xff] }
 0x20b   :  { %v325_v44 = vpop.xlane.xlu1 %324  ;;  %v292_v45 = vpop.xlane.xlu0 %291 }
 0x20c   :  { %551 = vrsqrt.f32 %v357_v40  ;;  %v349_v46 = vmul.f32 0.03125, %v325_v44  ;;  %v338_v47 = vmul.f32 0.03125, %v292_v45  ;;  %v402_v45 = vld [vmem:[%s1015_s3] sm:$0xff] }
 0x20d   :  { %553 = vrsqrt.f32 %v364_v43 }
 0x20e   :  { %v365_v48 = vadd.f32 1e-05, %v349_v46  ;;  %v354_v49 = vadd.f32 1e-05, %v338_v47 }
 0x20f   :  { %v295_v50 = vpop.xlane.xlu1 %294  ;;  %v316_v52 = vpop.xlane.xlu0 %315 }
 0x210   :  { %555 = vrsqrt.f32 %v365_v48  ;;  %v339_v54 = vmul.f32 0.03125, %v295_v50  ;;  %v346_v55 = vmul.f32 0.03125, %v316_v52 }
 0x211   :  { %557 = vrsqrt.f32 %v354_v49 }
 0x212   :  { %v550_v56 = vpop.eup %549  ;;  %v355_v60 = vadd.f32 1e-05, %v339_v54  ;;  %v362_v61 = vadd.f32 1e-05, %v346_v55 }
 0x213   :  { %v388_v62 = vmul.f32 %v550_v56, %v749_v16  ;;  %v319_v3 = vpop.xlane.xlu1 %318  ;;  %v310_v4 = vpop.xlane.xlu0 %309 }
 0x214   :  { %559 = vrsqrt.f32 %v355_v60  ;;  %v347_v6 = vmul.f32 0.03125, %v319_v3  ;;  %v344_v9 = vmul.f32 0.03125, %v310_v4 }
 0x215   :  { %v427_v10 = vmul.f32 %v844_v59, %v388_v62  ;;  %561 = vrsqrt.f32 %v362_v61  ;;  %v403_v61 = vld [vmem:[%s1015_s3 + $0x8] sm:$0xff] }
 0x216   :  { %v552_v11 = vpop.eup %551  ;;  %v363_v0 = vadd.f32 1e-05, %v347_v6  ;;  %v360_v16 = vadd.f32 1e-05, %v344_v9 }
 0x217   :  { %v554_v14 = vpop.eup %553  ;;  %v443_v17 = vadd.f32 %v427_v10, %v404_v5  ;;  %v389_v18 = vmul.f32 %v552_v11, %v754_v22  ;;  %v313_v19 = vpop.xlane.xlu1 %312  ;;  %v410_v5 = vld [vmem:[%s1015_s3 + $0x40] sm:$0xff] }
 0x218   :  { %v304_v20 = vpop.xlane.xlu0 %303  ;;  %v396_v24 = vmul.f32 %v554_v14, %v746_v15  ;;  %563 = vrsqrt.f32 %v363_v0  ;;  %v345_v25 = vmul.f32 0.03125, %v313_v19 }
 0x219   :  { %v342_v26 = vmul.f32 0.03125, %v304_v20  ;;  %v466_v27 = vadd.f32 %v854_v12, %v443_v17  ;;  %v428_v28 = vmul.f32 %v844_v59, %v389_v18  ;;  %565 = vrsqrt.f32 %v360_v16  ;;  %v411_v20 = vld [vmem:[%s1015_s3 + $0x48] sm:$0xff] }
 0x21a   :  { %v556_v22 = vpop.eup %555  ;;  %v435_v30 = vmul.f32 %v844_v59, %v396_v24  ;;  %v361_v8 = vadd.f32 1e-05, %v345_v25 }
 0x21b   :  { %v358_v7 = vadd.f32 1e-05, %v342_v26  ;;  %v558_v31 = vpop.eup %557  ;;  %482 = vst.msk [vmem:[%s1017_s6 + $0x10] sm:$0xff] %vm71_vm0, %v466_v27  ;;  %v444_v15 = vadd.f32 %v428_v28, %v405_v21  ;;  %v397_v34 = vmul.f32 %v556_v22, %v767_v32  ;;  %v307_v35 = vpop.xlane.xlu1 %306  ;;  %v408_v26 = vld [vmem:[%s1015_s3 + $0x30] sm:$0xff] }
 0x21c   :  { %v328_v36 = vpop.xlane.xlu0 %327  ;;  %v451_v37 = vadd.f32 %v435_v30, %v412_v29  ;;  %v386_v39 = vmul.f32 %v558_v31, %v757_v23  ;;  %567 = vrsqrt.f32 %v361_v8  ;;  %v343_v40 = vmul.f32 0.03125, %v307_v35  ;;  %v409_v31 = vld [vmem:[%s1015_s3 + $0x38] sm:$0xff] }
 0x21d   :  { %v467_v43 = vadd.f32 %v854_v12, %v444_v15  ;;  %v436_v44 = vmul.f32 %v844_v59, %v397_v34  ;;  %569 = vrsqrt.f32 %v358_v7  ;;  %v350_v32 = vmul.f32 0.03125, %v328_v36 }
 0x21e   :  { %v560_v46 = vpop.eup %559  ;;  %v474_v47 = vadd.f32 %v854_v12, %v451_v37  ;;  %v425_v48 = vmul.f32 %v844_v59, %v386_v39  ;;  %v359_v49 = vadd.f32 1e-05, %v343_v40 }
 0x21f   :  { %v562_v50 = vpop.eup %561  ;;  %483 = vst.msk [vmem:[%s1017_s6 + $0x18] sm:$0xff] %vm71_vm0, %v467_v43  ;;  %v452_v23 = vadd.f32 %v436_v44, %v413_v38  ;;  %v387_v52 = vmul.f32 %v560_v46, %v781_v41  ;;  %v366_v54 = vadd.f32 1e-05, %v350_v32  ;;  %v331_v55 = vpop.xlane.xlu1 %330  ;;  %v407_v44 = vld [vmem:[%s1015_s3 + $0x28] sm:$0xff] }
 0x220   :  { %v334_v56 = vpop.xlane.xlu0 %333  ;;  %490 = vst.msk [vmem:[%s1017_s6 + $0x50] sm:$0xff] %vm71_vm0, %v474_v47  ;;  %v441_v60 = vadd.f32 %v425_v48, %v402_v45  ;;  %v394_v62 = vmul.f32 %v562_v50, %v770_v33  ;;  %571 = vrsqrt.f32 %v359_v49  ;;  %v351_v3 = vmul.f32 0.03125, %v331_v55 }
 0x221   :  { %v475_v4 = vadd.f32 %v854_v12, %v452_v23  ;;  %v426_v41 = vmul.f32 %v844_v59, %v387_v52  ;;  %573 = vrsqrt.f32 %v366_v54  ;;  %v352_v6 = vmul.f32 0.03125, %v334_v56  ;;  %v415_v54 = vld [vmem:[%s1015_s3 + $0x68] sm:$0xff] }
 0x222   :  { %v564_v9 = vpop.eup %563  ;;  %v464_v10 = vadd.f32 %v854_v12, %v441_v60  ;;  %v433_v11 = vmul.f32 %v844_v59, %v394_v62  ;;  %v367_v0 = vadd.f32 1e-05, %v351_v3 }
 0x223   :  { %v566_v16 = vpop.eup %565  ;;  %491 = vst.msk [vmem:[%s1017_s6 + $0x58] sm:$0xff] %vm71_vm0, %v475_v4  ;;  %v442_v33 = vadd.f32 %v426_v41, %v403_v61  ;;  %v395_v14 = vmul.f32 %v564_v9, %v778_v42  ;;  %v368_v17 = vadd.f32 1e-05, %v352_v6  ;;  %v337_v18 = vpop.xlane.xlu1 %336 }
 0x224   :  { %480 = vst.msk [vmem:[%s1017_s6] sm:$0xff] %vm71_vm0, %v464_v10  ;;  %v449_v19 = vadd.f32 %v433_v11, %v410_v5  ;;  %v392_v21 = vmul.f32 %v566_v16, %v794_v53  ;;  %575 = vrsqrt.f32 %v367_v0  ;;  %v353_v24 = vmul.f32 0.03125, %v337_v18  ;;  %v417_v5 = vld [vmem:[%s1015_s3 + $0x78] sm:$0xff] }
 0x225   :  { %v465_v25 = vadd.f32 %v854_v12, %v442_v33  ;;  %v434_v42 = vmul.f32 %v844_v59, %v395_v14  ;;  %577 = vrsqrt.f32 %v368_v17 }
 0x226   :  { %v568_v27 = vpop.eup %567  ;;  %v472_v28 = vadd.f32 %v854_v12, %v449_v19  ;;  %v431_v29 = vmul.f32 %v844_v59, %v392_v21  ;;  %v369_v22 = vadd.f32 1e-05, %v353_v24 }
 0x227   :  { %v570_v30 = vpop.eup %569  ;;  %481 = vst.msk [vmem:[%s1017_s6 + $0x8] sm:$0xff] %vm71_vm0, %v465_v25  ;;  %v450_v53 = vadd.f32 %v434_v42, %v411_v20  ;;  %v393_v8 = vmul.f32 %v568_v27, %v791_v51  ;;  %v406_v51 = vld [vmem:[%s1015_s3 + $0x20] sm:$0xff] }
 0x228   :  { %488 = vst.msk [vmem:[%s1017_s6 + $0x40] sm:$0xff] %vm71_vm0, %v472_v28  ;;  %v447_v7 = vadd.f32 %v431_v29, %v408_v26  ;;  %v390_v15 = vmul.f32 %v570_v30, %v805_v57  ;;  %579 = vrsqrt.f32 %v369_v22 }
 0x229   :  { %v473_v34 = vadd.f32 %v854_v12, %v450_v53  ;;  %v432_v35 = vmul.f32 %v844_v59, %v393_v8 }
 0x22a   :  { %v572_v36 = vpop.eup %571  ;;  %v470_v37 = vadd.f32 %v854_v12, %v447_v7  ;;  %v429_v38 = vmul.f32 %v844_v59, %v390_v15 }
 0x22b   :  { %v574_v39 = vpop.eup %573  ;;  %489 = vst.msk [vmem:[%s1017_s6 + $0x48] sm:$0xff] %vm71_vm0, %v473_v34  ;;  %v448_v57 = vadd.f32 %v432_v35, %v409_v31  ;;  %v391_v40 = vmul.f32 %v572_v36, %v802_v58  ;;  %v414_v58 = vld [vmem:[%s1015_s3 + $0x60] sm:$0xff] }
 0x22c   :  { %486 = vst.msk [vmem:[%s1017_s6 + $0x30] sm:$0xff] %vm71_vm0, %v470_v37  ;;  %v445_v43 = vadd.f32 %v429_v38, %v406_v51  ;;  %v398_v45 = vmul.f32 %v574_v39, %v818_v13 }
 0x22d   :  { %v471_v32 = vadd.f32 %v854_v12, %v448_v57  ;;  %v430_v46 = vmul.f32 %v844_v59, %v391_v40 }
 0x22e   :  { %v576_v47 = vpop.eup %575  ;;  %v468_v48 = vadd.f32 %v854_v12, %v445_v43  ;;  %v437_v49 = vmul.f32 %v844_v59, %v398_v45 }
 0x22f   :  { %v578_v50 = vpop.eup %577  ;;  %487 = vst.msk [vmem:[%s1017_s6 + $0x38] sm:$0xff] %vm71_vm0, %v471_v32  ;;  %v446_v13 = vadd.f32 %v430_v46, %v407_v44  ;;  %v399_v23 = vmul.f32 %v576_v47, %v815_v63  ;;  %v416_v63 = vld [vmem:[%s1015_s3 + $0x70] sm:$0xff] }
 0x230   :  { %484 = vst.msk [vmem:[%s1017_s6 + $0x20] sm:$0xff] %vm71_vm0, %v468_v48  ;;  %v453_v52 = vadd.f32 %v437_v49, %v414_v58  ;;  %v400_v55 = vmul.f32 %v578_v50, %v829_v1 }
 0x231   :  { %v469_v56 = vadd.f32 %v854_v12, %v446_v13  ;;  %v438_v60 = vmul.f32 %v844_v59, %v399_v23 }
 0x232   :  { %v580_v61 = vpop.eup %579  ;;  %v476_v62 = vadd.f32 %v854_v12, %v453_v52  ;;  %v439_v3 = vmul.f32 %v844_v59, %v400_v55 }
 0x233   :  { %485 = vst.msk [vmem:[%s1017_s6 + $0x28] sm:$0xff] %vm71_vm0, %v469_v56  ;;  %v454_v4 = vadd.f32 %v438_v60, %v415_v54  ;;  %v401_v1 = vmul.f32 %v580_v61, %v826_v2 }
 0x234   :  { %492 = vst.msk [vmem:[%s1017_s6 + $0x60] sm:$0xff] %vm71_vm0, %v476_v62  ;;  %v455_v41 = vadd.f32 %v439_v3, %v416_v63 }
 0x235   :  { %v477_v6 = vadd.f32 %v854_v12, %v454_v4  ;;  %v440_v9 = vmul.f32 %v844_v59, %v401_v1 }
 0x236   :  { %v478_v10 = vadd.f32 %v854_v12, %v455_v41 }
 0x237   :  { %493 = vst.msk [vmem:[%s1017_s6 + $0x68] sm:$0xff] %vm71_vm0, %v477_v6  ;;  %v456_v2 = vadd.f32 %v440_v9, %v417_v5 }
 0x238   :  { %494 = vst.msk [vmem:[%s1017_s6 + $0x70] sm:$0xff] %vm71_vm0, %v478_v10 }
 0x239   :  { %v479_v11 = vadd.f32 %v854_v12, %v456_v2 }
 0x23b   :  { %495 = vst.msk [vmem:[%s1017_s6 + $0x78] sm:$0xff] %vm71_vm0, %v479_v11 }

// kernel: swin_connect_decoder_forward.12
= control target key start
LH: loop header
LB: loop body
LE: loop exit
PB: predicated region body
PF: predicated region fallthrough
CT: control target
= control target key end

     0   :  { %vm62_vm0 = vcmask 261120   ;;  %vm184_vm1 = vcmask 785408   ;;  %s401_s1 = inlined_call_operand.vmem [shape: bf16[32,96], index: 1, kind: input, shape index: {}]   ;;  %s402_s0 = inlined_call_operand.vmem [shape: f32[128,32], index: 0, kind: input, shape index: {}]   ;;  %s403_s2 = inlined_call_operand.vmem [shape: f32[1,96], index: 2, kind: input, shape index: {}]   ;;  %s404_s3 = inlined_call_operand.vmem [shape: f32[128,96], index: 3, kind: output, shape index: {}]  }
   0x1   :  { %v250_v0 = vld [vmem:[%s401_s1] sm:$0xff]   ;;  %v251_v1 = vld [vmem:[%s401_s1 + $0x8] sm:$0xff]   ;;  %v17_v7 = vld [vmem:[%s402_s0 + $0x10] sm:$0xff] }
   0x2   :  { %226 = vmatprep.subr.bf16.mxu0 %v250_v0  ;;  %246 = vmatprep.subr.bf16.mxu1 %v250_v0  ;;  %v15_v2 = vld [vmem:[%s402_s0] sm:$0xff]  ;;  %v16_v3 = vld [vmem:[%s402_s0 + $0x8] sm:$0xff]  ;;  %v18_v8 = vld [vmem:[%s402_s0 + $0x18] sm:$0xff] }
   0x3   :  { %v23_v4 = vld [vmem:[%s402_s0 + $0x40] sm:$0xff]  ;;  %227 = vmatpush3.bf16.msra.mxu0 %v250_v0  ;;  %248 = vmatpush3.bf16.msra.mxu1 %v250_v0  ;;  %v31_v5 = vpack.c.bf16 %v16_v3, %v15_v2  ;;  %v24_v6 = vld [vmem:[%s402_s0 + $0x48] sm:$0xff]  ;;  %v25_v10 = vld [vmem:[%s402_s0 + $0x50] sm:$0xff]  ;;  %v32_v16 = vpack.c.bf16 %v18_v8, %v17_v7 }
   0x4   :  { %228 = vmatprep.subr.bf16.mxu0 %v251_v1  ;;  %247 = vmatprep.subr.bf16.mxu1 %v251_v1  ;;  %v35_v9 = vpack.c.bf16 %v24_v6, %v23_v4  ;;  %v26_v11 = vld [vmem:[%s402_s0 + $0x58] sm:$0xff]  ;;  %v19_v12 = vld [vmem:[%s402_s0 + $0x20] sm:$0xff]  ;;  %v20_v13 = vld [vmem:[%s402_s0 + $0x28] sm:$0xff] }
   0x5   :  { %230 = vmatprep.mubr.msk.bf16.mxu0 %vm62_vm0, %v31_v5  ;;  %v27_v14 = vld [vmem:[%s402_s0 + $0x60] sm:$0xff]  ;;  %v28_v15 = vld [vmem:[%s402_s0 + $0x68] sm:$0xff]  ;;  %v36_v17 = vpack.c.bf16 %v26_v11, %v25_v10  ;;  %v33_v18 = vpack.c.bf16 %v20_v13, %v19_v12  ;;  %v21_v20 = vld [vmem:[%s402_s0 + $0x30] sm:$0xff] }
   0x6   :  { %238 = vmatprep.mubr.msk.bf16.mxu1 %vm62_vm0, %v35_v9  ;;  %v37_v19 = vpack.c.bf16 %v28_v15, %v27_v14  ;;  %v22_v21 = vld [vmem:[%s402_s0 + $0x38] sm:$0xff]  ;;  %v29_v22 = vld [vmem:[%s402_s0 + $0x70] sm:$0xff]  ;;  %v205_v26 = vld [vmem:[%s403_s2] ss:$0 sm:$0xff] }
   0x7   :  { %229 = vmatpush3.bf16.msra.mxu0 %v251_v1  ;;  %249 = vmatpush3.bf16.msra.mxu1 %v251_v1  ;;  %v30_v23 = vld [vmem:[%s402_s0 + $0x78] sm:$0xff]  ;;  %v34_v24 = vpack.c.bf16 %v22_v21, %v21_v20 }
   0x8   :  { %v38_v25 = vpack.c.bf16 %v30_v23, %v29_v22 }
   0xa   :  { %231 = vmatmul.mubr.msk.bf16.vlgmr.msra.gmra.mrb[0].mxu0 %vm62_vm0, %v32_v16  ;;  %239 = vmatmul.mubr.msk.bf16.vlgmr.msra.gmra.mrb[0].mxu1 %vm62_vm0, %v36_v17 }
   0xb   :  { %234 = vmatprep.mubr.msk.bf16.mxu0 %vm62_vm0, %v33_v18  ;;  %242 = vmatprep.mubr.msk.bf16.mxu1 %vm62_vm0, %v37_v19 }
  0x12   :  { %235 = vmatmul.mubr.msk.bf16.gmra.mrb[4].mxu0 %vm62_vm0, %v34_v24  ;;  %243 = vmatmul.mubr.msk.bf16.gmra.mrb[4].mxu1 %vm62_vm0, %v38_v25 }
  0xdd   :  { %v232_v27 = vpop.f32.mrb[0].mxu0  ;;  %v240_v28 = vpop.f32.mrb[0].mxu1 }
  0xde   :  { %v130_v29 = vadd.f32 %v232_v27, %v205_v26  ;;  %v162_v30 = vadd.f32 %v240_v28, %v205_v26  ;;  %v121_v31 = vpop.f32.mrb[1].mxu0  ;;  %v153_v32 = vpop.f32.mrb[1].mxu1 }
  0xdf   :  { %v122_v33 = vadd.f32 %v205_v26, %v121_v31  ;;  %v154_v34 = vadd.f32 %v205_v26, %v153_v32  ;;  %v233_v35 = vpop.f32.mrb[2].mxu0  ;;  %v241_v36 = vpop.f32.mrb[2].mxu1 }
  0xe0   :  { %187 = vst.msk [vmem:[%s404_s3 + $0x10] sm:$0xff] %vm184_vm1, %v130_v29  ;;  %195 = vst.msk [vmem:[%s404_s3 + $0x50] sm:$0xff] %vm184_vm1, %v162_v30  ;;  %v133_v37 = vadd.f32 %v233_v35, %v205_v26  ;;  %v165_v38 = vadd.f32 %v241_v36, %v205_v26  ;;  %v124_v39 = vpop.f32.mrb[3].mxu0  ;;  %v156_v40 = vpop.f32.mrb[3].mxu1 }
  0xe1   :  { %185 = vst.msk [vmem:[%s404_s3] sm:$0xff] %vm184_vm1, %v122_v33  ;;  %193 = vst.msk [vmem:[%s404_s3 + $0x40] sm:$0xff] %vm184_vm1, %v154_v34  ;;  %v125_v41 = vadd.f32 %v205_v26, %v124_v39  ;;  %v157_v42 = vadd.f32 %v205_v26, %v156_v40 }
  0xe2   :  { %188 = vst.msk [vmem:[%s404_s3 + $0x18] sm:$0xff] %vm184_vm1, %v133_v37  ;;  %196 = vst.msk [vmem:[%s404_s3 + $0x58] sm:$0xff] %vm184_vm1, %v165_v38 }
  0xe3   :  { %186 = vst.msk [vmem:[%s404_s3 + $0x8] sm:$0xff] %vm184_vm1, %v125_v41  ;;  %194 = vst.msk [vmem:[%s404_s3 + $0x48] sm:$0xff] %vm184_vm1, %v157_v42 }
  0xe5   :  { %v236_v43 = vpop.f32.mrb[4].mxu0  ;;  %v244_v44 = vpop.f32.mrb[4].mxu1 }
  0xe6   :  { %v146_v45 = vadd.f32 %v236_v43, %v205_v26  ;;  %v178_v46 = vadd.f32 %v244_v44, %v205_v26  ;;  %v137_v47 = vpop.f32.mrb[5].mxu0  ;;  %v169_v48 = vpop.f32.mrb[5].mxu1 }
  0xe7   :  { %v138_v49 = vadd.f32 %v205_v26, %v137_v47  ;;  %v170_v50 = vadd.f32 %v205_v26, %v169_v48  ;;  %v237_v51 = vpop.f32.mrb[6].mxu0  ;;  %v245_v52 = vpop.f32.mrb[6].mxu1 }
  0xe8   :  { %191 = vst.msk [vmem:[%s404_s3 + $0x30] sm:$0xff] %vm184_vm1, %v146_v45  ;;  %199 = vst.msk [vmem:[%s404_s3 + $0x70] sm:$0xff] %vm184_vm1, %v178_v46  ;;  %v149_v53 = vadd.f32 %v237_v51, %v205_v26  ;;  %v181_v54 = vadd.f32 %v245_v52, %v205_v26  ;;  %v140_v55 = vpop.f32.mrb[7].mxu0  ;;  %v172_v56 = vpop.f32.mrb[7].mxu1 }
  0xe9   :  { %189 = vst.msk [vmem:[%s404_s3 + $0x20] sm:$0xff] %vm184_vm1, %v138_v49  ;;  %197 = vst.msk [vmem:[%s404_s3 + $0x60] sm:$0xff] %vm184_vm1, %v170_v50  ;;  %v141_v57 = vadd.f32 %v205_v26, %v140_v55  ;;  %v173_v58 = vadd.f32 %v205_v26, %v172_v56 }
  0xea   :  { %192 = vst.msk [vmem:[%s404_s3 + $0x38] sm:$0xff] %vm184_vm1, %v149_v53  ;;  %200 = vst.msk [vmem:[%s404_s3 + $0x78] sm:$0xff] %vm184_vm1, %v181_v54 }
  0xeb   :  { %190 = vst.msk [vmem:[%s404_s3 + $0x28] sm:$0xff] %vm184_vm1, %v141_v57  ;;  %198 = vst.msk [vmem:[%s404_s3 + $0x68] sm:$0xff] %vm184_vm1, %v173_v58 }

// kernel: swin_connect_decoder_forward.15
= control target key start
LH: loop header
LB: loop body
LE: loop exit
PB: predicated region body
PF: predicated region fallthrough
CT: control target
= control target key end

     0   :  { %vm62_vm0 = vcmask 261120   ;;  %s540_s1 = inlined_call_operand.vmem [shape: bf16[32,128], index: 1, kind: input, shape index: {}]   ;;  %s541_s0 = inlined_call_operand.vmem [shape: f32[128,32], index: 0, kind: input, shape index: {}]   ;;  %s542_s2 = inlined_call_operand.vmem [shape: f32[1,128], index: 2, kind: input, shape index: {}]   ;;  %s543_s3 = inlined_call_operand.vmem [shape: f32[128,128], index: 3, kind: output, shape index: {}]  }
   0x1   :  { %v329_v0 = vld [vmem:[%s540_s1] sm:$0xff]   ;;  %v330_v1 = vld [vmem:[%s540_s1 + $0x8] sm:$0xff]   ;;  %v17_v7 = vld [vmem:[%s541_s0 + $0x10] sm:$0xff] }
   0x2   :  { %305 = vmatprep.subr.bf16.mxu0 %v329_v0  ;;  %325 = vmatprep.subr.bf16.mxu1 %v329_v0  ;;  %v15_v2 = vld [vmem:[%s541_s0] sm:$0xff]  ;;  %v16_v3 = vld [vmem:[%s541_s0 + $0x8] sm:$0xff]  ;;  %v18_v8 = vld [vmem:[%s541_s0 + $0x18] sm:$0xff] }
   0x3   :  { %v23_v4 = vld [vmem:[%s541_s0 + $0x40] sm:$0xff]  ;;  %306 = vmatpush3.bf16.msra.mxu0 %v329_v0  ;;  %327 = vmatpush3.bf16.msra.mxu1 %v329_v0  ;;  %v31_v5 = vpack.c.bf16 %v16_v3, %v15_v2  ;;  %v24_v6 = vld [vmem:[%s541_s0 + $0x48] sm:$0xff]  ;;  %v25_v10 = vld [vmem:[%s541_s0 + $0x50] sm:$0xff]  ;;  %v32_v16 = vpack.c.bf16 %v18_v8, %v17_v7 }
   0x4   :  { %307 = vmatprep.subr.bf16.mxu0 %v330_v1  ;;  %326 = vmatprep.subr.bf16.mxu1 %v330_v1  ;;  %v35_v9 = vpack.c.bf16 %v24_v6, %v23_v4  ;;  %v26_v11 = vld [vmem:[%s541_s0 + $0x58] sm:$0xff]  ;;  %v19_v12 = vld [vmem:[%s541_s0 + $0x20] sm:$0xff]  ;;  %v20_v13 = vld [vmem:[%s541_s0 + $0x28] sm:$0xff] }
   0x5   :  { %309 = vmatprep.mubr.msk.bf16.mxu0 %vm62_vm0, %v31_v5  ;;  %v27_v14 = vld [vmem:[%s541_s0 + $0x60] sm:$0xff]  ;;  %v28_v15 = vld [vmem:[%s541_s0 + $0x68] sm:$0xff]  ;;  %v36_v17 = vpack.c.bf16 %v26_v11, %v25_v10  ;;  %v33_v18 = vpack.c.bf16 %v20_v13, %v19_v12  ;;  %v21_v20 = vld [vmem:[%s541_s0 + $0x30] sm:$0xff] }
   0x6   :  { %317 = vmatprep.mubr.msk.bf16.mxu1 %vm62_vm0, %v35_v9  ;;  %v37_v19 = vpack.c.bf16 %v28_v15, %v27_v14  ;;  %v22_v21 = vld [vmem:[%s541_s0 + $0x38] sm:$0xff]  ;;  %v29_v22 = vld [vmem:[%s541_s0 + $0x70] sm:$0xff]  ;;  %v284_v26 = vld [vmem:[%s542_s2] ss:$0 sm:$0xff] }
   0x7   :  { %308 = vmatpush3.bf16.msra.mxu0 %v330_v1  ;;  %328 = vmatpush3.bf16.msra.mxu1 %v330_v1  ;;  %v30_v23 = vld [vmem:[%s541_s0 + $0x78] sm:$0xff]  ;;  %v34_v24 = vpack.c.bf16 %v22_v21, %v21_v20 }
   0x8   :  { %v38_v25 = vpack.c.bf16 %v30_v23, %v29_v22 }
   0xa   :  { %310 = vmatmul.mubr.msk.bf16.vlgmr.msra.gmra.mrb[0].mxu0 %vm62_vm0, %v32_v16  ;;  %318 = vmatmul.mubr.msk.bf16.vlgmr.msra.gmra.mrb[0].mxu1 %vm62_vm0, %v36_v17 }
   0xb   :  { %313 = vmatprep.mubr.msk.bf16.mxu0 %vm62_vm0, %v33_v18  ;;  %321 = vmatprep.mubr.msk.bf16.mxu1 %vm62_vm0, %v37_v19 }
  0x12   :  { %314 = vmatmul.mubr.msk.bf16.gmra.mrb[4].mxu0 %vm62_vm0, %v34_v24  ;;  %322 = vmatmul.mubr.msk.bf16.gmra.mrb[4].mxu1 %vm62_vm0, %v38_v25 }
  0xdd   :  { %v311_v27 = vpop.f32.mrb[0].mxu0  ;;  %v319_v28 = vpop.f32.mrb[0].mxu1 }
  0xde   :  { %v130_v29 = vadd.f32 %v311_v27, %v284_v26  ;;  %v162_v30 = vadd.f32 %v319_v28, %v284_v26  ;;  %v121_v31 = vpop.f32.mrb[1].mxu0  ;;  %v153_v32 = vpop.f32.mrb[1].mxu1 }
  0xdf   :  { %v122_v33 = vadd.f32 %v284_v26, %v121_v31  ;;  %v154_v34 = vadd.f32 %v284_v26, %v153_v32  ;;  %v312_v35 = vpop.f32.mrb[2].mxu0  ;;  %v320_v36 = vpop.f32.mrb[2].mxu1 }
  0xe0   :  { %v202_v37 = vmul.f32 0.70710677, %v130_v29  ;;  %v210_v38 = vmul.f32 0.70710677, %v162_v30  ;;  %v133_v41 = vadd.f32 %v312_v35, %v284_v26  ;;  %v448_v42 = vadd.f32 %v320_v36, %v284_v26  ;;  %v124_v43 = vpop.f32.mrb[3].mxu0  ;;  %v156_v44 = vpop.f32.mrb[3].mxu1 }
  0xe1   :  { %v200_v39 = vmul.f32 0.70710677, %v122_v33  ;;  %v208_v40 = vmul.f32 0.70710677, %v154_v34  ;;  %v450_v45 = vadd.f32 %v284_v26, %v124_v43  ;;  %v452_v46 = vadd.f32 %v284_v26, %v156_v44 }
  0xe2   :  { %331 = verf.f32 %v202_v37  ;;  %v203_v47 = vmul.f32 0.70710677, %v133_v41  ;;  %v211_v48 = vmul.f32 0.70710677, %v448_v42  ;;  %v186_v7 = vmul.f32 0.5, %v130_v29 }
  0xe3   :  { %333 = verf.f32 %v210_v38  ;;  %v201_v49 = vmul.f32 0.70710677, %v450_v45  ;;  %v209_v51 = vmul.f32 0.70710677, %v452_v46  ;;  %v194_v8 = vmul.f32 0.5, %v162_v30 }
  0xe4   :  { %335 = verf.f32 %v200_v39  ;;  %v184_v15 = vmul.f32 0.5, %v122_v33  ;;  %v192_v16 = vmul.f32 0.5, %v154_v34  ;;  %v187_v25 = vmul.f32 0.5, %v133_v41 }
  0xe5   :  { %337 = verf.f32 %v208_v40  ;;  %v315_v50 = vpop.f32.mrb[4].mxu0  ;;  %v323_v53 = vpop.f32.mrb[4].mxu1  ;;  %v195_v32 = vmul.f32 0.5, %v448_v42  ;;  %v185_v36 = vmul.f32 0.5, %v450_v45  ;;  %v193_v40 = vmul.f32 0.5, %v452_v46 }
  0xe6   :  { %339 = verf.f32 %v203_v47  ;;  %v457_v52 = vadd.f32 %v315_v50, %v284_v26  ;;  %v137_v54 = vpop.f32.mrb[5].mxu0  ;;  %v459_v55 = vadd.f32 %v323_v53, %v284_v26  ;;  %v169_v57 = vpop.f32.mrb[5].mxu1 }
  0xe7   :  { %341 = verf.f32 %v211_v48  ;;  %v461_v56 = vadd.f32 %v284_v26, %v137_v54  ;;  %v316_v58 = vpop.f32.mrb[6].mxu0  ;;  %v464_v60 = vadd.f32 %v284_v26, %v169_v57  ;;  %v324_v61 = vpop.f32.mrb[6].mxu1 }
  0xe8   :  { %343 = verf.f32 %v201_v49  ;;  %v206_v59 = vmul.f32 0.70710677, %v457_v52  ;;  %v140_v62 = vpop.f32.mrb[7].mxu0  ;;  %v214_v63 = vmul.f32 0.70710677, %v459_v55  ;;  %v172_v0 = vpop.f32.mrb[7].mxu1  ;;  %v469_v3 = vadd.f32 %v316_v58, %v284_v26 }
  0xe9   :  { %345 = verf.f32 %v209_v51  ;;  %v204_v1 = vmul.f32 0.70710677, %v461_v56  ;;  %v212_v2 = vmul.f32 0.70710677, %v464_v60  ;;  %v471_v4 = vadd.f32 %v324_v61, %v284_v26 }
  0xea   :  { %347 = verf.f32 %v206_v59  ;;  %v473_v5 = vadd.f32 %v284_v26, %v140_v62  ;;  %v207_v11 = vmul.f32 0.70710677, %v469_v3  ;;  %v476_v12 = vadd.f32 %v284_v26, %v172_v0 }
  0xeb   :  { %349 = verf.f32 %v214_v63  ;;  %v215_v17 = vmul.f32 0.70710677, %v471_v4  ;;  %v190_v44 = vmul.f32 0.5, %v457_v52  ;;  %v198_v49 = vmul.f32 0.5, %v459_v55 }
  0xec   :  { %v332_v6 = vpop.eup %331  ;;  %351 = verf.f32 %v204_v1  ;;  %v205_v21 = vmul.f32 0.70710677, %v473_v5  ;;  %v213_v29 = vmul.f32 0.70710677, %v476_v12  ;;  %v188_v53 = vmul.f32 0.5, %v461_v56 }
  0xed   :  { %v334_v9 = vpop.eup %333  ;;  %v234_v10 = vadd.f32 1.0, %v332_v6  ;;  %353 = verf.f32 %v212_v2  ;;  %v196_v57 = vmul.f32 0.5, %v464_v60  ;;  %v191_v62 = vmul.f32 0.5, %v469_v3 }
  0xee   :  { %v336_v13 = vpop.eup %335  ;;  %v242_v14 = vadd.f32 1.0, %v334_v9  ;;  %355 = verf.f32 %v207_v11  ;;  %v199_v60 = vmul.f32 0.5, %v471_v4  ;;  %v189_v6 = vmul.f32 0.5, %v473_v5 }
  0xef   :  { %v338_v18 = vpop.eup %337  ;;  %v250_v19 = vmul.f32 %v234_v10, %v186_v7  ;;  %v232_v20 = vadd.f32 1.0, %v336_v13  ;;  %357 = verf.f32 %v215_v17  ;;  %v197_v10 = vmul.f32 0.5, %v476_v12 }
  0xf0   :  { %v340_v22 = vpop.eup %339  ;;  %v258_v23 = vmul.f32 %v242_v14, %v194_v8  ;;  %v240_v24 = vadd.f32 1.0, %v338_v18  ;;  %359 = verf.f32 %v205_v21 }
  0xf1   :  { %v342_v27 = vpop.eup %341  ;;  %266 = vst [vmem:[%s543_s3 + $0x10] sm:$0xff] %v250_v19  ;;  %v248_v26 = vmul.f32 %v232_v20, %v184_v15  ;;  %v235_v28 = vadd.f32 1.0, %v340_v22  ;;  %361 = verf.f32 %v213_v29 }
  0xf2   :  { %v344_v30 = vpop.eup %343  ;;  %274 = vst [vmem:[%s543_s3 + $0x50] sm:$0xff] %v258_v23  ;;  %v256_v31 = vmul.f32 %v240_v24, %v192_v16  ;;  %v243_v33 = vadd.f32 1.0, %v342_v27 }
  0xf3   :  { %v346_v34 = vpop.eup %345  ;;  %264 = vst [vmem:[%s543_s3] sm:$0xff] %v248_v26  ;;  %v251_v35 = vmul.f32 %v235_v28, %v187_v25  ;;  %v233_v37 = vadd.f32 1.0, %v344_v30 }
  0xf4   :  { %v348_v38 = vpop.eup %347  ;;  %272 = vst [vmem:[%s543_s3 + $0x40] sm:$0xff] %v256_v31  ;;  %v259_v39 = vmul.f32 %v243_v33, %v195_v32  ;;  %v241_v41 = vadd.f32 1.0, %v346_v34 }
  0xf5   :  { %v350_v42 = vpop.eup %349  ;;  %267 = vst [vmem:[%s543_s3 + $0x18] sm:$0xff] %v251_v35  ;;  %v249_v43 = vmul.f32 %v233_v37, %v185_v36  ;;  %v238_v45 = vadd.f32 1.0, %v348_v38 }
  0xf6   :  { %v352_v47 = vpop.eup %351  ;;  %275 = vst [vmem:[%s543_s3 + $0x58] sm:$0xff] %v259_v39  ;;  %v257_v48 = vmul.f32 %v241_v41, %v193_v40  ;;  %v246_v50 = vadd.f32 1.0, %v350_v42 }
  0xf7   :  { %v354_v46 = vpop.eup %353  ;;  %265 = vst [vmem:[%s543_s3 + $0x8] sm:$0xff] %v249_v43  ;;  %v254_v51 = vmul.f32 %v238_v45, %v190_v44  ;;  %v236_v54 = vadd.f32 1.0, %v352_v47 }
  0xf8   :  { %273 = vst [vmem:[%s543_s3 + $0x48] sm:$0xff] %v257_v48  ;;  %v262_v52 = vmul.f32 %v246_v50, %v198_v49  ;;  %v244_v58 = vadd.f32 1.0, %v354_v46  ;;  %v356_v59 = vpop.eup %355 }
  0xf9   :  { %270 = vst [vmem:[%s543_s3 + $0x30] sm:$0xff] %v254_v51  ;;  %v252_v55 = vmul.f32 %v236_v54, %v188_v53  ;;  %v358_v61 = vpop.eup %357  ;;  %v239_v63 = vadd.f32 1.0, %v356_v59 }
  0xfa   :  { %278 = vst [vmem:[%s543_s3 + $0x70] sm:$0xff] %v262_v52  ;;  %v260_v56 = vmul.f32 %v244_v58, %v196_v57  ;;  %v360_v0 = vpop.eup %359  ;;  %v247_v1 = vadd.f32 1.0, %v358_v61 }
  0xfb   :  { %268 = vst [vmem:[%s543_s3 + $0x20] sm:$0xff] %v252_v55  ;;  %v255_v2 = vmul.f32 %v239_v63, %v191_v62  ;;  %v237_v7 = vadd.f32 1.0, %v360_v0  ;;  %v362_v8 = vpop.eup %361 }
  0xfc   :  { %276 = vst [vmem:[%s543_s3 + $0x60] sm:$0xff] %v260_v56  ;;  %v263_v9 = vmul.f32 %v247_v1, %v199_v60  ;;  %v245_v11 = vadd.f32 1.0, %v362_v8 }
  0xfd   :  { %271 = vst [vmem:[%s543_s3 + $0x38] sm:$0xff] %v255_v2  ;;  %v253_v3 = vmul.f32 %v237_v7, %v189_v6 }
  0xfe   :  { %279 = vst [vmem:[%s543_s3 + $0x78] sm:$0xff] %v263_v9  ;;  %v261_v4 = vmul.f32 %v245_v11, %v197_v10 }
  0xff   :  { %269 = vst [vmem:[%s543_s3 + $0x28] sm:$0xff] %v253_v3 }
 0x100   :  { %277 = vst [vmem:[%s543_s3 + $0x68] sm:$0xff] %v261_v4 }

// kernel: swin_connect_decoder_forward.13
= control target key start
LH: loop header
LB: loop body
LE: loop exit
PB: predicated region body
PF: predicated region fallthrough
CT: control target
= control target key end

     0   :  { %s3626_s12 = smov 0   ;;  %s4692_s0 = inlined_call_operand.vmem [shape: f32[8,16,96], index: 0, kind: input, shape index: {}]   ;;  %s4693_s1 = inlined_call_operand.vmem [shape: f32[1,32], index: 1, kind: input, shape index: {}]   ;;  %s4694_s2 = inlined_call_operand.vmem [shape: f32[4,16,16], index: 2, kind: input, shape index: {}]   ;;  %s4695_s3 = inlined_call_operand.vmem [shape: f32[8,16,32], index: 3, kind: output, shape index: {}]  }
   0x1 LB: > { %s2989_s13 = sadd.s32 4294967295, %s3588_s12   ;;  %p2993_p0 = scmp.ge.s32.totalorder %s3588_s12, 1  ;;  %s3588_s12 = sphi %s3626_s12, %s13_s12  }
   0x2   : > { %p139_p1 = scmp.lt.s32.totalorder %s3588_s12, 3 }
   0x4   : > { %p140_p2 = pnand %p2993_p0, %p139_p1 }
   0x5   : > { %s2994_s14 = sshll.u32 (!%p140_p2), %s2989_s13, 2  ;;  %s3590_s19 = smov (!%p140_p2), 96   ;;  %vm205_vm0 = vcmask (!%p140_p2), 64512   ;;  %v3591_v50 = vmov (!%p140_p2), 0.0   ;;  %vm3592_vm1 = vmmov (!%p140_p2), 0   ;;  %vm556_vm2 = vcmask (!%p140_p2), 130048  }
   0x6   : > { %143 = sbr.rel (%p140_p2) target bundleno = 2951 (0xb87), region = 32  ;;  %p166_p3 = scmp.lt.s32.totalorder (!%p140_p2), %s2994_s14, 7  ;;  %3101 = vmatprep.subr.bf16.mxu0 (!%p140_p2), %v3591_v50  ;;  %3107 = vmatprep.subr.bf16.mxu1 (!%p140_p2), %v3591_v50  ;;  %vm2913_vm3 = vcmask (!%p140_p2), 195584   ;;  %vm2922_vm4 = vcmask (!%p140_p2), 261120  }
   0x7   : > { %3103 = vmatprep.mubr.msk.bf16.mxu0 (!%p140_p2), %vm3592_vm1, %v3591_v50  ;;  %3109 = vmatprep.mubr.msk.bf16.mxu1 (!%p140_p2), %vm3592_vm1, %v3591_v50  ;;  %s3593_s20 = smov (!%p140_p2), 88   ;;  %s3594_s21 = smov (!%p140_p2), 120  }
   0x8   : > { %s3595_s28 = smov (!%p140_p2), 64   ;;  %s3596_s29 = smov (!%p140_p2), 80  }
   0x9   : > { %s3597_s30 = smov (!%p140_p2), 112   ;;  %s3598_s8 = smov (!%p140_p2), 56  }
   0xa   : > { %s3599_s11 = smov (!%p140_p2), 72   ;;  %s3600_s13 = smov (!%p140_p2), 104  }
   0xb   : > { %s3602_s25 = smov (!%p140_p2), 40   ;;  %s3603_s26 = smov (!%p140_p2), 8  }
   0xc   : > { %s3604_s27 = smov (!%p140_p2), 16  }
   0xd   : > { %s4697_s14 = smov (!%p166_p3, %s2994_s14), 7 }
   0xe   : > { %s3035_s15 = sshll.u32 %s4697_s14, 4 }
   0xf   : > { %s3642_s18 = scalar_lea.vmem %s4692_s0, %s3035_s15  ;;  %s4641_s4 = scalar_lea.vmem %s4695_s3, %s3035_s15 }
  0x10   : > { %v3645_v0 = vld [vmem:[%s3642_s18] sm:$0xff]  ;;  %v3648_v1 = vld [vmem:[%s3642_s18 + $0x10] sm:$0xff]  ;;  %v3651_v2 = vld [vmem:[%s3642_s18 + $0x8] sm:$0xff] }
  0x11   : > { %v3655_v3 = vmul.f32 %v3645_v0, %v3645_v0  ;;  %v3659_v4 = vmul.f32 %v3648_v1, %v3648_v1  ;;  %v3662_v5 = vld [vmem:[%s3642_s18 + $0x18] sm:$0xff]  ;;  %v3670_v6 = vmul.f32 %v3651_v2, %v3651_v2  ;;  %v3677_v8 = vld [vmem:[%s3642_s18 + $0x28] sm:$0xff]  ;;  %v3680_v9 = vld [vmem:[%s3642_s18 + $0x20] sm:$0xff] }
  0x12   : > { %v3674_v7 = vmul.f32 %v3662_v5, %v3662_v5  ;;  %v3688_v10 = vmul.f32 %v3677_v8, %v3677_v8  ;;  %v3692_v11 = vmul.f32 %v3680_v9, %v3680_v9  ;;  %v3695_v12 = vld [vmem:[%s3642_s18 + $0x38] sm:$0xff]  ;;  %v3698_v13 = vld [vmem:[%s3642_s18 + $0x30] sm:$0xff] }
  0x13   : > { %276 = vrot.lane.b32.xlu0 %v3655_v3, %s3590_s19  ;;  %280 = vrot.lane.b32.xlu1 %v3659_v4, %s3590_s19  ;;  %v3706_v14 = vmul.f32 %v3695_v12, %v3695_v12  ;;  %v3710_v15 = vmul.f32 %v3698_v13, %v3698_v13  ;;  %v206_v32 = vsel %vm205_vm0, %v3655_v3, 0.0  ;;  %v209_v33 = vsel %vm205_vm0, %v3670_v6, 0.0 }
  0x14   : > { %v212_v34 = vsel %vm205_vm0, %v3659_v4, 0.0  ;;  %v215_v35 = vsel %vm205_vm0, %v3674_v7, 0.0  ;;  %v218_v36 = vsel %vm205_vm0, %v3692_v11, 0.0  ;;  %v221_v37 = vsel %vm205_vm0, %v3688_v10, 0.0 }
  0x15   : > { %v224_v38 = vsel %vm205_vm0, %v3710_v15, 0.0  ;;  %v227_v39 = vsel %vm205_vm0, %v3706_v14, 0.0 }
  0x17   : > { %278 = vrot.lane.b32.xlu0 %v3670_v6, %s3590_s19  ;;  %282 = vrot.lane.b32.xlu1 %v3674_v7, %s3590_s19 }
  0x1b   : > { %286 = vrot.lane.b32.xlu1 %v3688_v10, %s3590_s19  ;;  %284 = vrot.lane.b32.xlu0 %v3692_v11, %s3590_s19 }
  0x1f   : > { %290 = vrot.lane.b32.xlu1 %v3706_v14, %s3590_s19  ;;  %288 = vrot.lane.b32.xlu0 %v3710_v15, %s3590_s19 }
  0x85   : > { %v277_v16 = vpop.permute.xlu0 %276  ;;  %v281_v17 = vpop.permute.xlu1 %280 }
  0x86   : > { %v300_v18 = vsel %vm205_vm0, %v277_v16, 0.0  ;;  %v306_v19 = vsel %vm205_vm0, %v281_v17, 0.0 }
  0x87   : > { %301 = vadd.xlane.f32.xlu0 %v300_v18 }
  0x89   : > { %v279_v20 = vpop.permute.xlu0 %278  ;;  %v283_v21 = vpop.permute.xlu1 %282 }
  0x8a   : > { %v303_v22 = vsel %vm205_vm0, %v279_v20, 0.0  ;;  %v309_v23 = vsel %vm205_vm0, %v283_v21, 0.0 }
  0x8b   : > { %307 = vadd.xlane.f32.xlu0 %v306_v19  ;;  %304 = vadd.xlane.f32.xlu1 %v303_v22 }
  0x8d   : > { %v287_v24 = vpop.permute.xlu1 %286  ;;  %v285_v25 = vpop.permute.xlu0 %284 }
  0x8e   : > { %v312_v26 = vsel %vm205_vm0, %v285_v25, 0.0  ;;  %v315_v27 = vsel %vm205_vm0, %v287_v24, 0.0 }
  0x8f   : > { %310 = vadd.xlane.f32.xlu0 %v309_v23  ;;  %313 = vadd.xlane.f32.xlu1 %v312_v26 }
  0x91   : > { %v291_v28 = vpop.permute.xlu1 %290  ;;  %v289_v29 = vpop.permute.xlu0 %288 }
  0x92   : > { %v318_v30 = vsel %vm205_vm0, %v289_v29, 0.0  ;;  %v321_v31 = vsel %vm205_vm0, %v291_v28, 0.0 }
  0x93   : > { %316 = vadd.xlane.f32.xlu0 %v315_v27  ;;  %319 = vadd.xlane.f32.xlu1 %v318_v30 }
  0x97   : > { %322 = vadd.xlane.f32.xlu0 %v321_v31  ;;  %207 = vadd.xlane.f32.xlu1 %v206_v32 }
  0x9b   : > { %210 = vadd.xlane.f32.xlu0 %v209_v33  ;;  %213 = vadd.xlane.f32.xlu1 %v212_v34 }
  0x9f   : > { %216 = vadd.xlane.f32.xlu0 %v215_v35  ;;  %219 = vadd.xlane.f32.xlu1 %v218_v36 }
  0xa3   : > { %222 = vadd.xlane.f32.xlu0 %v221_v37  ;;  %225 = vadd.xlane.f32.xlu1 %v224_v38 }
  0xa7   : > { %228 = vadd.xlane.f32.xlu0 %v227_v39 }
 0x114   : > { %v302_v40 = vpop.xlane.xlu0 %301 }
 0x115   : > { %v324_v41 = vadd.f32 1e-06, %v302_v40 }
 0x117   : > { %3317 = vrsqrt.f32 %v324_v41 }
 0x118   : > { %v305_v42 = vpop.xlane.xlu1 %304  ;;  %v308_v43 = vpop.xlane.xlu0 %307 }
 0x119   : > { %v325_v44 = vadd.f32 1e-06, %v305_v42  ;;  %v326_v45 = vadd.f32 1e-06, %v308_v43 }
 0x11b   : > { %3319 = vrsqrt.f32 %v325_v44 }
 0x11c   : > { %v311_v46 = vpop.xlane.xlu0 %310  ;;  %v314_v47 = vpop.xlane.xlu1 %313  ;;  %3321 = vrsqrt.f32 %v326_v45 }
 0x11d   : > { %v327_v48 = vadd.f32 1e-06, %v311_v46  ;;  %v328_v49 = vadd.f32 1e-06, %v314_v47 }
 0x11f   : > { %3323 = vrsqrt.f32 %v327_v48 }
 0x120   : > { %3325 = vrsqrt.f32 %v328_v49  ;;  %v317_v51 = vpop.xlane.xlu0 %316  ;;  %v320_v52 = vpop.xlane.xlu1 %319 }
 0x121   : > { %v329_v53 = vadd.f32 1e-06, %v317_v51  ;;  %v330_v54 = vadd.f32 1e-06, %v320_v52  ;;  %v3318_v55 = vpop.eup %3317 }
 0x122   : > { %v340_v59 = vmul.f32 %v3318_v55, %v3645_v0 }
 0x123   : > { %3327 = vrsqrt.f32 %v329_v53  ;;  %v3795_v53 = vld [vmem:[%s4693_s1] ss:$0 sm:$0xff] }
 0x124   : > { %3329 = vrsqrt.f32 %v330_v54  ;;  %v323_v56 = vpop.xlane.xlu0 %322  ;;  %v208_v29 = vpop.xlane.xlu1 %207 }
 0x125   : > { %v3320_v57 = vpop.eup %3319  ;;  %v331_v58 = vadd.f32 1e-06, %v323_v56  ;;  %v230_v33 = vadd.f32 1e-06, %v208_v29 }
 0x126   : > { %v341_v60 = vmul.f32 %v3320_v57, %v3651_v2  ;;  %v3322_v61 = vpop.eup %3321 }
 0x127   : > { %3331 = vrsqrt.f32 %v331_v58  ;;  %v342_v17 = vmul.f32 %v3322_v61, %v3648_v1 }
 0x128   : > { %v352_v62 = vpack.c.bf16 %v341_v60, %v340_v59  ;;  %v211_v30 = vpop.xlane.xlu0 %210  ;;  %v214_v31 = vpop.xlane.xlu1 %213  ;;  %3333 = vrsqrt.f32 %v230_v33 }
 0x129   : > { %v3324_v63 = vpop.eup %3323  ;;  %v231_v34 = vadd.f32 1e-06, %v211_v30  ;;  %v232_v35 = vadd.f32 1e-06, %v214_v31 }
 0x12a   : > { %v3326_v16 = vpop.eup %3325  ;;  %357 = vrot.lane.b32.xlu1 %v352_v62, %s3590_s19  ;;  %v343_v18 = vmul.f32 %v3324_v63, %v3662_v5 }
 0x12b   : > { %v344_v20 = vmul.f32 %v3326_v16, %v3680_v9  ;;  %3335 = vrsqrt.f32 %v231_v34 }
 0x12c   : > { %v353_v19 = vpack.c.bf16 %v343_v18, %v342_v17  ;;  %v217_v32 = vpop.xlane.xlu0 %216  ;;  %v220_v36 = vpop.xlane.xlu1 %219  ;;  %3337 = vrsqrt.f32 %v232_v35 }
 0x12d   : > { %v3328_v21 = vpop.eup %3327  ;;  %v233_v37 = vadd.f32 1e-06, %v217_v32  ;;  %v234_v39 = vadd.f32 1e-06, %v220_v36 }
 0x12e   : > { %v3330_v22 = vpop.eup %3329  ;;  %407 = vrot.lane.b32.xlu0 %v353_v19, %s3590_s19  ;;  %v345_v23 = vmul.f32 %v3328_v21, %v3677_v8 }
 0x12f   : > { %v346_v25 = vmul.f32 %v3330_v22, %v3698_v13  ;;  %3339 = vrsqrt.f32 %v233_v37 }
 0x130   : > { %v354_v24 = vpack.c.bf16 %v345_v23, %v344_v20  ;;  %v223_v38 = vpop.xlane.xlu0 %222  ;;  %v226_v41 = vpop.xlane.xlu1 %225  ;;  %3341 = vrsqrt.f32 %v234_v39 }
 0x131   : > { %v3332_v26 = vpop.eup %3331  ;;  %v235_v40 = vadd.f32 1e-06, %v223_v38  ;;  %v236_v43 = vadd.f32 1e-06, %v226_v41 }
 0x132   : > { %457 = vrot.lane.b32.xlu1 %v354_v24, %s3590_s19  ;;  %v347_v27 = vmul.f32 %v3332_v26, %v3695_v12  ;;  %925 = vrot.lane.b32.xlu0 %v3655_v3, %s3593_s20  ;;  %v3334_v45 = vpop.eup %3333 }
 0x133   : > { %3343 = vrsqrt.f32 %v235_v40  ;;  %v246_v49 = vmul.f32 %v3334_v45, %v3645_v0 }
 0x134   : > { %v355_v28 = vpack.c.bf16 %v347_v27, %v346_v25  ;;  %v229_v42 = vpop.xlane.xlu0 %228  ;;  %3345 = vrsqrt.f32 %v236_v43 }
 0x135   : > { %v237_v44 = vadd.f32 1e-06, %v229_v42  ;;  %v3336_v46 = vpop.eup %3335  ;;  %v260_v58 = vmul.f32 %v3795_v53, %v246_v49  ;;  %v189_v49 = vld [vmem:[%s4694_s2] sm:$0xff] }
 0x136   : > { %507 = vrot.lane.b32.xlu1 %v355_v28, %s3590_s19  ;;  %929 = vrot.lane.b32.xlu0 %v3659_v4, %s3593_s20  ;;  %v3338_v47 = vpop.eup %3337  ;;  %v247_v51 = vmul.f32 %v3336_v46, %v3651_v2 }
 0x137   : > { %3347 = vrsqrt.f32 %v237_v44  ;;  %v248_v55 = vmul.f32 %v3338_v47, %v3648_v1 }
 0x138   : > { %v261_v59 = vmul.f32 %v3795_v53, %v247_v51 }
 0x139   : > { %v3340_v48 = vpop.eup %3339  ;;  %v262_v16 = vmul.f32 %v3795_v53, %v248_v55 }
 0x13a   : > { %927 = vrot.lane.b32.xlu1 %v3670_v6, %s3593_s20  ;;  %845 = vrot.lane.b32.xlu0 %v3655_v3, %s3594_s21  ;;  %v249_v56 = vmul.f32 %v3340_v48, %v3662_v5  ;;  %v3342_v57 = vpop.eup %3341  ;;  %v348_v20 = vpack.c.bf16 %v261_v59, %v260_v58 }
 0x13b   : > { %v250_v63 = vmul.f32 %v3342_v57, %v3680_v9 }
 0x13c   : > { %v263_v17 = vmul.f32 %v3795_v53, %v249_v56 }
 0x13d   : > { %v3344_v60 = vpop.eup %3343  ;;  %v264_v27 = vmul.f32 %v3795_v53, %v250_v63 }
 0x13e   : > { %931 = vrot.lane.b32.xlu1 %v3674_v7, %s3593_s20  ;;  %849 = vrot.lane.b32.xlu0 %v3659_v4, %s3594_s21  ;;  %v3346_v18 = vpop.eup %3345  ;;  %v251_v19 = vmul.f32 %v3344_v60, %v3677_v8  ;;  %v349_v26 = vpack.c.bf16 %v263_v17, %v262_v16 }
 0x13f   : > { %v252_v29 = vmul.f32 %v3346_v18, %v3698_v13 }
 0x140   : > { %v265_v30 = vmul.f32 %v3795_v53, %v251_v19 }
 0x141   : > { %v3348_v21 = vpop.eup %3347  ;;  %v266_v36 = vmul.f32 %v3795_v53, %v252_v29 }
 0x142   : > { %847 = vrot.lane.b32.xlu1 %v3670_v6, %s3594_s21  ;;  %933 = vrot.lane.b32.xlu0 %v3692_v11, %s3593_s20  ;;  %v253_v28 = vmul.f32 %v3348_v21, %v3695_v12  ;;  %v350_v35 = vpack.c.bf16 %v265_v30, %v264_v27 }
 0x144   : > { %v267_v37 = vmul.f32 %v3795_v53, %v253_v28 }
 0x146   : > { %851 = vrot.lane.b32.xlu1 %v3674_v7, %s3594_s21  ;;  %937 = vrot.lane.b32.xlu0 %v3710_v15, %s3593_s20  ;;  %v351_v42 = vpack.c.bf16 %v267_v37, %v266_v36 }
 0x14a   : > { %935 = vrot.lane.b32.xlu1 %v3688_v10, %s3593_s20  ;;  %853 = vrot.lane.b32.xlu0 %v3692_v11, %s3594_s21 }
 0x14e   : > { %939 = vrot.lane.b32.xlu1 %v3706_v14, %s3593_s20  ;;  %857 = vrot.lane.b32.xlu0 %v3710_v15, %s3594_s21 }
 0x152   : > { %855 = vrot.lane.b32.xlu1 %v3688_v10, %s3594_s21 }
 0x156   : > { %859 = vrot.lane.b32.xlu1 %v3706_v14, %s3594_s21 }
 0x19c   : > { %v358_v52 = vpop.permute.xlu1 %357 }
 0x19d   : > { %v363_v54 = vsel %vm205_vm0, %v358_v52, 0  ;;  %v190_v52 = vld [vmem:[%s4694_s2 + $0x8] sm:$0xff] }
 0x19e   : > { %3102 = vmatpush3.bf16.xpose.msra.mxu0 %v363_v54 }
 0x19f   : > { %3113 = vmatprep.subr.bf16.mxu0 %v3591_v50 }
 0x1a0   : > { %v408_v61 = vpop.permute.xlu0 %407 }
 0x1a1   : > { %v413_v62 = vsel %vm205_vm0, %v408_v61, 0 }
 0x1a2   : > { %3108 = vmatpush3.bf16.xpose.msra.mxu1 %v413_v62 }
 0x1a3   : > { %3119 = vmatprep.subr.bf16.mxu1 %v3591_v50 }
 0x1a4   : > { %v458_v22 = vpop.permute.xlu1 %457  ;;  %v926_v23 = vpop.permute.xlu0 %925 }
 0x1a5   : > { %v463_v24 = vsel %vm205_vm0, %v458_v22, 0  ;;  %3104 = vmatmul.mubr.msk.bf16.vlgmr.msra.gmra.mrb[0].mxu0 %vm205_vm0, %v348_v20  ;;  %v949_v25 = vsel %vm205_vm0, %v926_v23, 0.0 }
 0x1a6   : > { %3114 = vmatpush3.bf16.xpose.msra.mxu0 %v463_v24  ;;  %3115 = vmatprep.mubr.msk.bf16.mxu0 %vm3592_vm1, %v3591_v50 }
 0x1a7   : > { %950 = vadd.xlane.f32.xlu1 %v949_v25  ;;  %3125 = vmatprep.subr.bf16.mxu0 %v3591_v50 }
 0x1a8   : > { %v508_v31 = vpop.permute.xlu1 %507  ;;  %v930_v32 = vpop.permute.xlu0 %929 }
 0x1a9   : > { %v513_v33 = vsel %vm205_vm0, %v508_v31, 0  ;;  %3110 = vmatmul.mubr.msk.bf16.vlgmr.msra.gmra.mrb[0].mxu1 %vm205_vm0, %v349_v26  ;;  %v955_v34 = vsel %vm205_vm0, %v930_v32, 0.0 }
 0x1aa   : > { %3120 = vmatpush3.bf16.xpose.msra.mxu1 %v513_v33  ;;  %3121 = vmatprep.mubr.msk.bf16.mxu1 %vm3592_vm1, %v3591_v50 }
 0x1ab   : > { %956 = vadd.xlane.f32.xlu1 %v955_v34  ;;  %3131 = vmatprep.subr.bf16.mxu1 %v3591_v50 }
 0x1ac   : > { %v928_v38 = vpop.permute.xlu1 %927  ;;  %v846_v39 = vpop.permute.xlu0 %845 }
 0x1ad   : > { %3116 = vmatmul.mubr.msk.bf16.vlgmr.msra.gmra.mrb[4].mxu0 %vm205_vm0, %v350_v35  ;;  %v952_v40 = vsel %vm205_vm0, %v928_v38, 0.0  ;;  %v869_v41 = vsel %vm205_vm0, %v846_v39, 0.0 }
 0x1ae   : > { %953 = vadd.xlane.f32.xlu0 %v952_v40  ;;  %3127 = vmatprep.mubr.msk.bf16.mxu0 %vm3592_vm1, %v3591_v50 }
 0x1af   : > { %870 = vadd.xlane.f32.xlu1 %v869_v41 }
 0x1b0   : > { %v932_v43 = vpop.permute.xlu1 %931  ;;  %v850_v46 = vpop.permute.xlu0 %849 }
 0x1b1   : > { %3122 = vmatmul.mubr.msk.bf16.vlgmr.msra.gmra.mrb[4].mxu1 %vm205_vm0, %v351_v42  ;;  %v958_v44 = vsel %vm205_vm0, %v932_v43, 0.0  ;;  %v875_v48 = vsel %vm205_vm0, %v850_v46, 0.0 }
 0x1b2   : > { %959 = vadd.xlane.f32.xlu0 %v958_v44  ;;  %3133 = vmatprep.mubr.msk.bf16.mxu1 %vm3592_vm1, %v3591_v50 }
 0x1b3   : > { %876 = vadd.xlane.f32.xlu1 %v875_v48 }
 0x1b4   : > { %v848_v45 = vpop.permute.xlu1 %847  ;;  %v934_v21 = vpop.permute.xlu0 %933 }
 0x1b5   : > { %v872_v47 = vsel %vm205_vm0, %v848_v45, 0.0  ;;  %v961_v40 = vsel %vm205_vm0, %v934_v21, 0.0 }
 0x1b6   : > { %873 = vadd.xlane.f32.xlu0 %v872_v47 }
 0x1b8   : > { %v852_v30 = vpop.permute.xlu1 %851  ;;  %v938_v34 = vpop.permute.xlu0 %937 }
 0x1b9   : > { %v878_v43 = vsel %vm205_vm0, %v852_v30, 0.0  ;;  %v967_v44 = vsel %vm205_vm0, %v938_v34, 0.0 }
 0x1bc   : > { %v936_v39 = vpop.permute.xlu1 %935  ;;  %v854_v42 = vpop.permute.xlu0 %853 }
 0x1bd   : > { %v964_v46 = vsel %vm205_vm0, %v936_v39, 0.0  ;;  %v881_v47 = vsel %vm205_vm0, %v854_v42, 0.0 }
 0x1c0   : > { %v940_v45 = vpop.permute.xlu1 %939  ;;  %v858_v48 = vpop.permute.xlu0 %857 }
 0x278   : > { %v399_v51 = vpop.f32.mrb[0].mxu0 }
 0x279   : > { %v3844_v54 = vadd.f32 %v399_v51, %v189_v49  ;;  %v3105_v55 = vpop.f32.mrb[1].mxu0  ;;  %v970_v51 = vsel %vm205_vm0, %v940_v45, 0.0 }
 0x27a   : > { %v402_v56 = vpop.f32.mrb[2].mxu0 }
 0x27b   : > { %v3846_v57 = vadd.f32 %v402_v56, %v190_v52  ;;  %v3106_v58 = vpop.f32.mrb[3].mxu0  ;;  %v557_v59 = vsel %vm556_vm2, %v3844_v54, -inf }
 0x27c   : > { %v449_v60 = vpop.f32.mrb[0].mxu1  ;;  %558 = vmax.xlane.f32.xlu0 %v557_v59  ;;  %v3887_v59 = vpack.c.bf16 %v3651_v2, %v3645_v0 }
 0x27d   : > { %v3850_v61 = vadd.f32 %v449_v60, %v189_v49  ;;  %v3111_v62 = vpop.f32.mrb[1].mxu1  ;;  %v560_v63 = vsel %vm556_vm2, %v3846_v57, -inf  ;;  %v3892_v60 = vpack.c.bf16 %v3677_v8, %v3680_v9 }
 0x27e   : > { %v452_v16 = vpop.f32.mrb[2].mxu1  ;;  %561 = vmax.xlane.f32.xlu1 %v560_v63  ;;  %v3897_v62 = vpack.c.bf16 %v3695_v12, %v3698_v13  ;;  %v3902_v63 = vpack.c.bf16 %v3662_v5, %v3648_v1 }
 0x27f   : > { %v3854_v17 = vadd.f32 %v452_v16, %v190_v52  ;;  %v3112_v18 = vpop.f32.mrb[3].mxu1  ;;  %v563_v19 = vsel %vm556_vm2, %v3850_v61, -inf }
 0x280   : > { %v499_v20 = vpop.f32.mrb[4].mxu0  ;;  %564 = vmax.xlane.f32.xlu0 %v563_v19  ;;  %v3905_v18 = vpop.xlane.xlu0 %953 }
 0x281   : > { %v3858_v22 = vadd.f32 %v499_v20, %v189_v49  ;;  %v3117_v23 = vpop.f32.mrb[5].mxu0  ;;  %v566_v28 = vsel %vm556_vm2, %v3854_v17, -inf }
 0x282   : > { %v502_v24 = vpop.f32.mrb[6].mxu0 }
 0x283   : > { %v3860_v25 = vadd.f32 %v502_v24, %v190_v52  ;;  %v3118_v26 = vpop.f32.mrb[7].mxu0  ;;  %v569_v27 = vsel %vm556_vm2, %v3858_v22, -inf }
 0x284   : > { %570 = vmax.xlane.f32.xlu1 %v569_v27  ;;  %v549_v29 = vpop.f32.mrb[4].mxu1  ;;  %567 = vmax.xlane.f32.xlu0 %v566_v28  ;;  %v960_v20 = vpop.xlane.xlu0 %959 }
 0x285   : > { %v3866_v31 = vadd.f32 %v549_v29, %v189_v49  ;;  %v3123_v32 = vpop.f32.mrb[5].mxu1  ;;  %v572_v38 = vsel %vm556_vm2, %v3860_v25, -inf  ;;  %v856_v49 = vpop.permute.xlu1 %855 }
 0x286   : > { %v552_v33 = vpop.f32.mrb[6].mxu1  ;;  %v884_v55 = vsel %vm205_vm0, %v856_v49, 0.0 }
 0x287   : > { %v3868_v35 = vadd.f32 %v552_v33, %v190_v52  ;;  %v3124_v36 = vpop.f32.mrb[7].mxu1  ;;  %v575_v37 = vsel %vm556_vm2, %v3866_v31, -inf  ;;  %v887_v52 = vsel %vm205_vm0, %v858_v48, 0.0 }
 0x288   : > { %576 = vmax.xlane.f32.xlu1 %v575_v37  ;;  %573 = vmax.xlane.f32.xlu0 %v572_v38  ;;  %v3909_v23 = vpop.xlane.xlu0 %873 }
 0x289   : > { %v578_v41 = vsel %vm556_vm2, %v3868_v35, -inf  ;;  %v860_v56 = vpop.permute.xlu1 %859 }
 0x28a   : > { %v890_v58 = vsel %vm205_vm0, %v860_v56, 0.0 }
 0x28c   : > { %579 = vmax.xlane.f32.xlu0 %v578_v41  ;;  %962 = vadd.xlane.f32.xlu1 %v961_v40 }
 0x28d   : > { %v951_v16 = vpop.xlane.xlu1 %950 }
 0x290   : > { %879 = vadd.xlane.f32.xlu0 %v878_v43  ;;  %968 = vadd.xlane.f32.xlu1 %v967_v44 }
 0x291   : > { %v957_v19 = vpop.xlane.xlu1 %956 }
 0x294   : > { %965 = vadd.xlane.f32.xlu0 %v964_v46  ;;  %882 = vadd.xlane.f32.xlu1 %v881_v47 }
 0x295   : > { %v3907_v21 = vpop.xlane.xlu1 %870 }
 0x298   : > { %971 = vadd.xlane.f32.xlu0 %v970_v51  ;;  %888 = vadd.xlane.f32.xlu1 %v887_v52 }
 0x299   : > { %v3911_v24 = vpop.xlane.xlu1 %876 }
 0x29c   : > { %885 = vadd.xlane.f32.xlu0 %v884_v55 }
 0x2a0   : > { %891 = vadd.xlane.f32.xlu0 %v890_v58  ;;  %v973_v58 = vadd.f32 1e-06, %v951_v16 }
 0x2a9   : > { %654 = vrot.lane.b32.xlu1 %v3887_v59, %s3595_s28 }
 0x2ad   : > { %750 = vrot.lane.b32.xlu1 %v3892_v60, %s3595_s28 }
 0x2b1   : > { %798 = vrot.lane.b32.xlu1 %v3897_v62, %s3595_s28 }
 0x2b6   : > { %702 = vrot.lane.b32.xlu0 %v3902_v63, %s3595_s28  ;;  %s3605_s28 = smov 24  }
 0x309   : > { %v559_v26 = vpop.xlane.xlu0 %558 }
 0x30a   : > { %v581_v27 = vsub.f32 %v3844_v54, %v559_v26 }
 0x30b   : > { %v562_v28 = vpop.xlane.xlu1 %561 }
 0x30c   : > { %v589_v29 = vmul.f32 1.442695, %v581_v27  ;;  %v582_v30 = vsub.f32 %v3846_v57, %v562_v28  ;;  %v976_v28 = vadd.f32 1e-06, %v960_v20 }
 0x30d   : > { %v565_v32 = vpop.xlane.xlu0 %564 }
 0x30e   : > { %3349 = vpow2.f32 %v589_v29  ;;  %v591_v33 = vmul.f32 1.442695, %v582_v30  ;;  %v583_v34 = vsub.f32 %v3850_v61, %v565_v32 }
 0x310   : > { %3351 = vpow2.f32 %v591_v33  ;;  %v593_v36 = vmul.f32 1.442695, %v583_v34 }
 0x311   : > { %v568_v37 = vpop.xlane.xlu0 %567  ;;  %v571_v38 = vpop.xlane.xlu1 %570 }
 0x312   : > { %3353 = vpow2.f32 %v593_v36  ;;  %v584_v39 = vsub.f32 %v3854_v17, %v568_v37  ;;  %v585_v40 = vsub.f32 %v3858_v22, %v571_v38 }
 0x314   : > { %v595_v41 = vmul.f32 1.442695, %v584_v39  ;;  %v597_v54 = vmul.f32 1.442695, %v585_v40 }
 0x315   : > { %v574_v42 = vpop.xlane.xlu0 %573  ;;  %v577_v43 = vpop.xlane.xlu1 %576 }
 0x316   : > { %3355 = vpow2.f32 %v595_v41  ;;  %v586_v57 = vsub.f32 %v3860_v25, %v574_v42  ;;  %v587_v44 = vsub.f32 %v3866_v31, %v577_v43  ;;  %v893_v43 = vadd.f32 1e-06, %v3907_v21 }
 0x317   : > { %3357 = vpow2.f32 %v597_v54 }
 0x318   : > { %v3920_v61 = vpop.eup %3349  ;;  %v599_v45 = vmul.f32 1.442695, %v586_v57  ;;  %v601_v46 = vmul.f32 1.442695, %v587_v44  ;;  %v894_v57 = vadd.f32 1e-06, %v3909_v23 }
 0x319   : > { %v580_v47 = vpop.xlane.xlu0 %579  ;;  %v605_v17 = vsel %vm556_vm2, %v3920_v61, 0.0  ;;  %v963_v48 = vpop.xlane.xlu1 %962 }
 0x31a   : > { %v3924_v22 = vpop.eup %3351  ;;  %3359 = vpow2.f32 %v599_v45  ;;  %v588_v49 = vsub.f32 %v3868_v35, %v580_v47  ;;  %606 = vadd.xlane.f32.xlu1 %v605_v17  ;;  %v975_v35 = vadd.f32 1e-06, %v957_v19  ;;  %v977_v34 = vadd.f32 1e-06, %v963_v48 }
 0x31b   : > { %3361 = vpow2.f32 %v601_v46  ;;  %v608_v25 = vsel %vm556_vm2, %v3924_v22, 0.0  ;;  %v974_v19 = vadd.f32 1e-06, %v3905_v18  ;;  %v895_v47 = vadd.f32 1e-06, %v3911_v24 }
 0x31c   : > { %v3929_v31 = vpop.eup %3353  ;;  %v603_v51 = vmul.f32 1.442695, %v588_v49  ;;  %609 = vadd.xlane.f32.xlu0 %v608_v25 }
 0x31d   : > { %v880_v52 = vpop.xlane.xlu0 %879  ;;  %v611_v55 = vsel %vm556_vm2, %v3929_v31, 0.0  ;;  %v969_v56 = vpop.xlane.xlu1 %968 }
 0x31e   : > { %3363 = vpow2.f32 %v603_v51  ;;  %612 = vadd.xlane.f32.xlu1 %v611_v55  ;;  %v979_v39 = vadd.f32 1e-06, %v969_v56  ;;  %v896_v21 = vadd.f32 1e-06, %v880_v52 }
 0x31f   : > { %3365 = vrsqrt.f32 %v973_v58 }
 0x320   : > { %v3933_v26 = vpop.eup %3355  ;;  %3367 = vrsqrt.f32 %v975_v35 }
 0x321   : > { %v3935_v27 = vpop.eup %3357  ;;  %v614_v29 = vsel %vm556_vm2, %v3933_v26, 0.0  ;;  %v966_v30 = vpop.xlane.xlu0 %965  ;;  %3369 = vrsqrt.f32 %v976_v28 }
 0x322   : > { %v883_v32 = vpop.xlane.xlu1 %882  ;;  %615 = vadd.xlane.f32.xlu0 %v614_v29  ;;  %v617_v33 = vsel %vm556_vm2, %v3935_v27, 0.0  ;;  %v978_v36 = vadd.f32 1e-06, %v966_v30  ;;  %3371 = vrsqrt.f32 %v977_v34 }
 0x323   : > { %618 = vadd.xlane.f32.xlu1 %v617_v33  ;;  %v897_v49 = vadd.f32 1e-06, %v883_v32 }
 0x324   : > { %v3941_v16 = vpop.eup %3359  ;;  %3373 = vrsqrt.f32 %v978_v36 }
 0x325   : > { %v3944_v37 = vpop.eup %3361  ;;  %v620_v20 = vsel %vm556_vm2, %v3941_v16, 0.0  ;;  %v972_v38 = vpop.xlane.xlu0 %971  ;;  %3375 = vrsqrt.f32 %v974_v19 }
 0x326   : > { %v889_v40 = vpop.xlane.xlu1 %888  ;;  %621 = vadd.xlane.f32.xlu0 %v620_v20  ;;  %v623_v41 = vsel %vm556_vm2, %v3944_v37, 0.0  ;;  %v980_v54 = vadd.f32 1e-06, %v972_v38  ;;  %3377 = vrsqrt.f32 %v979_v39 }
 0x327   : > { %624 = vadd.xlane.f32.xlu1 %v623_v41  ;;  %v899_v42 = vadd.f32 1e-06, %v889_v40 }
 0x328   : > { %v3950_v18 = vpop.eup %3363  ;;  %3379 = vrsqrt.f32 %v980_v54 }
 0x329   : > { %v626_v44 = vsel %vm556_vm2, %v3950_v18, 0.0  ;;  %v886_v45 = vpop.xlane.xlu0 %885  ;;  %3381 = vrsqrt.f32 %v899_v42  ;;  %v3366_v17 = vpop.eup %3365 }
 0x32a   : > { %v655_v46 = vpop.permute.xlu1 %654  ;;  %627 = vadd.xlane.f32.xlu0 %v626_v44  ;;  %3383 = vrsqrt.f32 %v893_v43  ;;  %v3368_v23 = vpop.eup %3367  ;;  %v898_v55 = vadd.f32 1e-06, %v886_v45  ;;  %v989_v43 = vmul.f32 %v3366_v17, %v3645_v0 }
 0x32b   : > { %3126 = vmatpush3.bf16.msra.mxu0 %v655_v46  ;;  %3385 = vrsqrt.f32 %v894_v57  ;;  %v3370_v51 = vpop.eup %3369  ;;  %v991_v28 = vmul.f32 %v3368_v23, %v3648_v1 }
 0x32c   : > { %3137 = vmatprep.subr.bf16.mxu0 %v3591_v50  ;;  %3387 = vrsqrt.f32 %v895_v47  ;;  %v3372_v56 = vpop.eup %3371  ;;  %v992_v29 = vmul.f32 %v3370_v51, %v3662_v5 }
 0x32d   : > { %v892_v48 = vpop.xlane.xlu0 %891  ;;  %v993_v32 = vmul.f32 %v3372_v56, %v3680_v9 }
 0x32e   : > { %v900_v25 = vadd.f32 1e-06, %v892_v48  ;;  %v3374_v58 = vpop.eup %3373  ;;  %v1002_v19 = vpack.c.bf16 %v992_v29, %v991_v28 }
 0x32f   : > { %v3376_v24 = vpop.eup %3375  ;;  %v994_v33 = vmul.f32 %v3374_v58, %v3677_v8 }
 0x330   : > { %3389 = vrsqrt.f32 %v900_v25  ;;  %v3378_v52 = vpop.eup %3377  ;;  %v990_v57 = vmul.f32 %v3376_v24, %v3651_v2 }
 0x331   : > { %3391 = vrsqrt.f32 %v896_v21  ;;  %v703_v35 = vpop.permute.xlu0 %702  ;;  %v1003_v38 = vpack.c.bf16 %v994_v33, %v993_v32  ;;  %v995_v39 = vmul.f32 %v3378_v52, %v3698_v13 }
 0x332   : > { %3393 = vrsqrt.f32 %v897_v49  ;;  %3132 = vmatpush3.bf16.msra.mxu1 %v703_v35  ;;  %v3380_v30 = vpop.eup %3379  ;;  %v1001_v25 = vpack.c.bf16 %v990_v57, %v989_v43 }
 0x333   : > { %3395 = vrsqrt.f32 %v898_v55  ;;  %3143 = vmatprep.subr.bf16.mxu1 %v3591_v50  ;;  %v3382_v34 = vpop.eup %3381  ;;  %v996_v40 = vmul.f32 %v3380_v30, %v3695_v12 }
 0x334   : > { %v3384_v36 = vpop.eup %3383  ;;  %v915_v41 = vmul.f32 %v3382_v34, %v3698_v13 }
 0x335   : > { %v3386_v20 = vpop.eup %3385  ;;  %v909_v44 = vmul.f32 %v3384_v36, %v3645_v0  ;;  %v1004_v48 = vpack.c.bf16 %v996_v40, %v995_v39 }
 0x336   : > { %v3388_v54 = vpop.eup %3387  ;;  %v910_v45 = vmul.f32 %v3386_v20, %v3651_v2  ;;  %v923_v23 = vmul.f32 %v3795_v53, %v915_v41 }
 0x337   : > { %v917_v17 = vmul.f32 %v3795_v53, %v909_v44  ;;  %v911_v2 = vmul.f32 %v3388_v54, %v3648_v1 }
 0x338   : > { %1062 = vrot.lane.b32.xlu1 %v1002_v19, %s3593_s20  ;;  %v918_v51 = vmul.f32 %v3795_v53, %v910_v45 }
 0x339   : > { %v919_v24 = vmul.f32 %v3795_v53, %v911_v2 }
 0x33a   : > { %v3390_v42 = vpop.eup %3389  ;;  %v997_v58 = vpack.c.bf16 %v918_v51, %v917_v17 }
 0x33b   : > { %v3392_v46 = vpop.eup %3391  ;;  %v916_v47 = vmul.f32 %v3390_v42, %v3695_v12 }
 0x33c   : > { %v3394_v21 = vpop.eup %3393  ;;  %1115 = vrot.lane.b32.xlu1 %v1003_v38, %s3593_s20  ;;  %v912_v0 = vmul.f32 %v3392_v46, %v3662_v5 }
 0x33d   : > { %v3396_v13 = vpop.eup %3395  ;;  %v924_v49 = vmul.f32 %v3795_v53, %v916_v47  ;;  %v913_v12 = vmul.f32 %v3394_v21, %v3680_v9 }
 0x33e   : > { %v914_v55 = vmul.f32 %v3396_v13, %v3677_v8  ;;  %v920_v35 = vmul.f32 %v3795_v53, %v912_v0  ;;  %v751_v8 = vpop.permute.xlu1 %750 }
 0x33f   : > { %v1000_v56 = vpack.c.bf16 %v924_v49, %v923_v23  ;;  %v921_v5 = vmul.f32 %v3795_v53, %v913_v12 }
 0x340   : > { %1009 = vrot.lane.b32.xlu0 %v1001_v25, %s3593_s20  ;;  %1168 = vrot.lane.b32.xlu1 %v1004_v48, %s3593_s20  ;;  %v922_v1 = vmul.f32 %v3795_v53, %v914_v55  ;;  %v998_v28 = vpack.c.bf16 %v920_v35, %v919_v24  ;;  %s3601_s20 = smov 48  }
 0x342   : > { %v999_v9 = vpack.c.bf16 %v922_v1, %v921_v5  ;;  %v799_v53 = vpop.permute.xlu1 %798 }
 0x344   : > { %1006 = vrot.lane.b32.xlu0 %v997_v58, %s3594_s21  ;;  %1165 = vrot.lane.b32.xlu1 %v1000_v56, %s3594_s21 }
 0x348   : > { %1059 = vrot.lane.b32.xlu0 %v998_v28, %s3594_s21  ;;  %1579 = vrot.lane.b32.xlu1 %v3670_v6, %s3596_s29 }
 0x34c   : > { %1112 = vrot.lane.b32.xlu0 %v999_v9, %s3594_s21  ;;  %1583 = vrot.lane.b32.xlu1 %v3674_v7, %s3596_s29 }
 0x350   : > { %1577 = vrot.lane.b32.xlu0 %v3655_v3, %s3596_s29  ;;  %1499 = vrot.lane.b32.xlu1 %v3670_v6, %s3597_s30 }
 0x354   : > { %1581 = vrot.lane.b32.xlu0 %v3659_v4, %s3596_s29  ;;  %1503 = vrot.lane.b32.xlu1 %v3674_v7, %s3597_s30 }
 0x358   : > { %1497 = vrot.lane.b32.xlu0 %v3655_v3, %s3597_s30  ;;  %1587 = vrot.lane.b32.xlu1 %v3688_v10, %s3596_s29 }
 0x35c   : > { %1501 = vrot.lane.b32.xlu0 %v3659_v4, %s3597_s30  ;;  %1591 = vrot.lane.b32.xlu1 %v3706_v14, %s3596_s29 }
 0x360   : > { %1585 = vrot.lane.b32.xlu0 %v3692_v11, %s3596_s29  ;;  %1507 = vrot.lane.b32.xlu1 %v3688_v10, %s3597_s30 }
 0x364   : > { %1589 = vrot.lane.b32.xlu0 %v3710_v15, %s3596_s29  ;;  %1511 = vrot.lane.b32.xlu1 %v3706_v14, %s3597_s30 }
 0x368   : > { %1505 = vrot.lane.b32.xlu0 %v3692_v11, %s3597_s30 }
 0x36c   : > { %1509 = vrot.lane.b32.xlu0 %v3710_v15, %s3597_s30 }
 0x3a7   : > { %v607_v29 = vpop.xlane.xlu1 %606 }
 0x3a8   : > { %3397 = vrcp.f32 %v607_v29 }
 0x3a9   : > { %v610_v52 = vpop.xlane.xlu0 %609 }
 0x3aa   : > { %3399 = vrcp.f32 %v610_v52 }
 0x3ab   : > { %v613_v30 = vpop.xlane.xlu1 %612 }
 0x3ac   : > { %3401 = vrcp.f32 %v613_v30 }
 0x3af   : > { %v616_v32 = vpop.xlane.xlu0 %615 }
 0x3b0   : > { %3403 = vrcp.f32 %v616_v32  ;;  %v619_v33 = vpop.xlane.xlu1 %618 }
 0x3b1   : > { %3405 = vrcp.f32 %v619_v33 }
 0x3b2   : > { %v3398_v34 = vpop.eup %3397 }
 0x3b3   : > { %v622_v36 = vpop.xlane.xlu0 %621  ;;  %v637_v38 = vmul.f32 %v3398_v34, %v3920_v61 }
 0x3b4   : > { %v3400_v19 = vpop.eup %3399  ;;  %3407 = vrcp.f32 %v622_v36  ;;  %v625_v20 = vpop.xlane.xlu1 %624 }
 0x3b5   : > { %v638_v39 = vmul.f32 %v3400_v19, %v3924_v22  ;;  %3409 = vrcp.f32 %v625_v20 }
 0x3b6   : > { %v3402_v54 = vpop.eup %3401 }
 0x3b7   : > { %v628_v40 = vpop.xlane.xlu0 %627  ;;  %v645_v41 = vpack.c.bf16 %v638_v39, %v637_v38  ;;  %v639_v43 = vmul.f32 %v3402_v54, %v3929_v31 }
 0x3b8   : > { %3411 = vrcp.f32 %v628_v40  ;;  %v1063_v13 = vpop.permute.xlu1 %1062 }
 0x3b9   : > { %3128 = vmatmul.mubr.msk.bf16.vlgmr.msra.gmra.mrb[8].mxu0 %vm556_vm2, %v645_v41  ;;  %v1068_v25 = vsel %vm205_vm0, %v1063_v13, 0 }
 0x3ba   : > { %v3404_v42 = vpop.eup %3403  ;;  %3138 = vmatpush3.bf16.msra.mxu0 %v751_v8  ;;  %3139 = vmatprep.mubr.msk.bf16.mxu0 %vm3592_vm1, %v3591_v50 }
 0x3bb   : > { %v640_v57 = vmul.f32 %v3404_v42, %v3933_v26  ;;  %3149 = vmatprep.subr.bf16.mxu0 %v3591_v50  ;;  %v3406_v61 = vpop.eup %3405  ;;  %v1010_v21 = vpop.permute.xlu0 %1009 }
 0x3bc   : > { %v641_v45 = vmul.f32 %v3406_v61, %v3935_v27  ;;  %v1015_v27 = vsel %vm205_vm0, %v1010_v21, 0  ;;  %v1116_v49 = vpop.permute.xlu1 %1115 }
 0x3bd   : > { %v646_v22 = vpack.c.bf16 %v640_v57, %v639_v43 }
 0x3be   : > { %v3408_v44 = vpop.eup %3407 }
 0x3bf   : > { %v642_v46 = vmul.f32 %v3408_v44, %v3941_v16  ;;  %3134 = vmatmul.mubr.msk.bf16.vlgmr.msra.gmra.mrb[8].mxu1 %vm556_vm2, %v646_v22  ;;  %v3410_v47 = vpop.eup %3409  ;;  %v191_v22 = vld [vmem:[%s4694_s2 + $0x10] sm:$0xff] }
 0x3c0   : > { %3144 = vmatpush3.bf16.msra.mxu1 %v799_v53  ;;  %3145 = vmatprep.mubr.msk.bf16.mxu1 %vm3592_vm1, %v3591_v50  ;;  %v643_v48 = vmul.f32 %v3410_v47, %v3944_v37  ;;  %v1007_v37 = vpop.permute.xlu0 %1006  ;;  %v1169_v17 = vpop.permute.xlu1 %1168 }
 0x3c1   : > { %v647_v31 = vpack.c.bf16 %v642_v46, %v641_v45  ;;  %3155 = vmatprep.subr.bf16.mxu1 %v3591_v50  ;;  %v1174_v0 = vsel %vm205_vm0, %v1169_v17, 0  ;;  %v192_v46 = vld [vmem:[%s4694_s2 + $0x18] sm:$0xff] }
 0x3c2   : > { %v3412_v26 = vpop.eup %3411 }
 0x3c3   : > { %v644_v23 = vmul.f32 %v3412_v26, %v3950_v18  ;;  %3140 = vmatmul.mubr.msk.bf16.vlgmr.msra.gmra.mrb[12].mxu0 %vm556_vm2, %v647_v31  ;;  %v1121_v18 = vsel %vm205_vm0, %v1116_v49, 0 }
 0x3c4   : > { %3150 = vmatpush3.bf16.xpose.msra.mxu0 %v1015_v27  ;;  %3151 = vmatprep.mubr.msk.bf16.mxu0 %vm3592_vm1, %v3591_v50  ;;  %v1060_v51 = vpop.permute.xlu0 %1059  ;;  %v1166_v12 = vpop.permute.xlu1 %1165 }
 0x3c5   : > { %v648_v16 = vpack.c.bf16 %v644_v23, %v643_v48  ;;  %3161 = vmatprep.subr.bf16.mxu0 %v3591_v50 }
 0x3c7   : > { %3146 = vmatmul.mubr.msk.bf16.vlgmr.msra.gmra.mrb[12].mxu1 %vm556_vm2, %v648_v16 }
 0x3c8   : > { %3157 = vmatprep.mubr.msk.bf16.mxu1 %vm3592_vm1, %v3591_v50  ;;  %v1113_v2 = vpop.permute.xlu0 %1112  ;;  %v1580_v58 = vpop.permute.xlu1 %1579 }
 0x3c9   : > { %3156 = vmatpush3.bf16.xpose.msra.mxu1 %v1068_v25  ;;  %v1604_v24 = vsel %vm205_vm0, %v1580_v58, 0.0 }
 0x3ca   : > { %3167 = vmatprep.subr.bf16.mxu1 %v3591_v50  ;;  %1605 = vadd.xlane.f32.xlu0 %v1604_v24 }
 0x3cb   : > { %3152 = vmatmul.mubr.msk.bf16.vlgmr.msra.gmra.mrb[16].mxu0 %vm205_vm0, %v1007_v37 }
 0x3cc   : > { %3162 = vmatpush3.bf16.xpose.msra.mxu0 %v1121_v18  ;;  %3163 = vmatprep.mubr.msk.bf16.mxu0 %vm3592_vm1, %v3591_v50  ;;  %v1578_v55 = vpop.permute.xlu0 %1577  ;;  %v1584_v1 = vpop.permute.xlu1 %1583 }
 0x3cd   : > { %3173 = vmatprep.subr.bf16.mxu0 %v3591_v50  ;;  %v1601_v56 = vsel %vm205_vm0, %v1578_v55, 0.0  ;;  %v1610_v9 = vsel %vm205_vm0, %v1584_v1, 0.0 }
 0x3ce   : > { %1602 = vadd.xlane.f32.xlu1 %v1601_v56  ;;  %1611 = vadd.xlane.f32.xlu0 %v1610_v9 }
 0x3d0   : > { %3158 = vmatmul.mubr.msk.bf16.vlgmr.msra.gmra.mrb[16].mxu1 %vm205_vm0, %v1060_v51  ;;  %v1582_v35 = vpop.permute.xlu0 %1581  ;;  %v1500_v53 = vpop.permute.xlu1 %1499 }
 0x3d1   : > { %3168 = vmatpush3.bf16.xpose.msra.mxu1 %v1174_v0  ;;  %3169 = vmatprep.mubr.msk.bf16.mxu1 %vm3592_vm1, %v3591_v50  ;;  %v1607_v5 = vsel %vm205_vm0, %v1582_v35, 0.0  ;;  %v1524_v52 = vsel %vm205_vm0, %v1500_v53, 0.0 }
 0x3d2   : > { %3179 = vmatprep.subr.bf16.mxu1 %v3591_v50  ;;  %1608 = vadd.xlane.f32.xlu1 %v1607_v5 }
 0x3d3   : > { %3164 = vmatmul.mubr.msk.bf16.vlgmr.msra.gmra.mrb[20].mxu0 %vm205_vm0, %v1113_v2  ;;  %1525 = vadd.xlane.f32.xlu0 %v1524_v52 }
 0x3d4   : > { %3175 = vmatprep.mubr.msk.bf16.mxu0 %vm3592_vm1, %v3591_v50  ;;  %v1498_v28 = vpop.permute.xlu0 %1497  ;;  %v1504_v1 = vpop.permute.xlu1 %1503 }
 0x3d5   : > { %v1521_v8 = vsel %vm205_vm0, %v1498_v28, 0.0 }
 0x3d6   : > { %1522 = vadd.xlane.f32.xlu1 %v1521_v8 }
 0x3d8   : > { %3170 = vmatmul.mubr.msk.bf16.vlgmr.msra.gmra.mrb[20].mxu1 %vm205_vm0, %v1166_v12  ;;  %v1502_v29 = vpop.permute.xlu0 %1501 }
 0x3d9   : > { %3181 = vmatprep.mubr.msk.bf16.mxu1 %vm3592_vm1, %v3591_v50  ;;  %v1527_v30 = vsel %vm205_vm0, %v1502_v29, 0.0 }
 0x3da   : > { %1528 = vadd.xlane.f32.xlu1 %v1527_v30 }
 0x3dc   : > { %v1586_v12 = vpop.permute.xlu0 %1585 }
 0x3e0   : > { %v1590_v53 = vpop.permute.xlu0 %1589 }
 0x48c   : > { %v4072_v32 = vpop.f32.mrb[8].mxu0 }
 0x48d   : > { %v3129_v33 = vpop.f32.mrb[9].mxu0 }
 0x48e   : > { %v4074_v34 = vpop.f32.mrb[10].mxu0 }
 0x48f   : > { %v3130_v36 = vpop.f32.mrb[11].mxu0 }
 0x490   : > { %v1588_v36 = vpop.permute.xlu1 %1587 }
 0x492   : > { %v4076_v19 = vpop.f32.mrb[8].mxu1 }
 0x493   : > { %v3135_v20 = vpop.f32.mrb[9].mxu1 }
 0x494   : > { %v4078_v38 = vpop.f32.mrb[10].mxu1  ;;  %v1613_v20 = vsel %vm205_vm0, %v1586_v12, 0.0 }
 0x495   : > { %v3136_v39 = vpop.f32.mrb[11].mxu1 }
 0x496   : > { %v4080_v40 = vpop.f32.mrb[12].mxu0 }
 0x497   : > { %v3141_v41 = vpop.f32.mrb[13].mxu0 }
 0x498   : > { %v4082_v54 = vpop.f32.mrb[14].mxu0  ;;  %v1506_v41 = vpop.permute.xlu0 %1505 }
 0x499   : > { %v3142_v42 = vpop.f32.mrb[15].mxu0 }
 0x49a   : > { %v4084_v43 = vpop.f32.mrb[12].mxu1  ;;  %v1530_v42 = vsel %vm205_vm0, %v1504_v1, 0.0 }
 0x49b   : > { %v3147_v57 = vpop.f32.mrb[13].mxu1 }
 0x49c   : > { %v4086_v61 = vpop.f32.mrb[14].mxu1  ;;  %v1619_v57 = vsel %vm205_vm0, %v1590_v53, 0.0 }
 0x49d   : > { %v3148_v44 = vpop.f32.mrb[15].mxu1 }
 0x49e   : > { %v1051_v45 = vpop.f32.mrb[16].mxu0  ;;  %v1616_v44 = vsel %vm205_vm0, %v1588_v36, 0.0 }
 0x49f   : > { %v4094_v47 = vadd.f32 %v1051_v45, %v191_v22  ;;  %v3153_v21 = vpop.f32.mrb[17].mxu0  ;;  %v1533_v45 = vsel %vm205_vm0, %v1506_v41, 0.0 }
 0x4a0   : > { %v1054_v31 = vpop.f32.mrb[18].mxu0 }
 0x4a1   : > { %v4096_v26 = vadd.f32 %v1054_v31, %v192_v46  ;;  %v3154_v48 = vpop.f32.mrb[19].mxu0  ;;  %v1217_v23 = vsel %vm556_vm2, %v4094_v47, -inf }
 0x4a2   : > { %1218 = vmax.xlane.f32.xlu0 %v1217_v23 }
 0x4a3   : > { %v1104_v13 = vpop.f32.mrb[16].mxu1  ;;  %v1220_v27 = vsel %vm556_vm2, %v4096_v26, -inf }
 0x4a4   : > { %v4102_v16 = vadd.f32 %v1104_v13, %v191_v22  ;;  %v3159_v49 = vpop.f32.mrb[17].mxu1  ;;  %1221 = vmax.xlane.f32.xlu1 %v1220_v27 }
 0x4a5   : > { %v1107_v25 = vpop.f32.mrb[18].mxu1 }
 0x4a6   : > { %v4104_v37 = vadd.f32 %v1107_v25, %v192_v46  ;;  %v3160_v18 = vpop.f32.mrb[19].mxu1  ;;  %v1157_v17 = vpop.f32.mrb[20].mxu0  ;;  %v1223_v51 = vsel %vm556_vm2, %v4102_v16, -inf }
 0x4a7   : > { %v4108_v0 = vadd.f32 %v1157_v17, %v191_v22  ;;  %1224 = vmax.xlane.f32.xlu0 %v1223_v51  ;;  %v3165_v2 = vpop.f32.mrb[21].mxu0 }
 0x4a8   : > { %v1160_v55 = vpop.f32.mrb[22].mxu0  ;;  %v1226_v24 = vsel %vm556_vm2, %v4104_v37, -inf }
 0x4a9   : > { %v3166_v56 = vpop.f32.mrb[23].mxu0  ;;  %v1229_v58 = vsel %vm556_vm2, %v4108_v0, -inf  ;;  %v4112_v35 = vadd.f32 %v1160_v55, %v192_v46 }
 0x4aa   : > { %1230 = vmax.xlane.f32.xlu1 %v1229_v58 }
 0x4ab   : > { %v1210_v5 = vpop.f32.mrb[20].mxu1  ;;  %1227 = vmax.xlane.f32.xlu0 %v1226_v24  ;;  %v1232_v33 = vsel %vm556_vm2, %v4112_v35, -inf }
 0x4ac   : > { %v4116_v28 = vadd.f32 %v1210_v5, %v191_v22  ;;  %v3171_v9 = vpop.f32.mrb[21].mxu1  ;;  %v1592_v22 = vpop.permute.xlu1 %1591 }
 0x4ad   : > { %v1213_v8 = vpop.f32.mrb[22].mxu1  ;;  %v1622_v31 = vsel %vm205_vm0, %v1592_v22, 0.0 }
 0x4ae   : > { %v4118_v29 = vadd.f32 %v1213_v8, %v192_v46  ;;  %v3172_v52 = vpop.f32.mrb[23].mxu1  ;;  %v1235_v30 = vsel %vm556_vm2, %v4116_v28, -inf  ;;  %v1510_v46 = vpop.permute.xlu0 %1509 }
 0x4af   : > { %1236 = vmax.xlane.f32.xlu1 %v1235_v30  ;;  %1233 = vmax.xlane.f32.xlu0 %v1232_v33  ;;  %v1539_v48 = vsel %vm205_vm0, %v1510_v46, 0.0 }
 0x4b0   : > { %v1238_v39 = vsel %vm556_vm2, %v4118_v29, -inf  ;;  %v1508_v21 = vpop.permute.xlu1 %1507 }
 0x4b1   : > { %v1536_v23 = vsel %vm205_vm0, %v1508_v21, 0.0 }
 0x4b2   : > { %v4139_v25 = vpop.xlane.xlu0 %1605 }
 0x4b3   : > { %1239 = vmax.xlane.f32.xlu0 %v1238_v39  ;;  %1614 = vadd.xlane.f32.xlu1 %v1613_v20 }
 0x4b4   : > { %v1512_v13 = vpop.permute.xlu1 %1511 }
 0x4b5   : > { %v1542_v27 = vsel %vm205_vm0, %v1512_v13, 0.0 }
 0x4b6   : > { %v1612_v17 = vpop.xlane.xlu0 %1611 }
 0x4b7   : > { %1531 = vadd.xlane.f32.xlu0 %v1530_v42  ;;  %1620 = vadd.xlane.f32.xlu1 %v1619_v57 }
 0x4b8   : > { %v1603_v49 = vpop.xlane.xlu1 %1602 }
 0x4ba   : > { %v4143_v2 = vpop.xlane.xlu0 %1525 }
 0x4bb   : > { %1617 = vadd.xlane.f32.xlu0 %v1616_v44  ;;  %1534 = vadd.xlane.f32.xlu1 %v1533_v45 }
 0x4bc   : > { %v1609_v18 = vpop.xlane.xlu1 %1608 }
 0x4bf   : > { %1623 = vadd.xlane.f32.xlu0 %v1622_v31  ;;  %1540 = vadd.xlane.f32.xlu1 %v1539_v48 }
 0x4c0   : > { %v4141_v51 = vpop.xlane.xlu1 %1522 }
 0x4c3   : > { %1537 = vadd.xlane.f32.xlu0 %v1536_v23 }
 0x4c4   : > { %v4145_v12 = vpop.xlane.xlu1 %1528 }
 0x4c7   : > { %1543 = vadd.xlane.f32.xlu0 %v1542_v27  ;;  %v1625_v27 = vadd.f32 1e-06, %v1603_v49  ;;  %v1626_v49 = vadd.f32 1e-06, %v4139_v25 }
 0x4d0   : > { %1309 = vrot.lane.b32.xlu1 %v3887_v59, %s3598_s8 }
 0x4d4   : > { %1403 = vrot.lane.b32.xlu1 %v3892_v60, %s3598_s8 }
 0x4d8   : > { %1450 = vrot.lane.b32.xlu1 %v3897_v62, %s3598_s8 }
 0x4dd   : > { %1356 = vrot.lane.b32.xlu0 %v3902_v63, %s3598_s8 }
 0x52f   : > { %v1219_v55 = vpop.xlane.xlu0 %1218 }
 0x530   : > { %v1241_v56 = vsub.f32 %v4094_v47, %v1219_v55 }
 0x531   : > { %v1222_v58 = vpop.xlane.xlu1 %1221 }
 0x532   : > { %v1249_v24 = vmul.f32 1.442695, %v1241_v56  ;;  %v1242_v5 = vsub.f32 %v4096_v26, %v1222_v58  ;;  %v1628_v58 = vadd.f32 1e-06, %v1612_v17 }
 0x534   : > { %3413 = vpow2.f32 %v1249_v24  ;;  %v1251_v1 = vmul.f32 1.442695, %v1242_v5  ;;  %v1225_v9 = vpop.xlane.xlu0 %1224 }
 0x535   : > { %v1243_v8 = vsub.f32 %v4102_v16, %v1225_v9 }
 0x536   : > { %3415 = vpow2.f32 %v1251_v1 }
 0x537   : > { %v1253_v53 = vmul.f32 1.442695, %v1243_v8  ;;  %v1231_v52 = vpop.xlane.xlu1 %1230 }
 0x538   : > { %v1228_v30 = vpop.xlane.xlu0 %1227  ;;  %v1245_v33 = vsub.f32 %v4108_v0, %v1231_v52 }
 0x539   : > { %3417 = vpow2.f32 %v1253_v53  ;;  %v1244_v36 = vsub.f32 %v4104_v37, %v1228_v30 }
 0x53a   : > { %v1257_v20 = vmul.f32 1.442695, %v1245_v33 }
 0x53b   : > { %v1255_v47 = vmul.f32 1.442695, %v1244_v36 }
 0x53c   : > { %3419 = vpow2.f32 %v1257_v20  ;;  %v1234_v39 = vpop.xlane.xlu0 %1233  ;;  %v1237_v41 = vpop.xlane.xlu1 %1236 }
 0x53d   : > { %3421 = vpow2.f32 %v1255_v47  ;;  %v1246_v26 = vsub.f32 %v4112_v35, %v1234_v39  ;;  %v1247_v42 = vsub.f32 %v4116_v28, %v1237_v41  ;;  %v1545_v39 = vadd.f32 1e-06, %v4141_v51 }
 0x53e   : > { %v4154_v16 = vpop.eup %3413  ;;  %v1546_v41 = vadd.f32 1e-06, %v4143_v2 }
 0x53f   : > { %v1259_v57 = vmul.f32 1.442695, %v1246_v26  ;;  %v1261_v22 = vmul.f32 1.442695, %v1247_v42  ;;  %v1265_v0 = vsel %vm556_vm2, %v4154_v16, 0.0 }
 0x540   : > { %v4158_v44 = vpop.eup %3415  ;;  %v1240_v37 = vpop.xlane.xlu0 %1239  ;;  %1266 = vadd.xlane.f32.xlu1 %v1265_v0 }
 0x541   : > { %v1615_v45 = vpop.xlane.xlu1 %1614  ;;  %3423 = vpow2.f32 %v1259_v57  ;;  %v1248_v46 = vsub.f32 %v4118_v29, %v1240_v37  ;;  %v1268_v35 = vsel %vm556_vm2, %v4158_v44, 0.0  ;;  %v1627_v29 = vadd.f32 1e-06, %v1609_v18 }
 0x542   : > { %3425 = vpow2.f32 %v1261_v22  ;;  %1269 = vadd.xlane.f32.xlu0 %v1268_v35  ;;  %v1629_v9 = vadd.f32 1e-06, %v1615_v45  ;;  %v1547_v22 = vadd.f32 1e-06, %v4145_v12 }
 0x543   : > { %v4163_v28 = vpop.eup %3417  ;;  %v1263_v21 = vmul.f32 1.442695, %v1248_v46 }
 0x544   : > { %v1532_v31 = vpop.xlane.xlu0 %1531  ;;  %v1271_v48 = vsel %vm556_vm2, %v4163_v28, 0.0 }
 0x545   : > { %v1621_v23 = vpop.xlane.xlu1 %1620  ;;  %3427 = vpow2.f32 %v1263_v21  ;;  %1272 = vadd.xlane.f32.xlu1 %v1271_v48  ;;  %v1548_v51 = vadd.f32 1e-06, %v1532_v31 }
 0x546   : > { %v4167_v13 = vpop.eup %3419  ;;  %3429 = vrsqrt.f32 %v1625_v27  ;;  %v1631_v30 = vadd.f32 1e-06, %v1621_v23 }
 0x547   : > { %v4169_v55 = vpop.eup %3421  ;;  %v1277_v56 = vsel %vm556_vm2, %v4167_v13, 0.0  ;;  %3431 = vrsqrt.f32 %v1627_v29  ;;  %v4193_v29 = vld [vmem:[%s3642_s18 + $0x10] sm:$0xff] }
 0x548   : > { %v1274_v24 = vsel %vm556_vm2, %v4169_v55, 0.0  ;;  %v1618_v5 = vpop.xlane.xlu0 %1617  ;;  %3433 = vrsqrt.f32 %v1628_v58 }
 0x549   : > { %v1535_v1 = vpop.xlane.xlu1 %1534  ;;  %1275 = vadd.xlane.f32.xlu0 %v1274_v24  ;;  %1278 = vadd.xlane.f32.xlu1 %v1277_v56  ;;  %v1630_v8 = vadd.f32 1e-06, %v1618_v5  ;;  %3435 = vrsqrt.f32 %v1629_v9  ;;  %v4197_v56 = vld [vmem:[%s3642_s18 + $0x18] sm:$0xff] }
 0x54a   : > { %v1549_v45 = vadd.f32 1e-06, %v1535_v1  ;;  %v4202_v1 = vld [vmem:[%s3642_s18 + $0x20] sm:$0xff] }
 0x54b   : > { %v4175_v53 = vpop.eup %3423  ;;  %3437 = vrsqrt.f32 %v1630_v8  ;;  %v4206_v8 = vld [vmem:[%s3642_s18 + $0x28] sm:$0xff] }
 0x54c   : > { %v4178_v18 = vpop.eup %3425  ;;  %v1280_v17 = vsel %vm556_vm2, %v4175_v53, 0.0  ;;  %v1624_v52 = vpop.xlane.xlu0 %1623  ;;  %3439 = vrsqrt.f32 %v1626_v49 }
 0x54d   : > { %v1541_v33 = vpop.xlane.xlu1 %1540  ;;  %1281 = vadd.xlane.f32.xlu0 %v1280_v17  ;;  %v1283_v36 = vsel %vm556_vm2, %v4178_v18, 0.0  ;;  %v1632_v20 = vadd.f32 1e-06, %v1624_v52  ;;  %3441 = vrsqrt.f32 %v1631_v30 }
 0x54e   : > { %1284 = vadd.xlane.f32.xlu1 %v1283_v36  ;;  %v1551_v47 = vadd.f32 1e-06, %v1541_v33 }
 0x54f   : > { %v4184_v25 = vpop.eup %3427  ;;  %3443 = vrsqrt.f32 %v1632_v20  ;;  %v4211_v20 = vld [vmem:[%s3642_s18 + $0x30] sm:$0xff] }
 0x550   : > { %v1286_v26 = vsel %vm556_vm2, %v4184_v25, 0.0  ;;  %v1538_v42 = vpop.xlane.xlu0 %1537  ;;  %3445 = vrsqrt.f32 %v1551_v47  ;;  %v3430_v0 = vpop.eup %3429 }
 0x551   : > { %v1310_v57 = vpop.permute.xlu1 %1309  ;;  %1287 = vadd.xlane.f32.xlu0 %v1286_v26  ;;  %3447 = vrsqrt.f32 %v1545_v39  ;;  %v3432_v37 = vpop.eup %3431  ;;  %v1550_v21 = vadd.f32 1e-06, %v1538_v42  ;;  %v4215_v39 = vld [vmem:[%s3642_s18 + $0x38] sm:$0xff] }
 0x552   : > { %3174 = vmatpush3.bf16.msra.mxu0 %v1310_v57  ;;  %3449 = vrsqrt.f32 %v1546_v41  ;;  %v3434_v35 = vpop.eup %3433  ;;  %v1643_v31 = vmul.f32 %v4193_v29, %v3432_v37 }
 0x553   : > { %3185 = vmatprep.subr.bf16.mxu0 %v3591_v50  ;;  %3451 = vrsqrt.f32 %v1547_v22  ;;  %v3436_v48 = vpop.eup %3435  ;;  %v1644_v58 = vmul.f32 %v4197_v56, %v3434_v35  ;;  %v4220_v22 = vld [vmem:[%s3642_s18] sm:$0xff] }
 0x554   : > { %v1544_v2 = vpop.xlane.xlu0 %1543  ;;  %v1645_v9 = vmul.f32 %v4202_v1, %v3436_v48 }
 0x555   : > { %v1552_v46 = vadd.f32 1e-06, %v1544_v2  ;;  %v3438_v12 = vpop.eup %3437  ;;  %v1654_v30 = vpack.c.bf16 %v1644_v58, %v1643_v31  ;;  %v4224_v2 = vld [vmem:[%s3642_s18 + $0x8] sm:$0xff] }
 0x556   : > { %v3440_v27 = vpop.eup %3439  ;;  %v1646_v49 = vmul.f32 %v4206_v8, %v3438_v12 }
 0x557   : > { %3453 = vrsqrt.f32 %v1552_v46  ;;  %v3442_v24 = vpop.eup %3441  ;;  %v1642_v37 = vmul.f32 %v4224_v2, %v3440_v27 }
 0x558   : > { %3455 = vrsqrt.f32 %v1548_v51  ;;  %v1357_v23 = vpop.permute.xlu0 %1356  ;;  %v1655_v36 = vpack.c.bf16 %v1646_v49, %v1645_v9  ;;  %v1647_v47 = vmul.f32 %v4211_v20, %v3442_v24  ;;  %v1641_v51 = vmul.f32 %v4220_v22, %v3430_v0 }
 0x559   : > { %3457 = vrsqrt.f32 %v1549_v45  ;;  %3180 = vmatpush3.bf16.msra.mxu1 %v1357_v23  ;;  %v3444_v5 = vpop.eup %3443  ;;  %v4234_v23 = vld [vmem:[%s4693_s1] ss:$0 sm:$0xff] }
 0x55a   : > { %3459 = vrsqrt.f32 %v1550_v21  ;;  %3191 = vmatprep.subr.bf16.mxu1 %v3591_v50  ;;  %v3446_v17 = vpop.eup %3445  ;;  %v1648_v41 = vmul.f32 %v4215_v39, %v3444_v5  ;;  %v1653_v58 = vpack.c.bf16 %v1642_v37, %v1641_v51 }
 0x55b   : > { %v3448_v52 = vpop.eup %3447  ;;  %v1567_v26 = vmul.f32 %v4211_v20, %v3446_v17 }
 0x55c   : > { %v3450_v33 = vpop.eup %3449  ;;  %v1561_v45 = vmul.f32 %v4220_v22, %v3448_v52  ;;  %v1656_v12 = vpack.c.bf16 %v1648_v41, %v1647_v47 }
 0x55d   : > { %v3452_v42 = vpop.eup %3451  ;;  %v1562_v46 = vmul.f32 %v4224_v2, %v3450_v33  ;;  %v1575_v0 = vmul.f32 %v4234_v23, %v1567_v26 }
 0x55e   : > { %v1569_v24 = vmul.f32 %v4234_v23, %v1561_v45  ;;  %v1563_v49 = vmul.f32 %v4193_v29, %v3452_v42 }
 0x55f   : > { %1714 = vrot.lane.b32.xlu1 %v1654_v30, %s3596_s29  ;;  %v1570_v5 = vmul.f32 %v4234_v23, %v1562_v46 }
 0x560   : > { %v1571_v47 = vmul.f32 %v4234_v23, %v1563_v49 }
 0x561   : > { %v3454_v57 = vpop.eup %3453  ;;  %v1649_v33 = vpack.c.bf16 %v1570_v5, %v1569_v24 }
 0x562   : > { %v3456_v35 = vpop.eup %3455  ;;  %v1568_v21 = vmul.f32 %v4215_v39, %v3454_v57 }
 0x563   : > { %v3458_v48 = vpop.eup %3457  ;;  %1767 = vrot.lane.b32.xlu1 %v1655_v36, %s3596_s29  ;;  %v1564_v9 = vmul.f32 %v4197_v56, %v3456_v35 }
 0x564   : > { %v3460_v31 = vpop.eup %3459  ;;  %v1576_v27 = vmul.f32 %v4234_v23, %v1568_v21  ;;  %v1565_v17 = vmul.f32 %v4202_v1, %v3458_v48 }
 0x565   : > { %v1566_v52 = vmul.f32 %v4206_v8, %v3460_v31  ;;  %v1572_v36 = vmul.f32 %v4234_v23, %v1564_v9 }
 0x566   : > { %v1652_v30 = vpack.c.bf16 %v1576_v27, %v1575_v0  ;;  %v1573_v41 = vmul.f32 %v4234_v23, %v1565_v17 }
 0x567   : > { %1661 = vrot.lane.b32.xlu0 %v1653_v58, %s3596_s29  ;;  %1820 = vrot.lane.b32.xlu1 %v1656_v12, %s3596_s29  ;;  %v1574_v26 = vmul.f32 %v4234_v23, %v1566_v52  ;;  %v1650_v42 = vpack.c.bf16 %v1572_v36, %v1571_v47 }
 0x569   : > { %v1651_v57 = vpack.c.bf16 %v1574_v26, %v1573_v41 }
 0x56b   : > { %1658 = vrot.lane.b32.xlu0 %v1649_v33, %s3597_s30  ;;  %1817 = vrot.lane.b32.xlu1 %v1652_v30, %s3597_s30 }
 0x56f   : > { %1711 = vrot.lane.b32.xlu0 %v1650_v42, %s3597_s30  ;;  %2231 = vrot.lane.b32.xlu1 %v3670_v6, %s3599_s11 }
 0x573   : > { %1764 = vrot.lane.b32.xlu0 %v1651_v57, %s3597_s30  ;;  %2235 = vrot.lane.b32.xlu1 %v3674_v7, %s3599_s11 }
 0x577   : > { %2229 = vrot.lane.b32.xlu0 %v3655_v3, %s3599_s11  ;;  %2151 = vrot.lane.b32.xlu1 %v3670_v6, %s3600_s13 }
 0x57b   : > { %2233 = vrot.lane.b32.xlu0 %v3659_v4, %s3599_s11  ;;  %2155 = vrot.lane.b32.xlu1 %v3674_v7, %s3600_s13 }
 0x57f   : > { %2149 = vrot.lane.b32.xlu0 %v3655_v3, %s3600_s13  ;;  %2239 = vrot.lane.b32.xlu1 %v3688_v10, %s3599_s11  ;;  %v1404_v3 = vpop.permute.xlu1 %1403 }
 0x583   : > { %2153 = vrot.lane.b32.xlu0 %v3659_v4, %s3600_s13  ;;  %2243 = vrot.lane.b32.xlu1 %v3706_v14, %s3599_s11  ;;  %v1451_v4 = vpop.permute.xlu1 %1450 }
 0x587   : > { %2237 = vrot.lane.b32.xlu0 %v3692_v11, %s3599_s11  ;;  %2159 = vrot.lane.b32.xlu1 %v3688_v10, %s3600_s13 }
 0x58b   : > { %2241 = vrot.lane.b32.xlu0 %v3710_v15, %s3599_s11  ;;  %2163 = vrot.lane.b32.xlu1 %v3706_v14, %s3600_s13 }
 0x58f   : > { %2157 = vrot.lane.b32.xlu0 %v3692_v11, %s3600_s13 }
 0x593   : > { %2161 = vrot.lane.b32.xlu0 %v3710_v15, %s3600_s13 }
 0x5cd   : > { %v1267_v6 = vpop.xlane.xlu1 %1266 }
 0x5ce   : > { %3461 = vrcp.f32 %v1267_v6 }
 0x5cf   : > { %v1270_v7 = vpop.xlane.xlu0 %1269 }
 0x5d0   : > { %3463 = vrcp.f32 %v1270_v7 }
 0x5d2   : > { %v1273_v51 = vpop.xlane.xlu1 %1272 }
 0x5d3   : > { %3465 = vrcp.f32 %v1273_v51 }
 0x5d6   : > { %v1276_v37 = vpop.xlane.xlu0 %1275  ;;  %v1279_v45 = vpop.xlane.xlu1 %1278 }
 0x5d7   : > { %3467 = vrcp.f32 %v1276_v37 }
 0x5d8   : > { %v3462_v10 = vpop.eup %3461  ;;  %3469 = vrcp.f32 %v1279_v45 }
 0x5d9   : > { %v1297_v14 = vmul.f32 %v3462_v10, %v4154_v16 }
 0x5da   : > { %v3464_v11 = vpop.eup %3463  ;;  %v1282_v46 = vpop.xlane.xlu0 %1281 }
 0x5db   : > { %v1298_v35 = vmul.f32 %v3464_v11, %v4158_v44  ;;  %3471 = vrcp.f32 %v1282_v46  ;;  %v1285_v15 = vpop.xlane.xlu1 %1284 }
 0x5dc   : > { %3473 = vrcp.f32 %v1285_v15 }
 0x5dd   : > { %v1305_v21 = vpack.c.bf16 %v1298_v35, %v1297_v14  ;;  %v3466_v12 = vpop.eup %3465 }
 0x5de   : > { %v1288_v48 = vpop.xlane.xlu0 %1287  ;;  %v1299_v16 = vmul.f32 %v3466_v12, %v4163_v28 }
 0x5df   : > { %3475 = vrcp.f32 %v1288_v48  ;;  %3176 = vmatmul.mubr.msk.bf16.vlgmr.msra.gmra.mrb[24].mxu0 %vm556_vm2, %v1305_v21  ;;  %v1715_v30 = vpop.permute.xlu1 %1714 }
 0x5e0   : > { %3186 = vmatpush3.bf16.msra.mxu0 %v1404_v3  ;;  %3187 = vmatprep.mubr.msk.bf16.mxu0 %vm3592_vm1, %v3591_v50  ;;  %v1720_v36 = vsel %vm205_vm0, %v1715_v30, 0 }
 0x5e1   : > { %v3468_v0 = vpop.eup %3467  ;;  %3197 = vmatprep.subr.bf16.mxu0 %v3591_v50 }
 0x5e2   : > { %v1300_v44 = vmul.f32 %v3468_v0, %v4169_v55  ;;  %v3470_v31 = vpop.eup %3469  ;;  %v1662_v49 = vpop.permute.xlu0 %1661 }
 0x5e3   : > { %v1301_v24 = vmul.f32 %v3470_v31, %v4167_v13  ;;  %v1667_v13 = vsel %vm205_vm0, %v1662_v49, 0  ;;  %v1768_v33 = vpop.permute.xlu1 %1767 }
 0x5e4   : > { %v1306_v27 = vpack.c.bf16 %v1300_v44, %v1299_v16 }
 0x5e5   : > { %v3472_v58 = vpop.eup %3471 }
 0x5e6   : > { %v1302_v5 = vmul.f32 %v3472_v58, %v4175_v53  ;;  %3182 = vmatmul.mubr.msk.bf16.vlgmr.msra.gmra.mrb[24].mxu1 %vm556_vm2, %v1306_v27  ;;  %v3474_v9 = vpop.eup %3473 }
 0x5e7   : > { %3192 = vmatpush3.bf16.msra.mxu1 %v1451_v4  ;;  %3193 = vmatprep.mubr.msk.bf16.mxu1 %vm3592_vm1, %v3591_v50  ;;  %v1303_v55 = vmul.f32 %v3474_v9, %v4178_v18  ;;  %v1659_v18 = vpop.permute.xlu0 %1658  ;;  %v1821_v47 = vpop.permute.xlu1 %1820 }
 0x5e8   : > { %v1307_v17 = vpack.c.bf16 %v1302_v5, %v1301_v24  ;;  %3203 = vmatprep.subr.bf16.mxu1 %v3591_v50  ;;  %v1826_v26 = vsel %vm205_vm0, %v1821_v47, 0 }
 0x5e9   : > { %v3476_v28 = vpop.eup %3475 }
 0x5ea   : > { %v1304_v52 = vmul.f32 %v3476_v28, %v4184_v25  ;;  %3188 = vmatmul.mubr.msk.bf16.vlgmr.msra.gmra.mrb[28].mxu0 %vm556_vm2, %v1307_v17  ;;  %v1773_v25 = vsel %vm205_vm0, %v1768_v33, 0 }
 0x5eb   : > { %3198 = vmatpush3.bf16.xpose.msra.mxu0 %v1667_v13  ;;  %3199 = vmatprep.mubr.msk.bf16.mxu0 %vm3592_vm1, %v3591_v50  ;;  %v1712_v41 = vpop.permute.xlu0 %1711  ;;  %v1818_v57 = vpop.permute.xlu1 %1817 }
 0x5ec   : > { %v1308_v53 = vpack.c.bf16 %v1304_v52, %v1303_v55  ;;  %3209 = vmatprep.subr.bf16.mxu0 %v3591_v50  ;;  %v193_v52 = vld [vmem:[%s4694_s2 + $0x20] sm:$0xff] }
 0x5ee   : > { %3194 = vmatmul.mubr.msk.bf16.vlgmr.msra.gmra.mrb[28].mxu1 %vm556_vm2, %v1308_v53  ;;  %v194_v53 = vld [vmem:[%s4694_s2 + $0x28] sm:$0xff] }
 0x5ef   : > { %3205 = vmatprep.mubr.msk.bf16.mxu1 %vm3592_vm1, %v3591_v50  ;;  %v1765_v42 = vpop.permute.xlu0 %1764  ;;  %v2232_v6 = vpop.permute.xlu1 %2231 }
 0x5f0   : > { %3204 = vmatpush3.bf16.xpose.msra.mxu1 %v1720_v36  ;;  %v2256_v51 = vsel %vm205_vm0, %v2232_v6, 0.0 }
 0x5f1   : > { %3215 = vmatprep.subr.bf16.mxu1 %v3591_v50  ;;  %2257 = vadd.xlane.f32.xlu0 %v2256_v51 }
 0x5f2   : > { %3200 = vmatmul.mubr.msk.bf16.vlgmr.msra.gmra.mrb[32].mxu0 %vm205_vm0, %v1659_v18 }
 0x5f3   : > { %3210 = vmatpush3.bf16.xpose.msra.mxu0 %v1773_v25  ;;  %3211 = vmatprep.mubr.msk.bf16.mxu0 %vm3592_vm1, %v3591_v50  ;;  %v2230_v3 = vpop.permute.xlu0 %2229  ;;  %v2236_v45 = vpop.permute.xlu1 %2235 }
 0x5f4   : > { %3221 = vmatprep.subr.bf16.mxu0 %v3591_v50  ;;  %v2253_v4 = vsel %vm205_vm0, %v2230_v3, 0.0  ;;  %v2262_v11 = vsel %vm205_vm0, %v2236_v45, 0.0 }
 0x5f5   : > { %2254 = vadd.xlane.f32.xlu1 %v2253_v4  ;;  %2263 = vadd.xlane.f32.xlu0 %v2262_v11 }
 0x5f7   : > { %3206 = vmatmul.mubr.msk.bf16.vlgmr.msra.gmra.mrb[32].mxu1 %vm205_vm0, %v1712_v41  ;;  %v2234_v7 = vpop.permute.xlu0 %2233  ;;  %v2152_v14 = vpop.permute.xlu1 %2151 }
 0x5f8   : > { %3216 = vmatpush3.bf16.xpose.msra.mxu1 %v1826_v26  ;;  %3217 = vmatprep.mubr.msk.bf16.mxu1 %vm3592_vm1, %v3591_v50  ;;  %v2259_v37 = vsel %vm205_vm0, %v2234_v7, 0.0  ;;  %v2176_v21 = vsel %vm205_vm0, %v2152_v14, 0.0 }
 0x5f9   : > { %3227 = vmatprep.subr.bf16.mxu1 %v3591_v50  ;;  %2260 = vadd.xlane.f32.xlu1 %v2259_v37 }
 0x5fa   : > { %3212 = vmatmul.mubr.msk.bf16.vlgmr.msra.gmra.mrb[36].mxu0 %vm205_vm0, %v1765_v42  ;;  %2177 = vadd.xlane.f32.xlu0 %v2176_v21 }
 0x5fb   : > { %3223 = vmatprep.mubr.msk.bf16.mxu0 %vm3592_vm1, %v3591_v50  ;;  %v2150_v10 = vpop.permute.xlu0 %2149 }
 0x5fc   : > { %v2173_v46 = vsel %vm205_vm0, %v2150_v10, 0.0 }
 0x5fd   : > { %2174 = vadd.xlane.f32.xlu1 %v2173_v46 }
 0x5ff   : > { %3218 = vmatmul.mubr.msk.bf16.vlgmr.msra.gmra.mrb[36].mxu1 %vm205_vm0, %v1818_v57  ;;  %v2154_v35 = vpop.permute.xlu0 %2153 }
 0x600   : > { %3229 = vmatprep.mubr.msk.bf16.mxu1 %vm3592_vm1, %v3591_v50  ;;  %v2179_v15 = vsel %vm205_vm0, %v2154_v35, 0.0 }
 0x601   : > { %2180 = vadd.xlane.f32.xlu1 %v2179_v15 }
 0x603   : > { %v2238_v11 = vpop.permute.xlu0 %2237 }
 0x6b2   : > { %v4335_v48 = vpop.f32.mrb[24].mxu0 }
 0x6b3   : > { %v3177_v12 = vpop.f32.mrb[25].mxu0 }
 0x6b4   : > { %v4337_v0 = vpop.f32.mrb[26].mxu0 }
 0x6b5   : > { %v3178_v16 = vpop.f32.mrb[27].mxu0 }
 0x6b6   : > { %v2156_v16 = vpop.permute.xlu1 %2155 }
 0x6b9   : > { %v4339_v44 = vpop.f32.mrb[24].mxu1 }
 0x6ba   : > { %v3183_v31 = vpop.f32.mrb[25].mxu1 }
 0x6bb   : > { %v4341_v27 = vpop.f32.mrb[26].mxu1 }
 0x6bc   : > { %v3184_v58 = vpop.f32.mrb[27].mxu1 }
 0x6bd   : > { %v4343_v24 = vpop.f32.mrb[28].mxu0 }
 0x6be   : > { %v3189_v5 = vpop.f32.mrb[29].mxu0 }
 0x6bf   : > { %v4345_v9 = vpop.f32.mrb[30].mxu0 }
 0x6c0   : > { %v3190_v49 = vpop.f32.mrb[31].mxu0 }
 0x6c1   : > { %v4347_v17 = vpop.f32.mrb[28].mxu1  ;;  %v2242_v49 = vpop.permute.xlu0 %2241 }
 0x6c2   : > { %v3195_v28 = vpop.f32.mrb[29].mxu1 }
 0x6c3   : > { %v4349_v55 = vpop.f32.mrb[30].mxu1 }
 0x6c4   : > { %v3196_v30 = vpop.f32.mrb[31].mxu1 }
 0x6c5   : > { %v1703_v13 = vpop.f32.mrb[32].mxu0 }
 0x6c6   : > { %v4357_v33 = vadd.f32 %v1703_v13, %v193_v52  ;;  %v3201_v36 = vpop.f32.mrb[33].mxu0 }
 0x6c7   : > { %v1706_v18 = vpop.f32.mrb[34].mxu0 }
 0x6c8   : > { %v4359_v25 = vadd.f32 %v1706_v18, %v194_v53  ;;  %v3202_v47 = vpop.f32.mrb[35].mxu0  ;;  %v1869_v41 = vsel %vm556_vm2, %v4357_v33, -inf  ;;  %v2240_v18 = vpop.permute.xlu1 %2239 }
 0x6c9   : > { %1870 = vmax.xlane.f32.xlu0 %v1869_v41  ;;  %v2265_v47 = vsel %vm205_vm0, %v2238_v11, 0.0  ;;  %v2158_v41 = vpop.permute.xlu0 %2157 }
 0x6ca   : > { %v1756_v26 = vpop.f32.mrb[32].mxu1  ;;  %v1872_v42 = vsel %vm556_vm2, %v4359_v25, -inf }
 0x6cb   : > { %v4365_v57 = vadd.f32 %v1756_v26, %v193_v52  ;;  %v3207_v3 = vpop.f32.mrb[33].mxu1  ;;  %1873 = vmax.xlane.f32.xlu1 %v1872_v42  ;;  %v2271_v26 = vsel %vm205_vm0, %v2242_v49, 0.0 }
 0x6cc   : > { %v1759_v4 = vpop.f32.mrb[34].mxu1  ;;  %v2244_v42 = vpop.permute.xlu1 %2243  ;;  %v2268_v3 = vsel %vm205_vm0, %v2240_v18, 0.0 }
 0x6cd   : > { %v4367_v6 = vadd.f32 %v1759_v4, %v194_v53  ;;  %v3208_v7 = vpop.f32.mrb[35].mxu1  ;;  %v1809_v51 = vpop.f32.mrb[36].mxu0  ;;  %v1875_v37 = vsel %vm556_vm2, %v4365_v57, -inf  ;;  %v2185_v4 = vsel %vm205_vm0, %v2158_v41, 0.0 }
 0x6ce   : > { %v4371_v45 = vadd.f32 %v1809_v51, %v193_v52  ;;  %1876 = vmax.xlane.f32.xlu0 %v1875_v37  ;;  %v3213_v10 = vpop.f32.mrb[37].mxu0  ;;  %v2162_v7 = vpop.permute.xlu0 %2161  ;;  %v2274_v37 = vsel %vm205_vm0, %v2244_v42, 0.0 }
 0x6cf   : > { %v1812_v46 = vpop.f32.mrb[38].mxu0  ;;  %v1878_v21 = vsel %vm556_vm2, %v4367_v6, -inf  ;;  %v2191_v10 = vsel %vm205_vm0, %v2162_v7, 0.0 }
 0x6d0   : > { %v3214_v14 = vpop.f32.mrb[39].mxu0  ;;  %v1881_v35 = vsel %vm556_vm2, %v4371_v45, -inf  ;;  %v4375_v15 = vadd.f32 %v1812_v46, %v194_v53  ;;  %v2160_v51 = vpop.permute.xlu1 %2159 }
 0x6d1   : > { %1882 = vmax.xlane.f32.xlu1 %v1881_v35  ;;  %v2188_v11 = vsel %vm205_vm0, %v2160_v51, 0.0 }
 0x6d2   : > { %v1862_v12 = vpop.f32.mrb[36].mxu1  ;;  %1879 = vmax.xlane.f32.xlu0 %v1878_v21  ;;  %v1884_v36 = vsel %vm556_vm2, %v4375_v15, -inf  ;;  %v4402_v21 = vpop.xlane.xlu0 %2257 }
 0x6d3   : > { %v4379_v31 = vadd.f32 %v1862_v12, %v193_v52  ;;  %v3219_v58 = vpop.f32.mrb[37].mxu1 }
 0x6d4   : > { %v1865_v5 = vpop.f32.mrb[38].mxu1  ;;  %v2164_v46 = vpop.permute.xlu1 %2163 }
 0x6d5   : > { %v4381_v28 = vadd.f32 %v1865_v5, %v194_v53  ;;  %v3220_v30 = vpop.f32.mrb[39].mxu1  ;;  %v1887_v13 = vsel %vm556_vm2, %v4379_v31, -inf  ;;  %v2182_v53 = vsel %vm205_vm0, %v2156_v16, 0.0  ;;  %v2194_v14 = vsel %vm205_vm0, %v2164_v46, 0.0 }
 0x6d6   : > { %1888 = vmax.xlane.f32.xlu1 %v1887_v13  ;;  %1885 = vmax.xlane.f32.xlu0 %v1884_v36  ;;  %v2264_v16 = vpop.xlane.xlu0 %2263 }
 0x6d7   : > { %v1890_v52 = vsel %vm556_vm2, %v4381_v28, -inf }
 0x6d8   : > { %v2255_v35 = vpop.xlane.xlu1 %2254 }
 0x6da   : > { %1891 = vmax.xlane.f32.xlu0 %v1890_v52  ;;  %2266 = vadd.xlane.f32.xlu1 %v2265_v47  ;;  %v4406_v5 = vpop.xlane.xlu0 %2177 }
 0x6dc   : > { %v2261_v12 = vpop.xlane.xlu1 %2260 }
 0x6de   : > { %2183 = vadd.xlane.f32.xlu0 %v2182_v53  ;;  %2272 = vadd.xlane.f32.xlu1 %v2271_v26 }
 0x6e0   : > { %v4404_v58 = vpop.xlane.xlu1 %2174 }
 0x6e2   : > { %2269 = vadd.xlane.f32.xlu0 %v2268_v3  ;;  %2186 = vadd.xlane.f32.xlu1 %v2185_v4 }
 0x6e4   : > { %v4408_v49 = vpop.xlane.xlu1 %2180 }
 0x6e6   : > { %2275 = vadd.xlane.f32.xlu0 %v2274_v37  ;;  %2192 = vadd.xlane.f32.xlu1 %v2191_v10 }
 0x6ea   : > { %2189 = vadd.xlane.f32.xlu0 %v2188_v11 }
 0x6ee   : > { %2195 = vadd.xlane.f32.xlu0 %v2194_v14 }
 0x6f7   : > { %1961 = vrot.lane.b32.xlu1 %v3887_v59, %s3601_s20 }
 0x6fb   : > { %2055 = vrot.lane.b32.xlu1 %v3892_v60, %s3601_s20 }
 0x6ff   : > { %2102 = vrot.lane.b32.xlu1 %v3897_v62, %s3601_s20 }
 0x704   : > { %2008 = vrot.lane.b32.xlu0 %v3902_v63, %s3601_s20 }
 0x756   : > { %v1871_v30 = vpop.xlane.xlu0 %1870 }
 0x757   : > { %v1893_v13 = vsub.f32 %v4357_v33, %v1871_v30 }
 0x758   : > { %v1874_v36 = vpop.xlane.xlu1 %1873 }
 0x759   : > { %v1901_v18 = vmul.f32 1.442695, %v1893_v13  ;;  %v1894_v47 = vsub.f32 %v4359_v25, %v1874_v36 }
 0x75b   : > { %3477 = vpow2.f32 %v1901_v18  ;;  %v1903_v52 = vmul.f32 1.442695, %v1894_v47  ;;  %v1877_v41 = vpop.xlane.xlu0 %1876 }
 0x75c   : > { %v1895_v53 = vsub.f32 %v4365_v57, %v1877_v41 }
 0x75d   : > { %3479 = vpow2.f32 %v1903_v52 }
 0x75e   : > { %v1905_v26 = vmul.f32 1.442695, %v1895_v53  ;;  %v1883_v42 = vpop.xlane.xlu1 %1882 }
 0x75f   : > { %v1880_v3 = vpop.xlane.xlu0 %1879  ;;  %v1897_v4 = vsub.f32 %v4371_v45, %v1883_v42 }
 0x760   : > { %3481 = vpow2.f32 %v1905_v26  ;;  %v1896_v7 = vsub.f32 %v4367_v6, %v1880_v3  ;;  %v2277_v26 = vadd.f32 1e-06, %v2255_v35  ;;  %v2278_v35 = vadd.f32 1e-06, %v4402_v21 }
 0x761   : > { %v1909_v51 = vmul.f32 1.442695, %v1897_v4  ;;  %v2280_v4 = vadd.f32 1e-06, %v2264_v16 }
 0x762   : > { %v1907_v33 = vmul.f32 1.442695, %v1896_v7 }
 0x763   : > { %3483 = vpow2.f32 %v1909_v51  ;;  %v1886_v37 = vpop.xlane.xlu0 %1885  ;;  %v1889_v10 = vpop.xlane.xlu1 %1888 }
 0x764   : > { %3485 = vpow2.f32 %v1907_v33  ;;  %v1898_v25 = vsub.f32 %v4375_v15, %v1886_v37  ;;  %v1899_v11 = vsub.f32 %v4379_v31, %v1889_v10 }
 0x765   : > { %v4417_v57 = vpop.eup %3477 }
 0x766   : > { %v1911_v46 = vmul.f32 1.442695, %v1898_v25  ;;  %v1913_v14 = vmul.f32 1.442695, %v1899_v11  ;;  %v1917_v45 = vsel %vm556_vm2, %v4417_v57, 0.0 }
 0x767   : > { %v4421_v30 = vpop.eup %3479  ;;  %v1892_v6 = vpop.xlane.xlu0 %1891  ;;  %1918 = vadd.xlane.f32.xlu1 %v1917_v45 }
 0x768   : > { %v2267_v13 = vpop.xlane.xlu1 %2266  ;;  %3487 = vpow2.f32 %v1911_v46  ;;  %v1900_v36 = vsub.f32 %v4381_v28, %v1892_v6  ;;  %v1920_v15 = vsel %vm556_vm2, %v4421_v30, 0.0  ;;  %v2279_v28 = vadd.f32 1e-06, %v2261_v12 }
 0x769   : > { %3489 = vpow2.f32 %v1913_v14  ;;  %1921 = vadd.xlane.f32.xlu0 %v1920_v15  ;;  %v2281_v37 = vadd.f32 1e-06, %v2267_v13  ;;  %v2198_v15 = vadd.f32 1e-06, %v4406_v5 }
 0x76a   : > { %v4426_v31 = vpop.eup %3481  ;;  %v1915_v18 = vmul.f32 1.442695, %v1900_v36  ;;  %v2197_v36 = vadd.f32 1e-06, %v4404_v58 }
 0x76b   : > { %v2184_v47 = vpop.xlane.xlu0 %2183  ;;  %v1923_v52 = vsel %vm556_vm2, %v4426_v31, 0.0 }
 0x76c   : > { %v2273_v41 = vpop.xlane.xlu1 %2272  ;;  %3491 = vpow2.f32 %v1915_v18  ;;  %1924 = vadd.xlane.f32.xlu1 %v1923_v52  ;;  %v2200_v58 = vadd.f32 1e-06, %v2184_v47 }
 0x76d   : > { %v4430_v53 = vpop.eup %3483  ;;  %3493 = vrsqrt.f32 %v2277_v26  ;;  %v2283_v46 = vadd.f32 1e-06, %v2273_v41  ;;  %v2199_v26 = vadd.f32 1e-06, %v4408_v49 }
 0x76e   : > { %v4432_v42 = vpop.eup %3485  ;;  %v1929_v3 = vsel %vm556_vm2, %v4430_v53, 0.0  ;;  %3495 = vrsqrt.f32 %v2279_v28 }
 0x76f   : > { %v1926_v7 = vsel %vm556_vm2, %v4432_v42, 0.0  ;;  %v2270_v51 = vpop.xlane.xlu0 %2269  ;;  %3497 = vrsqrt.f32 %v2280_v4 }
 0x770   : > { %v2187_v33 = vpop.xlane.xlu1 %2186  ;;  %1927 = vadd.xlane.f32.xlu0 %v1926_v7  ;;  %1930 = vadd.xlane.f32.xlu1 %v1929_v3  ;;  %v2282_v10 = vadd.f32 1e-06, %v2270_v51  ;;  %3499 = vrsqrt.f32 %v2281_v37 }
 0x771   : > { %v2201_v4 = vadd.f32 1e-06, %v2187_v33 }
 0x772   : > { %v4438_v25 = vpop.eup %3487  ;;  %3501 = vrsqrt.f32 %v2282_v10 }
 0x773   : > { %v4441_v12 = vpop.eup %3489  ;;  %v1932_v16 = vsel %vm556_vm2, %v4438_v25, 0.0  ;;  %v2276_v11 = vpop.xlane.xlu0 %2275  ;;  %3503 = vrsqrt.f32 %v2278_v35 }
 0x774   : > { %v2193_v14 = vpop.xlane.xlu1 %2192  ;;  %1933 = vadd.xlane.f32.xlu0 %v1932_v16  ;;  %v1935_v45 = vsel %vm556_vm2, %v4441_v12, 0.0  ;;  %v2284_v6 = vadd.f32 1e-06, %v2276_v11  ;;  %3505 = vrsqrt.f32 %v2283_v46 }
 0x775   : > { %1936 = vadd.xlane.f32.xlu1 %v1935_v45  ;;  %v2203_v13 = vadd.f32 1e-06, %v2193_v14 }
 0x776   : > { %v4447_v21 = vpop.eup %3491  ;;  %3507 = vrsqrt.f32 %v2284_v6 }
 0x777   : > { %v1938_v18 = vsel %vm556_vm2, %v4447_v21, 0.0  ;;  %v2190_v52 = vpop.xlane.xlu0 %2189  ;;  %3509 = vrsqrt.f32 %v2203_v13  ;;  %v3494_v28 = vpop.eup %3493 }
 0x778   : > { %v1962_v41 = vpop.permute.xlu1 %1961  ;;  %1939 = vadd.xlane.f32.xlu0 %v1938_v18  ;;  %3511 = vrsqrt.f32 %v2197_v36  ;;  %v3496_v5 = vpop.eup %3495  ;;  %v2202_v37 = vadd.f32 1e-06, %v2190_v52 }
 0x779   : > { %3222 = vmatpush3.bf16.msra.mxu0 %v1962_v41  ;;  %3513 = vrsqrt.f32 %v2198_v15  ;;  %v3498_v51 = vpop.eup %3497  ;;  %v2295_v11 = vmul.f32 %v4193_v29, %v3496_v5  ;;  %v2293_v5 = vmul.f32 %v4220_v22, %v3494_v28 }
 0x77a   : > { %3233 = vmatprep.subr.bf16.mxu0 %v3591_v50  ;;  %3515 = vrsqrt.f32 %v2199_v26  ;;  %v3500_v10 = vpop.eup %3499  ;;  %v2296_v46 = vmul.f32 %v4197_v56, %v3498_v51 }
 0x77b   : > { %v2196_v3 = vpop.xlane.xlu0 %2195  ;;  %v2297_v14 = vmul.f32 %v4202_v1, %v3500_v10 }
 0x77c   : > { %v2204_v7 = vadd.f32 1e-06, %v2196_v3  ;;  %v3502_v35 = vpop.eup %3501  ;;  %v2306_v36 = vpack.c.bf16 %v2296_v46, %v2295_v11 }
 0x77d   : > { %v3504_v49 = vpop.eup %3503  ;;  %v2298_v45 = vmul.f32 %v4206_v8, %v3502_v35 }
 0x77e   : > { %3517 = vrsqrt.f32 %v2204_v7  ;;  %v3506_v47 = vpop.eup %3505 }
 0x77f   : > { %3519 = vrsqrt.f32 %v2200_v58  ;;  %v2009_v16 = vpop.permute.xlu0 %2008  ;;  %v2307_v18 = vpack.c.bf16 %v2298_v45, %v2297_v14  ;;  %v2299_v52 = vmul.f32 %v4211_v20, %v3506_v47 }
 0x780   : > { %3521 = vrsqrt.f32 %v2201_v4  ;;  %3228 = vmatpush3.bf16.msra.mxu1 %v2009_v16  ;;  %v3508_v33 = vpop.eup %3507  ;;  %v2294_v4 = vmul.f32 %v4224_v2, %v3504_v49 }
 0x781   : > { %3523 = vrsqrt.f32 %v2202_v37  ;;  %3239 = vmatprep.subr.bf16.mxu1 %v3591_v50  ;;  %v3510_v6 = vpop.eup %3509  ;;  %v2300_v41 = vmul.f32 %v4215_v39, %v3508_v33 }
 0x782   : > { %v3512_v13 = vpop.eup %3511  ;;  %v2219_v26 = vmul.f32 %v4211_v20, %v3510_v6  ;;  %v2305_v47 = vpack.c.bf16 %v2294_v4, %v2293_v5 }
 0x783   : > { %v3514_v15 = vpop.eup %3513  ;;  %v2213_v7 = vmul.f32 %v4220_v22, %v3512_v13  ;;  %v2308_v16 = vpack.c.bf16 %v2300_v41, %v2299_v52 }
 0x784   : > { %v3516_v58 = vpop.eup %3515  ;;  %v2214_v51 = vmul.f32 %v4224_v2, %v3514_v15  ;;  %v2227_v11 = vmul.f32 %v4234_v23, %v2219_v26 }
 0x785   : > { %v2221_v28 = vmul.f32 %v4234_v23, %v2213_v7  ;;  %v2215_v2 = vmul.f32 %v4193_v29, %v3516_v58 }
 0x786   : > { %2366 = vrot.lane.b32.xlu1 %v2306_v36, %s3599_s11  ;;  %v2222_v49 = vmul.f32 %v4234_v23, %v2214_v51 }
 0x787   : > { %v2223_v13 = vmul.f32 %v4234_v23, %v2215_v2 }
 0x788   : > { %v3518_v3 = vpop.eup %3517  ;;  %v2301_v45 = vpack.c.bf16 %v2222_v49, %v2221_v28 }
 0x789   : > { %v3520_v37 = vpop.eup %3519  ;;  %v2220_v10 = vmul.f32 %v4215_v39, %v3518_v3 }
 0x78a   : > { %v3522_v35 = vpop.eup %3521  ;;  %2419 = vrot.lane.b32.xlu1 %v2307_v18, %s3599_s11  ;;  %v2216_v22 = vmul.f32 %v4197_v56, %v3520_v37 }
 0x78b   : > { %v3524_v20 = vpop.eup %3523  ;;  %v2228_v46 = vmul.f32 %v4234_v23, %v2220_v10  ;;  %v2217_v39 = vmul.f32 %v4202_v1, %v3522_v35 }
 0x78c   : > { %v2218_v33 = vmul.f32 %v4206_v8, %v3524_v20  ;;  %v2224_v6 = vmul.f32 %v4234_v23, %v2216_v22  ;;  %v2056_v8 = vpop.permute.xlu1 %2055 }
 0x78d   : > { %v2304_v14 = vpack.c.bf16 %v2228_v46, %v2227_v11  ;;  %v2225_v56 = vmul.f32 %v4234_v23, %v2217_v39 }
 0x78e   : > { %2313 = vrot.lane.b32.xlu0 %v2305_v47, %s3599_s11  ;;  %2472 = vrot.lane.b32.xlu1 %v2308_v16, %s3599_s11  ;;  %v2226_v29 = vmul.f32 %v4234_v23, %v2218_v33  ;;  %v2302_v36 = vpack.c.bf16 %v2224_v6, %v2223_v13 }
 0x790   : > { %v2303_v1 = vpack.c.bf16 %v2226_v29, %v2225_v56  ;;  %v2103_v15 = vpop.permute.xlu1 %2102 }
 0x792   : > { %2310 = vrot.lane.b32.xlu0 %v2301_v45, %s3600_s13  ;;  %2469 = vrot.lane.b32.xlu1 %v2304_v14, %s3600_s13 }
 0x796   : > { %2363 = vrot.lane.b32.xlu0 %v2302_v36, %s3600_s13 }
 0x79a   : > { %2416 = vrot.lane.b32.xlu0 %v2303_v1, %s3600_s13 }
 0x7f4   : > { %v1919_v18 = vpop.xlane.xlu1 %1918 }
 0x7f5   : > { %3525 = vrcp.f32 %v1919_v18 }
 0x7f6   : > { %v1922_v52 = vpop.xlane.xlu0 %1921 }
 0x7f7   : > { %3527 = vrcp.f32 %v1922_v52 }
 0x7f9   : > { %v1925_v41 = vpop.xlane.xlu1 %1924 }
 0x7fa   : > { %3529 = vrcp.f32 %v1925_v41 }
 0x7fd   : > { %v1928_v26 = vpop.xlane.xlu0 %1927  ;;  %v1931_v58 = vpop.xlane.xlu1 %1930 }
 0x7fe   : > { %3531 = vrcp.f32 %v1928_v26 }
 0x7ff   : > { %v3526_v23 = vpop.eup %3525  ;;  %3533 = vrcp.f32 %v1931_v58 }
 0x800   : > { %v1949_v4 = vmul.f32 %v3526_v23, %v4417_v57 }
 0x801   : > { %v3528_v3 = vpop.eup %3527  ;;  %v1934_v5 = vpop.xlane.xlu0 %1933 }
 0x802   : > { %v1950_v7 = vmul.f32 %v3528_v3, %v4421_v30  ;;  %3535 = vrcp.f32 %v1934_v5  ;;  %v1937_v51 = vpop.xlane.xlu1 %1936 }
 0x803   : > { %3537 = vrcp.f32 %v1937_v51 }
 0x804   : > { %v1957_v37 = vpack.c.bf16 %v1950_v7, %v1949_v4  ;;  %v3530_v35 = vpop.eup %3529 }
 0x805   : > { %v1940_v10 = vpop.xlane.xlu0 %1939  ;;  %v1951_v57 = vmul.f32 %v3530_v35, %v4426_v31 }
 0x806   : > { %3539 = vrcp.f32 %v1940_v10  ;;  %3224 = vmatmul.mubr.msk.bf16.vlgmr.msra.gmra.mrb[40].mxu0 %vm556_vm2, %v1957_v37  ;;  %v2367_v33 = vpop.permute.xlu1 %2366  ;;  %v195_v10 = vld [vmem:[%s4694_s2 + $0x30] sm:$0xff] }
 0x807   : > { %3234 = vmatpush3.bf16.msra.mxu0 %v2056_v8  ;;  %3235 = vmatprep.mubr.msk.bf16.mxu0 %vm3592_vm1, %v3591_v50  ;;  %v2372_v45 = vsel %vm205_vm0, %v2367_v33, 0 }
 0x808   : > { %v3532_v16 = vpop.eup %3531  ;;  %3245 = vmatprep.subr.bf16.mxu0 %v3591_v50 }
 0x809   : > { %v1952_v30 = vmul.f32 %v3532_v16, %v4432_v42  ;;  %v3534_v11 = vpop.eup %3533  ;;  %v2314_v22 = vpop.permute.xlu0 %2313 }
 0x80a   : > { %v1953_v47 = vmul.f32 %v3534_v11, %v4430_v53  ;;  %v2319_v53 = vsel %vm205_vm0, %v2314_v22, 0  ;;  %v2420_v14 = vpop.permute.xlu1 %2419 }
 0x80b   : > { %v1958_v20 = vpack.c.bf16 %v1952_v30, %v1951_v57  ;;  %v196_v57 = vld [vmem:[%s4694_s2 + $0x38] sm:$0xff] }
 0x80c   : > { %v3536_v46 = vpop.eup %3535 }
 0x80d   : > { %v1954_v28 = vmul.f32 %v3536_v46, %v4438_v25  ;;  %3230 = vmatmul.mubr.msk.bf16.vlgmr.msra.gmra.mrb[40].mxu1 %vm556_vm2, %v1958_v20  ;;  %v3538_v49 = vpop.eup %3537 }
 0x80e   : > { %3240 = vmatpush3.bf16.msra.mxu1 %v2103_v15  ;;  %3241 = vmatprep.mubr.msk.bf16.mxu1 %vm3592_vm1, %v3591_v50  ;;  %v1955_v42 = vmul.f32 %v3538_v49, %v4441_v12  ;;  %v2311_v12 = vpop.permute.xlu0 %2310  ;;  %v2473_v6 = vpop.permute.xlu1 %2472 }
 0x80f   : > { %v1959_v2 = vpack.c.bf16 %v1954_v28, %v1953_v47  ;;  %3251 = vmatprep.subr.bf16.mxu1 %v3591_v50  ;;  %v2478_v56 = vsel %vm205_vm0, %v2473_v6, 0 }
 0x810   : > { %v3540_v31 = vpop.eup %3539 }
 0x811   : > { %v1956_v39 = vmul.f32 %v3540_v31, %v4447_v21  ;;  %3236 = vmatmul.mubr.msk.bf16.vlgmr.msra.gmra.mrb[44].mxu0 %vm556_vm2, %v1959_v2  ;;  %v2425_v21 = vsel %vm205_vm0, %v2420_v14, 0 }
 0x812   : > { %3246 = vmatpush3.bf16.xpose.msra.mxu0 %v2319_v53  ;;  %3247 = vmatprep.mubr.msk.bf16.mxu0 %vm3592_vm1, %v3591_v50  ;;  %v2364_v13 = vpop.permute.xlu0 %2363  ;;  %v2470_v36 = vpop.permute.xlu1 %2469 }
 0x813   : > { %v1960_v25 = vpack.c.bf16 %v1956_v39, %v1955_v42  ;;  %3257 = vmatprep.subr.bf16.mxu0 %v3591_v50 }
 0x815   : > { %3242 = vmatmul.mubr.msk.bf16.vlgmr.msra.gmra.mrb[44].mxu1 %vm556_vm2, %v1960_v25 }
 0x816   : > { %3253 = vmatprep.mubr.msk.bf16.mxu1 %vm3592_vm1, %v3591_v50  ;;  %v2417_v29 = vpop.permute.xlu0 %2416 }
 0x817   : > { %3252 = vmatpush3.bf16.xpose.msra.mxu1 %v2372_v45 }
 0x818   : > { %3263 = vmatprep.subr.bf16.mxu1 %v3591_v50 }
 0x819   : > { %3248 = vmatmul.mubr.msk.bf16.vlgmr.msra.gmra.mrb[48].mxu0 %vm205_vm0, %v2311_v12 }
 0x81a   : > { %3258 = vmatpush3.bf16.xpose.msra.mxu0 %v2425_v21  ;;  %3259 = vmatprep.mubr.msk.bf16.mxu0 %vm3592_vm1, %v3591_v50 }
 0x81b   : > { %3269 = vmatprep.subr.bf16.mxu0 %v3591_v50 }
 0x81e   : > { %3254 = vmatmul.mubr.msk.bf16.vlgmr.msra.gmra.mrb[48].mxu1 %vm205_vm0, %v2364_v13 }
 0x81f   : > { %3264 = vmatpush3.bf16.xpose.msra.mxu1 %v2478_v56  ;;  %3265 = vmatprep.mubr.msk.bf16.mxu1 %vm3592_vm1, %v3591_v50 }
 0x820   : > { %3275 = vmatprep.subr.bf16.mxu1 %v3591_v50 }
 0x821   : > { %3260 = vmatmul.mubr.msk.bf16.vlgmr.msra.gmra.mrb[52].mxu0 %vm205_vm0, %v2417_v29 }
 0x822   : > { %3271 = vmatprep.mubr.msk.bf16.mxu0 %vm3592_vm1, %v3591_v50 }
 0x826   : > { %3266 = vmatmul.mubr.msk.bf16.vlgmr.msra.gmra.mrb[52].mxu1 %vm205_vm0, %v2470_v36 }
 0x827   : > { %3277 = vmatprep.mubr.msk.bf16.mxu1 %vm3592_vm1, %v3591_v50 }
 0x8d9   : > { %v4530_v1 = vpop.f32.mrb[40].mxu0 }
 0x8da   : > { %v3225_v8 = vpop.f32.mrb[41].mxu0 }
 0x8db   : > { %v4532_v15 = vpop.f32.mrb[42].mxu0 }
 0x8dc   : > { %v3226_v18 = vpop.f32.mrb[43].mxu0 }
 0x8e0   : > { %v4534_v52 = vpop.f32.mrb[40].mxu1 }
 0x8e1   : > { %v3231_v41 = vpop.f32.mrb[41].mxu1 }
 0x8e2   : > { %v4536_v26 = vpop.f32.mrb[42].mxu1 }
 0x8e3   : > { %v3232_v58 = vpop.f32.mrb[43].mxu1 }
 0x8e4   : > { %v4538_v23 = vpop.f32.mrb[44].mxu0 }
 0x8e5   : > { %v3237_v3 = vpop.f32.mrb[45].mxu0 }
 0x8e6   : > { %v4540_v5 = vpop.f32.mrb[46].mxu0 }
 0x8e7   : > { %v3238_v4 = vpop.f32.mrb[47].mxu0 }
 0x8e8   : > { %v4542_v7 = vpop.f32.mrb[44].mxu1 }
 0x8e9   : > { %v3243_v51 = vpop.f32.mrb[45].mxu1 }
 0x8ea   : > { %v4544_v37 = vpop.f32.mrb[46].mxu1 }
 0x8eb   : > { %v3244_v35 = vpop.f32.mrb[47].mxu1 }
 0x8ec   : > { %v2355_v16 = vpop.f32.mrb[48].mxu0 }
 0x8ed   : > { %v2356_v30 = vadd.f32 %v2355_v16, %v195_v10  ;;  %v3249_v11 = vpop.f32.mrb[49].mxu0 }
 0x8ee   : > { %v2358_v20 = vpop.f32.mrb[50].mxu0 }
 0x8ef   : > { %v2359_v46 = vadd.f32 %v2358_v20, %v196_v57  ;;  %v3250_v47 = vpop.f32.mrb[51].mxu0  ;;  %v2521_v28 = vsel %vm556_vm2, %v2356_v30, -inf }
 0x8f0   : > { %2522 = vmax.xlane.f32.xlu0 %v2521_v28 }
 0x8f1   : > { %v2408_v49 = vpop.f32.mrb[48].mxu1  ;;  %v2524_v22 = vsel %vm556_vm2, %v2359_v46, -inf }
 0x8f2   : > { %v2409_v2 = vadd.f32 %v2408_v49, %v195_v10  ;;  %v3255_v31 = vpop.f32.mrb[49].mxu1  ;;  %2525 = vmax.xlane.f32.xlu1 %v2524_v22 }
 0x8f3   : > { %v2411_v42 = vpop.f32.mrb[50].mxu1 }
 0x8f4   : > { %v2412_v39 = vadd.f32 %v2411_v42, %v196_v57  ;;  %v3256_v33 = vpop.f32.mrb[51].mxu1  ;;  %v2527_v53 = vsel %vm556_vm2, %v2409_v2, -inf  ;;  %v2461_v25 = vpop.f32.mrb[52].mxu0 }
 0x8f5   : > { %2528 = vmax.xlane.f32.xlu0 %v2527_v53  ;;  %v2462_v14 = vadd.f32 %v2461_v25, %v195_v10  ;;  %v3261_v45 = vpop.f32.mrb[53].mxu0 }
 0x8f6   : > { %v2464_v12 = vpop.f32.mrb[54].mxu0  ;;  %v2530_v56 = vsel %vm556_vm2, %v2412_v39, -inf }
 0x8f7   : > { %v3262_v21 = vpop.f32.mrb[55].mxu0  ;;  %v2533_v6 = vsel %vm556_vm2, %v2462_v14, -inf  ;;  %v2465_v13 = vadd.f32 %v2464_v12, %v196_v57 }
 0x8f8   : > { %2534 = vmax.xlane.f32.xlu1 %v2533_v6 }
 0x8f9   : > { %2531 = vmax.xlane.f32.xlu0 %v2530_v56  ;;  %v2514_v29 = vpop.f32.mrb[52].mxu1  ;;  %v2536_v3 = vsel %vm556_vm2, %v2465_v13, -inf }
 0x8fa   : > { %v2515_v36 = vadd.f32 %v2514_v29, %v195_v10  ;;  %v3267_v8 = vpop.f32.mrb[53].mxu1 }
 0x8fb   : > { %v2517_v18 = vpop.f32.mrb[54].mxu1 }
 0x8fc   : > { %v2518_v41 = vadd.f32 %v2517_v18, %v196_v57  ;;  %v3268_v58 = vpop.f32.mrb[55].mxu1  ;;  %v2539_v4 = vsel %vm556_vm2, %v2515_v36, -inf }
 0x8fd   : > { %2537 = vmax.xlane.f32.xlu0 %v2536_v3  ;;  %2540 = vmax.xlane.f32.xlu1 %v2539_v4 }
 0x8fe   : > { %v2542_v51 = vsel %vm556_vm2, %v2518_v41, -inf }
 0x901   : > { %2543 = vmax.xlane.f32.xlu0 %v2542_v51 }
 0x90e   : > { %2613 = vrot.lane.b32.xlu1 %v3887_v59, %s3602_s25 }
 0x97d   : > { %v2523_v35 = vpop.xlane.xlu0 %2522 }
 0x97e   : > { %v2545_v16 = vsub.f32 %v2356_v30, %v2523_v35 }
 0x97f   : > { %v2526_v10 = vpop.xlane.xlu1 %2525 }
 0x980   : > { %v2553_v11 = vmul.f32 1.442695, %v2545_v16  ;;  %v2546_v20 = vsub.f32 %v2359_v46, %v2526_v10 }
 0x982   : > { %3541 = vpow2.f32 %v2553_v11  ;;  %v2555_v57 = vmul.f32 1.442695, %v2546_v20  ;;  %v2529_v47 = vpop.xlane.xlu0 %2528 }
 0x983   : > { %v2547_v28 = vsub.f32 %v2409_v2, %v2529_v47 }
 0x984   : > { %3543 = vpow2.f32 %v2555_v57 }
 0x985   : > { %v2557_v49 = vmul.f32 1.442695, %v2547_v28  ;;  %v2535_v22 = vpop.xlane.xlu1 %2534 }
 0x986   : > { %v2532_v31 = vpop.xlane.xlu0 %2531  ;;  %v2549_v42 = vsub.f32 %v2462_v14, %v2535_v22 }
 0x987   : > { %3545 = vpow2.f32 %v2557_v49  ;;  %v2548_v33 = vsub.f32 %v2412_v39, %v2532_v31 }
 0x988   : > { %v2561_v53 = vmul.f32 1.442695, %v2549_v42 }
 0x989   : > { %v2559_v25 = vmul.f32 1.442695, %v2548_v33 }
 0x98a   : > { %3547 = vpow2.f32 %v2561_v53  ;;  %v2538_v59 = vpop.xlane.xlu0 %2537  ;;  %v2541_v45 = vpop.xlane.xlu1 %2540 }
 0x98b   : > { %3549 = vpow2.f32 %v2559_v25  ;;  %v2550_v30 = vsub.f32 %v2465_v13, %v2538_v59  ;;  %v2551_v12 = vsub.f32 %v2515_v36, %v2541_v45 }
 0x98c   : > { %v4562_v46 = vpop.eup %3541 }
 0x98d   : > { %v2563_v21 = vmul.f32 1.442695, %v2550_v30  ;;  %v2565_v6 = vmul.f32 1.442695, %v2551_v12  ;;  %v2569_v2 = vsel %vm556_vm2, %v4562_v46, 0.0 }
 0x98e   : > { %v4566_v56 = vpop.eup %3543  ;;  %v2544_v14 = vpop.xlane.xlu0 %2543  ;;  %2570 = vadd.xlane.f32.xlu1 %v2569_v2 }
 0x98f   : > { %v2614_v39 = vpop.permute.xlu1 %2613  ;;  %3551 = vpow2.f32 %v2563_v21  ;;  %v2552_v29 = vsub.f32 %v2518_v41, %v2544_v14  ;;  %v2572_v8 = vsel %vm556_vm2, %v4566_v56, 0.0 }
 0x990   : > { %3270 = vmatpush3.bf16.msra.mxu0 %v2614_v39  ;;  %3553 = vpow2.f32 %v2565_v6  ;;  %2573 = vadd.xlane.f32.xlu0 %v2572_v8 }
 0x991   : > { %3281 = vmatprep.subr.bf16.mxu0 %v3591_v50  ;;  %v4571_v13 = vpop.eup %3545  ;;  %v2567_v36 = vmul.f32 1.442695, %v2552_v29 }
 0x992   : > { %v2575_v18 = vsel %vm556_vm2, %v4571_v13, 0.0 }
 0x993   : > { %3555 = vpow2.f32 %v2567_v36  ;;  %2576 = vadd.xlane.f32.xlu1 %v2575_v18 }
 0x994   : > { %v4575_v58 = vpop.eup %3547 }
 0x995   : > { %v4577_v3 = vpop.eup %3549  ;;  %v2581_v41 = vsel %vm556_vm2, %v4575_v58, 0.0 }
 0x996   : > { %v2578_v4 = vsel %vm556_vm2, %v4577_v3, 0.0 }
 0x997   : > { %2579 = vadd.xlane.f32.xlu0 %v2578_v4  ;;  %2582 = vadd.xlane.f32.xlu1 %v2581_v41 }
 0x999   : > { %v4583_v51 = vpop.eup %3551 }
 0x99a   : > { %v4585_v35 = vpop.eup %3553  ;;  %v2584_v16 = vsel %vm556_vm2, %v4583_v51, 0.0 }
 0x99b   : > { %2585 = vadd.xlane.f32.xlu0 %v2584_v16  ;;  %v2587_v10 = vsel %vm556_vm2, %v4585_v35, 0.0 }
 0x99c   : > { %2588 = vadd.xlane.f32.xlu1 %v2587_v10 }
 0x99d   : > { %v4591_v11 = vpop.eup %3555 }
 0x99e   : > { %v2590_v20 = vsel %vm556_vm2, %v4591_v11, 0.0 }
 0x99f   : > { %2591 = vadd.xlane.f32.xlu0 %v2590_v20 }
 0x9ad   : > { %2707 = vrot.lane.b32.xlu1 %v3892_v60, %s3602_s25 }
 0x9b1   : > { %2754 = vrot.lane.b32.xlu1 %v3897_v62, %s3602_s25 }
 0x9b5   : > { %2811 = vrot.lane.b32.xlu1 %v4337_v0, %s3603_s26  ;;  %2660 = vrot.lane.b32.xlu0 %v3902_v63, %s3602_s25 }
 0x9b9   : > { %2815 = vrot.lane.b32.xlu1 %v4341_v27, %s3603_s26  ;;  %2809 = vrot.lane.b32.xlu0 %v4335_v48, %s3603_s26 }
 0x9bd   : > { %2819 = vrot.lane.b32.xlu1 %v4345_v9, %s3603_s26  ;;  %2813 = vrot.lane.b32.xlu0 %v4339_v44, %s3603_s26 }
 0x9c1   : > { %2823 = vrot.lane.b32.xlu1 %v4349_v55, %s3603_s26  ;;  %2817 = vrot.lane.b32.xlu0 %v4343_v24, %s3603_s26 }
 0x9c5   : > { %2843 = vrot.lane.b32.xlu1 %v4532_v15, %s3604_s27  ;;  %2821 = vrot.lane.b32.xlu0 %v4347_v17, %s3603_s26 }
 0x9c9   : > { %2847 = vrot.lane.b32.xlu1 %v4536_v26, %s3604_s27  ;;  %2841 = vrot.lane.b32.xlu0 %v4530_v1, %s3604_s27 }
 0x9cd   : > { %2851 = vrot.lane.b32.xlu1 %v4540_v5, %s3604_s27  ;;  %2845 = vrot.lane.b32.xlu0 %v4534_v52, %s3604_s27 }
 0x9d1   : > { %2855 = vrot.lane.b32.xlu1 %v4544_v37, %s3604_s27  ;;  %2849 = vrot.lane.b32.xlu0 %v4538_v23, %s3604_s27 }
 0x9d5   : > { %2853 = vrot.lane.b32.xlu0 %v4542_v7, %s3604_s27 }
 0xa1b   : > { %v2571_v60 = vpop.xlane.xlu1 %2570 }
 0xa1c   : > { %3557 = vrcp.f32 %v2571_v60 }
 0xa1d   : > { %v2574_v62 = vpop.xlane.xlu0 %2573 }
 0xa1e   : > { %3559 = vrcp.f32 %v2574_v62 }
 0xa20   : > { %v2577_v63 = vpop.xlane.xlu1 %2576 }
 0xa21   : > { %3561 = vrcp.f32 %v2577_v63 }
 0xa24   : > { %v2580_v48 = vpop.xlane.xlu0 %2579  ;;  %v2583_v0 = vpop.xlane.xlu1 %2582 }
 0xa25   : > { %3563 = vrcp.f32 %v2580_v48 }
 0xa26   : > { %v3558_v44 = vpop.eup %3557  ;;  %3565 = vrcp.f32 %v2583_v0 }
 0xa27   : > { %v2601_v9 = vmul.f32 %v3558_v44, %v4562_v46 }
 0xa28   : > { %v3560_v27 = vpop.eup %3559  ;;  %v2586_v24 = vpop.xlane.xlu0 %2585 }
 0xa29   : > { %v2602_v17 = vmul.f32 %v3560_v27, %v4566_v56  ;;  %3567 = vrcp.f32 %v2586_v24  ;;  %v2589_v55 = vpop.xlane.xlu1 %2588 }
 0xa2a   : > { %3569 = vrcp.f32 %v2589_v55 }
 0xa2b   : > { %v2609_v1 = vpack.c.bf16 %v2602_v17, %v2601_v9  ;;  %v3562_v52 = vpop.eup %3561 }
 0xa2c   : > { %v2592_v15 = vpop.xlane.xlu0 %2591  ;;  %v2603_v5 = vmul.f32 %v3562_v52, %v4571_v13 }
 0xa2d   : > { %3571 = vrcp.f32 %v2592_v15  ;;  %v2708_v26 = vpop.permute.xlu1 %2707  ;;  %3272 = vmatmul.mubr.msk.bf16.vlgmr.msra.gmra.mrb[56].mxu0 %vm556_vm2, %v2609_v1 }
 0xa2e   : > { %3282 = vmatpush3.bf16.msra.mxu0 %v2708_v26  ;;  %3283 = vmatprep.mubr.msk.bf16.mxu0 %vm3592_vm1, %v3591_v50 }
 0xa2f   : > { %v3564_v23 = vpop.eup %3563 }
 0xa30   : > { %v2604_v7 = vmul.f32 %v3564_v23, %v4577_v3  ;;  %v2661_v37 = vpop.permute.xlu0 %2660  ;;  %v3566_v57 = vpop.eup %3565 }
 0xa31   : > { %3276 = vmatpush3.bf16.msra.mxu1 %v2661_v37  ;;  %v2605_v49 = vmul.f32 %v3566_v57, %v4575_v58  ;;  %v2755_v31 = vpop.permute.xlu1 %2754 }
 0xa32   : > { %v2610_v47 = vpack.c.bf16 %v2604_v7, %v2603_v5  ;;  %3287 = vmatprep.subr.bf16.mxu1 %v3591_v50 }
 0xa33   : > { %v3568_v28 = vpop.eup %3567 }
 0xa34   : > { %v2606_v22 = vmul.f32 %v3568_v28, %v4583_v51  ;;  %3278 = vmatmul.mubr.msk.bf16.vlgmr.msra.gmra.mrb[56].mxu1 %vm556_vm2, %v2610_v47  ;;  %v3570_v42 = vpop.eup %3569  ;;  %v2810_v3 = vpop.permute.xlu0 %2809 }
 0xa35   : > { %3288 = vmatpush3.bf16.msra.mxu1 %v2755_v31  ;;  %3289 = vmatprep.mubr.msk.bf16.mxu1 %vm3592_vm1, %v3591_v50  ;;  %v2607_v25 = vmul.f32 %v3570_v42, %v4585_v35  ;;  %v2812_v41 = vpop.permute.xlu1 %2811  ;;  %v2897_v24 = vsel %vm205_vm0, %v4072_v32, %v2810_v3 }
 0xa36   : > { %v2611_v33 = vpack.c.bf16 %v2606_v22, %v2605_v49  ;;  %v2898_v55 = vsel %vm205_vm0, %v4074_v34, %v2812_v41 }
 0xa37   : > { %v3572_v53 = vpop.eup %3571 }
 0xa38   : > { %v2608_v59 = vmul.f32 %v3572_v53, %v4591_v11  ;;  %3284 = vmatmul.mubr.msk.bf16.vlgmr.msra.gmra.mrb[60].mxu0 %vm556_vm2, %v2611_v33  ;;  %v2814_v4 = vpop.permute.xlu0 %2813 }
 0xa39   : > { %v2816_v51 = vpop.permute.xlu1 %2815  ;;  %v2899_v26 = vsel %vm205_vm0, %v4076_v19, %v2814_v4 }
 0xa3a   : > { %v2612_v45 = vpack.c.bf16 %v2608_v59, %v2607_v25  ;;  %v2900_v34 = vsel %vm205_vm0, %v4078_v38, %v2816_v51 }
 0xa3c   : > { %3290 = vmatmul.mubr.msk.bf16.vlgmr.msra.gmra.mrb[60].mxu1 %vm556_vm2, %v2612_v45  ;;  %v2818_v35 = vpop.permute.xlu0 %2817 }
 0xa3d   : > { %v2820_v16 = vpop.permute.xlu1 %2819  ;;  %v2901_v47 = vsel %vm205_vm0, %v4080_v40, %v2818_v35 }
 0xa3e   : > { %v2902_v38 = vsel %vm205_vm0, %v4082_v54, %v2820_v16 }
 0xa40   : > { %v2822_v10 = vpop.permute.xlu0 %2821 }
 0xa41   : > { %v2824_v11 = vpop.permute.xlu1 %2823  ;;  %v2903_v40 = vsel %vm205_vm0, %v4084_v43, %v2822_v10 }
 0xa42   : > { %v2904_v54 = vsel %vm205_vm0, %v4086_v61, %v2824_v11 }
 0xa44   : > { %v2842_v20 = vpop.permute.xlu0 %2841 }
 0xa45   : > { %v2844_v60 = vpop.permute.xlu1 %2843  ;;  %v2905_v9 = vsel %vm556_vm2, %v2897_v24, %v2842_v20 }
 0xa46   : > { %v2906_v32 = vsel %vm556_vm2, %v2898_v55, %v2844_v60 }
 0xa48   : > { %v2846_v62 = vpop.permute.xlu0 %2845 }
 0xa49   : > { %v2848_v63 = vpop.permute.xlu1 %2847  ;;  %v2907_v23 = vsel %vm556_vm2, %v2899_v26, %v2846_v62 }
 0xa4a   : > { %v2908_v37 = vsel %vm556_vm2, %v2900_v34, %v2848_v63 }
 0xa4c   : > { %v2850_v48 = vpop.permute.xlu0 %2849 }
 0xa4d   : > { %v2852_v0 = vpop.permute.xlu1 %2851  ;;  %v2909_v28 = vsel %vm556_vm2, %v2901_v47, %v2850_v48 }
 0xa4e   : > { %v2910_v31 = vsel %vm556_vm2, %v2902_v38, %v2852_v0 }
 0xa50   : > { %v2854_v44 = vpop.permute.xlu0 %2853 }
 0xa51   : > { %v2856_v27 = vpop.permute.xlu1 %2855  ;;  %v2911_v53 = vsel %vm556_vm2, %v2903_v40, %v2854_v44 }
 0xa52   : > { %v2912_v45 = vsel %vm556_vm2, %v2904_v54, %v2856_v27 }
 0xb00   : > { %v2653_v30 = vpop.f32.mrb[56].mxu0 }
 0xb01   : > { %2873 = vrot.lane.b32.xlu0 %v2653_v30, %s3605_s28  ;;  %v3273_v12 = vpop.f32.mrb[57].mxu0 }
 0xb02   : > { %v2656_v46 = vpop.f32.mrb[58].mxu0 }
 0xb03   : > { %2875 = vrot.lane.b32.xlu1 %v2656_v46, %s3605_s28  ;;  %v3274_v21 = vpop.f32.mrb[59].mxu0 }
 0xb07   : > { %v2700_v6 = vpop.f32.mrb[56].mxu1 }
 0xb08   : > { %2877 = vrot.lane.b32.xlu0 %v2700_v6, %s3605_s28  ;;  %v3279_v50 = vpop.f32.mrb[57].mxu1 }
 0xb09   : > { %v2703_v2 = vpop.f32.mrb[58].mxu1 }
 0xb0a   : > { %2879 = vrot.lane.b32.xlu1 %v2703_v2, %s3605_s28  ;;  %v3280_v56 = vpop.f32.mrb[59].mxu1 }
 0xb0b   : > { %v2747_v14 = vpop.f32.mrb[60].mxu0 }
 0xb0c   : > { %2881 = vrot.lane.b32.xlu0 %v2747_v14, %s3605_s28  ;;  %v3285_v39 = vpop.f32.mrb[61].mxu0 }
 0xb0d   : > { %v2750_v29 = vpop.f32.mrb[62].mxu0 }
 0xb0e   : > { %2883 = vrot.lane.b32.xlu1 %v2750_v29, %s3605_s28  ;;  %v3286_v8 = vpop.f32.mrb[63].mxu0 }
 0xb0f   : > { %v2794_v13 = vpop.f32.mrb[60].mxu1 }
 0xb10   : > { %2885 = vrot.lane.b32.xlu0 %v2794_v13, %s3605_s28  ;;  %v3291_v36 = vpop.f32.mrb[61].mxu1 }
 0xb11   : > { %v2797_v18 = vpop.f32.mrb[62].mxu1 }
 0xb12   : > { %2887 = vrot.lane.b32.xlu1 %v2797_v18, %s3605_s28  ;;  %v3292_v58 = vpop.f32.mrb[63].mxu1 }
 0xb73   : > { %v2874_v17 = vpop.permute.xlu0 %2873 }
 0xb74   : > { %v2914_v1 = vsel %vm2913_vm3, %v2905_v9, %v2874_v17 }
 0xb75   : > { %2923 = vst.msk [vmem:[%s4641_s4] sm:$0xff] %vm2922_vm4, %v2914_v1  ;;  %v2876_v15 = vpop.permute.xlu1 %2875 }
 0xb76   : > { %v2915_v52 = vsel %vm2913_vm3, %v2906_v32, %v2876_v15 }
 0xb77   : > { %2924 = vst.msk [vmem:[%s4641_s4 + $0x8] sm:$0xff] %vm2922_vm4, %v2915_v52 }
 0xb7a   : > { %v2878_v5 = vpop.permute.xlu0 %2877 }
 0xb7b   : > { %v2916_v7 = vsel %vm2913_vm3, %v2907_v23, %v2878_v5 }
 0xb7c   : > { %2925 = vst.msk [vmem:[%s4641_s4 + $0x10] sm:$0xff] %vm2922_vm4, %v2916_v7  ;;  %v2880_v57 = vpop.permute.xlu1 %2879 }
 0xb7d   : > { %v2917_v19 = vsel %vm2913_vm3, %v2908_v37, %v2880_v57 }
 0xb7e   : > { %2926 = vst.msk [vmem:[%s4641_s4 + $0x18] sm:$0xff] %vm2922_vm4, %v2917_v19  ;;  %v2882_v49 = vpop.permute.xlu0 %2881 }
 0xb7f   : > { %v2918_v22 = vsel %vm2913_vm3, %v2909_v28, %v2882_v49 }
 0xb80   : > { %2927 = vst.msk [vmem:[%s4641_s4 + $0x20] sm:$0xff] %vm2922_vm4, %v2918_v22  ;;  %v2884_v42 = vpop.permute.xlu1 %2883 }
 0xb81   : > { %v2919_v33 = vsel %vm2913_vm3, %v2910_v31, %v2884_v42 }
 0xb82   : > { %2928 = vst.msk [vmem:[%s4641_s4 + $0x28] sm:$0xff] %vm2922_vm4, %v2919_v33  ;;  %v2886_v25 = vpop.permute.xlu0 %2885 }
 0xb83   : > { %v2920_v59 = vsel %vm2913_vm3, %v2911_v53, %v2886_v25 }
 0xb84   : > { %2929 = vst.msk [vmem:[%s4641_s4 + $0x30] sm:$0xff] %vm2922_vm4, %v2920_v59  ;;  %v2888_v30 = vpop.permute.xlu1 %2887 }
 0xb85   : > { %v2921_v12 = vsel %vm2913_vm3, %v2912_v45, %v2888_v30 }
 0xb86   : > { %2930 = vst.msk [vmem:[%s4641_s4 + $0x38] sm:$0xff] %vm2922_vm4, %v2921_v12 }
 0xb87 PF: > { %s13_s12 = sadd.s32 1, %s3588_s12  }
 0xb88   : > { %p10_p4 = scmp.ge.s32.totalorder %s13_s12, 4  }
 0xb8a   :  { %12 = sbr.rel (!%p10_p4) target bundleno = 1 (0x1), region = 62 }

// kernel: swin_connect_decoder_forward.16
= control target key start
LH: loop header
LB: loop body
LE: loop exit
PB: predicated region body
PF: predicated region fallthrough
CT: control target
= control target key end

     0   :  { %vm216_vm0 = vcmask 261120   ;;  %s1079_s1 = inlined_call_operand.vmem [shape: bf16[128,32], index: 1, kind: input, shape index: {}]   ;;  %s1080_s0 = inlined_call_operand.vmem [shape: f32[128,128], index: 0, kind: input, shape index: {}]   ;;  %s1081_s2 = inlined_call_operand.vmem [shape: f32[1,32], index: 2, kind: input, shape index: {}]   ;;  %s1082_s4 = inlined_call_operand.vmem [shape: f32[1,32], index: 4, kind: input, shape index: {}]   ;;  %s1083_s3 = inlined_call_operand.vmem [shape: f32[128,32], index: 3, kind: input, shape index: {}]   ;;  %s1084_s5 = inlined_call_operand.vmem [shape: f32[1,32], index: 5, kind: input, shape index: {}]   ;;  %s1085_s6 = inlined_call_operand.vmem [shape: f32[128,32], index: 6, kind: output, shape index: {}]  }
   0x1   :  { %v599_v0 = vld [vmem:[%s1079_s1] sm:$0xff]   ;;  %v600_v1 = vld [vmem:[%s1079_s1 + $0x8] sm:$0xff]   ;;  %v601_v2 = vld [vmem:[%s1079_s1 + $0x10] sm:$0xff]  }
   0x2   :  { %551 = vmatprep.subr.bf16.mxu0 %v599_v0  ;;  %583 = vmatprep.subr.bf16.mxu1 %v599_v0  ;;  %v602_v3 = vld [vmem:[%s1079_s1 + $0x18] sm:$0xff]   ;;  %v24_v4 = vld [vmem:[%s1080_s0] sm:$0xff]  ;;  %v25_v5 = vld [vmem:[%s1080_s0 + $0x8] sm:$0xff] }
   0x3   :  { %552 = vmatpush3.bf16.msra.mxu0 %v599_v0  ;;  %591 = vmatpush3.bf16.msra.mxu1 %v599_v0  ;;  %v32_v6 = vld [vmem:[%s1080_s0 + $0x40] sm:$0xff]  ;;  %v40_v7 = vpack.c.bf16 %v25_v5, %v24_v4  ;;  %v33_v8 = vld [vmem:[%s1080_s0 + $0x48] sm:$0xff]  ;;  %v605_v12 = vld [vmem:[%s1079_s1 + $0x30] sm:$0xff]  }
   0x4   :  { %553 = vmatprep.subr.bf16.mxu0 %v600_v1  ;;  %584 = vmatprep.subr.bf16.mxu1 %v600_v1  ;;  %v44_v9 = vpack.c.bf16 %v33_v8, %v32_v6  ;;  %v603_v10 = vld [vmem:[%s1079_s1 + $0x20] sm:$0xff]   ;;  %v604_v11 = vld [vmem:[%s1079_s1 + $0x28] sm:$0xff]   ;;  %v606_v13 = vld [vmem:[%s1079_s1 + $0x38] sm:$0xff]  }
   0x5   :  { %567 = vmatprep.mubr.bf16.mxu0 %v40_v7  ;;  %v26_v14 = vld [vmem:[%s1080_s0 + $0x10] sm:$0xff]  ;;  %v27_v15 = vld [vmem:[%s1080_s0 + $0x18] sm:$0xff]  ;;  %v28_v18 = vld [vmem:[%s1080_s0 + $0x20] sm:$0xff] }
   0x6   :  { %575 = vmatprep.mubr.bf16.mxu1 %v44_v9  ;;  %v34_v16 = vld [vmem:[%s1080_s0 + $0x50] sm:$0xff]  ;;  %v35_v17 = vld [vmem:[%s1080_s0 + $0x58] sm:$0xff]  ;;  %v29_v19 = vld [vmem:[%s1080_s0 + $0x28] sm:$0xff]  ;;  %v41_v22 = vpack.c.bf16 %v27_v15, %v26_v14 }
   0x7   :  { %554 = vmatpush3.bf16.msra.mxu0 %v600_v1  ;;  %592 = vmatpush3.bf16.msra.mxu1 %v600_v1  ;;  %v36_v20 = vld [vmem:[%s1080_s0 + $0x60] sm:$0xff]  ;;  %v37_v21 = vld [vmem:[%s1080_s0 + $0x68] sm:$0xff]  ;;  %v45_v23 = vpack.c.bf16 %v35_v17, %v34_v16  ;;  %v42_v24 = vpack.c.bf16 %v29_v19, %v28_v18  ;;  %v30_v26 = vld [vmem:[%s1080_s0 + $0x30] sm:$0xff] }
   0x8   :  { %555 = vmatprep.subr.bf16.mxu0 %v601_v2  ;;  %585 = vmatprep.subr.bf16.mxu1 %v601_v2  ;;  %v46_v25 = vpack.c.bf16 %v37_v21, %v36_v20  ;;  %v31_v27 = vld [vmem:[%s1080_s0 + $0x38] sm:$0xff]  ;;  %v38_v28 = vld [vmem:[%s1080_s0 + $0x70] sm:$0xff]  ;;  %v524_v32 = vld [vmem:[%s1081_s2] ss:$0 sm:$0xff] }
   0x9   :  { %v39_v29 = vld [vmem:[%s1080_s0 + $0x78] sm:$0xff]  ;;  %v43_v30 = vpack.c.bf16 %v31_v27, %v30_v26 }
   0xa   :  { %v47_v31 = vpack.c.bf16 %v39_v29, %v38_v28 }
   0xb   :  { %556 = vmatpush3.bf16.msra.mxu0 %v601_v2  ;;  %593 = vmatpush3.bf16.msra.mxu1 %v601_v2 }
   0xc   :  { %557 = vmatprep.subr.bf16.mxu0 %v602_v3  ;;  %586 = vmatprep.subr.bf16.mxu1 %v602_v3 }
   0xf   :  { %558 = vmatpush3.bf16.msra.mxu0 %v602_v3  ;;  %594 = vmatpush3.bf16.msra.mxu1 %v602_v3 }
  0x10   :  { %559 = vmatprep.subr.bf16.mxu0 %v603_v10  ;;  %587 = vmatprep.subr.bf16.mxu1 %v603_v10 }
  0x13   :  { %560 = vmatpush3.bf16.msra.mxu0 %v603_v10  ;;  %595 = vmatpush3.bf16.msra.mxu1 %v603_v10 }
  0x14   :  { %561 = vmatprep.subr.bf16.mxu0 %v604_v11  ;;  %588 = vmatprep.subr.bf16.mxu1 %v604_v11 }
  0x17   :  { %562 = vmatpush3.bf16.msra.mxu0 %v604_v11  ;;  %596 = vmatpush3.bf16.msra.mxu1 %v604_v11 }
  0x18   :  { %563 = vmatprep.subr.bf16.mxu0 %v605_v12  ;;  %589 = vmatprep.subr.bf16.mxu1 %v605_v12 }
  0x1b   :  { %564 = vmatpush3.bf16.msra.mxu0 %v605_v12  ;;  %597 = vmatpush3.bf16.msra.mxu1 %v605_v12 }
  0x1c   :  { %565 = vmatprep.subr.bf16.mxu0 %v606_v13  ;;  %590 = vmatprep.subr.bf16.mxu1 %v606_v13 }
  0x1f   :  { %566 = vmatpush3.bf16.msra.mxu0 %v606_v13  ;;  %598 = vmatpush3.bf16.msra.mxu1 %v606_v13 }
  0x22   :  { %568 = vmatmul.mubr.bf16.vlgmr.msra.gmra.mrb[0].mxu0 %v41_v22  ;;  %576 = vmatmul.mubr.bf16.vlgmr.msra.gmra.mrb[0].mxu1 %v45_v23 }
  0x23   :  { %571 = vmatprep.mubr.bf16.mxu0 %v42_v24  ;;  %579 = vmatprep.mubr.bf16.mxu1 %v46_v25 }
  0x2a   :  { %572 = vmatmul.mubr.bf16.gmra.mrb[4].mxu0 %v43_v30  ;;  %580 = vmatmul.mubr.bf16.gmra.mrb[4].mxu1 %v47_v31 }
  0xf5   :  { %v569_v33 = vpop.f32.mrb[0].mxu0  ;;  %v577_v34 = vpop.f32.mrb[0].mxu1 }
  0xf6   :  { %v749_v35 = vadd.f32 %v569_v33, %v524_v32  ;;  %v751_v36 = vadd.f32 %v577_v34, %v524_v32  ;;  %v153_v37 = vpop.f32.mrb[1].mxu0  ;;  %v185_v38 = vpop.f32.mrb[1].mxu1 }
  0xf7   :  { %v570_v39 = vpop.f32.mrb[2].mxu0  ;;  %v578_v40 = vpop.f32.mrb[2].mxu1  ;;  %v753_v41 = vadd.f32 %v524_v32, %v153_v37  ;;  %v761_v47 = vadd.f32 %v524_v32, %v185_v38 }
  0xf8   :  { %v755_v42 = vadd.f32 %v570_v39, %v524_v32  ;;  %v156_v43 = vpop.f32.mrb[3].mxu0  ;;  %v188_v44 = vpop.f32.mrb[3].mxu1  ;;  %v247_v45 = vsel %vm216_vm0, %v751_v36, 0.0  ;;  %v223_v46 = vsel %vm216_vm0, %v749_v35, 0.0  ;;  %v763_v48 = vadd.f32 %v578_v40, %v524_v32 }
  0xf9   :  { %248 = vadd.xlane.f32.xlu0 %v247_v45  ;;  %224 = vadd.xlane.f32.xlu1 %v223_v46  ;;  %v217_v50 = vsel %vm216_vm0, %v753_v41, 0.0  ;;  %v769_v57 = vadd.f32 %v524_v32, %v156_v43  ;;  %v771_v58 = vadd.f32 %v524_v32, %v188_v44  ;;  %v241_v60 = vsel %vm216_vm0, %v761_v47, 0.0 }
  0xfa   :  { %v226_v49 = vsel %vm216_vm0, %v755_v42, 0.0  ;;  %v250_v59 = vsel %vm216_vm0, %v763_v48, 0.0 }
  0xfb   :  { %v244_v1 = vsel %vm216_vm0, %v771_v58, 0.0  ;;  %v220_v2 = vsel %vm216_vm0, %v769_v57, 0.0 }
  0xfd   :  { %227 = vadd.xlane.f32.xlu1 %v226_v49  ;;  %218 = vadd.xlane.f32.xlu0 %v217_v50  ;;  %v573_v51 = vpop.f32.mrb[4].mxu0  ;;  %v581_v52 = vpop.f32.mrb[4].mxu1 }
  0xfe   :  { %v169_v53 = vpop.f32.mrb[5].mxu0  ;;  %v201_v54 = vpop.f32.mrb[5].mxu1  ;;  %v777_v63 = vadd.f32 %v573_v51, %v524_v32  ;;  %v805_v13 = vadd.f32 %v581_v52, %v524_v32 }
  0xff   :  { %v574_v55 = vpop.f32.mrb[6].mxu0  ;;  %v582_v56 = vpop.f32.mrb[6].mxu1  ;;  %v789_v5 = vadd.f32 %v524_v32, %v169_v53  ;;  %v793_v7 = vadd.f32 %v524_v32, %v201_v54 }
 0x100   :  { %v172_v61 = vpop.f32.mrb[7].mxu0  ;;  %v204_v62 = vpop.f32.mrb[7].mxu1  ;;  %v779_v0 = vadd.f32 %v574_v55, %v524_v32  ;;  %v235_v4 = vsel %vm216_vm0, %v777_v63, 0.0  ;;  %v807_v14 = vadd.f32 %v582_v56, %v524_v32  ;;  %v259_v16 = vsel %vm216_vm0, %v805_v13, 0.0 }
 0x101   :  { %251 = vadd.xlane.f32.xlu1 %v250_v59  ;;  %242 = vadd.xlane.f32.xlu0 %v241_v60  ;;  %v791_v6 = vadd.f32 %v524_v32, %v172_v61  ;;  %v795_v8 = vadd.f32 %v524_v32, %v204_v62  ;;  %v229_v10 = vsel %vm216_vm0, %v789_v5, 0.0  ;;  %v253_v12 = vsel %vm216_vm0, %v793_v7, 0.0 }
 0x102   :  { %v238_v3 = vsel %vm216_vm0, %v779_v0, 0.0  ;;  %v262_v15 = vsel %vm216_vm0, %v807_v14, 0.0 }
 0x103   :  { %v232_v9 = vsel %vm216_vm0, %v791_v6, 0.0  ;;  %v256_v11 = vsel %vm216_vm0, %v795_v8, 0.0 }
 0x105   :  { %245 = vadd.xlane.f32.xlu1 %v244_v1  ;;  %221 = vadd.xlane.f32.xlu0 %v220_v2 }
 0x109   :  { %239 = vadd.xlane.f32.xlu1 %v238_v3  ;;  %236 = vadd.xlane.f32.xlu0 %v235_v4 }
 0x10d   :  { %233 = vadd.xlane.f32.xlu1 %v232_v9  ;;  %230 = vadd.xlane.f32.xlu0 %v229_v10 }
 0x111   :  { %257 = vadd.xlane.f32.xlu1 %v256_v11  ;;  %254 = vadd.xlane.f32.xlu0 %v253_v12 }
 0x115   :  { %263 = vadd.xlane.f32.xlu1 %v262_v15  ;;  %260 = vadd.xlane.f32.xlu0 %v259_v16 }
 0x186   :  { %v249_v17 = vpop.xlane.xlu0 %248  ;;  %v225_v18 = vpop.xlane.xlu1 %224 }
 0x187   :  { %v276_v19 = vmul.f32 0.03125, %v249_v17  ;;  %v268_v20 = vmul.f32 0.03125, %v225_v18 }
 0x189   :  { %v814_v21 = vsub.f32 %v751_v36, %v276_v19  ;;  %v817_v22 = vsub.f32 %v749_v35, %v268_v20 }
 0x18a   :  { %v228_v23 = vpop.xlane.xlu1 %227  ;;  %v219_v24 = vpop.xlane.xlu0 %218 }
 0x18b   :  { %v269_v25 = vmul.f32 0.03125, %v228_v23  ;;  %v266_v26 = vmul.f32 0.03125, %v219_v24  ;;  %v300_v27 = vmul.f32 %v817_v22, %v817_v22  ;;  %v308_v31 = vmul.f32 %v814_v21, %v814_v21 }
 0x18d   :  { %v822_v28 = vsub.f32 %v755_v42, %v269_v25  ;;  %v825_v29 = vsub.f32 %v753_v41, %v266_v26  ;;  %v320_v30 = vsel %vm216_vm0, %v300_v27, 0.0  ;;  %v344_v41 = vsel %vm216_vm0, %v308_v31, 0.0 }
 0x18e   :  { %v252_v32 = vpop.xlane.xlu1 %251  ;;  %321 = vadd.xlane.f32.xlu0 %v320_v30  ;;  %v243_v33 = vpop.xlane.xlu0 %242 }
 0x18f   :  { %v277_v34 = vmul.f32 0.03125, %v252_v32  ;;  %v274_v35 = vmul.f32 0.03125, %v243_v33  ;;  %v301_v36 = vmul.f32 %v822_v28, %v822_v28  ;;  %v298_v37 = vmul.f32 %v825_v29, %v825_v29 }
 0x191   :  { %v835_v38 = vsub.f32 %v763_v48, %v277_v34  ;;  %v838_v39 = vsub.f32 %v761_v47, %v274_v35  ;;  %v323_v40 = vsel %vm216_vm0, %v301_v36, 0.0  ;;  %v314_v49 = vsel %vm216_vm0, %v298_v37, 0.0 }
 0x192   :  { %v246_v42 = vpop.xlane.xlu1 %245  ;;  %324 = vadd.xlane.f32.xlu1 %v323_v40  ;;  %345 = vadd.xlane.f32.xlu0 %v344_v41  ;;  %v222_v43 = vpop.xlane.xlu0 %221 }
 0x193   :  { %v275_v44 = vmul.f32 0.03125, %v246_v42  ;;  %v267_v45 = vmul.f32 0.03125, %v222_v43  ;;  %v309_v46 = vmul.f32 %v835_v38, %v835_v38  ;;  %v306_v51 = vmul.f32 %v838_v39, %v838_v39 }
 0x195   :  { %v846_v48 = vsub.f32 %v771_v58, %v275_v44  ;;  %v849_v47 = vsub.f32 %v769_v57, %v267_v45  ;;  %v347_v50 = vsel %vm216_vm0, %v309_v46, 0.0  ;;  %v338_v60 = vsel %vm216_vm0, %v306_v51, 0.0 }
 0x196   :  { %v240_v52 = vpop.xlane.xlu1 %239  ;;  %348 = vadd.xlane.f32.xlu1 %v347_v50  ;;  %315 = vadd.xlane.f32.xlu0 %v314_v49  ;;  %v237_v53 = vpop.xlane.xlu0 %236 }
 0x197   :  { %v273_v54 = vmul.f32 0.03125, %v240_v52  ;;  %v272_v55 = vmul.f32 0.03125, %v237_v53  ;;  %v299_v56 = vmul.f32 %v849_v47, %v849_v47  ;;  %v307_v58 = vmul.f32 %v846_v48, %v846_v48 }
 0x199   :  { %v859_v57 = vsub.f32 %v779_v0, %v273_v54  ;;  %v862_v59 = vsub.f32 %v777_v63, %v272_v55  ;;  %v317_v61 = vsel %vm216_vm0, %v299_v56, 0.0  ;;  %v341_v9 = vsel %vm216_vm0, %v307_v58, 0.0 }
 0x19a   :  { %v234_v62 = vpop.xlane.xlu1 %233  ;;  %339 = vadd.xlane.f32.xlu0 %v338_v60  ;;  %318 = vadd.xlane.f32.xlu1 %v317_v61  ;;  %v231_v1 = vpop.xlane.xlu0 %230 }
 0x19b   :  { %v271_v2 = vmul.f32 0.03125, %v234_v62  ;;  %v270_v3 = vmul.f32 0.03125, %v231_v1  ;;  %v304_v4 = vmul.f32 %v862_v59, %v862_v59  ;;  %v305_v11 = vmul.f32 %v859_v57, %v859_v57  ;;  %v912_v1 = vld [vmem:[%s1082_s4] ss:$0 sm:$0xff] }
 0x19d   :  { %v870_v0 = vsub.f32 %v791_v6, %v271_v2  ;;  %v873_v63 = vsub.f32 %v789_v5, %v270_v3  ;;  %v332_v10 = vsel %vm216_vm0, %v304_v4, 0.0  ;;  %v335_v20 = vsel %vm216_vm0, %v305_v11, 0.0  ;;  %v428_v11 = vld [vmem:[%s1083_s3 + $0x10] sm:$0xff] }
 0x19e   :  { %v258_v12 = vpop.xlane.xlu1 %257  ;;  %342 = vadd.xlane.f32.xlu1 %v341_v9  ;;  %333 = vadd.xlane.f32.xlu0 %v332_v10  ;;  %v255_v15 = vpop.xlane.xlu0 %254 }
 0x19f   :  { %v279_v16 = vmul.f32 0.03125, %v258_v12  ;;  %v278_v17 = vmul.f32 0.03125, %v255_v15  ;;  %v302_v18 = vmul.f32 %v873_v63, %v873_v63  ;;  %v303_v6 = vmul.f32 %v870_v0, %v870_v0 }
 0x1a1   :  { %v883_v5 = vsub.f32 %v795_v8, %v279_v16  ;;  %v886_v19 = vsub.f32 %v793_v7, %v278_v17  ;;  %v326_v23 = vsel %vm216_vm0, %v302_v18, 0.0  ;;  %v329_v31 = vsel %vm216_vm0, %v303_v6, 0.0  ;;  %v922_v18 = vld [vmem:[%s1084_s5] ss:$0 sm:$0xff] }
 0x1a2   :  { %v264_v24 = vpop.xlane.xlu1 %263  ;;  %336 = vadd.xlane.f32.xlu1 %v335_v20  ;;  %327 = vadd.xlane.f32.xlu0 %v326_v23  ;;  %v261_v25 = vpop.xlane.xlu0 %260 }
 0x1a3   :  { %v281_v26 = vmul.f32 0.03125, %v264_v24  ;;  %v280_v27 = vmul.f32 0.03125, %v261_v25  ;;  %v310_v30 = vmul.f32 %v886_v19, %v886_v19  ;;  %v311_v33 = vmul.f32 %v883_v5, %v883_v5 }
 0x1a5   :  { %v894_v8 = vsub.f32 %v807_v14, %v281_v26  ;;  %v897_v7 = vsub.f32 %v805_v13, %v280_v27  ;;  %v350_v32 = vsel %vm216_vm0, %v310_v30, 0.0  ;;  %v353_v35 = vsel %vm216_vm0, %v311_v33, 0.0  ;;  %v429_v27 = vld [vmem:[%s1083_s3 + $0x18] sm:$0xff] }
 0x1a6   :  { %330 = vadd.xlane.f32.xlu1 %v329_v31  ;;  %351 = vadd.xlane.f32.xlu0 %v350_v32 }
 0x1a7   :  { %v312_v34 = vmul.f32 %v897_v7, %v897_v7  ;;  %v313_v14 = vmul.f32 %v894_v8, %v894_v8 }
 0x1a9   :  { %v356_v36 = vsel %vm216_vm0, %v312_v34, 0.0  ;;  %v359_v13 = vsel %vm216_vm0, %v313_v14, 0.0 }
 0x1aa   :  { %354 = vadd.xlane.f32.xlu1 %v353_v35  ;;  %357 = vadd.xlane.f32.xlu0 %v356_v36  ;;  %v436_v35 = vld [vmem:[%s1083_s3 + $0x50] sm:$0xff] }
 0x1ae   :  { %360 = vadd.xlane.f32.xlu1 %v359_v13 }
 0x21b   :  { %v322_v37 = vpop.xlane.xlu0 %321 }
 0x21c   :  { %v364_v40 = vmul.f32 0.03125, %v322_v37 }
 0x21e   :  { %v380_v41 = vadd.f32 1e-05, %v364_v40 }
 0x21f   :  { %v325_v42 = vpop.xlane.xlu1 %324  ;;  %v346_v43 = vpop.xlane.xlu0 %345 }
 0x220   :  { %607 = vrsqrt.f32 %v380_v41  ;;  %v365_v44 = vmul.f32 0.03125, %v325_v42  ;;  %v372_v45 = vmul.f32 0.03125, %v346_v43 }
 0x222   :  { %v381_v46 = vadd.f32 1e-05, %v365_v44  ;;  %v388_v49 = vadd.f32 1e-05, %v372_v45  ;;  %v437_v44 = vld [vmem:[%s1083_s3 + $0x58] sm:$0xff] }
 0x223   :  { %v349_v50 = vpop.xlane.xlu1 %348  ;;  %v316_v51 = vpop.xlane.xlu0 %315 }
 0x224   :  { %609 = vrsqrt.f32 %v381_v46  ;;  %v373_v52 = vmul.f32 0.03125, %v349_v50  ;;  %v362_v53 = vmul.f32 0.03125, %v316_v51  ;;  %v426_v51 = vld [vmem:[%s1083_s3] sm:$0xff] }
 0x225   :  { %611 = vrsqrt.f32 %v388_v49 }
 0x226   :  { %v389_v54 = vadd.f32 1e-05, %v373_v52  ;;  %v378_v55 = vadd.f32 1e-05, %v362_v53 }
 0x227   :  { %v319_v56 = vpop.xlane.xlu1 %318  ;;  %v340_v58 = vpop.xlane.xlu0 %339 }
 0x228   :  { %613 = vrsqrt.f32 %v389_v54  ;;  %v363_v60 = vmul.f32 0.03125, %v319_v56  ;;  %v370_v61 = vmul.f32 0.03125, %v340_v58 }
 0x229   :  { %615 = vrsqrt.f32 %v378_v55 }
 0x22a   :  { %v608_v62 = vpop.eup %607  ;;  %v379_v2 = vadd.f32 1e-05, %v363_v60  ;;  %v386_v3 = vadd.f32 1e-05, %v370_v61 }
 0x22b   :  { %v412_v4 = vmul.f32 %v608_v62, %v817_v22  ;;  %v343_v9 = vpop.xlane.xlu1 %342  ;;  %v334_v10 = vpop.xlane.xlu0 %333 }
 0x22c   :  { %617 = vrsqrt.f32 %v379_v2  ;;  %v371_v12 = vmul.f32 0.03125, %v343_v9  ;;  %v368_v15 = vmul.f32 0.03125, %v334_v10 }
 0x22d   :  { %v451_v16 = vmul.f32 %v912_v1, %v412_v4  ;;  %619 = vrsqrt.f32 %v386_v3  ;;  %v427_v3 = vld [vmem:[%s1083_s3 + $0x8] sm:$0xff] }
 0x22e   :  { %v610_v17 = vpop.eup %609  ;;  %v387_v6 = vadd.f32 1e-05, %v371_v12  ;;  %v384_v22 = vadd.f32 1e-05, %v368_v15 }
 0x22f   :  { %v612_v20 = vpop.eup %611  ;;  %v467_v23 = vadd.f32 %v451_v16, %v428_v11  ;;  %v413_v24 = vmul.f32 %v610_v17, %v822_v28  ;;  %v337_v25 = vpop.xlane.xlu1 %336  ;;  %v434_v11 = vld [vmem:[%s1083_s3 + $0x40] sm:$0xff] }
 0x230   :  { %v328_v26 = vpop.xlane.xlu0 %327  ;;  %v420_v30 = vmul.f32 %v612_v20, %v814_v21  ;;  %621 = vrsqrt.f32 %v387_v6  ;;  %v369_v31 = vmul.f32 0.03125, %v337_v25 }
 0x231   :  { %v366_v32 = vmul.f32 0.03125, %v328_v26  ;;  %v490_v33 = vadd.f32 %v922_v18, %v467_v23  ;;  %v452_v34 = vmul.f32 %v912_v1, %v413_v24  ;;  %623 = vrsqrt.f32 %v384_v22  ;;  %v435_v26 = vld [vmem:[%s1083_s3 + $0x48] sm:$0xff] }
 0x232   :  { %v614_v28 = vpop.eup %613  ;;  %v459_v36 = vmul.f32 %v912_v1, %v420_v30  ;;  %v385_v14 = vadd.f32 1e-05, %v369_v31 }
 0x233   :  { %v382_v13 = vadd.f32 1e-05, %v366_v32  ;;  %v616_v37 = vpop.eup %615  ;;  %506 = vst.msk [vmem:[%s1085_s6 + $0x10] sm:$0xff] %vm216_vm0, %v490_v33  ;;  %v468_v21 = vadd.f32 %v452_v34, %v429_v27  ;;  %v421_v40 = vmul.f32 %v614_v28, %v835_v38  ;;  %v331_v41 = vpop.xlane.xlu1 %330  ;;  %v432_v32 = vld [vmem:[%s1083_s3 + $0x30] sm:$0xff] }
 0x234   :  { %v352_v42 = vpop.xlane.xlu0 %351  ;;  %v475_v43 = vadd.f32 %v459_v36, %v436_v35  ;;  %v410_v45 = vmul.f32 %v616_v37, %v825_v29  ;;  %625 = vrsqrt.f32 %v385_v14  ;;  %v367_v46 = vmul.f32 0.03125, %v331_v41  ;;  %v433_v37 = vld [vmem:[%s1083_s3 + $0x38] sm:$0xff] }
 0x235   :  { %v491_v49 = vadd.f32 %v922_v18, %v468_v21  ;;  %v460_v50 = vmul.f32 %v912_v1, %v421_v40  ;;  %627 = vrsqrt.f32 %v382_v13  ;;  %v374_v38 = vmul.f32 0.03125, %v352_v42 }
 0x236   :  { %v618_v52 = vpop.eup %617  ;;  %v498_v53 = vadd.f32 %v922_v18, %v475_v43  ;;  %v449_v54 = vmul.f32 %v912_v1, %v410_v45  ;;  %v383_v55 = vadd.f32 1e-05, %v367_v46 }
 0x237   :  { %v620_v56 = vpop.eup %619  ;;  %507 = vst.msk [vmem:[%s1085_s6 + $0x18] sm:$0xff] %vm216_vm0, %v491_v49  ;;  %v476_v29 = vadd.f32 %v460_v50, %v437_v44  ;;  %v411_v58 = vmul.f32 %v618_v52, %v849_v47  ;;  %v390_v60 = vadd.f32 1e-05, %v374_v38  ;;  %v355_v61 = vpop.xlane.xlu1 %354  ;;  %v431_v50 = vld [vmem:[%s1083_s3 + $0x28] sm:$0xff] }
 0x238   :  { %v358_v62 = vpop.xlane.xlu0 %357  ;;  %514 = vst.msk [vmem:[%s1085_s6 + $0x50] sm:$0xff] %vm216_vm0, %v498_v53  ;;  %v465_v2 = vadd.f32 %v449_v54, %v426_v51  ;;  %v418_v4 = vmul.f32 %v620_v56, %v838_v39  ;;  %629 = vrsqrt.f32 %v383_v55  ;;  %v375_v9 = vmul.f32 0.03125, %v355_v61 }
 0x239   :  { %v499_v10 = vadd.f32 %v922_v18, %v476_v29  ;;  %v450_v47 = vmul.f32 %v912_v1, %v411_v58  ;;  %631 = vrsqrt.f32 %v390_v60  ;;  %v376_v12 = vmul.f32 0.03125, %v358_v62  ;;  %v439_v60 = vld [vmem:[%s1083_s3 + $0x68] sm:$0xff] }
 0x23a   :  { %v622_v15 = vpop.eup %621  ;;  %v488_v16 = vadd.f32 %v922_v18, %v465_v2  ;;  %v457_v17 = vmul.f32 %v912_v1, %v418_v4  ;;  %v391_v6 = vadd.f32 1e-05, %v375_v9 }
 0x23b   :  { %v624_v22 = vpop.eup %623  ;;  %515 = vst.msk [vmem:[%s1085_s6 + $0x58] sm:$0xff] %vm216_vm0, %v499_v10  ;;  %v466_v39 = vadd.f32 %v450_v47, %v427_v3  ;;  %v419_v20 = vmul.f32 %v622_v15, %v846_v48  ;;  %v392_v23 = vadd.f32 1e-05, %v376_v12  ;;  %v361_v24 = vpop.xlane.xlu1 %360 }
 0x23c   :  { %504 = vst.msk [vmem:[%s1085_s6] sm:$0xff] %vm216_vm0, %v488_v16  ;;  %v473_v25 = vadd.f32 %v457_v17, %v434_v11  ;;  %v416_v27 = vmul.f32 %v624_v22, %v862_v59  ;;  %633 = vrsqrt.f32 %v391_v6  ;;  %v377_v30 = vmul.f32 0.03125, %v361_v24  ;;  %v441_v11 = vld [vmem:[%s1083_s3 + $0x78] sm:$0xff] }
 0x23d   :  { %v489_v31 = vadd.f32 %v922_v18, %v466_v39  ;;  %v458_v48 = vmul.f32 %v912_v1, %v419_v20  ;;  %635 = vrsqrt.f32 %v392_v23 }
 0x23e   :  { %v626_v33 = vpop.eup %625  ;;  %v496_v34 = vadd.f32 %v922_v18, %v473_v25  ;;  %v455_v35 = vmul.f32 %v912_v1, %v416_v27  ;;  %v393_v28 = vadd.f32 1e-05, %v377_v30 }
 0x23f   :  { %v628_v36 = vpop.eup %627  ;;  %505 = vst.msk [vmem:[%s1085_s6 + $0x8] sm:$0xff] %vm216_vm0, %v489_v31  ;;  %v474_v59 = vadd.f32 %v458_v48, %v435_v26  ;;  %v417_v14 = vmul.f32 %v626_v33, %v859_v57  ;;  %v430_v57 = vld [vmem:[%s1083_s3 + $0x20] sm:$0xff] }
 0x240   :  { %512 = vst.msk [vmem:[%s1085_s6 + $0x40] sm:$0xff] %vm216_vm0, %v496_v34  ;;  %v471_v13 = vadd.f32 %v455_v35, %v432_v32  ;;  %v414_v21 = vmul.f32 %v628_v36, %v873_v63  ;;  %637 = vrsqrt.f32 %v393_v28 }
 0x241   :  { %v497_v40 = vadd.f32 %v922_v18, %v474_v59  ;;  %v456_v41 = vmul.f32 %v912_v1, %v417_v14 }
 0x242   :  { %v630_v42 = vpop.eup %629  ;;  %v494_v43 = vadd.f32 %v922_v18, %v471_v13  ;;  %v453_v44 = vmul.f32 %v912_v1, %v414_v21 }
 0x243   :  { %v632_v45 = vpop.eup %631  ;;  %513 = vst.msk [vmem:[%s1085_s6 + $0x48] sm:$0xff] %vm216_vm0, %v497_v40  ;;  %v472_v63 = vadd.f32 %v456_v41, %v433_v37  ;;  %v415_v46 = vmul.f32 %v630_v42, %v870_v0  ;;  %v438_v0 = vld [vmem:[%s1083_s3 + $0x60] sm:$0xff] }
 0x244   :  { %510 = vst.msk [vmem:[%s1085_s6 + $0x30] sm:$0xff] %vm216_vm0, %v494_v43  ;;  %v469_v49 = vadd.f32 %v453_v44, %v430_v57  ;;  %v422_v51 = vmul.f32 %v632_v45, %v886_v19 }
 0x245   :  { %v495_v38 = vadd.f32 %v922_v18, %v472_v63  ;;  %v454_v52 = vmul.f32 %v912_v1, %v415_v46 }
 0x246   :  { %v634_v53 = vpop.eup %633  ;;  %v492_v54 = vadd.f32 %v922_v18, %v469_v49  ;;  %v461_v55 = vmul.f32 %v912_v1, %v422_v51 }
 0x247   :  { %v636_v56 = vpop.eup %635  ;;  %511 = vst.msk [vmem:[%s1085_s6 + $0x38] sm:$0xff] %vm216_vm0, %v495_v38  ;;  %v470_v19 = vadd.f32 %v454_v52, %v431_v50  ;;  %v423_v29 = vmul.f32 %v634_v53, %v883_v5  ;;  %v440_v5 = vld [vmem:[%s1083_s3 + $0x70] sm:$0xff] }
 0x248   :  { %508 = vst.msk [vmem:[%s1085_s6 + $0x20] sm:$0xff] %vm216_vm0, %v492_v54  ;;  %v477_v58 = vadd.f32 %v461_v55, %v438_v0  ;;  %v424_v61 = vmul.f32 %v636_v56, %v897_v7 }
 0x249   :  { %v493_v62 = vadd.f32 %v922_v18, %v470_v19  ;;  %v462_v2 = vmul.f32 %v912_v1, %v423_v29 }
 0x24a   :  { %v638_v3 = vpop.eup %637  ;;  %v500_v4 = vadd.f32 %v922_v18, %v477_v58  ;;  %v463_v9 = vmul.f32 %v912_v1, %v424_v61 }
 0x24b   :  { %509 = vst.msk [vmem:[%s1085_s6 + $0x28] sm:$0xff] %vm216_vm0, %v493_v62  ;;  %v478_v10 = vadd.f32 %v462_v2, %v439_v60  ;;  %v425_v7 = vmul.f32 %v638_v3, %v894_v8 }
 0x24c   :  { %516 = vst.msk [vmem:[%s1085_s6 + $0x60] sm:$0xff] %vm216_vm0, %v500_v4  ;;  %v479_v47 = vadd.f32 %v463_v9, %v440_v5 }
 0x24d   :  { %v501_v12 = vadd.f32 %v922_v18, %v478_v10  ;;  %v464_v15 = vmul.f32 %v912_v1, %v425_v7 }
 0x24e   :  { %v502_v16 = vadd.f32 %v922_v18, %v479_v47 }
 0x24f   :  { %517 = vst.msk [vmem:[%s1085_s6 + $0x68] sm:$0xff] %vm216_vm0, %v501_v12  ;;  %v480_v8 = vadd.f32 %v464_v15, %v441_v11 }
 0x250   :  { %518 = vst.msk [vmem:[%s1085_s6 + $0x70] sm:$0xff] %vm216_vm0, %v502_v16 }
 0x251   :  { %v503_v17 = vadd.f32 %v922_v18, %v480_v8 }
 0x253   :  { %519 = vst.msk [vmem:[%s1085_s6 + $0x78] sm:$0xff] %vm216_vm0, %v503_v17 }

// kernel: swin_connect_decoder_forward.18
= control target key start
LH: loop header
LB: loop body
LE: loop exit
PB: predicated region body
PF: predicated region fallthrough
CT: control target
= control target key end

     0   :  { %s3706_s15 = smov 0   ;;  %s4884_s0 = inlined_call_operand.vmem [shape: f32[8,16,96], index: 0, kind: input, shape index: {}]   ;;  %s4885_s1 = inlined_call_operand.vmem [shape: f32[1,32], index: 1, kind: input, shape index: {}]   ;;  %s4886_s2 = inlined_call_operand.vmem [shape: f32[4,16,16], index: 2, kind: input, shape index: {}]   ;;  %s4887_s3 = inlined_call_operand.vmem [shape: f32[4,16,16], index: 3, kind: input, shape index: {}]   ;;  %s4888_s4 = inlined_call_operand.vmem [shape: f32[8,16,32], index: 4, kind: output, shape index: {}]  }
   0x1 LB: > { %s3056_s16 = sadd.s32 4294967295, %s3663_s15   ;;  %p3060_p0 = scmp.ge.s32.totalorder %s3663_s15, 1  ;;  %s3663_s15 = sphi %s3706_s15, %s14_s15  }
   0x2   : > { %p164_p1 = scmp.lt.s32.totalorder %s3663_s15, 3 }
   0x4   : > { %p165_p2 = pnand %p3060_p0, %p164_p1 }
   0x6   : > { %168 = sbr.rel (%p165_p2) target bundleno = 2962 (0xb92), region = 36 }
   0xd   : > { %s3061_s17 = sshll.u32 %s3056_s16, 2  ;;  %s3665_s22 = smov 96   ;;  %vm240_vm0 = vcmask 64512   ;;  %v4889_v50 = vmov 0.0   ;;  %vm3667_vm1 = vmmov 0   ;;  %vm599_vm2 = vcmask 130048  }
   0xe   : > { %p193_p3 = scmp.lt.s32.totalorder %s3061_s17, 7  ;;  %3168 = vmatprep.subr.bf16.mxu0 %v4889_v50  ;;  %3174 = vmatprep.subr.bf16.mxu1 %v4889_v50  ;;  %s3668_s23 = smov 88   ;;  %vm2980_vm3 = vcmask 195584   ;;  %vm2989_vm4 = vcmask 261120  }
   0xf   : > { %3170 = vmatprep.mubr.msk.bf16.mxu0 %vm3667_vm1, %v4889_v50  ;;  %3176 = vmatprep.mubr.msk.bf16.mxu1 %vm3667_vm1, %v4889_v50  ;;  %s3669_s24 = smov 120   ;;  %s3670_s27 = smov 64  }
  0x10   : > { %s4899_s17 = smov (!%p193_p3, %s3061_s17), 7  ;;  %s3672_s28 = smov 112  }
  0x11   : > { %s3102_s18 = sshll.u32 %s4899_s17, 4  ;;  %s3673_s6 = smov 56  }
  0x12   : > { %s3722_s21 = scalar_lea.vmem %s4884_s0, %s3102_s18  ;;  %s3675_s9 = smov 104  }
  0x13   : > { %v3725_v0 = vld [vmem:[%s3722_s21] sm:$0xff]  ;;  %v3728_v1 = vld [vmem:[%s3722_s21 + $0x10] sm:$0xff]  ;;  %v3731_v2 = vld [vmem:[%s3722_s21 + $0x8] sm:$0xff]  ;;  %s3676_s8 = smov 48   ;;  %s3677_s12 = smov 40  }
  0x14   : > { %v3735_v3 = vmul.f32 %v3725_v0, %v3725_v0  ;;  %v3739_v4 = vmul.f32 %v3728_v1, %v3728_v1  ;;  %v3742_v5 = vld [vmem:[%s3722_s21 + $0x18] sm:$0xff]  ;;  %v3750_v6 = vmul.f32 %v3731_v2, %v3731_v2  ;;  %v3757_v8 = vld [vmem:[%s3722_s21 + $0x28] sm:$0xff]  ;;  %v3760_v9 = vld [vmem:[%s3722_s21 + $0x20] sm:$0xff]  ;;  %s3678_s13 = smov 8   ;;  %s3679_s14 = smov 16  }
  0x15   : > { %v3754_v7 = vmul.f32 %v3742_v5, %v3742_v5  ;;  %v3768_v10 = vmul.f32 %v3757_v8, %v3757_v8  ;;  %v3772_v11 = vmul.f32 %v3760_v9, %v3760_v9  ;;  %v3775_v12 = vld [vmem:[%s3722_s21 + $0x38] sm:$0xff]  ;;  %v3778_v13 = vld [vmem:[%s3722_s21 + $0x30] sm:$0xff]  ;;  %s3680_s16 = smov 24  }
  0x16   : > { %311 = vrot.lane.b32.xlu0 %v3735_v3, %s3665_s22  ;;  %315 = vrot.lane.b32.xlu1 %v3739_v4, %s3665_s22  ;;  %v3786_v14 = vmul.f32 %v3775_v12, %v3775_v12  ;;  %v3790_v15 = vmul.f32 %v3778_v13, %v3778_v13  ;;  %v241_v32 = vsel %vm240_vm0, %v3735_v3, 0.0  ;;  %v244_v33 = vsel %vm240_vm0, %v3750_v6, 0.0 }
  0x17   : > { %v247_v34 = vsel %vm240_vm0, %v3739_v4, 0.0  ;;  %v250_v35 = vsel %vm240_vm0, %v3754_v7, 0.0  ;;  %v253_v36 = vsel %vm240_vm0, %v3772_v11, 0.0  ;;  %v256_v37 = vsel %vm240_vm0, %v3768_v10, 0.0 }
  0x18   : > { %v259_v38 = vsel %vm240_vm0, %v3790_v15, 0.0  ;;  %v262_v39 = vsel %vm240_vm0, %v3786_v14, 0.0 }
  0x1a   : > { %313 = vrot.lane.b32.xlu0 %v3750_v6, %s3665_s22  ;;  %317 = vrot.lane.b32.xlu1 %v3754_v7, %s3665_s22 }
  0x1e   : > { %321 = vrot.lane.b32.xlu1 %v3768_v10, %s3665_s22  ;;  %319 = vrot.lane.b32.xlu0 %v3772_v11, %s3665_s22 }
  0x22   : > { %325 = vrot.lane.b32.xlu1 %v3786_v14, %s3665_s22  ;;  %323 = vrot.lane.b32.xlu0 %v3790_v15, %s3665_s22 }
  0x88   : > { %v312_v16 = vpop.permute.xlu0 %311  ;;  %v316_v17 = vpop.permute.xlu1 %315 }
  0x89   : > { %v335_v18 = vsel %vm240_vm0, %v312_v16, 0.0  ;;  %v341_v19 = vsel %vm240_vm0, %v316_v17, 0.0 }
  0x8a   : > { %336 = vadd.xlane.f32.xlu0 %v335_v18 }
  0x8c   : > { %v314_v20 = vpop.permute.xlu0 %313  ;;  %v318_v21 = vpop.permute.xlu1 %317 }
  0x8d   : > { %v338_v22 = vsel %vm240_vm0, %v314_v20, 0.0  ;;  %v344_v23 = vsel %vm240_vm0, %v318_v21, 0.0 }
  0x8e   : > { %342 = vadd.xlane.f32.xlu0 %v341_v19  ;;  %339 = vadd.xlane.f32.xlu1 %v338_v22 }
  0x90   : > { %v322_v24 = vpop.permute.xlu1 %321  ;;  %v320_v25 = vpop.permute.xlu0 %319 }
  0x91   : > { %v347_v26 = vsel %vm240_vm0, %v320_v25, 0.0  ;;  %v350_v27 = vsel %vm240_vm0, %v322_v24, 0.0 }
  0x92   : > { %345 = vadd.xlane.f32.xlu0 %v344_v23  ;;  %348 = vadd.xlane.f32.xlu1 %v347_v26 }
  0x94   : > { %v326_v28 = vpop.permute.xlu1 %325  ;;  %v324_v29 = vpop.permute.xlu0 %323 }
  0x95   : > { %v353_v30 = vsel %vm240_vm0, %v324_v29, 0.0  ;;  %v356_v31 = vsel %vm240_vm0, %v326_v28, 0.0 }
  0x96   : > { %351 = vadd.xlane.f32.xlu0 %v350_v27  ;;  %354 = vadd.xlane.f32.xlu1 %v353_v30 }
  0x9a   : > { %357 = vadd.xlane.f32.xlu0 %v356_v31  ;;  %242 = vadd.xlane.f32.xlu1 %v241_v32 }
  0x9e   : > { %245 = vadd.xlane.f32.xlu0 %v244_v33  ;;  %248 = vadd.xlane.f32.xlu1 %v247_v34 }
  0xa2   : > { %251 = vadd.xlane.f32.xlu0 %v250_v35  ;;  %254 = vadd.xlane.f32.xlu1 %v253_v36 }
  0xa6   : > { %257 = vadd.xlane.f32.xlu0 %v256_v37  ;;  %260 = vadd.xlane.f32.xlu1 %v259_v38 }
  0xaa   : > { %263 = vadd.xlane.f32.xlu0 %v262_v39 }
 0x117   : > { %v337_v40 = vpop.xlane.xlu0 %336 }
 0x118   : > { %v359_v41 = vadd.f32 1e-06, %v337_v40 }
 0x11a   : > { %3384 = vrsqrt.f32 %v359_v41 }
 0x11b   : > { %v340_v42 = vpop.xlane.xlu1 %339  ;;  %v343_v43 = vpop.xlane.xlu0 %342 }
 0x11c   : > { %v360_v44 = vadd.f32 1e-06, %v340_v42  ;;  %v361_v45 = vadd.f32 1e-06, %v343_v43 }
 0x11e   : > { %3386 = vrsqrt.f32 %v360_v44 }
 0x11f   : > { %v346_v46 = vpop.xlane.xlu0 %345  ;;  %v349_v47 = vpop.xlane.xlu1 %348  ;;  %3388 = vrsqrt.f32 %v361_v45 }
 0x120   : > { %v362_v48 = vadd.f32 1e-06, %v346_v46  ;;  %v363_v49 = vadd.f32 1e-06, %v349_v47 }
 0x122   : > { %3390 = vrsqrt.f32 %v362_v48 }
 0x123   : > { %3392 = vrsqrt.f32 %v363_v49  ;;  %v352_v51 = vpop.xlane.xlu0 %351  ;;  %v355_v52 = vpop.xlane.xlu1 %354 }
 0x124   : > { %v364_v53 = vadd.f32 1e-06, %v352_v51  ;;  %v365_v54 = vadd.f32 1e-06, %v355_v52  ;;  %v3385_v55 = vpop.eup %3384 }
 0x125   : > { %v375_v59 = vmul.f32 %v3385_v55, %v3725_v0 }
 0x126   : > { %3394 = vrsqrt.f32 %v364_v53  ;;  %v3875_v53 = vld [vmem:[%s4885_s1] ss:$0 sm:$0xff] }
 0x127   : > { %3396 = vrsqrt.f32 %v365_v54  ;;  %v358_v56 = vpop.xlane.xlu0 %357  ;;  %v243_v29 = vpop.xlane.xlu1 %242 }
 0x128   : > { %v3387_v57 = vpop.eup %3386  ;;  %v366_v58 = vadd.f32 1e-06, %v358_v56  ;;  %v265_v33 = vadd.f32 1e-06, %v243_v29 }
 0x129   : > { %v376_v60 = vmul.f32 %v3387_v57, %v3731_v2  ;;  %v3389_v61 = vpop.eup %3388 }
 0x12a   : > { %3398 = vrsqrt.f32 %v366_v58  ;;  %v377_v17 = vmul.f32 %v3389_v61, %v3728_v1 }
 0x12b   : > { %v387_v62 = vpack.c.bf16 %v376_v60, %v375_v59  ;;  %v246_v30 = vpop.xlane.xlu0 %245  ;;  %v249_v31 = vpop.xlane.xlu1 %248  ;;  %3400 = vrsqrt.f32 %v265_v33 }
 0x12c   : > { %v3391_v63 = vpop.eup %3390  ;;  %v266_v34 = vadd.f32 1e-06, %v246_v30  ;;  %v267_v35 = vadd.f32 1e-06, %v249_v31 }
 0x12d   : > { %v3393_v16 = vpop.eup %3392  ;;  %392 = vrot.lane.b32.xlu1 %v387_v62, %s3665_s22  ;;  %v378_v18 = vmul.f32 %v3391_v63, %v3742_v5 }
 0x12e   : > { %v379_v20 = vmul.f32 %v3393_v16, %v3760_v9  ;;  %3402 = vrsqrt.f32 %v266_v34 }
 0x12f   : > { %v388_v19 = vpack.c.bf16 %v378_v18, %v377_v17  ;;  %v252_v32 = vpop.xlane.xlu0 %251  ;;  %v255_v36 = vpop.xlane.xlu1 %254  ;;  %3404 = vrsqrt.f32 %v267_v35 }
 0x130   : > { %v3395_v21 = vpop.eup %3394  ;;  %v268_v37 = vadd.f32 1e-06, %v252_v32  ;;  %v269_v39 = vadd.f32 1e-06, %v255_v36 }
 0x131   : > { %v3397_v22 = vpop.eup %3396  ;;  %442 = vrot.lane.b32.xlu0 %v388_v19, %s3665_s22  ;;  %v380_v23 = vmul.f32 %v3395_v21, %v3757_v8 }
 0x132   : > { %v381_v25 = vmul.f32 %v3397_v22, %v3778_v13  ;;  %3406 = vrsqrt.f32 %v268_v37 }
 0x133   : > { %v389_v24 = vpack.c.bf16 %v380_v23, %v379_v20  ;;  %v258_v38 = vpop.xlane.xlu0 %257  ;;  %v261_v41 = vpop.xlane.xlu1 %260  ;;  %3408 = vrsqrt.f32 %v269_v39 }
 0x134   : > { %v3399_v26 = vpop.eup %3398  ;;  %v270_v40 = vadd.f32 1e-06, %v258_v38  ;;  %v271_v43 = vadd.f32 1e-06, %v261_v41 }
 0x135   : > { %492 = vrot.lane.b32.xlu1 %v389_v24, %s3665_s22  ;;  %v382_v27 = vmul.f32 %v3399_v26, %v3775_v12  ;;  %968 = vrot.lane.b32.xlu0 %v3735_v3, %s3668_s23  ;;  %v3401_v45 = vpop.eup %3400 }
 0x136   : > { %3410 = vrsqrt.f32 %v270_v40  ;;  %v281_v49 = vmul.f32 %v3401_v45, %v3725_v0 }
 0x137   : > { %v390_v28 = vpack.c.bf16 %v382_v27, %v381_v25  ;;  %v264_v42 = vpop.xlane.xlu0 %263  ;;  %3412 = vrsqrt.f32 %v271_v43 }
 0x138   : > { %v272_v44 = vadd.f32 1e-06, %v264_v42  ;;  %v3403_v46 = vpop.eup %3402  ;;  %v295_v58 = vmul.f32 %v3875_v53, %v281_v49  ;;  %v216_v49 = vld [vmem:[%s4886_s2] sm:$0xff] }
 0x139   : > { %542 = vrot.lane.b32.xlu1 %v390_v28, %s3665_s22  ;;  %972 = vrot.lane.b32.xlu0 %v3739_v4, %s3668_s23  ;;  %v3405_v47 = vpop.eup %3404  ;;  %v282_v51 = vmul.f32 %v3403_v46, %v3731_v2  ;;  %s4833_s22 = scalar_lea.vmem %s4888_s4, %s3102_s18 }
 0x13a   : > { %3414 = vrsqrt.f32 %v272_v44  ;;  %v283_v55 = vmul.f32 %v3405_v47, %v3728_v1 }
 0x13b   : > { %v296_v59 = vmul.f32 %v3875_v53, %v282_v51 }
 0x13c   : > { %v3407_v48 = vpop.eup %3406  ;;  %v297_v16 = vmul.f32 %v3875_v53, %v283_v55 }
 0x13d   : > { %970 = vrot.lane.b32.xlu1 %v3750_v6, %s3668_s23  ;;  %888 = vrot.lane.b32.xlu0 %v3735_v3, %s3669_s24  ;;  %v284_v56 = vmul.f32 %v3407_v48, %v3742_v5  ;;  %v3409_v57 = vpop.eup %3408  ;;  %v383_v20 = vpack.c.bf16 %v296_v59, %v295_v58  ;;  %v3932_v58 = vld [vmem:[%s4887_s3 + $0x8] sm:$0xff] }
 0x13e   : > { %v285_v63 = vmul.f32 %v3409_v57, %v3760_v9 }
 0x13f   : > { %v298_v17 = vmul.f32 %v3875_v53, %v284_v56 }
 0x140   : > { %v3411_v60 = vpop.eup %3410  ;;  %v299_v27 = vmul.f32 %v3875_v53, %v285_v63  ;;  %v3940_v63 = vld [vmem:[%s4887_s3 + $0x10] sm:$0xff] }
 0x141   : > { %974 = vrot.lane.b32.xlu1 %v3754_v7, %s3668_s23  ;;  %892 = vrot.lane.b32.xlu0 %v3739_v4, %s3669_s24  ;;  %v3413_v18 = vpop.eup %3412  ;;  %v286_v19 = vmul.f32 %v3411_v60, %v3757_v8  ;;  %v384_v26 = vpack.c.bf16 %v298_v17, %v297_v16 }
 0x142   : > { %v287_v29 = vmul.f32 %v3413_v18, %v3778_v13 }
 0x143   : > { %v300_v30 = vmul.f32 %v3875_v53, %v286_v19 }
 0x144   : > { %v3415_v21 = vpop.eup %3414  ;;  %v301_v36 = vmul.f32 %v3875_v53, %v287_v29 }
 0x145   : > { %890 = vrot.lane.b32.xlu1 %v3750_v6, %s3669_s24  ;;  %976 = vrot.lane.b32.xlu0 %v3772_v11, %s3668_s23  ;;  %v288_v28 = vmul.f32 %v3415_v21, %v3775_v12  ;;  %v385_v35 = vpack.c.bf16 %v300_v30, %v299_v27  ;;  %v3950_v21 = vld [vmem:[%s4887_s3 + $0x18] sm:$0xff]  ;;  %v3960_v27 = vld [vmem:[%s4887_s3 + $0x20] sm:$0xff] }
 0x147   : > { %v302_v37 = vmul.f32 %v3875_v53, %v288_v28 }
 0x149   : > { %894 = vrot.lane.b32.xlu1 %v3754_v7, %s3669_s24  ;;  %980 = vrot.lane.b32.xlu0 %v3790_v15, %s3668_s23  ;;  %v386_v42 = vpack.c.bf16 %v302_v37, %v301_v36 }
 0x14d   : > { %978 = vrot.lane.b32.xlu1 %v3768_v10, %s3668_s23  ;;  %896 = vrot.lane.b32.xlu0 %v3772_v11, %s3669_s24 }
 0x151   : > { %982 = vrot.lane.b32.xlu1 %v3786_v14, %s3668_s23  ;;  %900 = vrot.lane.b32.xlu0 %v3790_v15, %s3669_s24 }
 0x155   : > { %898 = vrot.lane.b32.xlu1 %v3768_v10, %s3669_s24 }
 0x159   : > { %902 = vrot.lane.b32.xlu1 %v3786_v14, %s3669_s24 }
 0x19f   : > { %v393_v52 = vpop.permute.xlu1 %392 }
 0x1a0   : > { %v398_v54 = vsel %vm240_vm0, %v393_v52, 0  ;;  %v217_v52 = vld [vmem:[%s4886_s2 + $0x8] sm:$0xff] }
 0x1a1   : > { %3169 = vmatpush3.bf16.xpose.msra.mxu0 %v398_v54  ;;  %v3927_v54 = vld [vmem:[%s4887_s3] sm:$0xff] }
 0x1a2   : > { %3180 = vmatprep.subr.bf16.mxu0 %v4889_v50 }
 0x1a3   : > { %v443_v61 = vpop.permute.xlu0 %442 }
 0x1a4   : > { %v448_v62 = vsel %vm240_vm0, %v443_v61, 0 }
 0x1a5   : > { %3175 = vmatpush3.bf16.xpose.msra.mxu1 %v448_v62 }
 0x1a6   : > { %3186 = vmatprep.subr.bf16.mxu1 %v4889_v50 }
 0x1a7   : > { %v493_v22 = vpop.permute.xlu1 %492  ;;  %v969_v23 = vpop.permute.xlu0 %968 }
 0x1a8   : > { %v498_v24 = vsel %vm240_vm0, %v493_v22, 0  ;;  %3171 = vmatmul.mubr.msk.bf16.vlgmr.msra.gmra.mrb[0].mxu0 %vm240_vm0, %v383_v20  ;;  %v992_v25 = vsel %vm240_vm0, %v969_v23, 0.0 }
 0x1a9   : > { %3181 = vmatpush3.bf16.xpose.msra.mxu0 %v498_v24  ;;  %3182 = vmatprep.mubr.msk.bf16.mxu0 %vm3667_vm1, %v4889_v50 }
 0x1aa   : > { %993 = vadd.xlane.f32.xlu1 %v992_v25  ;;  %3192 = vmatprep.subr.bf16.mxu0 %v4889_v50 }
 0x1ab   : > { %v543_v31 = vpop.permute.xlu1 %542  ;;  %v973_v32 = vpop.permute.xlu0 %972 }
 0x1ac   : > { %v548_v33 = vsel %vm240_vm0, %v543_v31, 0  ;;  %3177 = vmatmul.mubr.msk.bf16.vlgmr.msra.gmra.mrb[0].mxu1 %vm240_vm0, %v384_v26  ;;  %v998_v34 = vsel %vm240_vm0, %v973_v32, 0.0 }
 0x1ad   : > { %3187 = vmatpush3.bf16.xpose.msra.mxu1 %v548_v33  ;;  %3188 = vmatprep.mubr.msk.bf16.mxu1 %vm3667_vm1, %v4889_v50  ;;  %v3970_v33 = vld [vmem:[%s4887_s3 + $0x28] sm:$0xff] }
 0x1ae   : > { %999 = vadd.xlane.f32.xlu1 %v998_v34  ;;  %3198 = vmatprep.subr.bf16.mxu1 %v4889_v50 }
 0x1af   : > { %v971_v38 = vpop.permute.xlu1 %970  ;;  %v889_v39 = vpop.permute.xlu0 %888 }
 0x1b0   : > { %3183 = vmatmul.mubr.msk.bf16.vlgmr.msra.gmra.mrb[4].mxu0 %vm240_vm0, %v385_v35  ;;  %v995_v40 = vsel %vm240_vm0, %v971_v38, 0.0  ;;  %v912_v41 = vsel %vm240_vm0, %v889_v39, 0.0  ;;  %v3978_v39 = vld [vmem:[%s4887_s3 + $0x30] sm:$0xff] }
 0x1b1   : > { %996 = vadd.xlane.f32.xlu0 %v995_v40  ;;  %3194 = vmatprep.mubr.msk.bf16.mxu0 %vm3667_vm1, %v4889_v50 }
 0x1b2   : > { %913 = vadd.xlane.f32.xlu1 %v912_v41 }
 0x1b3   : > { %v975_v43 = vpop.permute.xlu1 %974  ;;  %v893_v46 = vpop.permute.xlu0 %892 }
 0x1b4   : > { %3189 = vmatmul.mubr.msk.bf16.vlgmr.msra.gmra.mrb[4].mxu1 %vm240_vm0, %v386_v42  ;;  %v1001_v44 = vsel %vm240_vm0, %v975_v43, 0.0  ;;  %v918_v48 = vsel %vm240_vm0, %v893_v46, 0.0  ;;  %v3990_v46 = vld [vmem:[%s4887_s3 + $0x38] sm:$0xff] }
 0x1b5   : > { %1002 = vadd.xlane.f32.xlu0 %v1001_v44  ;;  %3200 = vmatprep.mubr.msk.bf16.mxu1 %vm3667_vm1, %v4889_v50 }
 0x1b6   : > { %919 = vadd.xlane.f32.xlu1 %v918_v48 }
 0x1b7   : > { %v891_v45 = vpop.permute.xlu1 %890  ;;  %v977_v34 = vpop.permute.xlu0 %976 }
 0x1b8   : > { %v915_v47 = vsel %vm240_vm0, %v891_v45, 0.0 }
 0x1b9   : > { %916 = vadd.xlane.f32.xlu0 %v915_v47 }
 0x1bb   : > { %v895_v47 = vpop.permute.xlu1 %894 }
 0x27b   : > { %v434_v51 = vpop.f32.mrb[0].mxu0 }
 0x27c   : > { %v435_v55 = vadd.f32 %v434_v51, %v216_v49  ;;  %v3172_v56 = vpop.f32.mrb[1].mxu0 }
 0x27d   : > { %v437_v57 = vpop.f32.mrb[2].mxu0 }
 0x27e   : > { %v438_v59 = vadd.f32 %v437_v57, %v217_v52  ;;  %v3173_v60 = vpop.f32.mrb[3].mxu0  ;;  %v3935_v61 = vadd.f32 %v435_v55, %v3927_v54  ;;  %v981_v55 = vpop.permute.xlu0 %980 }
 0x27f   : > { %v484_v62 = vpop.f32.mrb[0].mxu1  ;;  %v979_v60 = vpop.permute.xlu1 %978 }
 0x280   : > { %v485_v16 = vadd.f32 %v484_v62, %v216_v49  ;;  %v3178_v17 = vpop.f32.mrb[1].mxu1  ;;  %v600_v18 = vsel %vm599_vm2, %v3935_v61, -inf  ;;  %v3945_v19 = vadd.f32 %v438_v59, %v3932_v58  ;;  %v1004_v62 = vsel %vm240_vm0, %v977_v34, 0.0 }
 0x281   : > { %v487_v20 = vpop.f32.mrb[2].mxu1  ;;  %601 = vmax.xlane.f32.xlu0 %v600_v18  ;;  %v921_v17 = vsel %vm240_vm0, %v895_v47, 0.0  ;;  %v1010_v18 = vsel %vm240_vm0, %v981_v55, 0.0 }
 0x282   : > { %v488_v22 = vadd.f32 %v487_v20, %v217_v52  ;;  %v3179_v23 = vpop.f32.mrb[3].mxu1  ;;  %v603_v24 = vsel %vm599_vm2, %v3945_v19, -inf  ;;  %v3955_v25 = vadd.f32 %v485_v16, %v3940_v63  ;;  %v897_v16 = vpop.permute.xlu0 %896 }
 0x283   : > { %604 = vmax.xlane.f32.xlu1 %v603_v24  ;;  %v534_v26 = vpop.f32.mrb[4].mxu0  ;;  %v983_v20 = vpop.permute.xlu1 %982  ;;  %v924_v23 = vsel %vm240_vm0, %v897_v16, 0.0 }
 0x284   : > { %v535_v28 = vadd.f32 %v534_v26, %v216_v49  ;;  %v3184_v29 = vpop.f32.mrb[5].mxu0  ;;  %v606_v30 = vsel %vm599_vm2, %v3955_v25, -inf  ;;  %v3965_v31 = vadd.f32 %v488_v22, %v3950_v21  ;;  %v1007_v22 = vsel %vm240_vm0, %v979_v60, 0.0 }
 0x285   : > { %v537_v32 = vpop.f32.mrb[6].mxu0  ;;  %607 = vmax.xlane.f32.xlu0 %v606_v30 }
 0x286   : > { %v538_v35 = vadd.f32 %v537_v32, %v217_v52  ;;  %v3185_v36 = vpop.f32.mrb[7].mxu0  ;;  %v3973_v37 = vadd.f32 %v535_v28, %v3960_v27  ;;  %v609_v43 = vsel %vm599_vm2, %v3965_v31, -inf  ;;  %v901_v24 = vpop.permute.xlu0 %900  ;;  %v1013_v28 = vsel %vm240_vm0, %v983_v20, 0.0 }
 0x287   : > { %v584_v38 = vpop.f32.mrb[4].mxu1  ;;  %v899_v26 = vpop.permute.xlu1 %898  ;;  %v930_v29 = vsel %vm240_vm0, %v901_v24, 0.0  ;;  %v4020_v36 = vpack.c.bf16 %v3757_v8, %v3760_v9 }
 0x288   : > { %v585_v40 = vadd.f32 %v584_v38, %v216_v49  ;;  %v3190_v41 = vpop.f32.mrb[5].mxu1  ;;  %v612_v42 = vsel %vm599_vm2, %v3973_v37, -inf  ;;  %v3985_v44 = vadd.f32 %v538_v35, %v3970_v33  ;;  %v927_v30 = vsel %vm240_vm0, %v899_v26, 0.0 }
 0x289   : > { %613 = vmax.xlane.f32.xlu1 %v612_v42  ;;  %v587_v45 = vpop.f32.mrb[6].mxu1  ;;  %610 = vmax.xlane.f32.xlu0 %v609_v43  ;;  %v4015_v35 = vpack.c.bf16 %v3731_v2, %v3725_v0  ;;  %v4025_v38 = vpack.c.bf16 %v3775_v12, %v3778_v13 }
 0x28a   : > { %v588_v48 = vadd.f32 %v587_v45, %v217_v52  ;;  %v3191_v49 = vpop.f32.mrb[7].mxu1  ;;  %v3993_v51 = vadd.f32 %v585_v40, %v3978_v39  ;;  %v615_v57 = vsel %vm599_vm2, %v3985_v44, -inf  ;;  %v4030_v40 = vpack.c.bf16 %v3742_v5, %v3728_v1  ;;  %v4033_v42 = vpop.xlane.xlu0 %996 }
 0x28b   : > { %v903_v32 = vpop.permute.xlu1 %902 }
 0x28c   : > { %v618_v56 = vsel %vm599_vm2, %v3993_v51, -inf  ;;  %v4000_v59 = vadd.f32 %v588_v48, %v3990_v46  ;;  %v933_v34 = vsel %vm240_vm0, %v903_v32, 0.0 }
 0x28d   : > { %619 = vmax.xlane.f32.xlu1 %v618_v56  ;;  %616 = vmax.xlane.f32.xlu0 %v615_v57 }
 0x28e   : > { %v621_v52 = vsel %vm599_vm2, %v4000_v59, -inf  ;;  %v1003_v45 = vpop.xlane.xlu0 %1002 }
 0x28f   : > { %v994_v41 = vpop.xlane.xlu1 %993 }
 0x291   : > { %622 = vmax.xlane.f32.xlu0 %v621_v52  ;;  %1005 = vadd.xlane.f32.xlu1 %v1004_v62 }
 0x292   : > { %v4037_v48 = vpop.xlane.xlu0 %916 }
 0x293   : > { %v1000_v43 = vpop.xlane.xlu1 %999 }
 0x295   : > { %922 = vadd.xlane.f32.xlu0 %v921_v17  ;;  %1011 = vadd.xlane.f32.xlu1 %v1010_v18 }
 0x297   : > { %v4035_v47 = vpop.xlane.xlu1 %913 }
 0x299   : > { %1008 = vadd.xlane.f32.xlu0 %v1007_v22  ;;  %925 = vadd.xlane.f32.xlu1 %v924_v23 }
 0x29b   : > { %v4039_v49 = vpop.xlane.xlu1 %919 }
 0x29d   : > { %1014 = vadd.xlane.f32.xlu0 %v1013_v28  ;;  %931 = vadd.xlane.f32.xlu1 %v930_v29 }
 0x2a1   : > { %928 = vadd.xlane.f32.xlu0 %v927_v30 }
 0x2a5   : > { %934 = vadd.xlane.f32.xlu0 %v933_v34 }
 0x2ae   : > { %697 = vrot.lane.b32.xlu1 %v4015_v35, %s3670_s27 }
 0x2b2   : > { %793 = vrot.lane.b32.xlu1 %v4020_v36, %s3670_s27 }
 0x2b6   : > { %841 = vrot.lane.b32.xlu1 %v4025_v38, %s3670_s27 }
 0x2bb   : > { %745 = vrot.lane.b32.xlu0 %v4030_v40, %s3670_s27 }
 0x30e   : > { %v602_v55 = vpop.xlane.xlu0 %601 }
 0x30f   : > { %v624_v56 = vsub.f32 %v3935_v61, %v602_v55 }
 0x310   : > { %v605_v57 = vpop.xlane.xlu1 %604 }
 0x311   : > { %v632_v60 = vmul.f32 1.442695, %v624_v56  ;;  %v625_v62 = vsub.f32 %v3945_v19, %v605_v57 }
 0x312   : > { %v608_v52 = vpop.xlane.xlu0 %607 }
 0x313   : > { %3416 = vpow2.f32 %v632_v60  ;;  %v634_v16 = vmul.f32 1.442695, %v625_v62  ;;  %v626_v17 = vsub.f32 %v3955_v25, %v608_v52 }
 0x315   : > { %3418 = vpow2.f32 %v634_v16  ;;  %v636_v18 = vmul.f32 1.442695, %v626_v17  ;;  %v1016_v17 = vadd.f32 1e-06, %v994_v41 }
 0x316   : > { %v611_v20 = vpop.xlane.xlu0 %610  ;;  %v614_v22 = vpop.xlane.xlu1 %613 }
 0x317   : > { %3420 = vpow2.f32 %v636_v18  ;;  %v627_v23 = vsub.f32 %v3965_v31, %v611_v20  ;;  %v628_v24 = vsub.f32 %v3973_v37, %v614_v22  ;;  %v1019_v22 = vadd.f32 1e-06, %v1003_v45 }
 0x319   : > { %v638_v26 = vmul.f32 1.442695, %v627_v23  ;;  %v640_v61 = vmul.f32 1.442695, %v628_v24 }
 0x31a   : > { %v617_v28 = vpop.xlane.xlu0 %616  ;;  %v620_v29 = vpop.xlane.xlu1 %619 }
 0x31b   : > { %3422 = vpow2.f32 %v638_v26  ;;  %v629_v19 = vsub.f32 %v3985_v44, %v617_v28  ;;  %v630_v30 = vsub.f32 %v3993_v51, %v620_v29 }
 0x31c   : > { %3424 = vpow2.f32 %v640_v61 }
 0x31d   : > { %v4048_v25 = vpop.eup %3416  ;;  %v642_v32 = vmul.f32 1.442695, %v629_v19  ;;  %v644_v34 = vmul.f32 1.442695, %v630_v30 }
 0x31e   : > { %v623_v55 = vpop.xlane.xlu0 %622  ;;  %v648_v31 = vsel %vm599_vm2, %v4048_v25, 0.0  ;;  %v1006_v56 = vpop.xlane.xlu1 %1005 }
 0x31f   : > { %v4052_v37 = vpop.eup %3418  ;;  %3426 = vpow2.f32 %v642_v32  ;;  %v631_v57 = vsub.f32 %v4000_v59, %v623_v55  ;;  %649 = vadd.xlane.f32.xlu1 %v648_v31  ;;  %v1018_v59 = vadd.f32 1e-06, %v1000_v43  ;;  %v1020_v28 = vadd.f32 1e-06, %v1006_v56 }
 0x320   : > { %3428 = vpow2.f32 %v644_v34  ;;  %v651_v44 = vsel %vm599_vm2, %v4052_v37, 0.0  ;;  %v1017_v43 = vadd.f32 1e-06, %v4033_v42 }
 0x321   : > { %v4057_v51 = vpop.eup %3420  ;;  %v646_v60 = vmul.f32 1.442695, %v631_v57  ;;  %652 = vadd.xlane.f32.xlu0 %v651_v44  ;;  %v936_v57 = vadd.f32 1e-06, %v4035_v47  ;;  %v937_v44 = vadd.f32 1e-06, %v4037_v48 }
 0x322   : > { %v923_v62 = vpop.xlane.xlu0 %922  ;;  %v654_v52 = vsel %vm599_vm2, %v4057_v51, 0.0  ;;  %v1012_v16 = vpop.xlane.xlu1 %1011 }
 0x323   : > { %3430 = vpow2.f32 %v646_v60  ;;  %655 = vadd.xlane.f32.xlu1 %v654_v52  ;;  %v1022_v32 = vadd.f32 1e-06, %v1012_v16  ;;  %v939_v47 = vadd.f32 1e-06, %v923_v62 }
 0x324   : > { %3432 = vrsqrt.f32 %v1016_v17  ;;  %v938_v17 = vadd.f32 1e-06, %v4039_v49 }
 0x325   : > { %v4061_v18 = vpop.eup %3422  ;;  %3434 = vrsqrt.f32 %v1018_v59 }
 0x326   : > { %v4063_v20 = vpop.eup %3424  ;;  %v657_v23 = vsel %vm599_vm2, %v4061_v18, 0.0  ;;  %v1009_v24 = vpop.xlane.xlu0 %1008  ;;  %3436 = vrsqrt.f32 %v1019_v22 }
 0x327   : > { %v926_v26 = vpop.xlane.xlu1 %925  ;;  %658 = vadd.xlane.f32.xlu0 %v657_v23  ;;  %v660_v61 = vsel %vm599_vm2, %v4063_v20, 0.0  ;;  %v1021_v29 = vadd.f32 1e-06, %v1009_v24  ;;  %3438 = vrsqrt.f32 %v1020_v28 }
 0x328   : > { %661 = vadd.xlane.f32.xlu1 %v660_v61  ;;  %v940_v23 = vadd.f32 1e-06, %v926_v26 }
 0x329   : > { %v4069_v41 = vpop.eup %3426  ;;  %3440 = vrsqrt.f32 %v1021_v29 }
 0x32a   : > { %v4072_v19 = vpop.eup %3428  ;;  %v663_v45 = vsel %vm599_vm2, %v4069_v41, 0.0  ;;  %v1015_v30 = vpop.xlane.xlu0 %1014  ;;  %3442 = vrsqrt.f32 %v1017_v43 }
 0x32b   : > { %v932_v34 = vpop.xlane.xlu1 %931  ;;  %664 = vadd.xlane.f32.xlu0 %v663_v45  ;;  %v666_v55 = vsel %vm599_vm2, %v4072_v19, 0.0  ;;  %v1023_v31 = vadd.f32 1e-06, %v1015_v30  ;;  %3444 = vrsqrt.f32 %v1022_v32 }
 0x32c   : > { %667 = vadd.xlane.f32.xlu1 %v666_v55  ;;  %v942_v56 = vadd.f32 1e-06, %v932_v34 }
 0x32d   : > { %v4078_v42 = vpop.eup %3430  ;;  %3446 = vrsqrt.f32 %v1023_v31 }
 0x32e   : > { %v669_v60 = vsel %vm599_vm2, %v4078_v42, 0.0  ;;  %v929_v52 = vpop.xlane.xlu0 %928  ;;  %3448 = vrsqrt.f32 %v942_v56  ;;  %v3433_v59 = vpop.eup %3432 }
 0x32f   : > { %v698_v16 = vpop.permute.xlu1 %697  ;;  %670 = vadd.xlane.f32.xlu0 %v669_v60  ;;  %3450 = vrsqrt.f32 %v936_v57  ;;  %v3435_v48 = vpop.eup %3434  ;;  %v941_v28 = vadd.f32 1e-06, %v929_v52 }
 0x330   : > { %3193 = vmatpush3.bf16.msra.mxu0 %v698_v16  ;;  %3452 = vrsqrt.f32 %v937_v44  ;;  %v3437_v61 = vpop.eup %3436  ;;  %v1034_v30 = vmul.f32 %v3435_v48, %v3728_v1  ;;  %v1032_v48 = vmul.f32 %v3433_v59, %v3725_v0 }
 0x331   : > { %3204 = vmatprep.subr.bf16.mxu0 %v4889_v50  ;;  %3454 = vrsqrt.f32 %v938_v17  ;;  %v3439_v29 = vpop.eup %3438  ;;  %v1035_v32 = vmul.f32 %v3437_v61, %v3742_v5 }
 0x332   : > { %v935_v22 = vpop.xlane.xlu0 %934  ;;  %v1036_v34 = vmul.f32 %v3439_v29, %v3760_v9 }
 0x333   : > { %v943_v24 = vadd.f32 1e-06, %v935_v22  ;;  %v3441_v43 = vpop.eup %3440  ;;  %v1045_v57 = vpack.c.bf16 %v1035_v32, %v1034_v30 }
 0x334   : > { %v3443_v49 = vpop.eup %3442  ;;  %v1037_v55 = vmul.f32 %v3441_v43, %v3757_v8 }
 0x335   : > { %3456 = vrsqrt.f32 %v943_v24  ;;  %v3445_v62 = vpop.eup %3444 }
 0x336   : > { %3458 = vrsqrt.f32 %v939_v47  ;;  %v746_v45 = vpop.permute.xlu0 %745  ;;  %v1046_v60 = vpack.c.bf16 %v1037_v55, %v1036_v34  ;;  %v1038_v52 = vmul.f32 %v3445_v62, %v3778_v13 }
 0x337   : > { %3460 = vrsqrt.f32 %v940_v23  ;;  %3199 = vmatpush3.bf16.msra.mxu1 %v746_v45  ;;  %v3447_v26 = vpop.eup %3446  ;;  %v1033_v23 = vmul.f32 %v3443_v49, %v3731_v2 }
 0x338   : > { %3462 = vrsqrt.f32 %v941_v28  ;;  %3210 = vmatprep.subr.bf16.mxu1 %v4889_v50  ;;  %v3449_v31 = vpop.eup %3448  ;;  %v1039_v16 = vmul.f32 %v3447_v26, %v3775_v12 }
 0x339   : > { %v3451_v56 = vpop.eup %3450  ;;  %v958_v17 = vmul.f32 %v3449_v31, %v3778_v13  ;;  %v1044_v62 = vpack.c.bf16 %v1033_v23, %v1032_v48 }
 0x33a   : > { %v3453_v44 = vpop.eup %3452  ;;  %v952_v24 = vmul.f32 %v3451_v56, %v3725_v0  ;;  %v1047_v45 = vpack.c.bf16 %v1039_v16, %v1038_v52 }
 0x33b   : > { %v3455_v47 = vpop.eup %3454  ;;  %v953_v61 = vmul.f32 %v3453_v44, %v3731_v2  ;;  %v966_v30 = vmul.f32 %v3875_v53, %v958_v17 }
 0x33c   : > { %v960_v59 = vmul.f32 %v3875_v53, %v952_v24  ;;  %v954_v2 = vmul.f32 %v3455_v47, %v3728_v1 }
 0x33d   : > { %1105 = vrot.lane.b32.xlu1 %v1045_v57, %s3668_s23  ;;  %v961_v49 = vmul.f32 %v3875_v53, %v953_v61 }
 0x33e   : > { %v962_v56 = vmul.f32 %v3875_v53, %v954_v2 }
 0x33f   : > { %v3457_v22 = vpop.eup %3456  ;;  %v1040_v55 = vpack.c.bf16 %v961_v49, %v960_v59 }
 0x340   : > { %v3459_v28 = vpop.eup %3458  ;;  %v959_v29 = vmul.f32 %v3457_v22, %v3775_v12 }
 0x341   : > { %v3461_v43 = vpop.eup %3460  ;;  %1158 = vrot.lane.b32.xlu1 %v1046_v60, %s3668_s23  ;;  %v955_v0 = vmul.f32 %v3459_v28, %v3742_v5 }
 0x342   : > { %v3463_v13 = vpop.eup %3462  ;;  %v967_v32 = vmul.f32 %v3875_v53, %v959_v29  ;;  %v956_v12 = vmul.f32 %v3461_v43, %v3760_v9 }
 0x343   : > { %v957_v26 = vmul.f32 %v3463_v13, %v3757_v8  ;;  %v963_v31 = vmul.f32 %v3875_v53, %v955_v0  ;;  %v794_v8 = vpop.permute.xlu1 %793 }
 0x344   : > { %v1043_v34 = vpack.c.bf16 %v967_v32, %v966_v30  ;;  %v964_v5 = vmul.f32 %v3875_v53, %v956_v12 }
 0x345   : > { %1052 = vrot.lane.b32.xlu0 %v1044_v62, %s3668_s23  ;;  %1211 = vrot.lane.b32.xlu1 %v1047_v45, %s3668_s23  ;;  %v965_v1 = vmul.f32 %v3875_v53, %v957_v26  ;;  %v1041_v57 = vpack.c.bf16 %v963_v31, %v962_v56  ;;  %s3671_s23 = smov 80  }
 0x347   : > { %v1042_v9 = vpack.c.bf16 %v965_v1, %v964_v5  ;;  %v842_v53 = vpop.permute.xlu1 %841 }
 0x349   : > { %1049 = vrot.lane.b32.xlu0 %v1040_v55, %s3669_s24  ;;  %1208 = vrot.lane.b32.xlu1 %v1043_v34, %s3669_s24 }
 0x34d   : > { %1102 = vrot.lane.b32.xlu0 %v1041_v57, %s3669_s24  ;;  %1630 = vrot.lane.b32.xlu1 %v3750_v6, %s3671_s23 }
 0x351   : > { %1155 = vrot.lane.b32.xlu0 %v1042_v9, %s3669_s24  ;;  %1634 = vrot.lane.b32.xlu1 %v3754_v7, %s3671_s23 }
 0x355   : > { %1628 = vrot.lane.b32.xlu0 %v3735_v3, %s3671_s23  ;;  %1550 = vrot.lane.b32.xlu1 %v3750_v6, %s3672_s28 }
 0x359   : > { %1632 = vrot.lane.b32.xlu0 %v3739_v4, %s3671_s23  ;;  %1554 = vrot.lane.b32.xlu1 %v3754_v7, %s3672_s28 }
 0x35d   : > { %1548 = vrot.lane.b32.xlu0 %v3735_v3, %s3672_s28  ;;  %1638 = vrot.lane.b32.xlu1 %v3768_v10, %s3671_s23 }
 0x361   : > { %1552 = vrot.lane.b32.xlu0 %v3739_v4, %s3672_s28  ;;  %1642 = vrot.lane.b32.xlu1 %v3786_v14, %s3671_s23 }
 0x365   : > { %1636 = vrot.lane.b32.xlu0 %v3772_v11, %s3671_s23  ;;  %1558 = vrot.lane.b32.xlu1 %v3768_v10, %s3672_s28 }
 0x369   : > { %1640 = vrot.lane.b32.xlu0 %v3790_v15, %s3671_s23  ;;  %1562 = vrot.lane.b32.xlu1 %v3786_v14, %s3672_s28 }
 0x36d   : > { %1556 = vrot.lane.b32.xlu0 %v3772_v11, %s3672_s28 }
 0x371   : > { %1560 = vrot.lane.b32.xlu0 %v3790_v15, %s3672_s28 }
 0x3ac   : > { %v650_v44 = vpop.xlane.xlu1 %649 }
 0x3ad   : > { %3464 = vrcp.f32 %v650_v44 }
 0x3ae   : > { %v653_v60 = vpop.xlane.xlu0 %652 }
 0x3af   : > { %3466 = vrcp.f32 %v653_v60 }
 0x3b0   : > { %v656_v52 = vpop.xlane.xlu1 %655 }
 0x3b1   : > { %3468 = vrcp.f32 %v656_v52 }
 0x3b4   : > { %v659_v16 = vpop.xlane.xlu0 %658 }
 0x3b5   : > { %3470 = vrcp.f32 %v659_v16  ;;  %v662_v17 = vpop.xlane.xlu1 %661 }
 0x3b6   : > { %3472 = vrcp.f32 %v662_v17 }
 0x3b7   : > { %v3465_v47 = vpop.eup %3464 }
 0x3b8   : > { %v665_v22 = vpop.xlane.xlu0 %664  ;;  %v680_v24 = vmul.f32 %v3465_v47, %v4048_v25 }
 0x3b9   : > { %v3467_v48 = vpop.eup %3466  ;;  %3474 = vrcp.f32 %v665_v22  ;;  %v668_v23 = vpop.xlane.xlu1 %667 }
 0x3ba   : > { %v681_v61 = vmul.f32 %v3467_v48, %v4052_v37  ;;  %3476 = vrcp.f32 %v668_v23 }
 0x3bb   : > { %v3469_v43 = vpop.eup %3468 }
 0x3bc   : > { %v671_v28 = vpop.xlane.xlu0 %670  ;;  %v688_v29 = vpack.c.bf16 %v681_v61, %v680_v24  ;;  %v682_v30 = vmul.f32 %v3469_v43, %v4057_v51 }
 0x3bd   : > { %3478 = vrcp.f32 %v671_v28  ;;  %v1106_v26 = vpop.permute.xlu1 %1105 }
 0x3be   : > { %3195 = vmatmul.mubr.msk.bf16.vlgmr.msra.gmra.mrb[8].mxu0 %vm599_vm2, %v688_v29  ;;  %v1111_v55 = vsel %vm240_vm0, %v1106_v26, 0 }
 0x3bf   : > { %v3471_v45 = vpop.eup %3470  ;;  %3205 = vmatpush3.bf16.msra.mxu0 %v794_v8  ;;  %3206 = vmatprep.mubr.msk.bf16.mxu0 %vm3667_vm1, %v4889_v50 }
 0x3c0   : > { %v683_v13 = vmul.f32 %v3471_v45, %v4061_v18  ;;  %3216 = vmatprep.subr.bf16.mxu0 %v4889_v50  ;;  %v3473_v25 = vpop.eup %3472  ;;  %v1053_v0 = vpop.permute.xlu0 %1052 }
 0x3c1   : > { %v684_v62 = vmul.f32 %v3473_v25, %v4063_v20  ;;  %v1058_v20 = vsel %vm240_vm0, %v1053_v0, 0  ;;  %v1159_v34 = vpop.permute.xlu1 %1158 }
 0x3c2   : > { %v689_v37 = vpack.c.bf16 %v683_v13, %v682_v30 }
 0x3c3   : > { %v3475_v32 = vpop.eup %3474 }
 0x3c4   : > { %v685_v59 = vmul.f32 %v3475_v32, %v4069_v41  ;;  %3201 = vmatmul.mubr.msk.bf16.vlgmr.msra.gmra.mrb[8].mxu1 %vm599_vm2, %v689_v37  ;;  %v3477_v49 = vpop.eup %3476 }
 0x3c5   : > { %3211 = vmatpush3.bf16.msra.mxu1 %v842_v53  ;;  %3212 = vmatprep.mubr.msk.bf16.mxu1 %vm3667_vm1, %v4889_v50  ;;  %v686_v2 = vmul.f32 %v3477_v49, %v4072_v19  ;;  %v1050_v19 = vpop.permute.xlu0 %1049  ;;  %v1212_v31 = vpop.permute.xlu1 %1211 }
 0x3c6   : > { %v690_v51 = vpack.c.bf16 %v685_v59, %v684_v62  ;;  %3222 = vmatprep.subr.bf16.mxu1 %v4889_v50  ;;  %v1217_v5 = vsel %vm240_vm0, %v1212_v31, 0 }
 0x3c7   : > { %v3479_v18 = vpop.eup %3478 }
 0x3c8   : > { %v687_v12 = vmul.f32 %v3479_v18, %v4078_v42  ;;  %3207 = vmatmul.mubr.msk.bf16.vlgmr.msra.gmra.mrb[12].mxu0 %vm599_vm2, %v690_v51  ;;  %v1164_v42 = vsel %vm240_vm0, %v1159_v34, 0 }
 0x3c9   : > { %3217 = vmatpush3.bf16.xpose.msra.mxu0 %v1058_v20  ;;  %3218 = vmatprep.mubr.msk.bf16.mxu0 %vm3667_vm1, %v4889_v50  ;;  %v1103_v56 = vpop.permute.xlu0 %1102  ;;  %v1209_v57 = vpop.permute.xlu1 %1208  ;;  %v219_v20 = vld [vmem:[%s4886_s2 + $0x18] sm:$0xff] }
 0x3ca   : > { %v691_v41 = vpack.c.bf16 %v687_v12, %v686_v2  ;;  %3228 = vmatprep.subr.bf16.mxu0 %v4889_v50  ;;  %v218_v2 = vld [vmem:[%s4886_s2 + $0x10] sm:$0xff] }
 0x3cc   : > { %3213 = vmatmul.mubr.msk.bf16.vlgmr.msra.gmra.mrb[12].mxu1 %vm599_vm2, %v691_v41 }
 0x3cd   : > { %3224 = vmatprep.mubr.msk.bf16.mxu1 %vm3667_vm1, %v4889_v50  ;;  %v1156_v1 = vpop.permute.xlu0 %1155  ;;  %v1631_v53 = vpop.permute.xlu1 %1630 }
 0x3ce   : > { %3223 = vmatpush3.bf16.xpose.msra.mxu1 %v1111_v55  ;;  %v1655_v60 = vsel %vm240_vm0, %v1631_v53, 0.0 }
 0x3cf   : > { %3234 = vmatprep.subr.bf16.mxu1 %v4889_v50  ;;  %1656 = vadd.xlane.f32.xlu0 %v1655_v60 }
 0x3d0   : > { %3219 = vmatmul.mubr.msk.bf16.vlgmr.msra.gmra.mrb[16].mxu0 %vm240_vm0, %v1050_v19 }
 0x3d1   : > { %3229 = vmatpush3.bf16.xpose.msra.mxu0 %v1164_v42  ;;  %3230 = vmatprep.mubr.msk.bf16.mxu0 %vm3667_vm1, %v4889_v50  ;;  %v1629_v9 = vpop.permute.xlu0 %1628  ;;  %v1635_v16 = vpop.permute.xlu1 %1634 }
 0x3d2   : > { %3240 = vmatprep.subr.bf16.mxu0 %v4889_v50  ;;  %v1652_v8 = vsel %vm240_vm0, %v1629_v9, 0.0  ;;  %v1661_v47 = vsel %vm240_vm0, %v1635_v16, 0.0 }
 0x3d3   : > { %1653 = vadd.xlane.f32.xlu1 %v1652_v8  ;;  %1662 = vadd.xlane.f32.xlu0 %v1661_v47 }
 0x3d5   : > { %3225 = vmatmul.mubr.msk.bf16.vlgmr.msra.gmra.mrb[16].mxu1 %vm240_vm0, %v1103_v56  ;;  %v1633_v44 = vpop.permute.xlu0 %1632  ;;  %v1551_v48 = vpop.permute.xlu1 %1550 }
 0x3d6   : > { %3235 = vmatpush3.bf16.xpose.msra.mxu1 %v1217_v5  ;;  %3236 = vmatprep.mubr.msk.bf16.mxu1 %vm3667_vm1, %v4889_v50  ;;  %v1658_v52 = vsel %vm240_vm0, %v1633_v44, 0.0  ;;  %v1575_v23 = vsel %vm240_vm0, %v1551_v48, 0.0 }
 0x3d7   : > { %3246 = vmatprep.subr.bf16.mxu1 %v4889_v50  ;;  %1659 = vadd.xlane.f32.xlu1 %v1658_v52 }
 0x3d8   : > { %3231 = vmatmul.mubr.msk.bf16.vlgmr.msra.gmra.mrb[20].mxu0 %vm240_vm0, %v1156_v1  ;;  %1576 = vadd.xlane.f32.xlu0 %v1575_v23 }
 0x3d9   : > { %3242 = vmatprep.mubr.msk.bf16.mxu0 %vm3667_vm1, %v4889_v50  ;;  %v1549_v17 = vpop.permute.xlu0 %1548 }
 0x3da   : > { %v1572_v22 = vsel %vm240_vm0, %v1549_v17, 0.0 }
 0x3db   : > { %1573 = vadd.xlane.f32.xlu1 %v1572_v22 }
 0x3dd   : > { %3237 = vmatmul.mubr.msk.bf16.vlgmr.msra.gmra.mrb[20].mxu1 %vm240_vm0, %v1209_v57  ;;  %v1553_v24 = vpop.permute.xlu0 %1552 }
 0x3de   : > { %3248 = vmatprep.mubr.msk.bf16.mxu1 %vm3667_vm1, %v4889_v50  ;;  %v1578_v61 = vsel %vm240_vm0, %v1553_v24, 0.0 }
 0x3df   : > { %1579 = vadd.xlane.f32.xlu1 %v1578_v61 }
 0x3e1   : > { %v1637_v24 = vpop.permute.xlu0 %1636 }
 0x491   : > { %v4200_v28 = vpop.f32.mrb[8].mxu0 }
 0x492   : > { %v3196_v29 = vpop.f32.mrb[9].mxu0 }
 0x493   : > { %v4202_v43 = vpop.f32.mrb[10].mxu0 }
 0x494   : > { %v3197_v45 = vpop.f32.mrb[11].mxu0 }
 0x497   : > { %v4204_v30 = vpop.f32.mrb[8].mxu1 }
 0x498   : > { %v3202_v13 = vpop.f32.mrb[9].mxu1 }
 0x499   : > { %v4206_v25 = vpop.f32.mrb[10].mxu1 }
 0x49a   : > { %v3203_v37 = vpop.f32.mrb[11].mxu1 }
 0x49b   : > { %v4208_v32 = vpop.f32.mrb[12].mxu0 }
 0x49c   : > { %v3208_v62 = vpop.f32.mrb[13].mxu0 }
 0x49d   : > { %v4210_v59 = vpop.f32.mrb[14].mxu0 }
 0x49e   : > { %4891 = vst [vmem:[#allocation2_spill] sm:$0xff] %v4210_v59  ;;  %v3209_v49 = vpop.f32.mrb[15].mxu0 }
 0x49f   : > { %v4212_v0 = vpop.f32.mrb[12].mxu1 }
 0x4a0   : > { %4892 = vst [vmem:[#allocation3_spill] sm:$0xff] %v4212_v0  ;;  %v3214_v51 = vpop.f32.mrb[13].mxu1 }
 0x4a1   : > { %v4214_v18 = vpop.f32.mrb[14].mxu1 }
 0x4a2   : > { %4893 = vst [vmem:[#allocation4_spill] sm:$0xff] %v4214_v18  ;;  %v3215_v12 = vpop.f32.mrb[15].mxu1 }
 0x4a3   : > { %v1094_v26 = vpop.f32.mrb[16].mxu0 }
 0x4a4   : > { %v1095_v41 = vadd.f32 %v1094_v26, %v218_v2  ;;  %v3220_v34 = vpop.f32.mrb[17].mxu0  ;;  %v1641_v26 = vpop.permute.xlu0 %1640 }
 0x4a5   : > { %v1097_v55 = vpop.f32.mrb[18].mxu0 }
 0x4a6   : > { %v4223_v19 = vadd.f32 %v1095_v41, %v3927_v54  ;;  %v1098_v42 = vadd.f32 %v1097_v55, %v219_v20  ;;  %v3221_v31 = vpop.f32.mrb[19].mxu0  ;;  %v1664_v55 = vsel %vm240_vm0, %v1637_v24, 0.0 }
 0x4a8   : > { %v4226_v56 = vadd.f32 %v1098_v42, %v3932_v58  ;;  %v1147_v5 = vpop.f32.mrb[16].mxu1  ;;  %v1268_v1 = vsel %vm599_vm2, %v4223_v19, -inf  ;;  %v1670_v42 = vsel %vm240_vm0, %v1641_v26, 0.0 }
 0x4a9   : > { %v1148_v57 = vadd.f32 %v1147_v5, %v218_v2  ;;  %v3226_v9 = vpop.f32.mrb[17].mxu1  ;;  %1269 = vmax.xlane.f32.xlu0 %v1268_v1 }
 0x4aa   : > { %v1150_v8 = vpop.f32.mrb[18].mxu1  ;;  %v1271_v53 = vsel %vm599_vm2, %v4226_v56, -inf }
 0x4ab   : > { %v4233_v44 = vadd.f32 %v1148_v57, %v3940_v63  ;;  %v1151_v54 = vadd.f32 %v1150_v8, %v219_v20  ;;  %v3227_v60 = vpop.f32.mrb[19].mxu1  ;;  %1272 = vmax.xlane.f32.xlu1 %v1271_v53  ;;  %v1200_v52 = vpop.f32.mrb[20].mxu0 }
 0x4ac   : > { %v1201_v58 = vadd.f32 %v1200_v52, %v218_v2  ;;  %v3232_v16 = vpop.f32.mrb[21].mxu0 }
 0x4ad   : > { %v4236_v17 = vadd.f32 %v1151_v54, %v3950_v21  ;;  %v1203_v47 = vpop.f32.mrb[22].mxu0  ;;  %v1274_v22 = vsel %vm599_vm2, %v4233_v44, -inf }
 0x4ae   : > { %v4241_v48 = vadd.f32 %v1201_v58, %v3960_v27  ;;  %v1204_v23 = vadd.f32 %v1203_v47, %v219_v20  ;;  %1275 = vmax.xlane.f32.xlu0 %v1274_v22  ;;  %v3233_v63 = vpop.f32.mrb[23].mxu0  ;;  %v1555_v27 = vpop.permute.xlu1 %1554 }
 0x4af   : > { %v1277_v37 = vsel %vm599_vm2, %v4236_v17, -inf }
 0x4b0   : > { %v1253_v61 = vpop.f32.mrb[20].mxu1  ;;  %v1280_v29 = vsel %vm599_vm2, %v4241_v48, -inf  ;;  %v4246_v45 = vadd.f32 %v1204_v23, %v3970_v33 }
 0x4b1   : > { %v1254_v21 = vadd.f32 %v1253_v61, %v218_v2  ;;  %v3238_v13 = vpop.f32.mrb[21].mxu1  ;;  %1281 = vmax.xlane.f32.xlu1 %v1280_v29 }
 0x4b2   : > { %v1256_v62 = vpop.f32.mrb[22].mxu1  ;;  %1278 = vmax.xlane.f32.xlu0 %v1277_v37  ;;  %v1283_v2 = vsel %vm599_vm2, %v4246_v45, -inf  ;;  %v1639_v34 = vpop.permute.xlu1 %1638 }
 0x4b3   : > { %v4251_v49 = vadd.f32 %v1254_v21, %v3978_v39  ;;  %v1257_v51 = vadd.f32 %v1256_v62, %v219_v20  ;;  %v3239_v12 = vpop.f32.mrb[23].mxu1  ;;  %v1557_v20 = vpop.permute.xlu0 %1556  ;;  %v1667_v5 = vsel %vm240_vm0, %v1639_v34, 0.0 }
 0x4b4   : > { %v1584_v1 = vsel %vm240_vm0, %v1557_v20, 0.0 }
 0x4b5   : > { %v4254_v41 = vadd.f32 %v1257_v51, %v3990_v46  ;;  %v1286_v33 = vsel %vm599_vm2, %v4251_v49, -inf  ;;  %v1581_v46 = vsel %vm240_vm0, %v1555_v27, 0.0 }
 0x4b6   : > { %1287 = vmax.xlane.f32.xlu1 %v1286_v33  ;;  %1284 = vmax.xlane.f32.xlu0 %v1283_v2  ;;  %v1643_v31 = vpop.permute.xlu1 %1642 }
 0x4b7   : > { %v1289_v39 = vsel %vm599_vm2, %v4254_v41, -inf  ;;  %v1561_v57 = vpop.permute.xlu0 %1560  ;;  %v1673_v8 = vsel %vm240_vm0, %v1643_v31, 0.0 }
 0x4b8   : > { %v1590_v53 = vsel %vm240_vm0, %v1561_v57, 0.0 }
 0x4ba   : > { %1290 = vmax.xlane.f32.xlu0 %v1289_v39  ;;  %1665 = vadd.xlane.f32.xlu1 %v1664_v55  ;;  %v1559_v9 = vpop.permute.xlu1 %1558 }
 0x4bb   : > { %v1587_v54 = vsel %vm240_vm0, %v1559_v9, 0.0  ;;  %v4275_v16 = vpop.xlane.xlu0 %1656 }
 0x4be   : > { %1582 = vadd.xlane.f32.xlu0 %v1581_v46  ;;  %1671 = vadd.xlane.f32.xlu1 %v1670_v42  ;;  %v1563_v60 = vpop.permute.xlu1 %1562 }
 0x4bf   : > { %v1593_v52 = vsel %vm240_vm0, %v1563_v60, 0.0  ;;  %v1663_v22 = vpop.xlane.xlu0 %1662 }
 0x4c2   : > { %1668 = vadd.xlane.f32.xlu0 %v1667_v5  ;;  %1585 = vadd.xlane.f32.xlu1 %v1584_v1  ;;  %v1654_v58 = vpop.xlane.xlu1 %1653 }
 0x4c3   : > { %v4279_v63 = vpop.xlane.xlu0 %1576 }
 0x4c6   : > { %1674 = vadd.xlane.f32.xlu0 %v1673_v8  ;;  %1591 = vadd.xlane.f32.xlu1 %v1590_v53  ;;  %v1660_v47 = vpop.xlane.xlu1 %1659 }
 0x4ca   : > { %1588 = vadd.xlane.f32.xlu0 %v1587_v54  ;;  %v4277_v23 = vpop.xlane.xlu1 %1573 }
 0x4ce   : > { %1594 = vadd.xlane.f32.xlu0 %v1593_v52  ;;  %v4281_v24 = vpop.xlane.xlu1 %1579  ;;  %v1676_v52 = vadd.f32 1e-06, %v1654_v58  ;;  %v1677_v58 = vadd.f32 1e-06, %v4275_v16 }
 0x4d7   : > { %1360 = vrot.lane.b32.xlu1 %v4015_v35, %s3673_s6 }
 0x4db   : > { %1454 = vrot.lane.b32.xlu1 %v4020_v36, %s3673_s6 }
 0x4df   : > { %1501 = vrot.lane.b32.xlu1 %v4025_v38, %s3673_s6 }
 0x4e4   : > { %1407 = vrot.lane.b32.xlu0 %v4030_v40, %s3673_s6 }
 0x536   : > { %v1270_v61 = vpop.xlane.xlu0 %1269 }
 0x537   : > { %v1292_v29 = vsub.f32 %v4223_v19, %v1270_v61 }
 0x538   : > { %v1273_v21 = vpop.xlane.xlu1 %1272 }
 0x539   : > { %v1300_v13 = vmul.f32 1.442695, %v1292_v29  ;;  %v1293_v37 = vsub.f32 %v4226_v56, %v1273_v21  ;;  %v1679_v21 = vadd.f32 1e-06, %v1663_v22 }
 0x53b   : > { %3480 = vpow2.f32 %v1300_v13  ;;  %v1302_v62 = vmul.f32 1.442695, %v1293_v37  ;;  %v1276_v27 = vpop.xlane.xlu0 %1275 }
 0x53c   : > { %v1294_v51 = vsub.f32 %v4233_v44, %v1276_v27 }
 0x53d   : > { %3482 = vpow2.f32 %v1302_v62 }
 0x53e   : > { %v1304_v12 = vmul.f32 1.442695, %v1294_v51  ;;  %v1282_v26 = vpop.xlane.xlu1 %1281 }
 0x53f   : > { %v1279_v33 = vpop.xlane.xlu0 %1278  ;;  %v1296_v2 = vsub.f32 %v4241_v48, %v1282_v26 }
 0x540   : > { %3484 = vpow2.f32 %v1304_v12  ;;  %v1295_v34 = vsub.f32 %v4236_v17, %v1279_v33 }
 0x541   : > { %v1308_v55 = vmul.f32 1.442695, %v1296_v2 }
 0x542   : > { %v1306_v19 = vmul.f32 1.442695, %v1295_v34 }
 0x543   : > { %3486 = vpow2.f32 %v1308_v55  ;;  %v1285_v39 = vpop.xlane.xlu0 %1284  ;;  %v1288_v20 = vpop.xlane.xlu1 %1287 }
 0x544   : > { %3488 = vpow2.f32 %v1306_v19  ;;  %v1297_v56 = vsub.f32 %v4246_v45, %v1285_v39  ;;  %v1298_v46 = vsub.f32 %v4251_v49, %v1288_v20  ;;  %v1596_v39 = vadd.f32 1e-06, %v4277_v23 }
 0x545   : > { %v4290_v44 = vpop.eup %3480  ;;  %v1597_v20 = vadd.f32 1e-06, %v4279_v63 }
 0x546   : > { %v1310_v42 = vmul.f32 1.442695, %v1297_v56  ;;  %v1312_v31 = vmul.f32 1.442695, %v1298_v46  ;;  %v1316_v48 = vsel %vm599_vm2, %v4290_v44, 0.0 }
 0x547   : > { %v4294_v5 = vpop.eup %3482  ;;  %v1291_v17 = vpop.xlane.xlu0 %1290  ;;  %1317 = vadd.xlane.f32.xlu1 %v1316_v48 }
 0x548   : > { %v1666_v1 = vpop.xlane.xlu1 %1665  ;;  %3490 = vpow2.f32 %v1310_v42  ;;  %v1299_v57 = vsub.f32 %v4254_v41, %v1291_v17  ;;  %v1319_v45 = vsel %vm599_vm2, %v4294_v5, 0.0  ;;  %v1678_v41 = vadd.f32 1e-06, %v1660_v47 }
 0x549   : > { %3492 = vpow2.f32 %v1312_v31  ;;  %1320 = vadd.xlane.f32.xlu0 %v1319_v45  ;;  %v1680_v27 = vadd.f32 1e-06, %v1666_v1  ;;  %v1598_v31 = vadd.f32 1e-06, %v4281_v24 }
 0x54a   : > { %v4299_v49 = vpop.eup %3484  ;;  %v1314_v9 = vmul.f32 1.442695, %v1299_v57 }
 0x54b   : > { %v1583_v8 = vpop.xlane.xlu0 %1582  ;;  %v1322_v53 = vsel %vm599_vm2, %v4299_v49, 0.0 }
 0x54c   : > { %v1672_v54 = vpop.xlane.xlu1 %1671  ;;  %3494 = vpow2.f32 %v1314_v9  ;;  %1323 = vadd.xlane.f32.xlu1 %v1322_v53  ;;  %v1599_v23 = vadd.f32 1e-06, %v1583_v8 }
 0x54d   : > { %v4303_v60 = vpop.eup %3486  ;;  %3496 = vrsqrt.f32 %v1676_v52  ;;  %v1682_v33 = vadd.f32 1e-06, %v1672_v54 }
 0x54e   : > { %v4305_v61 = vpop.eup %3488  ;;  %v1328_v29 = vsel %vm599_vm2, %v4303_v60, 0.0  ;;  %3498 = vrsqrt.f32 %v1678_v41  ;;  %v4329_v41 = vld [vmem:[%s3722_s21 + $0x10] sm:$0xff] }
 0x54f   : > { %v1325_v13 = vsel %vm599_vm2, %v4305_v61, 0.0  ;;  %v1669_v37 = vpop.xlane.xlu0 %1668  ;;  %3500 = vrsqrt.f32 %v1679_v21 }
 0x550   : > { %v1586_v62 = vpop.xlane.xlu1 %1585  ;;  %1326 = vadd.xlane.f32.xlu0 %v1325_v13  ;;  %1329 = vadd.xlane.f32.xlu1 %v1328_v29  ;;  %v1681_v51 = vadd.f32 1e-06, %v1669_v37  ;;  %3502 = vrsqrt.f32 %v1680_v27  ;;  %v4333_v29 = vld [vmem:[%s3722_s21 + $0x18] sm:$0xff] }
 0x551   : > { %v1600_v1 = vadd.f32 1e-06, %v1586_v62  ;;  %v4338_v62 = vld [vmem:[%s3722_s21 + $0x20] sm:$0xff] }
 0x552   : > { %v4311_v12 = vpop.eup %3490  ;;  %3504 = vrsqrt.f32 %v1681_v51  ;;  %v4342_v51 = vld [vmem:[%s3722_s21 + $0x28] sm:$0xff] }
 0x553   : > { %v4314_v47 = vpop.eup %3492  ;;  %v1331_v22 = vsel %vm599_vm2, %v4311_v12, 0.0  ;;  %v1675_v26 = vpop.xlane.xlu0 %1674  ;;  %3506 = vrsqrt.f32 %v1677_v58 }
 0x554   : > { %v1592_v2 = vpop.xlane.xlu1 %1591  ;;  %1332 = vadd.xlane.f32.xlu0 %v1331_v22  ;;  %v1334_v34 = vsel %vm599_vm2, %v4314_v47, 0.0  ;;  %v1683_v55 = vadd.f32 1e-06, %v1675_v26  ;;  %3508 = vrsqrt.f32 %v1682_v33 }
 0x555   : > { %1335 = vadd.xlane.f32.xlu1 %v1334_v34  ;;  %v1602_v19 = vadd.f32 1e-06, %v1592_v2 }
 0x556   : > { %v4320_v16 = vpop.eup %3494  ;;  %3510 = vrsqrt.f32 %v1683_v55  ;;  %v4347_v55 = vld [vmem:[%s3722_s21 + $0x30] sm:$0xff] }
 0x557   : > { %v1337_v56 = vsel %vm599_vm2, %v4320_v16, 0.0  ;;  %v1589_v46 = vpop.xlane.xlu0 %1588  ;;  %3512 = vrsqrt.f32 %v1602_v19  ;;  %v3497_v48 = vpop.eup %3496 }
 0x558   : > { %v1361_v42 = vpop.permute.xlu1 %1360  ;;  %1338 = vadd.xlane.f32.xlu0 %v1337_v56  ;;  %3514 = vrsqrt.f32 %v1596_v39  ;;  %v3499_v17 = vpop.eup %3498  ;;  %v1601_v9 = vadd.f32 1e-06, %v1589_v46  ;;  %v4351_v39 = vld [vmem:[%s3722_s21 + $0x38] sm:$0xff] }
 0x559   : > { %3241 = vmatpush3.bf16.msra.mxu0 %v1361_v42  ;;  %3516 = vrsqrt.f32 %v1597_v20  ;;  %v3501_v45 = vpop.eup %3500  ;;  %v1694_v8 = vmul.f32 %v4329_v41, %v3499_v17 }
 0x55a   : > { %3252 = vmatprep.subr.bf16.mxu0 %v4889_v50  ;;  %3518 = vrsqrt.f32 %v1598_v31  ;;  %v3503_v53 = vpop.eup %3502  ;;  %v1695_v21 = vmul.f32 %v4333_v29, %v3501_v45  ;;  %v4356_v31 = vld [vmem:[%s3722_s21] sm:$0xff] }
 0x55b   : > { %v1595_v63 = vpop.xlane.xlu0 %1594  ;;  %v1696_v27 = vmul.f32 %v4338_v62, %v3503_v53 }
 0x55c   : > { %v1603_v57 = vadd.f32 1e-06, %v1595_v63  ;;  %v3505_v24 = vpop.eup %3504  ;;  %v1705_v33 = vpack.c.bf16 %v1695_v21, %v1694_v8  ;;  %v4360_v63 = vld [vmem:[%s3722_s21 + $0x8] sm:$0xff]  ;;  %s3674_s21 = smov 72  }
 0x55d   : > { %v3507_v52 = vpop.eup %3506  ;;  %v1697_v58 = vmul.f32 %v4342_v51, %v3505_v24 }
 0x55e   : > { %3520 = vrsqrt.f32 %v1603_v57  ;;  %v3509_v13 = vpop.eup %3508  ;;  %v1693_v17 = vmul.f32 %v4360_v63, %v3507_v52 }
 0x55f   : > { %3522 = vrsqrt.f32 %v1599_v23  ;;  %v1408_v54 = vpop.permute.xlu0 %1407  ;;  %v1706_v34 = vpack.c.bf16 %v1697_v58, %v1696_v27  ;;  %v1698_v19 = vmul.f32 %v4347_v55, %v3509_v13  ;;  %v1692_v23 = vmul.f32 %v4356_v31, %v3497_v48 }
 0x560   : > { %3524 = vrsqrt.f32 %v1600_v1  ;;  %3247 = vmatpush3.bf16.msra.mxu1 %v1408_v54  ;;  %v3511_v37 = vpop.eup %3510  ;;  %v4370_v54 = vld [vmem:[%s4885_s1] ss:$0 sm:$0xff] }
 0x561   : > { %3526 = vrsqrt.f32 %v1601_v9  ;;  %3258 = vmatprep.subr.bf16.mxu1 %v4889_v50  ;;  %v3513_v22 = vpop.eup %3512  ;;  %v1699_v20 = vmul.f32 %v4351_v39, %v3511_v37  ;;  %v1704_v21 = vpack.c.bf16 %v1693_v17, %v1692_v23 }
 0x562   : > { %v3515_v26 = vpop.eup %3514  ;;  %v1618_v56 = vmul.f32 %v4347_v55, %v3513_v22 }
 0x563   : > { %v3517_v2 = vpop.eup %3516  ;;  %v1612_v1 = vmul.f32 %v4356_v31, %v3515_v26  ;;  %v1707_v24 = vpack.c.bf16 %v1699_v20, %v1698_v19 }
 0x564   : > { %v3519_v46 = vpop.eup %3518  ;;  %v1613_v57 = vmul.f32 %v4360_v63, %v3517_v2  ;;  %v1626_v48 = vmul.f32 %v4370_v54, %v1618_v56 }
 0x565   : > { %v1620_v13 = vmul.f32 %v4370_v54, %v1612_v1  ;;  %v1614_v58 = vmul.f32 %v4329_v41, %v3519_v46 }
 0x566   : > { %1765 = vrot.lane.b32.xlu1 %v1705_v33, %s3671_s23  ;;  %v1621_v37 = vmul.f32 %v4370_v54, %v1613_v57 }
 0x567   : > { %v1622_v19 = vmul.f32 %v4370_v54, %v1614_v58 }
 0x568   : > { %v3521_v42 = vpop.eup %3520  ;;  %v1700_v2 = vpack.c.bf16 %v1621_v37, %v1620_v13 }
 0x569   : > { %v3523_v45 = vpop.eup %3522  ;;  %v1619_v9 = vmul.f32 %v4351_v39, %v3521_v42 }
 0x56a   : > { %v3525_v53 = vpop.eup %3524  ;;  %1818 = vrot.lane.b32.xlu1 %v1706_v34, %s3671_s23  ;;  %v1615_v27 = vmul.f32 %v4333_v29, %v3523_v45 }
 0x56b   : > { %v3527_v8 = vpop.eup %3526  ;;  %v1627_v52 = vmul.f32 %v4370_v54, %v1619_v9  ;;  %v1616_v22 = vmul.f32 %v4338_v62, %v3525_v53 }
 0x56c   : > { %v1617_v26 = vmul.f32 %v4342_v51, %v3527_v8  ;;  %v1623_v34 = vmul.f32 %v4370_v54, %v1615_v27 }
 0x56d   : > { %v1703_v33 = vpack.c.bf16 %v1627_v52, %v1626_v48  ;;  %v1624_v20 = vmul.f32 %v4370_v54, %v1616_v22 }
 0x56e   : > { %1712 = vrot.lane.b32.xlu0 %v1704_v21, %s3671_s23  ;;  %1871 = vrot.lane.b32.xlu1 %v1707_v24, %s3671_s23  ;;  %v1625_v56 = vmul.f32 %v4370_v54, %v1617_v26  ;;  %v1701_v46 = vpack.c.bf16 %v1623_v34, %v1622_v19 }
 0x570   : > { %v1702_v42 = vpack.c.bf16 %v1625_v56, %v1624_v20 }
 0x572   : > { %1709 = vrot.lane.b32.xlu0 %v1700_v2, %s3672_s28  ;;  %1868 = vrot.lane.b32.xlu1 %v1703_v33, %s3672_s28 }
 0x576   : > { %1762 = vrot.lane.b32.xlu0 %v1701_v46, %s3672_s28  ;;  %2290 = vrot.lane.b32.xlu1 %v3750_v6, %s3674_s21 }
 0x57a   : > { %1815 = vrot.lane.b32.xlu0 %v1702_v42, %s3672_s28  ;;  %2294 = vrot.lane.b32.xlu1 %v3754_v7, %s3674_s21 }
 0x57e   : > { %2288 = vrot.lane.b32.xlu0 %v3735_v3, %s3674_s21  ;;  %2210 = vrot.lane.b32.xlu1 %v3750_v6, %s3675_s9 }
 0x582   : > { %2292 = vrot.lane.b32.xlu0 %v3739_v4, %s3674_s21  ;;  %2214 = vrot.lane.b32.xlu1 %v3754_v7, %s3675_s9 }
 0x586   : > { %2208 = vrot.lane.b32.xlu0 %v3735_v3, %s3675_s9  ;;  %2298 = vrot.lane.b32.xlu1 %v3768_v10, %s3674_s21  ;;  %v1455_v3 = vpop.permute.xlu1 %1454 }
 0x58a   : > { %2212 = vrot.lane.b32.xlu0 %v3739_v4, %s3675_s9  ;;  %2302 = vrot.lane.b32.xlu1 %v3786_v14, %s3674_s21  ;;  %v1502_v4 = vpop.permute.xlu1 %1501 }
 0x58e   : > { %2296 = vrot.lane.b32.xlu0 %v3772_v11, %s3674_s21  ;;  %2218 = vrot.lane.b32.xlu1 %v3768_v10, %s3675_s9 }
 0x592   : > { %2300 = vrot.lane.b32.xlu0 %v3790_v15, %s3674_s21  ;;  %2222 = vrot.lane.b32.xlu1 %v3786_v14, %s3675_s9 }
 0x596   : > { %2216 = vrot.lane.b32.xlu0 %v3772_v11, %s3675_s9 }
 0x59a   : > { %2220 = vrot.lane.b32.xlu0 %v3790_v15, %s3675_s9 }
 0x5d4   : > { %v1318_v6 = vpop.xlane.xlu1 %1317 }
 0x5d5   : > { %3528 = vrcp.f32 %v1318_v6 }
 0x5d6   : > { %v1321_v7 = vpop.xlane.xlu0 %1320 }
 0x5d7   : > { %3530 = vrcp.f32 %v1321_v7 }
 0x5d9   : > { %v1324_v23 = vpop.xlane.xlu1 %1323 }
 0x5da   : > { %3532 = vrcp.f32 %v1324_v23 }
 0x5dd   : > { %v1327_v17 = vpop.xlane.xlu0 %1326  ;;  %v1330_v1 = vpop.xlane.xlu1 %1329 }
 0x5de   : > { %3534 = vrcp.f32 %v1327_v17 }
 0x5df   : > { %v3529_v10 = vpop.eup %3528  ;;  %3536 = vrcp.f32 %v1330_v1 }
 0x5e0   : > { %v1348_v14 = vmul.f32 %v3529_v10, %v4290_v44 }
 0x5e1   : > { %v3531_v11 = vpop.eup %3530  ;;  %v1333_v57 = vpop.xlane.xlu0 %1332 }
 0x5e2   : > { %v1349_v45 = vmul.f32 %v3531_v11, %v4294_v5  ;;  %3538 = vrcp.f32 %v1333_v57  ;;  %v1336_v15 = vpop.xlane.xlu1 %1335 }
 0x5e3   : > { %3540 = vrcp.f32 %v1336_v15 }
 0x5e4   : > { %v1356_v9 = vpack.c.bf16 %v1349_v45, %v1348_v14  ;;  %v3533_v24 = vpop.eup %3532 }
 0x5e5   : > { %v1339_v53 = vpop.xlane.xlu0 %1338  ;;  %v1350_v44 = vmul.f32 %v3533_v24, %v4299_v49 }
 0x5e6   : > { %3542 = vrcp.f32 %v1339_v53  ;;  %3243 = vmatmul.mubr.msk.bf16.vlgmr.msra.gmra.mrb[24].mxu0 %vm599_vm2, %v1356_v9  ;;  %v1766_v33 = vpop.permute.xlu1 %1765 }
 0x5e7   : > { %3253 = vmatpush3.bf16.msra.mxu0 %v1455_v3  ;;  %3254 = vmatprep.mubr.msk.bf16.mxu0 %vm3667_vm1, %v4889_v50  ;;  %v1771_v34 = vsel %vm240_vm0, %v1766_v33, 0 }
 0x5e8   : > { %v3535_v48 = vpop.eup %3534  ;;  %3264 = vmatprep.subr.bf16.mxu0 %v4889_v50 }
 0x5e9   : > { %v1351_v5 = vmul.f32 %v3535_v48, %v4305_v61  ;;  %v3537_v8 = vpop.eup %3536  ;;  %v1713_v58 = vpop.permute.xlu0 %1712 }
 0x5ea   : > { %v1352_v13 = vmul.f32 %v3537_v8, %v4303_v60  ;;  %v1718_v60 = vsel %vm240_vm0, %v1713_v58, 0  ;;  %v1819_v2 = vpop.permute.xlu1 %1818 }
 0x5eb   : > { %v1357_v52 = vpack.c.bf16 %v1351_v5, %v1350_v44 }
 0x5ec   : > { %v3539_v21 = vpop.eup %3538 }
 0x5ed   : > { %v1353_v37 = vmul.f32 %v3539_v21, %v4311_v12  ;;  %3249 = vmatmul.mubr.msk.bf16.vlgmr.msra.gmra.mrb[24].mxu1 %vm599_vm2, %v1357_v52  ;;  %v3541_v27 = vpop.eup %3540 }
 0x5ee   : > { %3259 = vmatpush3.bf16.msra.mxu1 %v1502_v4  ;;  %3260 = vmatprep.mubr.msk.bf16.mxu1 %vm3667_vm1, %v4889_v50  ;;  %v1354_v61 = vmul.f32 %v3541_v27, %v4314_v47  ;;  %v1710_v47 = vpop.permute.xlu0 %1709  ;;  %v1872_v19 = vpop.permute.xlu1 %1871 }
 0x5ef   : > { %v1358_v22 = vpack.c.bf16 %v1353_v37, %v1352_v13  ;;  %3270 = vmatprep.subr.bf16.mxu1 %v4889_v50  ;;  %v1877_v56 = vsel %vm240_vm0, %v1872_v19, 0 }
 0x5f0   : > { %v3543_v49 = vpop.eup %3542 }
 0x5f1   : > { %v1355_v26 = vmul.f32 %v3543_v49, %v4320_v16  ;;  %3255 = vmatmul.mubr.msk.bf16.vlgmr.msra.gmra.mrb[28].mxu0 %vm599_vm2, %v1358_v22  ;;  %v1824_v16 = vsel %vm240_vm0, %v1819_v2, 0 }
 0x5f2   : > { %3265 = vmatpush3.bf16.xpose.msra.mxu0 %v1718_v60  ;;  %3266 = vmatprep.mubr.msk.bf16.mxu0 %vm3667_vm1, %v4889_v50  ;;  %v1763_v20 = vpop.permute.xlu0 %1762  ;;  %v1869_v42 = vpop.permute.xlu1 %1868 }
 0x5f3   : > { %v1359_v12 = vpack.c.bf16 %v1355_v26, %v1354_v61  ;;  %3276 = vmatprep.subr.bf16.mxu0 %v4889_v50  ;;  %v220_v26 = vld [vmem:[%s4886_s2 + $0x20] sm:$0xff] }
 0x5f5   : > { %3261 = vmatmul.mubr.msk.bf16.vlgmr.msra.gmra.mrb[28].mxu1 %vm599_vm2, %v1359_v12  ;;  %v221_v12 = vld [vmem:[%s4886_s2 + $0x28] sm:$0xff] }
 0x5f6   : > { %3272 = vmatprep.mubr.msk.bf16.mxu1 %vm3667_vm1, %v4889_v50  ;;  %v1816_v46 = vpop.permute.xlu0 %1815  ;;  %v2291_v6 = vpop.permute.xlu1 %2290 }
 0x5f7   : > { %3271 = vmatpush3.bf16.xpose.msra.mxu1 %v1771_v34  ;;  %v2315_v23 = vsel %vm240_vm0, %v2291_v6, 0.0 }
 0x5f8   : > { %3282 = vmatprep.subr.bf16.mxu1 %v4889_v50  ;;  %2316 = vadd.xlane.f32.xlu0 %v2315_v23 }
 0x5f9   : > { %3267 = vmatmul.mubr.msk.bf16.vlgmr.msra.gmra.mrb[32].mxu0 %vm240_vm0, %v1710_v47 }
 0x5fa   : > { %3277 = vmatpush3.bf16.xpose.msra.mxu0 %v1824_v16  ;;  %3278 = vmatprep.mubr.msk.bf16.mxu0 %vm3667_vm1, %v4889_v50  ;;  %v2289_v3 = vpop.permute.xlu0 %2288  ;;  %v2295_v1 = vpop.permute.xlu1 %2294  ;;  %v4496_v16 = vld [vmem:[%s4887_s3] sm:$0xff] }
 0x5fb   : > { %3288 = vmatprep.subr.bf16.mxu0 %v4889_v50  ;;  %v2312_v4 = vsel %vm240_vm0, %v2289_v3, 0.0  ;;  %v2321_v11 = vsel %vm240_vm0, %v2295_v1, 0.0  ;;  %v4516_v1 = vld [vmem:[%s4887_s3 + $0x10] sm:$0xff] }
 0x5fc   : > { %2313 = vadd.xlane.f32.xlu1 %v2312_v4  ;;  %2322 = vadd.xlane.f32.xlu0 %v2321_v11 }
 0x5fe   : > { %3273 = vmatmul.mubr.msk.bf16.vlgmr.msra.gmra.mrb[32].mxu1 %vm240_vm0, %v1763_v20  ;;  %v2293_v7 = vpop.permute.xlu0 %2292  ;;  %v2211_v14 = vpop.permute.xlu1 %2210 }
 0x5ff   : > { %3283 = vmatpush3.bf16.xpose.msra.mxu1 %v1877_v56  ;;  %3284 = vmatprep.mubr.msk.bf16.mxu1 %vm3667_vm1, %v4889_v50  ;;  %v2318_v17 = vsel %vm240_vm0, %v2293_v7, 0.0  ;;  %v2235_v45 = vsel %vm240_vm0, %v2211_v14, 0.0 }
 0x600   : > { %3294 = vmatprep.subr.bf16.mxu1 %v4889_v50  ;;  %2319 = vadd.xlane.f32.xlu1 %v2318_v17 }
 0x601   : > { %3279 = vmatmul.mubr.msk.bf16.vlgmr.msra.gmra.mrb[36].mxu0 %vm240_vm0, %v1816_v46  ;;  %2236 = vadd.xlane.f32.xlu0 %v2235_v45  ;;  %v4504_v46 = vld [vmem:[%s4887_s3 + $0x8] sm:$0xff] }
 0x602   : > { %3290 = vmatprep.mubr.msk.bf16.mxu0 %vm3667_vm1, %v4889_v50  ;;  %v2209_v10 = vpop.permute.xlu0 %2208 }
 0x603   : > { %v2232_v57 = vsel %vm240_vm0, %v2209_v10, 0.0 }
 0x604   : > { %2233 = vadd.xlane.f32.xlu1 %v2232_v57 }
 0x606   : > { %3285 = vmatmul.mubr.msk.bf16.vlgmr.msra.gmra.mrb[36].mxu1 %vm240_vm0, %v1869_v42  ;;  %v2213_v15 = vpop.permute.xlu0 %2212 }
 0x607   : > { %3296 = vmatprep.mubr.msk.bf16.mxu1 %vm3667_vm1, %v4889_v50  ;;  %v2238_v9 = vsel %vm240_vm0, %v2213_v15, 0.0 }
 0x608   : > { %2239 = vadd.xlane.f32.xlu1 %v2238_v9  ;;  %v4524_v9 = vld [vmem:[%s4887_s3 + $0x18] sm:$0xff] }
 0x6b9   : > { %v4471_v53 = vpop.f32.mrb[24].mxu0 }
 0x6ba   : > { %v3244_v24 = vpop.f32.mrb[25].mxu0 }
 0x6bb   : > { %v4473_v48 = vpop.f32.mrb[26].mxu0 }
 0x6bc   : > { %v3245_v44 = vpop.f32.mrb[27].mxu0 }
 0x6c0   : > { %v4475_v5 = vpop.f32.mrb[24].mxu1 }
 0x6c1   : > { %v3250_v8 = vpop.f32.mrb[25].mxu1 }
 0x6c2   : > { %v4477_v52 = vpop.f32.mrb[26].mxu1 }
 0x6c3   : > { %v3251_v21 = vpop.f32.mrb[27].mxu1 }
 0x6c4   : > { %v4479_v13 = vpop.f32.mrb[28].mxu0  ;;  %v4534_v21 = vld [vmem:[%s4887_s3 + $0x20] sm:$0xff] }
 0x6c5   : > { %v3256_v37 = vpop.f32.mrb[29].mxu0 }
 0x6c6   : > { %v4481_v27 = vpop.f32.mrb[30].mxu0 }
 0x6c7   : > { %v3257_v58 = vpop.f32.mrb[31].mxu0 }
 0x6c8   : > { %v4483_v22 = vpop.f32.mrb[28].mxu1 }
 0x6c9   : > { %v3262_v49 = vpop.f32.mrb[29].mxu1 }
 0x6ca   : > { %v4485_v61 = vpop.f32.mrb[30].mxu1 }
 0x6cb   : > { %v3263_v33 = vpop.f32.mrb[31].mxu1 }
 0x6cc   : > { %v1754_v60 = vpop.f32.mrb[32].mxu0  ;;  %v2297_v33 = vpop.permute.xlu0 %2296 }
 0x6cd   : > { %v1755_v2 = vadd.f32 %v1754_v60, %v220_v26  ;;  %v3268_v34 = vpop.f32.mrb[33].mxu0 }
 0x6ce   : > { %v1757_v47 = vpop.f32.mrb[34].mxu0  ;;  %v4544_v34 = vld [vmem:[%s4887_s3 + $0x28] sm:$0xff] }
 0x6cf   : > { %v4499_v19 = vadd.f32 %v4496_v16, %v1755_v2  ;;  %v1758_v20 = vadd.f32 %v1757_v47, %v221_v12  ;;  %v3269_v56 = vpop.f32.mrb[35].mxu0 }
 0x6d1   : > { %v4507_v42 = vadd.f32 %v4504_v46, %v1758_v20  ;;  %v1807_v3 = vpop.f32.mrb[32].mxu1  ;;  %v1928_v4 = vsel %vm599_vm2, %v4499_v19, -inf }
 0x6d2   : > { %v1808_v6 = vadd.f32 %v1807_v3, %v220_v26  ;;  %v3274_v7 = vpop.f32.mrb[33].mxu1  ;;  %1929 = vmax.xlane.f32.xlu0 %v1928_v4 }
 0x6d3   : > { %v1810_v23 = vpop.f32.mrb[34].mxu1  ;;  %v1931_v17 = vsel %vm599_vm2, %v4507_v42, -inf  ;;  %v4554_v7 = vld [vmem:[%s4887_s3 + $0x30] sm:$0xff] }
 0x6d4   : > { %v4519_v10 = vadd.f32 %v4516_v1, %v1808_v6  ;;  %v1811_v11 = vadd.f32 %v1810_v23, %v221_v12  ;;  %v3275_v57 = vpop.f32.mrb[35].mxu1  ;;  %1932 = vmax.xlane.f32.xlu1 %v1931_v17  ;;  %v1860_v14 = vpop.f32.mrb[36].mxu0 }
 0x6d5   : > { %v1861_v45 = vadd.f32 %v1860_v14, %v220_v26  ;;  %v3280_v15 = vpop.f32.mrb[37].mxu0  ;;  %v2215_v6 = vpop.permute.xlu1 %2214 }
 0x6d6   : > { %v4527_v24 = vadd.f32 %v4524_v9, %v1811_v11  ;;  %v1863_v44 = vpop.f32.mrb[38].mxu0  ;;  %v1934_v8 = vsel %vm599_vm2, %v4519_v10, -inf  ;;  %v2301_v57 = vpop.permute.xlu0 %2300 }
 0x6d7   : > { %v4537_v37 = vadd.f32 %v4534_v21, %v1861_v45  ;;  %v1864_v58 = vadd.f32 %v1863_v44, %v221_v12  ;;  %1935 = vmax.xlane.f32.xlu0 %v1934_v8  ;;  %v3281_v49 = vpop.f32.mrb[39].mxu0 }
 0x6d8   : > { %v1937_v3 = vsel %vm599_vm2, %v4527_v24, -inf  ;;  %v2241_v49 = vsel %vm240_vm0, %v2215_v6, 0.0 }
 0x6d9   : > { %v1913_v60 = vpop.f32.mrb[36].mxu1  ;;  %v1940_v2 = vsel %vm599_vm2, %v4537_v37, -inf  ;;  %v4547_v47 = vadd.f32 %v4544_v34, %v1864_v58  ;;  %v2299_v44 = vpop.permute.xlu1 %2298 }
 0x6da   : > { %v1914_v20 = vadd.f32 %v1913_v60, %v220_v26  ;;  %v3286_v56 = vpop.f32.mrb[37].mxu1  ;;  %1941 = vmax.xlane.f32.xlu1 %v1940_v2  ;;  %v4562_v26 = vld [vmem:[%s4887_s3 + $0x38] sm:$0xff]  ;;  %v2217_v58 = vpop.permute.xlu0 %2216  ;;  %v2330_v60 = vsel %vm240_vm0, %v2301_v57, 0.0 }
 0x6db   : > { %v1916_v4 = vpop.f32.mrb[38].mxu1  ;;  %1938 = vmax.xlane.f32.xlu0 %v1937_v3  ;;  %v1943_v15 = vsel %vm599_vm2, %v4547_v47, -inf  ;;  %v2244_v56 = vsel %vm240_vm0, %v2217_v58, 0.0 }
 0x6dc   : > { %v4557_v23 = vadd.f32 %v4554_v7, %v1914_v20  ;;  %v1917_v17 = vadd.f32 %v1916_v4, %v221_v12  ;;  %v3287_v11 = vpop.f32.mrb[39].mxu1  ;;  %v2324_v12 = vsel %vm240_vm0, %v2297_v33, 0.0  ;;  %v2327_v20 = vsel %vm240_vm0, %v2299_v44, 0.0 }
 0x6dd   : > { %v2303_v2 = vpop.permute.xlu1 %2302 }
 0x6de   : > { %v4565_v14 = vadd.f32 %v4562_v26, %v1917_v17  ;;  %v1946_v45 = vsel %vm599_vm2, %v4557_v23, -inf  ;;  %v2221_v3 = vpop.permute.xlu0 %2220  ;;  %v2333_v4 = vsel %vm240_vm0, %v2303_v2, 0.0 }
 0x6df   : > { %1947 = vmax.xlane.f32.xlu1 %v1946_v45  ;;  %1944 = vmax.xlane.f32.xlu0 %v1943_v15  ;;  %v2250_v17 = vsel %vm240_vm0, %v2221_v3, 0.0 }
 0x6e0   : > { %v1949_v8 = vsel %vm599_vm2, %v4565_v14, -inf }
 0x6e1   : > { %v2219_v33 = vpop.permute.xlu1 %2218 }
 0x6e2   : > { %v2247_v6 = vsel %vm240_vm0, %v2219_v33, 0.0  ;;  %v4586_v15 = vpop.xlane.xlu0 %2316 }
 0x6e3   : > { %1950 = vmax.xlane.f32.xlu0 %v1949_v8  ;;  %2325 = vadd.xlane.f32.xlu1 %v2324_v12 }
 0x6e5   : > { %v2223_v11 = vpop.permute.xlu1 %2222 }
 0x6e6   : > { %v2253_v57 = vsel %vm240_vm0, %v2223_v11, 0.0  ;;  %v2323_v12 = vpop.xlane.xlu0 %2322 }
 0x6e7   : > { %2242 = vadd.xlane.f32.xlu0 %v2241_v49  ;;  %2331 = vadd.xlane.f32.xlu1 %v2330_v60 }
 0x6e9   : > { %v2314_v45 = vpop.xlane.xlu1 %2313 }
 0x6ea   : > { %v4590_v58 = vpop.xlane.xlu0 %2236 }
 0x6eb   : > { %2328 = vadd.xlane.f32.xlu0 %v2327_v20  ;;  %2245 = vadd.xlane.f32.xlu1 %v2244_v56 }
 0x6ed   : > { %v2320_v44 = vpop.xlane.xlu1 %2319 }
 0x6ef   : > { %2334 = vadd.xlane.f32.xlu0 %v2333_v4  ;;  %2251 = vadd.xlane.f32.xlu1 %v2250_v17 }
 0x6f1   : > { %v4588_v8 = vpop.xlane.xlu1 %2233 }
 0x6f3   : > { %2248 = vadd.xlane.f32.xlu0 %v2247_v6 }
 0x6f5   : > { %v4592_v49 = vpop.xlane.xlu1 %2239 }
 0x6f7   : > { %2254 = vadd.xlane.f32.xlu0 %v2253_v57 }
 0x700   : > { %2020 = vrot.lane.b32.xlu1 %v4015_v35, %s3676_s8 }
 0x704   : > { %2114 = vrot.lane.b32.xlu1 %v4020_v36, %s3676_s8 }
 0x708   : > { %2161 = vrot.lane.b32.xlu1 %v4025_v38, %s3676_s8 }
 0x70d   : > { %2067 = vrot.lane.b32.xlu0 %v4030_v40, %s3676_s8 }
 0x75f   : > { %v1930_v60 = vpop.xlane.xlu0 %1929 }
 0x760   : > { %v1952_v2 = vsub.f32 %v4499_v19, %v1930_v60 }
 0x761   : > { %v1933_v20 = vpop.xlane.xlu1 %1932 }
 0x762   : > { %v1960_v56 = vmul.f32 1.442695, %v1952_v2  ;;  %v1953_v3 = vsub.f32 %v4507_v42, %v1933_v20 }
 0x764   : > { %3544 = vpow2.f32 %v1960_v56  ;;  %v1962_v33 = vmul.f32 1.442695, %v1953_v3  ;;  %v1936_v4 = vpop.xlane.xlu0 %1935 }
 0x765   : > { %v1954_v17 = vsub.f32 %v4519_v10, %v1936_v4 }
 0x766   : > { %3546 = vpow2.f32 %v1962_v33 }
 0x767   : > { %v1964_v6 = vmul.f32 1.442695, %v1954_v17  ;;  %v1942_v11 = vpop.xlane.xlu1 %1941 }
 0x768   : > { %v1939_v57 = vpop.xlane.xlu0 %1938  ;;  %v1956_v50 = vsub.f32 %v4537_v37, %v1942_v11 }
 0x769   : > { %3548 = vpow2.f32 %v1964_v6  ;;  %v1955_v18 = vsub.f32 %v4527_v24, %v1939_v57  ;;  %v2336_v57 = vadd.f32 1e-06, %v2314_v45  ;;  %v2337_v45 = vadd.f32 1e-06, %v4586_v15 }
 0x76a   : > { %v1968_v0 = vmul.f32 1.442695, %v1956_v50 }
 0x76b   : > { %v1966_v19 = vmul.f32 1.442695, %v1955_v18 }
 0x76c   : > { %3550 = vpow2.f32 %v1968_v0  ;;  %v1945_v60 = vpop.xlane.xlu0 %1944  ;;  %v1948_v2 = vpop.xlane.xlu1 %1947 }
 0x76d   : > { %3552 = vpow2.f32 %v1966_v19  ;;  %v1957_v42 = vsub.f32 %v4547_v47, %v1945_v60  ;;  %v1958_v20 = vsub.f32 %v4557_v23, %v1948_v2  ;;  %v2339_v2 = vadd.f32 1e-06, %v2323_v12 }
 0x76e   : > { %v4601_v10 = vpop.eup %3544 }
 0x76f   : > { %v1970_v56 = vmul.f32 1.442695, %v1957_v42  ;;  %v1972_v3 = vmul.f32 1.442695, %v1958_v20  ;;  %v1976_v37 = vsel %vm599_vm2, %v4601_v10, 0.0 }
 0x770   : > { %v4605_v33 = vpop.eup %3546  ;;  %v1951_v24 = vpop.xlane.xlu0 %1950  ;;  %1977 = vadd.xlane.f32.xlu1 %v1976_v37 }
 0x771   : > { %v2326_v50 = vpop.xlane.xlu1 %2325  ;;  %3554 = vpow2.f32 %v1970_v56  ;;  %v1959_v0 = vsub.f32 %v4565_v14, %v1951_v24  ;;  %v1979_v18 = vsel %vm599_vm2, %v4605_v33, 0.0  ;;  %v2338_v14 = vadd.f32 1e-06, %v2320_v44 }
 0x772   : > { %3556 = vpow2.f32 %v1972_v3  ;;  %1980 = vadd.xlane.f32.xlu0 %v1979_v18  ;;  %v2340_v3 = vadd.f32 1e-06, %v2326_v50 }
 0x773   : > { %v4610_v47 = vpop.eup %3548  ;;  %v1974_v23 = vmul.f32 1.442695, %v1959_v0 }
 0x774   : > { %v2243_v4 = vpop.xlane.xlu0 %2242  ;;  %v1982_v17 = vsel %vm599_vm2, %v4610_v47, 0.0 }
 0x775   : > { %v2332_v6 = vpop.xlane.xlu1 %2331  ;;  %3558 = vpow2.f32 %v1974_v23  ;;  %1983 = vadd.xlane.f32.xlu1 %v1982_v17 }
 0x776   : > { %v4614_v11 = vpop.eup %3550  ;;  %3560 = vrsqrt.f32 %v2336_v57  ;;  %v2342_v18 = vadd.f32 1e-06, %v2332_v6 }
 0x777   : > { %v4616_v19 = vpop.eup %3552  ;;  %v1988_v60 = vsel %vm599_vm2, %v4614_v11, 0.0  ;;  %3562 = vrsqrt.f32 %v2338_v14  ;;  %v2256_v14 = vadd.f32 1e-06, %v4588_v8  ;;  %v2259_v8 = vadd.f32 1e-06, %v2243_v4 }
 0x778   : > { %v1985_v42 = vsel %vm599_vm2, %v4616_v19, 0.0  ;;  %v2329_v20 = vpop.xlane.xlu0 %2328  ;;  %3564 = vrsqrt.f32 %v2339_v2 }
 0x779   : > { %v2246_v56 = vpop.xlane.xlu1 %2245  ;;  %1986 = vadd.xlane.f32.xlu0 %v1985_v42  ;;  %1989 = vadd.xlane.f32.xlu1 %v1988_v60  ;;  %v2341_v37 = vadd.f32 1e-06, %v2329_v20  ;;  %3566 = vrsqrt.f32 %v2340_v3  ;;  %v2257_v60 = vadd.f32 1e-06, %v4590_v58  ;;  %v2258_v20 = vadd.f32 1e-06, %v4592_v49 }
 0x77a   : > { %v4894_v3 = vmov 0.0  }
 0x77b   : > { %v4622_v24 = vpop.eup %3554  ;;  %3568 = vrsqrt.f32 %v2341_v37 }
 0x77c   : > { %v4625_v44 = vpop.eup %3556  ;;  %v1991_v12 = vsel %vm599_vm2, %v4622_v24, 0.0  ;;  %v2335_v0 = vpop.xlane.xlu0 %2334  ;;  %3570 = vrsqrt.f32 %v2337_v45 }
 0x77d   : > { %v2252_v23 = vpop.xlane.xlu1 %2251  ;;  %1992 = vadd.xlane.f32.xlu0 %v1991_v12  ;;  %v1994_v50 = vsel %vm599_vm2, %v4625_v44, 0.0  ;;  %v2343_v17 = vadd.f32 1e-06, %v2335_v0  ;;  %3572 = vrsqrt.f32 %v2342_v18  ;;  %v2260_v12 = vadd.f32 1e-06, %v2246_v56 }
 0x77e   : > { %1995 = vadd.xlane.f32.xlu1 %v1994_v50  ;;  %v2262_v57 = vadd.f32 1e-06, %v2252_v23 }
 0x77f   : > { %v4631_v15 = vpop.eup %3558  ;;  %3574 = vrsqrt.f32 %v2343_v17 }
 0x780   : > { %v1997_v6 = vsel %vm599_vm2, %v4631_v15, 0.0  ;;  %v2249_v2 = vpop.xlane.xlu0 %2248  ;;  %3576 = vrsqrt.f32 %v2262_v57  ;;  %v3561_v37 = vpop.eup %3560 }
 0x781   : > { %v2021_v42 = vpop.permute.xlu1 %2020  ;;  %1998 = vadd.xlane.f32.xlu0 %v1997_v6  ;;  %3578 = vrsqrt.f32 %v2256_v14  ;;  %v3563_v58 = vpop.eup %3562  ;;  %v2261_v18 = vadd.f32 1e-06, %v2249_v2  ;;  %v2352_v59 = vmul.f32 %v4356_v31, %v3561_v37 }
 0x782   : > { %3289 = vmatpush3.bf16.msra.mxu0 %v2021_v42  ;;  %3580 = vrsqrt.f32 %v2257_v60  ;;  %v3565_v23 = vpop.eup %3564  ;;  %v2354_v57 = vmul.f32 %v4329_v41, %v3563_v58 }
 0x783   : > { %3300 = vmatprep.subr.bf16.mxu0 %v4894_v3  ;;  %3582 = vrsqrt.f32 %v2258_v20  ;;  %v3567_v50 = vpop.eup %3566  ;;  %v2355_v14 = vmul.f32 %v4333_v29, %v3565_v23 }
 0x784   : > { %v2255_v45 = vpop.xlane.xlu0 %2254  ;;  %v2356_v60 = vmul.f32 %v4338_v62, %v3567_v50 }
 0x785   : > { %v2263_v0 = vadd.f32 1e-06, %v2255_v45  ;;  %v3569_v17 = vpop.eup %3568 }
 0x786   : > { %v3571_v49 = vpop.eup %3570  ;;  %v2357_v2 = vmul.f32 %v4342_v51, %v3569_v17 }
 0x787   : > { %3584 = vrsqrt.f32 %v2263_v0  ;;  %v3573_v4 = vpop.eup %3572  ;;  %v2353_v50 = vmul.f32 %v4360_v63, %v3571_v49 }
 0x788   : > { %3586 = vrsqrt.f32 %v2259_v8  ;;  %v2068_v6 = vpop.permute.xlu0 %2067  ;;  %v2365_v8 = vpack.c.bf16 %v2355_v14, %v2354_v57  ;;  %v2366_v58 = vpack.c.bf16 %v2357_v2, %v2356_v60  ;;  %v2358_v0 = vmul.f32 %v4347_v55, %v3573_v4 }
 0x789   : > { %3588 = vrsqrt.f32 %v2260_v12  ;;  %3295 = vmatpush3.bf16.msra.mxu1 %v2068_v6  ;;  %v3575_v56 = vpop.eup %3574 }
 0x78a   : > { %3590 = vrsqrt.f32 %v2261_v18  ;;  %3306 = vmatprep.subr.bf16.mxu1 %v4894_v3  ;;  %v3577_v42 = vpop.eup %3576  ;;  %v2359_v12 = vmul.f32 %v4351_v39, %v3575_v56 }
 0x78b   : > { %v3579_v20 = vpop.eup %3578  ;;  %v2278_v23 = vmul.f32 %v4347_v55, %v3577_v42  ;;  %v2364_v42 = vpack.c.bf16 %v2353_v50, %v2352_v59 }
 0x78c   : > { %v3581_v45 = vpop.eup %3580  ;;  %v2272_v17 = vmul.f32 %v4356_v31, %v3579_v20  ;;  %v2367_v4 = vpack.c.bf16 %v2359_v12, %v2358_v0 }
 0x78d   : > { %v3583_v18 = vpop.eup %3582  ;;  %v2273_v57 = vmul.f32 %v4360_v63, %v3581_v45  ;;  %v2286_v56 = vmul.f32 %v4370_v54, %v2278_v23 }
 0x78e   : > { %v2280_v37 = vmul.f32 %v4370_v54, %v2272_v17  ;;  %v2274_v63 = vmul.f32 %v4329_v41, %v3583_v18 }
 0x78f   : > { %2425 = vrot.lane.b32.xlu1 %v2365_v8, %s3674_s21  ;;  %v2281_v49 = vmul.f32 %v4370_v54, %v2273_v57 }
 0x790   : > { %v2282_v0 = vmul.f32 %v4370_v54, %v2274_v63 }
 0x791   : > { %v3585_v6 = vpop.eup %3584 }
 0x792   : > { %v3587_v14 = vpop.eup %3586  ;;  %v2279_v8 = vmul.f32 %v4351_v39, %v3585_v6 }
 0x793   : > { %v3589_v60 = vpop.eup %3588  ;;  %2478 = vrot.lane.b32.xlu1 %v2366_v58, %s3674_s21  ;;  %v2275_v31 = vmul.f32 %v4333_v29, %v3587_v14  ;;  %v2360_v58 = vpack.c.bf16 %v2281_v49, %v2280_v37 }
 0x794   : > { %v3591_v55 = vpop.eup %3590  ;;  %v2287_v2 = vmul.f32 %v4370_v54, %v2279_v8  ;;  %v2276_v39 = vmul.f32 %v4338_v62, %v3589_v60 }
 0x795   : > { %v2277_v20 = vmul.f32 %v4342_v51, %v3591_v55  ;;  %v2283_v59 = vmul.f32 %v4370_v54, %v2275_v31  ;;  %v2115_v51 = vpop.permute.xlu1 %2114 }
 0x796   : > { %v2363_v45 = vpack.c.bf16 %v2287_v2, %v2286_v56  ;;  %v2284_v29 = vmul.f32 %v4370_v54, %v2276_v39 }
 0x797   : > { %2372 = vrot.lane.b32.xlu0 %v2364_v42, %s3674_s21  ;;  %2531 = vrot.lane.b32.xlu1 %v2367_v4, %s3674_s21  ;;  %v2285_v41 = vmul.f32 %v4370_v54, %v2277_v20  ;;  %v2361_v12 = vpack.c.bf16 %v2283_v59, %v2282_v0 }
 0x799   : > { %v2362_v62 = vpack.c.bf16 %v2285_v41, %v2284_v29  ;;  %v2162_v23 = vpop.permute.xlu1 %2161 }
 0x79b   : > { %2369 = vrot.lane.b32.xlu0 %v2360_v58, %s3675_s9  ;;  %2528 = vrot.lane.b32.xlu1 %v2363_v45, %s3675_s9 }
 0x79f   : > { %2422 = vrot.lane.b32.xlu0 %v2361_v12, %s3675_s9 }
 0x7a3   : > { %2475 = vrot.lane.b32.xlu0 %v2362_v62, %s3675_s9 }
 0x7fd   : > { %v1978_v18 = vpop.xlane.xlu1 %1977 }
 0x7fe   : > { %3592 = vrcp.f32 %v1978_v18 }
 0x7ff   : > { %v1981_v6 = vpop.xlane.xlu0 %1980 }
 0x800   : > { %3594 = vrcp.f32 %v1981_v6 }
 0x802   : > { %v1984_v50 = vpop.xlane.xlu1 %1983 }
 0x803   : > { %3596 = vrcp.f32 %v1984_v50 }
 0x806   : > { %v1987_v17 = vpop.xlane.xlu0 %1986  ;;  %v1990_v57 = vpop.xlane.xlu1 %1989 }
 0x807   : > { %3598 = vrcp.f32 %v1987_v17 }
 0x808   : > { %v3593_v54 = vpop.eup %3592  ;;  %3600 = vrcp.f32 %v1990_v57 }
 0x809   : > { %v2008_v60 = vmul.f32 %v3593_v54, %v4601_v10 }
 0x80a   : > { %v3595_v14 = vpop.eup %3594  ;;  %v1993_v8 = vpop.xlane.xlu0 %1992 }
 0x80b   : > { %v2009_v4 = vmul.f32 %v3595_v14, %v4605_v33  ;;  %3602 = vrcp.f32 %v1993_v8  ;;  %v1996_v56 = vpop.xlane.xlu1 %1995 }
 0x80c   : > { %3604 = vrcp.f32 %v1996_v56 }
 0x80d   : > { %v2016_v55 = vpack.c.bf16 %v2009_v4, %v2008_v60  ;;  %v3597_v42 = vpop.eup %3596 }
 0x80e   : > { %v1999_v2 = vpop.xlane.xlu0 %1998  ;;  %v2010_v10 = vmul.f32 %v3597_v42, %v4610_v47 }
 0x80f   : > { %3606 = vrcp.f32 %v1999_v2  ;;  %3291 = vmatmul.mubr.msk.bf16.vlgmr.msra.gmra.mrb[40].mxu0 %vm599_vm2, %v2016_v55  ;;  %v2426_v29 = vpop.permute.xlu1 %2425 }
 0x810   : > { %3301 = vmatpush3.bf16.msra.mxu0 %v2115_v51  ;;  %3302 = vmatprep.mubr.msk.bf16.mxu0 %vm3667_vm1, %v4894_v3  ;;  %v2431_v12 = vsel %vm240_vm0, %v2426_v29, 0 }
 0x811   : > { %v3599_v37 = vpop.eup %3598  ;;  %3312 = vmatprep.subr.bf16.mxu0 %v4894_v3 }
 0x812   : > { %v2011_v33 = vmul.f32 %v3599_v37, %v4616_v19  ;;  %v3601_v49 = vpop.eup %3600  ;;  %v2373_v58 = vpop.permute.xlu0 %2372 }
 0x813   : > { %v2012_v39 = vmul.f32 %v3601_v49, %v4614_v11  ;;  %v2378_v11 = vsel %vm240_vm0, %v2373_v58, 0  ;;  %v2479_v41 = vpop.permute.xlu1 %2478  ;;  %v222_v49 = vld [vmem:[%s4886_s2 + $0x30] sm:$0xff] }
 0x814   : > { %v2017_v31 = vpack.c.bf16 %v2011_v33, %v2010_v10 }
 0x815   : > { %v3603_v63 = vpop.eup %3602 }
 0x816   : > { %v2013_v20 = vmul.f32 %v3603_v63, %v4622_v24  ;;  %3297 = vmatmul.mubr.msk.bf16.vlgmr.msra.gmra.mrb[40].mxu1 %vm599_vm2, %v2017_v31  ;;  %v3605_v45 = vpop.eup %3604 }
 0x817   : > { %3307 = vmatpush3.bf16.msra.mxu1 %v2162_v23  ;;  %3308 = vmatprep.mubr.msk.bf16.mxu1 %vm3667_vm1, %v4894_v3  ;;  %v2014_v19 = vmul.f32 %v3605_v45, %v4625_v44  ;;  %v2370_v44 = vpop.permute.xlu0 %2369  ;;  %v2532_v62 = vpop.permute.xlu1 %2531 }
 0x818   : > { %v2018_v59 = vpack.c.bf16 %v2013_v20, %v2012_v39  ;;  %3318 = vmatprep.subr.bf16.mxu1 %v4894_v3  ;;  %v2537_v23 = vsel %vm240_vm0, %v2532_v62, 0  ;;  %v223_v39 = vld [vmem:[%s4886_s2 + $0x38] sm:$0xff] }
 0x819   : > { %v3607_v47 = vpop.eup %3606 }
 0x81a   : > { %v2015_v0 = vmul.f32 %v3607_v47, %v4631_v15  ;;  %3303 = vmatmul.mubr.msk.bf16.vlgmr.msra.gmra.mrb[44].mxu0 %vm599_vm2, %v2018_v59  ;;  %v2484_v15 = vsel %vm240_vm0, %v2479_v41, 0 }
 0x81b   : > { %3313 = vmatpush3.bf16.xpose.msra.mxu0 %v2378_v11  ;;  %3314 = vmatprep.mubr.msk.bf16.mxu0 %vm3667_vm1, %v4894_v3  ;;  %v2423_v51 = vpop.permute.xlu0 %2422  ;;  %v2529_v6 = vpop.permute.xlu1 %2528 }
 0x81c   : > { %v2019_v24 = vpack.c.bf16 %v2015_v0, %v2014_v19  ;;  %3324 = vmatprep.subr.bf16.mxu0 %v4894_v3 }
 0x81e   : > { %3309 = vmatmul.mubr.msk.bf16.vlgmr.msra.gmra.mrb[44].mxu1 %vm599_vm2, %v2019_v24 }
 0x81f   : > { %3320 = vmatprep.mubr.msk.bf16.mxu1 %vm3667_vm1, %v4894_v3  ;;  %v2476_v18 = vpop.permute.xlu0 %2475 }
 0x820   : > { %3319 = vmatpush3.bf16.xpose.msra.mxu1 %v2431_v12 }
 0x821   : > { %3330 = vmatprep.subr.bf16.mxu1 %v4894_v3 }
 0x822   : > { %3315 = vmatmul.mubr.msk.bf16.vlgmr.msra.gmra.mrb[48].mxu0 %vm240_vm0, %v2370_v44 }
 0x823   : > { %3325 = vmatpush3.bf16.xpose.msra.mxu0 %v2484_v15  ;;  %3326 = vmatprep.mubr.msk.bf16.mxu0 %vm3667_vm1, %v4894_v3 }
 0x824   : > { %3336 = vmatprep.subr.bf16.mxu0 %v4894_v3 }
 0x827   : > { %3321 = vmatmul.mubr.msk.bf16.vlgmr.msra.gmra.mrb[48].mxu1 %vm240_vm0, %v2423_v51 }
 0x828   : > { %3331 = vmatpush3.bf16.xpose.msra.mxu1 %v2537_v23  ;;  %3332 = vmatprep.mubr.msk.bf16.mxu1 %vm3667_vm1, %v4894_v3 }
 0x829   : > { %3342 = vmatprep.subr.bf16.mxu1 %v4894_v3 }
 0x82a   : > { %3327 = vmatmul.mubr.msk.bf16.vlgmr.msra.gmra.mrb[52].mxu0 %vm240_vm0, %v2476_v18 }
 0x82b   : > { %3338 = vmatprep.mubr.msk.bf16.mxu0 %vm3667_vm1, %v4894_v3 }
 0x82f   : > { %3333 = vmatmul.mubr.msk.bf16.vlgmr.msra.gmra.mrb[52].mxu1 %vm240_vm0, %v2529_v6 }
 0x830   : > { %3344 = vmatprep.mubr.msk.bf16.mxu1 %vm3667_vm1, %v4894_v3 }
 0x8e2   : > { %v4714_v50 = vpop.f32.mrb[40].mxu0 }
 0x8e3   : > { %v3292_v17 = vpop.f32.mrb[41].mxu0 }
 0x8e4   : > { %v4716_v57 = vpop.f32.mrb[42].mxu0 }
 0x8e5   : > { %v3293_v54 = vpop.f32.mrb[43].mxu0 }
 0x8e9   : > { %v4718_v14 = vpop.f32.mrb[40].mxu1 }
 0x8ea   : > { %v3298_v8 = vpop.f32.mrb[41].mxu1 }
 0x8eb   : > { %v4720_v60 = vpop.f32.mrb[42].mxu1 }
 0x8ec   : > { %v3299_v4 = vpop.f32.mrb[43].mxu1 }
 0x8ed   : > { %v4722_v56 = vpop.f32.mrb[44].mxu0 }
 0x8ee   : > { %v3304_v55 = vpop.f32.mrb[45].mxu0 }
 0x8ef   : > { %v4724_v2 = vpop.f32.mrb[46].mxu0 }
 0x8f0   : > { %v3305_v42 = vpop.f32.mrb[47].mxu0 }
 0x8f1   : > { %v4726_v37 = vpop.f32.mrb[44].mxu1 }
 0x8f2   : > { %v3310_v10 = vpop.f32.mrb[45].mxu1 }
 0x8f3   : > { %v4728_v33 = vpop.f32.mrb[46].mxu1 }
 0x8f4   : > { %v3311_v31 = vpop.f32.mrb[47].mxu1 }
 0x8f5   : > { %v2414_v63 = vpop.f32.mrb[48].mxu0 }
 0x8f6   : > { %v2415_v20 = vadd.f32 %v2414_v63, %v222_v49  ;;  %v3316_v45 = vpop.f32.mrb[49].mxu0 }
 0x8f7   : > { %v2417_v58 = vpop.f32.mrb[50].mxu0 }
 0x8f8   : > { %v2580_v59 = vadd.f32 %v4496_v16, %v2415_v20  ;;  %v2418_v47 = vadd.f32 %v2417_v58, %v223_v39  ;;  %v3317_v19 = vpop.f32.mrb[51].mxu0 }
 0x8fa   : > { %v2581_v0 = vadd.f32 %v4504_v46, %v2418_v47  ;;  %v2467_v29 = vpop.f32.mrb[48].mxu1  ;;  %v2588_v11 = vsel %vm599_vm2, %v2580_v59, -inf }
 0x8fb   : > { %v2468_v24 = vadd.f32 %v2467_v29, %v222_v49  ;;  %v3322_v41 = vpop.f32.mrb[49].mxu1  ;;  %2589 = vmax.xlane.f32.xlu0 %v2588_v11 }
 0x8fc   : > { %v2470_v12 = vpop.f32.mrb[50].mxu1  ;;  %v2591_v44 = vsel %vm599_vm2, %v2581_v0, -inf }
 0x8fd   : > { %v2582_v15 = vadd.f32 %v4516_v1, %v2468_v24  ;;  %v2471_v62 = vadd.f32 %v2470_v12, %v223_v39  ;;  %v3323_v51 = vpop.f32.mrb[51].mxu1  ;;  %2592 = vmax.xlane.f32.xlu1 %v2591_v44  ;;  %v2520_v23 = vpop.f32.mrb[52].mxu0 }
 0x8fe   : > { %v2521_v16 = vadd.f32 %v2520_v23, %v222_v49  ;;  %v3328_v18 = vpop.f32.mrb[53].mxu0 }
 0x8ff   : > { %v2583_v6 = vadd.f32 %v4524_v9, %v2471_v62  ;;  %v2594_v46 = vsel %vm599_vm2, %v2582_v15, -inf  ;;  %v2523_v17 = vpop.f32.mrb[54].mxu0 }
 0x900   : > { %v2584_v54 = vadd.f32 %v4534_v21, %v2521_v16  ;;  %2595 = vmax.xlane.f32.xlu0 %v2594_v46  ;;  %v2524_v8 = vadd.f32 %v2523_v17, %v223_v39  ;;  %v3329_v4 = vpop.f32.mrb[55].mxu0 }
 0x901   : > { %v2597_v63 = vsel %vm599_vm2, %v2583_v6, -inf }
 0x902   : > { %v2573_v55 = vpop.f32.mrb[52].mxu1  ;;  %v2600_v42 = vsel %vm599_vm2, %v2584_v54, -inf  ;;  %v2585_v1 = vadd.f32 %v4544_v34, %v2524_v8 }
 0x903   : > { %v2574_v10 = vadd.f32 %v2573_v55, %v222_v49  ;;  %v3334_v31 = vpop.f32.mrb[53].mxu1  ;;  %2601 = vmax.xlane.f32.xlu1 %v2600_v42 }
 0x904   : > { %2598 = vmax.xlane.f32.xlu0 %v2597_v63  ;;  %v2576_v9 = vpop.f32.mrb[54].mxu1  ;;  %v2603_v47 = vsel %vm599_vm2, %v2585_v1, -inf }
 0x905   : > { %v2586_v20 = vadd.f32 %v4554_v7, %v2574_v10  ;;  %v2577_v45 = vadd.f32 %v2576_v9, %v223_v39  ;;  %v3335_v58 = vpop.f32.mrb[55].mxu1 }
 0x907   : > { %v2587_v21 = vadd.f32 %v4562_v26, %v2577_v45  ;;  %v2606_v19 = vsel %vm599_vm2, %v2586_v20, -inf }
 0x908   : > { %2604 = vmax.xlane.f32.xlu0 %v2603_v47  ;;  %2607 = vmax.xlane.f32.xlu1 %v2606_v19 }
 0x909   : > { %v2609_v34 = vsel %vm599_vm2, %v2587_v21, -inf }
 0x90c   : > { %2610 = vmax.xlane.f32.xlu0 %v2609_v34 }
 0x919   : > { %2680 = vrot.lane.b32.xlu1 %v4015_v35, %s3677_s12 }
 0x988   : > { %v2590_v49 = vpop.xlane.xlu0 %2589 }
 0x989   : > { %v2612_v29 = vsub.f32 %v2580_v59, %v2590_v49 }
 0x98a   : > { %v2593_v7 = vpop.xlane.xlu1 %2592 }
 0x98b   : > { %v2620_v39 = vmul.f32 1.442695, %v2612_v29  ;;  %v2613_v11 = vsub.f32 %v2581_v0, %v2593_v7 }
 0x98d   : > { %3608 = vpow2.f32 %v2620_v39  ;;  %v2622_v26 = vmul.f32 1.442695, %v2613_v11  ;;  %v2596_v24 = vpop.xlane.xlu0 %2595 }
 0x98e   : > { %v2614_v41 = vsub.f32 %v2582_v15, %v2596_v24 }
 0x98f   : > { %3610 = vpow2.f32 %v2622_v26 }
 0x990   : > { %v2624_v12 = vmul.f32 1.442695, %v2614_v41  ;;  %v2602_v44 = vpop.xlane.xlu1 %2601 }
 0x991   : > { %v2599_v62 = vpop.xlane.xlu0 %2598  ;;  %v2616_v51 = vsub.f32 %v2584_v54, %v2602_v44 }
 0x992   : > { %3612 = vpow2.f32 %v2624_v12  ;;  %v2615_v23 = vsub.f32 %v2583_v6, %v2599_v62 }
 0x993   : > { %v2628_v16 = vmul.f32 1.442695, %v2616_v51 }
 0x994   : > { %v2626_v18 = vmul.f32 1.442695, %v2615_v23 }
 0x995   : > { %3614 = vpow2.f32 %v2628_v16  ;;  %v2605_v35 = vpop.xlane.xlu0 %2604  ;;  %v2608_v46 = vpop.xlane.xlu1 %2607 }
 0x996   : > { %3616 = vpow2.f32 %v2626_v18  ;;  %v2617_v59 = vsub.f32 %v2585_v1, %v2605_v35  ;;  %v2618_v17 = vsub.f32 %v2586_v20, %v2608_v46 }
 0x997   : > { %v4754_v0 = vpop.eup %3608 }
 0x998   : > { %v2630_v8 = vmul.f32 1.442695, %v2617_v59  ;;  %v2632_v4 = vmul.f32 1.442695, %v2618_v17  ;;  %v2636_v15 = vsel %vm599_vm2, %v4754_v0, 0.0 }
 0x999   : > { %v4758_v55 = vpop.eup %3610  ;;  %v2611_v54 = vpop.xlane.xlu0 %2610  ;;  %2637 = vadd.xlane.f32.xlu1 %v2636_v15 }
 0x99a   : > { %v2681_v6 = vpop.permute.xlu1 %2680  ;;  %3618 = vpow2.f32 %v2630_v8  ;;  %v2619_v42 = vsub.f32 %v2587_v21, %v2611_v54  ;;  %v2639_v10 = vsel %vm599_vm2, %v4758_v55, 0.0 }
 0x99b   : > { %3337 = vmatpush3.bf16.msra.mxu0 %v2681_v6  ;;  %3620 = vpow2.f32 %v2632_v4  ;;  %2640 = vadd.xlane.f32.xlu0 %v2639_v10 }
 0x99c   : > { %3348 = vmatprep.subr.bf16.mxu0 %v4894_v3  ;;  %v4763_v1 = vpop.eup %3612  ;;  %v2634_v31 = vmul.f32 1.442695, %v2619_v42 }
 0x99d   : > { %v2642_v63 = vsel %vm599_vm2, %v4763_v1, 0.0 }
 0x99e   : > { %3622 = vpow2.f32 %v2634_v31  ;;  %2643 = vadd.xlane.f32.xlu1 %v2642_v63 }
 0x99f   : > { %v4767_v9 = vpop.eup %3614 }
 0x9a0   : > { %v4769_v20 = vpop.eup %3616  ;;  %v2648_v45 = vsel %vm599_vm2, %v4767_v9, 0.0 }
 0x9a1   : > { %v2645_v58 = vsel %vm599_vm2, %v4769_v20, 0.0 }
 0x9a2   : > { %2646 = vadd.xlane.f32.xlu0 %v2645_v58  ;;  %2649 = vadd.xlane.f32.xlu1 %v2648_v45 }
 0x9a4   : > { %v4775_v21 = vpop.eup %3618 }
 0x9a5   : > { %v4777_v47 = vpop.eup %3620  ;;  %v2651_v19 = vsel %vm599_vm2, %v4775_v21, 0.0 }
 0x9a6   : > { %2652 = vadd.xlane.f32.xlu0 %v2651_v19  ;;  %v2654_v34 = vsel %vm599_vm2, %v4777_v47, 0.0 }
 0x9a7   : > { %2655 = vadd.xlane.f32.xlu1 %v2654_v34 }
 0x9a8   : > { %v4783_v49 = vpop.eup %3622 }
 0x9a9   : > { %v2657_v29 = vsel %vm599_vm2, %v4783_v49, 0.0 }
 0x9aa   : > { %2658 = vadd.xlane.f32.xlu0 %v2657_v29 }
 0x9b8   : > { %2774 = vrot.lane.b32.xlu1 %v4020_v36, %s3677_s12 }
 0x9bc   : > { %2821 = vrot.lane.b32.xlu1 %v4025_v38, %s3677_s12 }
 0x9c0   : > { %2878 = vrot.lane.b32.xlu1 %v4473_v48, %s3678_s13  ;;  %2727 = vrot.lane.b32.xlu0 %v4030_v40, %s3677_s12 }
 0x9c4   : > { %2882 = vrot.lane.b32.xlu1 %v4477_v52, %s3678_s13  ;;  %2876 = vrot.lane.b32.xlu0 %v4471_v53, %s3678_s13 }
 0x9c8   : > { %2886 = vrot.lane.b32.xlu1 %v4481_v27, %s3678_s13  ;;  %2880 = vrot.lane.b32.xlu0 %v4475_v5, %s3678_s13 }
 0x9cc   : > { %2890 = vrot.lane.b32.xlu1 %v4485_v61, %s3678_s13  ;;  %2884 = vrot.lane.b32.xlu0 %v4479_v13, %s3678_s13 }
 0x9d0   : > { %2910 = vrot.lane.b32.xlu1 %v4716_v57, %s3679_s14  ;;  %2888 = vrot.lane.b32.xlu0 %v4483_v22, %s3678_s13 }
 0x9d4   : > { %2914 = vrot.lane.b32.xlu1 %v4720_v60, %s3679_s14  ;;  %2908 = vrot.lane.b32.xlu0 %v4714_v50, %s3679_s14 }
 0x9d8   : > { %2918 = vrot.lane.b32.xlu1 %v4724_v2, %s3679_s14  ;;  %2912 = vrot.lane.b32.xlu0 %v4718_v14, %s3679_s14 }
 0x9dc   : > { %2922 = vrot.lane.b32.xlu1 %v4728_v33, %s3679_s14  ;;  %2916 = vrot.lane.b32.xlu0 %v4722_v56, %s3679_s14 }
 0x9e0   : > { %2920 = vrot.lane.b32.xlu0 %v4726_v37, %s3679_s14 }
 0xa26   : > { %v2638_v36 = vpop.xlane.xlu1 %2637 }
 0xa27   : > { %3624 = vrcp.f32 %v2638_v36 }
 0xa28   : > { %v2641_v38 = vpop.xlane.xlu0 %2640 }
 0xa29   : > { %3626 = vrcp.f32 %v2641_v38 }
 0xa2b   : > { %v2644_v40 = vpop.xlane.xlu1 %2643 }
 0xa2c   : > { %3628 = vrcp.f32 %v2644_v40 }
 0xa2f   : > { %v2647_v53 = vpop.xlane.xlu0 %2646  ;;  %v2650_v48 = vpop.xlane.xlu1 %2649 }
 0xa30   : > { %3630 = vrcp.f32 %v2647_v53 }
 0xa31   : > { %v3625_v5 = vpop.eup %3624  ;;  %3632 = vrcp.f32 %v2650_v48 }
 0xa32   : > { %v2668_v27 = vmul.f32 %v3625_v5, %v4754_v0 }
 0xa33   : > { %v3627_v52 = vpop.eup %3626  ;;  %v2653_v13 = vpop.xlane.xlu0 %2652 }
 0xa34   : > { %v2669_v22 = vmul.f32 %v3627_v52, %v4758_v55  ;;  %3634 = vrcp.f32 %v2653_v13  ;;  %v2656_v61 = vpop.xlane.xlu1 %2655 }
 0xa35   : > { %3636 = vrcp.f32 %v2656_v61 }
 0xa36   : > { %v2676_v50 = vpack.c.bf16 %v2669_v22, %v2668_v27  ;;  %v3629_v14 = vpop.eup %3628 }
 0xa37   : > { %v2659_v57 = vpop.xlane.xlu0 %2658  ;;  %v2670_v2 = vmul.f32 %v3629_v14, %v4763_v1 }
 0xa38   : > { %3638 = vrcp.f32 %v2659_v57  ;;  %v2775_v60 = vpop.permute.xlu1 %2774  ;;  %3339 = vmatmul.mubr.msk.bf16.vlgmr.msra.gmra.mrb[56].mxu0 %vm599_vm2, %v2676_v50 }
 0xa39   : > { %3349 = vmatpush3.bf16.msra.mxu0 %v2775_v60  ;;  %3350 = vmatprep.mubr.msk.bf16.mxu0 %vm3667_vm1, %v4894_v3 }
 0xa3a   : > { %v3631_v56 = vpop.eup %3630 }
 0xa3b   : > { %v2671_v37 = vmul.f32 %v3631_v56, %v4769_v20  ;;  %v2728_v33 = vpop.permute.xlu0 %2727  ;;  %v3633_v7 = vpop.eup %3632 }
 0xa3c   : > { %3343 = vmatpush3.bf16.msra.mxu1 %v2728_v33  ;;  %v2672_v26 = vmul.f32 %v3633_v7, %v4767_v9  ;;  %v2822_v41 = vpop.permute.xlu1 %2821 }
 0xa3d   : > { %v2677_v39 = vpack.c.bf16 %v2671_v37, %v2670_v2  ;;  %3354 = vmatprep.subr.bf16.mxu1 %v4894_v3 }
 0xa3e   : > { %v3635_v11 = vpop.eup %3634 }
 0xa3f   : > { %v2673_v24 = vmul.f32 %v3635_v11, %v4775_v21  ;;  %3345 = vmatmul.mubr.msk.bf16.vlgmr.msra.gmra.mrb[56].mxu1 %vm599_vm2, %v2677_v39  ;;  %v3637_v12 = vpop.eup %3636  ;;  %v2877_v31 = vpop.permute.xlu0 %2876 }
 0xa40   : > { %3355 = vmatpush3.bf16.msra.mxu1 %v2822_v41  ;;  %3356 = vmatprep.mubr.msk.bf16.mxu1 %vm3667_vm1, %v4894_v3  ;;  %v2674_v51 = vmul.f32 %v3637_v12, %v4777_v47  ;;  %v2879_v63 = vpop.permute.xlu1 %2878  ;;  %v2964_v48 = vsel %vm240_vm0, %v4200_v28, %v2877_v31 }
 0xa41   : > { %v2678_v44 = vpack.c.bf16 %v2673_v24, %v2672_v26  ;;  %v2965_v13 = vsel %vm240_vm0, %v4202_v43, %v2879_v63 }
 0xa42   : > { %v3639_v62 = vpop.eup %3638 }
 0xa43   : > { %v2675_v23 = vmul.f32 %v3639_v62, %v4783_v49  ;;  %3351 = vmatmul.mubr.msk.bf16.vlgmr.msra.gmra.mrb[60].mxu0 %vm599_vm2, %v2678_v44  ;;  %v2881_v9 = vpop.permute.xlu0 %2880 }
 0xa44   : > { %v2883_v20 = vpop.permute.xlu1 %2882  ;;  %v2966_v50 = vsel %vm240_vm0, %v4204_v30, %v2881_v9 }
 0xa45   : > { %v2679_v16 = vpack.c.bf16 %v2675_v23, %v2674_v51  ;;  %v2967_v43 = vsel %vm240_vm0, %v4206_v25, %v2883_v20  ;;  %v4895_v25 = vld [vmem:[#allocation2_spill] sm:$0xff]  ;;  %v4897_v51 = vld [vmem:[#allocation4_spill] sm:$0xff] }
 0xa47   : > { %3357 = vmatmul.mubr.msk.bf16.vlgmr.msra.gmra.mrb[60].mxu1 %vm599_vm2, %v2679_v16  ;;  %v2885_v45 = vpop.permute.xlu0 %2884 }
 0xa48   : > { %v2887_v58 = vpop.permute.xlu1 %2886  ;;  %v2968_v37 = vsel %vm240_vm0, %v4208_v32, %v2885_v45  ;;  %v4896_v32 = vld [vmem:[#allocation3_spill] sm:$0xff] }
 0xa49   : > { %v2969_v39 = vsel %vm240_vm0, %v4895_v25, %v2887_v58 }
 0xa4b   : > { %v2889_v21 = vpop.permute.xlu0 %2888 }
 0xa4c   : > { %v2891_v47 = vpop.permute.xlu1 %2890  ;;  %v2970_v41 = vsel %vm240_vm0, %v4896_v32, %v2889_v21 }
 0xa4d   : > { %v2971_v23 = vsel %vm240_vm0, %v4897_v51, %v2891_v47 }
 0xa4f   : > { %v2909_v19 = vpop.permute.xlu0 %2908 }
 0xa50   : > { %v2911_v34 = vpop.permute.xlu1 %2910  ;;  %v2972_v5 = vsel %vm599_vm2, %v2964_v48, %v2909_v19 }
 0xa51   : > { %v2973_v28 = vsel %vm599_vm2, %v2965_v13, %v2911_v34 }
 0xa53   : > { %v2913_v49 = vpop.permute.xlu0 %2912 }
 0xa54   : > { %v2915_v29 = vpop.permute.xlu1 %2914  ;;  %v2974_v57 = vsel %vm599_vm2, %v2966_v50, %v2913_v49 }
 0xa55   : > { %v2975_v56 = vsel %vm599_vm2, %v2967_v43, %v2915_v29 }
 0xa57   : > { %v2917_v36 = vpop.permute.xlu0 %2916 }
 0xa58   : > { %v2919_v38 = vpop.permute.xlu1 %2918  ;;  %v2976_v33 = vsel %vm599_vm2, %v2968_v37, %v2917_v36 }
 0xa59   : > { %v2977_v26 = vsel %vm599_vm2, %v2969_v39, %v2919_v38 }
 0xa5b   : > { %v2921_v40 = vpop.permute.xlu0 %2920 }
 0xa5c   : > { %v2923_v53 = vpop.permute.xlu1 %2922  ;;  %v2978_v44 = vsel %vm599_vm2, %v2970_v41, %v2921_v40 }
 0xb0b   : > { %v2720_v18 = vpop.f32.mrb[56].mxu0 }
 0xb0c   : > { %2940 = vrot.lane.b32.xlu0 %v2720_v18, %s3680_s16  ;;  %v3340_v35 = vpop.f32.mrb[57].mxu0  ;;  %v2979_v18 = vsel %vm599_vm2, %v2971_v23, %v2923_v53 }
 0xb0d   : > { %v2723_v46 = vpop.f32.mrb[58].mxu0 }
 0xb0e   : > { %2942 = vrot.lane.b32.xlu1 %v2723_v46, %s3680_s16  ;;  %v3341_v59 = vpop.f32.mrb[59].mxu0 }
 0xb12   : > { %v2767_v17 = vpop.f32.mrb[56].mxu1 }
 0xb13   : > { %2944 = vrot.lane.b32.xlu0 %v2767_v17, %s3680_s16  ;;  %v3346_v3 = vpop.f32.mrb[57].mxu1 }
 0xb14   : > { %v2770_v0 = vpop.f32.mrb[58].mxu1 }
 0xb15   : > { %2946 = vrot.lane.b32.xlu1 %v2770_v0, %s3680_s16  ;;  %v3347_v8 = vpop.f32.mrb[59].mxu1 }
 0xb16   : > { %v2814_v4 = vpop.f32.mrb[60].mxu0 }
 0xb17   : > { %2948 = vrot.lane.b32.xlu0 %v2814_v4, %s3680_s16  ;;  %v3352_v15 = vpop.f32.mrb[61].mxu0 }
 0xb18   : > { %v2817_v55 = vpop.f32.mrb[62].mxu0 }
 0xb19   : > { %2950 = vrot.lane.b32.xlu1 %v2817_v55, %s3680_s16  ;;  %v3353_v54 = vpop.f32.mrb[63].mxu0 }
 0xb1a   : > { %v2861_v6 = vpop.f32.mrb[60].mxu1 }
 0xb1b   : > { %2952 = vrot.lane.b32.xlu0 %v2861_v6, %s3680_s16  ;;  %v3358_v42 = vpop.f32.mrb[61].mxu1 }
 0xb1c   : > { %v2864_v10 = vpop.f32.mrb[62].mxu1 }
 0xb1d   : > { %2954 = vrot.lane.b32.xlu1 %v2864_v10, %s3680_s16  ;;  %v3359_v1 = vpop.f32.mrb[63].mxu1 }
 0xb7e   : > { %v2941_v52 = vpop.permute.xlu0 %2940 }
 0xb7f   : > { %v2981_v27 = vsel %vm2980_vm3, %v2972_v5, %v2941_v52 }
 0xb80   : > { %2990 = vst.msk [vmem:[%s4833_s22] sm:$0xff] %vm2989_vm4, %v2981_v27  ;;  %v2943_v22 = vpop.permute.xlu1 %2942 }
 0xb81   : > { %v2982_v61 = vsel %vm2980_vm3, %v2973_v28, %v2943_v22 }
 0xb82   : > { %2991 = vst.msk [vmem:[%s4833_s22 + $0x8] sm:$0xff] %vm2989_vm4, %v2982_v61 }
 0xb85   : > { %v2945_v14 = vpop.permute.xlu0 %2944 }
 0xb86   : > { %v2983_v60 = vsel %vm2980_vm3, %v2974_v57, %v2945_v14 }
 0xb87   : > { %2992 = vst.msk [vmem:[%s4833_s22 + $0x10] sm:$0xff] %vm2989_vm4, %v2983_v60  ;;  %v2947_v2 = vpop.permute.xlu1 %2946 }
 0xb88   : > { %v2984_v30 = vsel %vm2980_vm3, %v2975_v56, %v2947_v2 }
 0xb89   : > { %2993 = vst.msk [vmem:[%s4833_s22 + $0x18] sm:$0xff] %vm2989_vm4, %v2984_v30  ;;  %v2949_v7 = vpop.permute.xlu0 %2948 }
 0xb8a   : > { %v2985_v11 = vsel %vm2980_vm3, %v2976_v33, %v2949_v7 }
 0xb8b   : > { %2994 = vst.msk [vmem:[%s4833_s22 + $0x20] sm:$0xff] %vm2989_vm4, %v2985_v11  ;;  %v2951_v24 = vpop.permute.xlu1 %2950 }
 0xb8c   : > { %v2986_v12 = vsel %vm2980_vm3, %v2977_v26, %v2951_v24 }
 0xb8d   : > { %2995 = vst.msk [vmem:[%s4833_s22 + $0x28] sm:$0xff] %vm2989_vm4, %v2986_v12  ;;  %v2953_v62 = vpop.permute.xlu0 %2952 }
 0xb8e   : > { %v2987_v16 = vsel %vm2980_vm3, %v2978_v44, %v2953_v62 }
 0xb8f   : > { %2996 = vst.msk [vmem:[%s4833_s22 + $0x30] sm:$0xff] %vm2989_vm4, %v2987_v16  ;;  %v2955_v35 = vpop.permute.xlu1 %2954 }
 0xb90   : > { %v2988_v46 = vsel %vm2980_vm3, %v2979_v18, %v2955_v35 }
 0xb91   : > { %2997 = vst.msk [vmem:[%s4833_s22 + $0x38] sm:$0xff] %vm2989_vm4, %v2988_v46 }
 0xb92 PF: > { %s14_s15 = sadd.s32 1, %s3663_s15  }
 0xb93   : > { %p11_p4 = scmp.ge.s32.totalorder %s14_s15, 4  }
 0xb95   :  { %13 = sbr.rel (!%p11_p4) target bundleno = 1 (0x1), region = 66 }

</bundles_post_ra>
